<compile_context>
chip_gen: v5e
topology: v5e:2x2
jax: 0.10.0
libtpu: 0.0.40
codegen_flags: <defaults>
</compile_context>

<pallas_src>
import functools

import jax
import jax.numpy as jnp
from jax.experimental import pallas as pl
from jax.experimental.pallas import tpu as pltpu

NUM_RESIDUAL = 6
_EPS = 1e-5


# ----------------------------------------------------------------------------
# Fused Pallas kernel: (im2col patches) @ W  + bias  + InstanceNorm/ReLU/res/Tanh
# ----------------------------------------------------------------------------
def _fused_conv_kernel(*refs, mode, has_bias, has_res, eps=_EPS):
    """One batch element per grid step.

    refs layout (static, decided by the wrapper):
        a_ref    : (M, Kp)  bf16   im2col patches for this batch element
        w_ref    : (Kp, N)  bf16   packed conv weight (shared across grid)
        [bias_ref: (1, N)   f32 ]  optional
        [res_ref : (M, N)   f32 ]  optional residual (for mode == "norm_add")
        o_ref    : (M, N)   f32

    mode: "norm_relu" | "norm_add" | "tanh" | "none"
    InstanceNorm reduces over axis 0 (the spatial M = Ho*Wo axis), per channel.
    """
    a_ref, w_ref = refs[0], refs[1]
    idx = 2
    bias_ref = refs[idx] if has_bias else None
    idx += 1 if has_bias else 0
    res_ref = refs[idx] if has_res else None
    idx += 1 if has_res else 0
    o_ref = refs[idx]

    # bf16 x bf16 on the MXU, f32 accumulation.
    acc = jnp.dot(a_ref[...], w_ref[...], preferred_element_type=jnp.float32)

    if has_bias:
        acc = acc + bias_ref[...]                       # (1, N) broadcast over rows

    if mode in ("norm_relu", "norm_add"):
        mean = jnp.mean(acc, axis=0, keepdims=True)     # per-channel over spatial
        var = jnp.mean(jnp.square(acc - mean), axis=0, keepdims=True)
        acc = (acc - mean) * jax.lax.rsqrt(var + eps)

    if mode == "norm_relu":
        acc = jnp.maximum(acc, 0.0)
    elif mode == "norm_add":
        acc = acc + res_ref[...].astype(jnp.float32)    # x + InstanceNorm(conv(...))
    elif mode == "tanh":
        acc = jnp.tanh(acc)

    o_ref[...] = acc.astype(o_ref.dtype)


# ----------------------------------------------------------------------------
# Convolution wrappers (im2col glue in plain JAX, matmul+epilogue in Pallas)
# ----------------------------------------------------------------------------
def _round_up(x, m):
    return (x + m - 1) // m * m


def _extract_patches(x_nhwc, kh, kw, stride, pad):
    """Returns (N, Ho, Wo, kh*kw*Cin) patches, ordered (kh, kw, cin)."""
    N, H, W, C = x_nhwc.shape
    xpad = jnp.pad(x_nhwc, ((0, 0), (pad, pad), (pad, pad), (0, 0)))
    Ho = (H + 2 * pad - kh) // stride + 1
    Wo = (W + 2 * pad - kw) // stride + 1
    cols = []
    for i in range(kh):
        for j in range(kw):
            cols.append(xpad[:, i:i + (Ho - 1) * stride + 1:stride,
                             j:j + (Wo - 1) * stride + 1:stride, :])
    # TODO(synk): at real CycleGAN resolutions (256x256) drive the taps from a
    # grid axis / manual DMA instead of materializing 9x-duplicated patches.
    return jnp.concatenate(cols, axis=-1)


def conv2d_fused(x_nhwc, w_mat, bias, *, kh, kw, stride, pad, mode,
                 residual=None, out_dtype=jnp.float32):
    """PyTorch-semantics Conv2d + fused epilogue.

    w_mat: pre-packed (Kp, Cout) bf16 weight, Kp = round_up(kh*kw*Cin, 128),
           row order (kh, kw, cin), zero rows in the pad region.
    bias : pre-packed (1, Cout) f32, or None.
    """
    patches = _extract_patches(x_nhwc.astype(jnp.bfloat16), kh, kw, stride, pad)
    Nb, Ho, Wo, K = patches.shape
    Kp, Cout = w_mat.shape
    M = Ho * Wo

    a = patches.reshape(Nb, M, K)
    if Kp != K:                                   # zero-pad contraction dim to 128-mult
        a = jnp.pad(a, ((0, 0), (0, 0), (0, Kp - K)))

    in_args = [a, w_mat]
    in_specs = [
        pl.BlockSpec((None, M, Kp), lambda b: (b, 0, 0)),     # per-batch patch slab
        pl.BlockSpec((Kp, Cout), lambda b: (0, 0)),           # shared weight
    ]
    has_bias = bias is not None
    if has_bias:
        in_args.append(bias)
        in_specs.append(pl.BlockSpec((1, Cout), lambda b: (0, 0)))
    has_res = residual is not None
    if has_res:
        in_args.append(residual.reshape(Nb, M, Cout).astype(jnp.float32))
        in_specs.append(pl.BlockSpec((None, M, Cout), lambda b: (b, 0, 0)))

    kernel = functools.partial(_fused_conv_kernel, mode=mode,
                               has_bias=has_bias, has_res=has_res)

    out = pl.pallas_call(
        kernel,
        out_shape=jax.ShapeDtypeStruct((Nb, M, Cout), out_dtype),
        grid=(Nb,),
        in_specs=in_specs,
        out_specs=pl.BlockSpec((None, M, Cout), lambda b: (b, 0, 0)),
        compiler_params=pltpu.CompilerParams(
            dimension_semantics=("parallel",)),   # batch -> both TCs on v7x
    )(*in_args)
    return out.reshape(Nb, Ho, Wo, Cout)


def conv_transpose2d_fused(x_nhwc, w_mat, bias, *, kh, kw, stride, pad, outpad, mode):
    """PyTorch-semantics ConvTranspose2d (weight already flipped/swapped & packed).

    Implemented as zero-dilation of the input followed by a stride-1 conv.
    """
    N, H, W, C = x_nhwc.shape
    Hd, Wd = (H - 1) * stride + 1, (W - 1) * stride + 1
    xd = jnp.zeros((N, Hd, Wd, C), x_nhwc.dtype).at[:, ::stride, ::stride, :].set(x_nhwc)
    p = kh - 1 - pad
    xd = jnp.pad(xd, ((0, 0), (p, p + outpad), (p, p + outpad), (0, 0)))
    return conv2d_fused(xd, w_mat, bias, kh=kh, kw=kw, stride=1, pad=0, mode=mode)


# ----------------------------------------------------------------------------
# Parameters: PyTorch-layout init + one-time packing to matmul layout
# ----------------------------------------------------------------------------
def init_params(key):
    params = {}

    def nrm(k, shape, scale=0.05):
        return scale * jax.random.normal(k, shape, dtype=jnp.float32)

    keys = iter(jax.random.split(key, 64))
    # encoder
    params['enc1_w'] = nrm(next(keys), (32, 3, 7, 7));   params['enc1_b'] = nrm(next(keys), (32,))
    params['enc2_w'] = nrm(next(keys), (64, 32, 3, 3));  params['enc2_b'] = nrm(next(keys), (64,))
    params['enc3_w'] = nrm(next(keys), (128, 64, 3, 3)); params['enc3_b'] = nrm(next(keys), (128,))
    # residual blocks (bias=False convs)
    for r in range(NUM_RESIDUAL):
        params[f'res{r}_w1'] = nrm(next(keys), (128, 128, 3, 3))
        params[f'res{r}_w2'] = nrm(next(keys), (128, 128, 3, 3))
    # decoder (ConvTranspose weights are (Cin, Cout, KH, KW))
    params['dec1_w'] = nrm(next(keys), (128, 64, 3, 3)); params['dec1_b'] = nrm(next(keys), (64,))
    params['dec2_w'] = nrm(next(keys), (64, 32, 3, 3));  params['dec2_b'] = nrm(next(keys), (32,))
    params['out_w'] = nrm(next(keys), (3, 32, 7, 7));    params['out_b'] = nrm(next(keys), (3,))
    return params


def _pack_conv_w(w_oihw):
    """(Cout, Cin, KH, KW) -> (Kp, Cout) bf16, row order (kh, kw, cin), K padded to 128."""
    cout, cin, kh, kw = w_oihw.shape
    w = jnp.transpose(w_oihw, (2, 3, 1, 0)).reshape(kh * kw * cin, cout)
    Kp = _round_up(kh * kw * cin, 128)
    w = jnp.pad(w, ((0, Kp - kh * kw * cin), (0, 0)))
    return w.astype(jnp.bfloat16)


def _pack_convT_w(w_iohw):
    """(Cin, Cout, KH, KW) -> equivalent conv weight, then pack."""
    w_conv = jnp.transpose(w_iohw[:, :, ::-1, ::-1], (1, 0, 2, 3))   # (Cout, Cin, KH, KW)
    return _pack_conv_w(w_conv)


def _pack_bias(b):
    return b.astype(jnp.float32).reshape(1, -1)


def pack_params(p):
    """One-time weight packing (done outside the jitted forward)."""
    packed = {
        'enc1_w': _pack_conv_w(p['enc1_w']), 'enc1_b': _pack_bias(p['enc1_b']),
        'enc2_w': _pack_conv_w(p['enc2_w']), 'enc2_b': _pack_bias(p['enc2_b']),
        'enc3_w': _pack_conv_w(p['enc3_w']), 'enc3_b': _pack_bias(p['enc3_b']),
        'dec1_w': _pack_convT_w(p['dec1_w']), 'dec1_b': _pack_bias(p['dec1_b']),
        'dec2_w': _pack_convT_w(p['dec2_w']), 'dec2_b': _pack_bias(p['dec2_b']),
        'out_w': _pack_conv_w(p['out_w']),   'out_b': _pack_bias(p['out_b']),
    }
    for r in range(NUM_RESIDUAL):
        packed[f'res{r}_w1'] = _pack_conv_w(p[f'res{r}_w1'])
        packed[f'res{r}_w2'] = _pack_conv_w(p[f'res{r}_w2'])
    return packed


# ----------------------------------------------------------------------------
# Generator forward
# ----------------------------------------------------------------------------
def generator_forward(packed, x_nchw):
    x = jnp.transpose(x_nchw, (0, 2, 3, 1)).astype(jnp.float32)  # NCHW -> NHWC

    # ---- encoder ----
    x = conv2d_fused(x, packed['enc1_w'], packed['enc1_b'],
                     kh=7, kw=7, stride=1, pad=3, mode='norm_relu')
    x = conv2d_fused(x, packed['enc2_w'], packed['enc2_b'],
                     kh=3, kw=3, stride=2, pad=1, mode='norm_relu')
    x = conv2d_fused(x, packed['enc3_w'], packed['enc3_b'],
                     kh=3, kw=3, stride=2, pad=1, mode='norm_relu')

    # ---- residual blocks (no-bias convs; norm/relu/residual fused in epilogue) ----
    for r in range(NUM_RESIDUAL):
        y = conv2d_fused(x, packed[f'res{r}_w1'], None,
                         kh=3, kw=3, stride=1, pad=1, mode='norm_relu')
        x = conv2d_fused(y, packed[f'res{r}_w2'], None,
                         kh=3, kw=3, stride=1, pad=1, mode='norm_add', residual=x)

    # ---- decoder ----
    x = conv_transpose2d_fused(x, packed['dec1_w'], packed['dec1_b'],
                               kh=3, kw=3, stride=2, pad=1, outpad=1, mode='norm_relu')
    x = conv_transpose2d_fused(x, packed['dec2_w'], packed['dec2_b'],
                               kh=3, kw=3, stride=2, pad=1, outpad=1, mode='norm_relu')
    x = conv2d_fused(x, packed['out_w'], packed['out_b'],
                     kh=7, kw=7, stride=1, pad=3, mode='tanh')

    return jnp.transpose(x, (0, 3, 1, 2))  # NHWC -> NCHW


# ----------------------------------------------------------------------------
# Main
# ----------------------------------------------------------------------------
if __name__ == "__main__":
    key = jax.random.PRNGKey(0)
    pkey, xkey = jax.random.split(key)
    raw_params = init_params(pkey)
    packed_params = pack_params(raw_params)          # packed once, outside jit
    x = jax.random.normal(xkey, (2, 3, 16, 16), dtype=jnp.float32)  # NCHW input

    fwd = jax.jit(generator_forward)
    out = fwd(packed_params, x)
    out = jax.block_until_ready(out)

    assert out.shape == (2, 3, 16, 16), out.shape
    assert bool(jnp.all(jnp.isfinite(out)))
    assert bool(jnp.all(jnp.abs(out) <= 1.0))  # tanh output range
    print("KERNEL_OK")
</pallas_src>

<mosaic_0001>
module attributes {stable_mosaic.version = 11 : i64} {
  func.func @_fused_conv_kernel(%arg0: i32, %arg1: memref<1x256x256xbf16, #tpu.memory_space<vmem>>, %arg2: memref<256x32xbf16, #tpu.memory_space<vmem>>, %arg3: memref<1x32xf32, #tpu.memory_space<vmem>>, %arg4: memref<1x256x32xf32, #tpu.memory_space<vmem>>) attributes {dimension_semantics = [#tpu.dimension_semantics<parallel>], iteration_bounds = array<i64: 2>, scalar_prefetch = 0 : i64, scratch_operands = 0 : i64, tpu.core_type = #tpu.core_type<tc>, window_params = [{transform_indices = @transform_0, window_bounds = array<i64: 1, 256, 256>}, {pipeline_mode = #tpu.pipeline_mode<synchronous>, transform_indices = @transform_1, window_bounds = array<i64: 256, 32>}, {pipeline_mode = #tpu.pipeline_mode<synchronous>, transform_indices = @transform_2, window_bounds = array<i64: 1, 32>}, {transform_indices = @transform_3, window_bounds = array<i64: 1, 256, 32>}]} {
    %c0 = arith.constant 0 : index
    %c0_0 = arith.constant 0 : index
    %c0_1 = arith.constant 0 : index
    %0 = vector.load %arg1[%c0, %c0_0, %c0_1] : memref<1x256x256xbf16, #tpu.memory_space<vmem>>, vector<1x256x256xbf16>
    %1 = vector.shape_cast %0 : vector<1x256x256xbf16> to vector<256x256xbf16>
    %c0_2 = arith.constant 0 : index
    %c0_3 = arith.constant 0 : index
    %2 = vector.load %arg2[%c0_2, %c0_3] : memref<256x32xbf16, #tpu.memory_space<vmem>>, vector<256x32xbf16>
    %cst = arith.constant dense<0.000000e+00> : vector<256x32xf32>
    %3 = tpu.matmul %1, %2, %cst {dimension_numbers = #tpu.dot_dimension_numbers<[1], [0], [0], [1], [0, 0, 1, 1], [], []>} : vector<256x256xbf16>, vector<256x32xbf16>, vector<256x32xf32> -> vector<256x32xf32>
    %c0_4 = arith.constant 0 : index
    %c0_5 = arith.constant 0 : index
    %4 = vector.load %arg3[%c0_4, %c0_5] : memref<1x32xf32, #tpu.memory_space<vmem>>, vector<1x32xf32>
    %5 = vector.broadcast %4 : vector<1x32xf32> to vector<256x32xf32>
    %6 = arith.addf %3, %5 : vector<256x32xf32>
    %cst_6 = arith.constant dense<0.000000e+00> : vector<32xf32>
    %7 = vector.multi_reduction <add>, %6, %cst_6 [0] : vector<256x32xf32> to vector<32xf32>
    %8 = vector.shape_cast %7 : vector<32xf32> to vector<1x32xf32>
    %cst_7 = arith.constant 2.560000e+02 : f32
    %9 = vector.broadcast %cst_7 : f32 to vector<1x32xf32>
    %10 = arith.divf %8, %9 : vector<1x32xf32>
    %11 = vector.broadcast %10 : vector<1x32xf32> to vector<256x32xf32>
    %12 = arith.subf %6, %11 : vector<256x32xf32>
    %13 = arith.mulf %12, %12 : vector<256x32xf32>
    %cst_8 = arith.constant dense<0.000000e+00> : vector<32xf32>
    %14 = vector.multi_reduction <add>, %13, %cst_8 [0] : vector<256x32xf32> to vector<32xf32>
    %15 = vector.shape_cast %14 : vector<32xf32> to vector<1x32xf32>
    %cst_9 = arith.constant 2.560000e+02 : f32
    %16 = vector.broadcast %cst_9 : f32 to vector<1x32xf32>
    %17 = arith.divf %15, %16 : vector<1x32xf32>
    %18 = vector.broadcast %10 : vector<1x32xf32> to vector<256x32xf32>
    %19 = arith.subf %6, %18 : vector<256x32xf32>
    %cst_10 = arith.constant 9.99999974E-6 : f32
    %20 = vector.broadcast %cst_10 : f32 to vector<1x32xf32>
    %21 = arith.addf %17, %20 : vector<1x32xf32>
    %22 = math.rsqrt %21 : vector<1x32xf32>
    %23 = vector.broadcast %22 : vector<1x32xf32> to vector<256x32xf32>
    %24 = arith.mulf %19, %23 : vector<256x32xf32>
    %cst_11 = arith.constant 0.000000e+00 : f32
    %25 = vector.broadcast %cst_11 : f32 to vector<256x32xf32>
    %26 = arith.maximumf %24, %25 : vector<256x32xf32>
    %c0_12 = arith.constant 0 : index
    %c0_13 = arith.constant 0 : index
    %c0_14 = arith.constant 0 : index
    %27 = vector.load %arg4[%c0_12, %c0_13, %c0_14] : memref<1x256x32xf32, #tpu.memory_space<vmem>>, vector<1x256x32xf32>
    %28 = vector.shape_cast %27 : vector<1x256x32xf32> to vector<256x32xf32>
    %29 = vector.shape_cast %26 : vector<256x32xf32> to vector<1x256x32xf32>
    tpu.vector_store %arg4[%c0_12, %c0_13, %c0_14], %29 {strides = array<i32>} : memref<1x256x32xf32, #tpu.memory_space<vmem>>, vector<1x256x32xf32>,
    return
  }
  func.func @transform_0(%arg0: i32) -> (i32, i32, i32) {
    %c0_i32 = arith.constant 0 : i32
    %c0_i32_0 = arith.constant 0 : i32
    %c0_i32_1 = arith.constant 0 : i32
    return %arg0, %c0_i32, %c0_i32_0 : i32, i32, i32
  }
  func.func @transform_1(%arg0: i32) -> (i32, i32) {
    %c0_i32 = arith.constant 0 : i32
    %c0_i32_0 = arith.constant 0 : i32
    %c0_i32_1 = arith.constant 0 : i32
    return %c0_i32, %c0_i32_0 : i32, i32
  }
  func.func @transform_2(%arg0: i32) -> (i32, i32) {
    %c0_i32 = arith.constant 0 : i32
    %c0_i32_0 = arith.constant 0 : i32
    %c0_i32_1 = arith.constant 0 : i32
    return %c0_i32, %c0_i32_0 : i32, i32
  }
  func.func @transform_3(%arg0: i32) -> (i32, i32, i32) {
    %c0_i32 = arith.constant 0 : i32
    %c0_i32_0 = arith.constant 0 : i32
    %c0_i32_1 = arith.constant 0 : i32
    return %arg0, %c0_i32, %c0_i32_0 : i32, i32, i32
  }
}

module attributes {stable_mosaic.version = 11 : i64} {
  func.func @_fused_conv_kernel(%arg0: i32, %arg1: memref<1x64x384xbf16, #tpu.memory_space<vmem>>, %arg2: memref<384x64xbf16, #tpu.memory_space<vmem>>, %arg3: memref<1x64xf32, #tpu.memory_space<vmem>>, %arg4: memref<1x64x64xf32, #tpu.memory_space<vmem>>) attributes {dimension_semantics = [#tpu.dimension_semantics<parallel>], iteration_bounds = array<i64: 2>, scalar_prefetch = 0 : i64, scratch_operands = 0 : i64, tpu.core_type = #tpu.core_type<tc>, window_params = [{transform_indices = @transform_0, window_bounds = array<i64: 1, 64, 384>}, {pipeline_mode = #tpu.pipeline_mode<synchronous>, transform_indices = @transform_1, window_bounds = array<i64: 384, 64>}, {pipeline_mode = #tpu.pipeline_mode<synchronous>, transform_indices = @transform_2, window_bounds = array<i64: 1, 64>}, {transform_indices = @transform_3, window_bounds = array<i64: 1, 64, 64>}]} {
    %c0 = arith.constant 0 : index
    %c0_0 = arith.constant 0 : index
    %c0_1 = arith.constant 0 : index
    %0 = vector.load %arg1[%c0, %c0_0, %c0_1] : memref<1x64x384xbf16, #tpu.memory_space<vmem>>, vector<1x64x384xbf16>
    %1 = vector.shape_cast %0 : vector<1x64x384xbf16> to vector<64x384xbf16>
    %c0_2 = arith.constant 0 : index
    %c0_3 = arith.constant 0 : index
    %2 = vector.load %arg2[%c0_2, %c0_3] : memref<384x64xbf16, #tpu.memory_space<vmem>>, vector<384x64xbf16>
    %cst = arith.constant dense<0.000000e+00> : vector<64x64xf32>
    %3 = tpu.matmul %1, %2, %cst {dimension_numbers = #tpu.dot_dimension_numbers<[1], [0], [0], [1], [0, 0, 1, 1], [], []>} : vector<64x384xbf16>, vector<384x64xbf16>, vector<64x64xf32> -> vector<64x64xf32>
    %c0_4 = arith.constant 0 : index
    %c0_5 = arith.constant 0 : index
    %4 = vector.load %arg3[%c0_4, %c0_5] : memref<1x64xf32, #tpu.memory_space<vmem>>, vector<1x64xf32>
    %5 = vector.broadcast %4 : vector<1x64xf32> to vector<64x64xf32>
    %6 = arith.addf %3, %5 : vector<64x64xf32>
    %cst_6 = arith.constant dense<0.000000e+00> : vector<64xf32>
    %7 = vector.multi_reduction <add>, %6, %cst_6 [0] : vector<64x64xf32> to vector<64xf32>
    %8 = vector.shape_cast %7 : vector<64xf32> to vector<1x64xf32>
    %cst_7 = arith.constant 6.400000e+01 : f32
    %9 = vector.broadcast %cst_7 : f32 to vector<1x64xf32>
    %10 = arith.divf %8, %9 : vector<1x64xf32>
    %11 = vector.broadcast %10 : vector<1x64xf32> to vector<64x64xf32>
    %12 = arith.subf %6, %11 : vector<64x64xf32>
    %13 = arith.mulf %12, %12 : vector<64x64xf32>
    %cst_8 = arith.constant dense<0.000000e+00> : vector<64xf32>
    %14 = vector.multi_reduction <add>, %13, %cst_8 [0] : vector<64x64xf32> to vector<64xf32>
    %15 = vector.shape_cast %14 : vector<64xf32> to vector<1x64xf32>
    %cst_9 = arith.constant 6.400000e+01 : f32
    %16 = vector.broadcast %cst_9 : f32 to vector<1x64xf32>
    %17 = arith.divf %15, %16 : vector<1x64xf32>
    %18 = vector.broadcast %10 : vector<1x64xf32> to vector<64x64xf32>
    %19 = arith.subf %6, %18 : vector<64x64xf32>
    %cst_10 = arith.constant 9.99999974E-6 : f32
    %20 = vector.broadcast %cst_10 : f32 to vector<1x64xf32>
    %21 = arith.addf %17, %20 : vector<1x64xf32>
    %22 = math.rsqrt %21 : vector<1x64xf32>
    %23 = vector.broadcast %22 : vector<1x64xf32> to vector<64x64xf32>
    %24 = arith.mulf %19, %23 : vector<64x64xf32>
    %cst_11 = arith.constant 0.000000e+00 : f32
    %25 = vector.broadcast %cst_11 : f32 to vector<64x64xf32>
    %26 = arith.maximumf %24, %25 : vector<64x64xf32>
    %c0_12 = arith.constant 0 : index
    %c0_13 = arith.constant 0 : index
    %c0_14 = arith.constant 0 : index
    %27 = vector.load %arg4[%c0_12, %c0_13, %c0_14] : memref<1x64x64xf32, #tpu.memory_space<vmem>>, vector<1x64x64xf32>
    %28 = vector.shape_cast %27 : vector<1x64x64xf32> to vector<64x64xf32>
    %29 = vector.shape_cast %26 : vector<64x64xf32> to vector<1x64x64xf32>
    tpu.vector_store %arg4[%c0_12, %c0_13, %c0_14], %29 {strides = array<i32>} : memref<1x64x64xf32, #tpu.memory_space<vmem>>, vector<1x64x64xf32>,
    return
  }
  func.func @transform_0(%arg0: i32) -> (i32, i32, i32) {
    %c0_i32 = arith.constant 0 : i32
    %c0_i32_0 = arith.constant 0 : i32
    %c0_i32_1 = arith.constant 0 : i32
    return %arg0, %c0_i32, %c0_i32_0 : i32, i32, i32
  }
  func.func @transform_1(%arg0: i32) -> (i32, i32) {
    %c0_i32 = arith.constant 0 : i32
    %c0_i32_0 = arith.constant 0 : i32
    %c0_i32_1 = arith.constant 0 : i32
    return %c0_i32, %c0_i32_0 : i32, i32
  }
  func.func @transform_2(%arg0: i32) -> (i32, i32) {
    %c0_i32 = arith.constant 0 : i32
    %c0_i32_0 = arith.constant 0 : i32
    %c0_i32_1 = arith.constant 0 : i32
    return %c0_i32, %c0_i32_0 : i32, i32
  }
  func.func @transform_3(%arg0: i32) -> (i32, i32, i32) {
    %c0_i32 = arith.constant 0 : i32
    %c0_i32_0 = arith.constant 0 : i32
    %c0_i32_1 = arith.constant 0 : i32
    return %arg0, %c0_i32, %c0_i32_0 : i32, i32, i32
  }
}

module attributes {stable_mosaic.version = 11 : i64} {
  func.func @_fused_conv_kernel(%arg0: i32, %arg1: memref<1x16x640xbf16, #tpu.memory_space<vmem>>, %arg2: memref<640x128xbf16, #tpu.memory_space<vmem>>, %arg3: memref<1x128xf32, #tpu.memory_space<vmem>>, %arg4: memref<1x16x128xf32, #tpu.memory_space<vmem>>) attributes {dimension_semantics = [#tpu.dimension_semantics<parallel>], iteration_bounds = array<i64: 2>, scalar_prefetch = 0 : i64, scratch_operands = 0 : i64, tpu.core_type = #tpu.core_type<tc>, window_params = [{transform_indices = @transform_0, window_bounds = array<i64: 1, 16, 640>}, {pipeline_mode = #tpu.pipeline_mode<synchronous>, transform_indices = @transform_1, window_bounds = array<i64: 640, 128>}, {pipeline_mode = #tpu.pipeline_mode<synchronous>, transform_indices = @transform_2, window_bounds = array<i64: 1, 128>}, {transform_indices = @transform_3, window_bounds = array<i64: 1, 16, 128>}]} {
    %c0 = arith.constant 0 : index
    %c0_0 = arith.constant 0 : index
    %c0_1 = arith.constant 0 : index
    %0 = vector.load %arg1[%c0, %c0_0, %c0_1] : memref<1x16x640xbf16, #tpu.memory_space<vmem>>, vector<1x16x640xbf16>
    %1 = vector.shape_cast %0 : vector<1x16x640xbf16> to vector<16x640xbf16>
    %c0_2 = arith.constant 0 : index
    %c0_3 = arith.constant 0 : index
    %2 = vector.load %arg2[%c0_2, %c0_3] : memref<640x128xbf16, #tpu.memory_space<vmem>>, vector<640x128xbf16>
    %cst = arith.constant dense<0.000000e+00> : vector<16x128xf32>
    %3 = tpu.matmul %1, %2, %cst {dimension_numbers = #tpu.dot_dimension_numbers<[1], [0], [0], [1], [0, 0, 1, 1], [], []>} : vector<16x640xbf16>, vector<640x128xbf16>, vector<16x128xf32> -> vector<16x128xf32>
    %c0_4 = arith.constant 0 : index
    %c0_5 = arith.constant 0 : index
    %4 = vector.load %arg3[%c0_4, %c0_5] : memref<1x128xf32, #tpu.memory_space<vmem>>, vector<1x128xf32>
    %5 = vector.broadcast %4 : vector<1x128xf32> to vector<16x128xf32>
    %6 = arith.addf %3, %5 : vector<16x128xf32>
    %cst_6 = arith.constant dense<0.000000e+00> : vector<128xf32>
    %7 = vector.multi_reduction <add>, %6, %cst_6 [0] : vector<16x128xf32> to vector<128xf32>
    %8 = vector.shape_cast %7 : vector<128xf32> to vector<1x128xf32>
    %cst_7 = arith.constant 1.600000e+01 : f32
    %9 = vector.broadcast %cst_7 : f32 to vector<1x128xf32>
    %10 = arith.divf %8, %9 : vector<1x128xf32>
    %11 = vector.broadcast %10 : vector<1x128xf32> to vector<16x128xf32>
    %12 = arith.subf %6, %11 : vector<16x128xf32>
    %13 = arith.mulf %12, %12 : vector<16x128xf32>
    %cst_8 = arith.constant dense<0.000000e+00> : vector<128xf32>
    %14 = vector.multi_reduction <add>, %13, %cst_8 [0] : vector<16x128xf32> to vector<128xf32>
    %15 = vector.shape_cast %14 : vector<128xf32> to vector<1x128xf32>
    %cst_9 = arith.constant 1.600000e+01 : f32
    %16 = vector.broadcast %cst_9 : f32 to vector<1x128xf32>
    %17 = arith.divf %15, %16 : vector<1x128xf32>
    %18 = vector.broadcast %10 : vector<1x128xf32> to vector<16x128xf32>
    %19 = arith.subf %6, %18 : vector<16x128xf32>
    %cst_10 = arith.constant 9.99999974E-6 : f32
    %20 = vector.broadcast %cst_10 : f32 to vector<1x128xf32>
    %21 = arith.addf %17, %20 : vector<1x128xf32>
    %22 = math.rsqrt %21 : vector<1x128xf32>
    %23 = vector.broadcast %22 : vector<1x128xf32> to vector<16x128xf32>
    %24 = arith.mulf %19, %23 : vector<16x128xf32>
    %cst_11 = arith.constant 0.000000e+00 : f32
    %25 = vector.broadcast %cst_11 : f32 to vector<16x128xf32>
    %26 = arith.maximumf %24, %25 : vector<16x128xf32>
    %c0_12 = arith.constant 0 : index
    %c0_13 = arith.constant 0 : index
    %c0_14 = arith.constant 0 : index
    %27 = vector.load %arg4[%c0_12, %c0_13, %c0_14] : memref<1x16x128xf32, #tpu.memory_space<vmem>>, vector<1x16x128xf32>
    %28 = vector.shape_cast %27 : vector<1x16x128xf32> to vector<16x128xf32>
    %29 = vector.shape_cast %26 : vector<16x128xf32> to vector<1x16x128xf32>
    tpu.vector_store %arg4[%c0_12, %c0_13, %c0_14], %29 {strides = array<i32>} : memref<1x16x128xf32, #tpu.memory_space<vmem>>, vector<1x16x128xf32>,
    return
  }
  func.func @transform_0(%arg0: i32) -> (i32, i32, i32) {
    %c0_i32 = arith.constant 0 : i32
    %c0_i32_0 = arith.constant 0 : i32
    %c0_i32_1 = arith.constant 0 : i32
    return %arg0, %c0_i32, %c0_i32_0 : i32, i32, i32
  }
  func.func @transform_1(%arg0: i32) -> (i32, i32) {
    %c0_i32 = arith.constant 0 : i32
    %c0_i32_0 = arith.constant 0 : i32
    %c0_i32_1 = arith.constant 0 : i32
    return %c0_i32, %c0_i32_0 : i32, i32
  }
  func.func @transform_2(%arg0: i32) -> (i32, i32) {
    %c0_i32 = arith.constant 0 : i32
    %c0_i32_0 = arith.constant 0 : i32
    %c0_i32_1 = arith.constant 0 : i32
    return %c0_i32, %c0_i32_0 : i32, i32
  }
  func.func @transform_3(%arg0: i32) -> (i32, i32, i32) {
    %c0_i32 = arith.constant 0 : i32
    %c0_i32_0 = arith.constant 0 : i32
    %c0_i32_1 = arith.constant 0 : i32
    return %arg0, %c0_i32, %c0_i32_0 : i32, i32, i32
  }
}

module attributes {stable_mosaic.version = 11 : i64} {
  func.func @_fused_conv_kernel(%arg0: i32, %arg1: memref<1x16x1152xbf16, #tpu.memory_space<vmem>>, %arg2: memref<1152x128xbf16, #tpu.memory_space<vmem>>, %arg3: memref<1x16x128xf32, #tpu.memory_space<vmem>>) attributes {dimension_semantics = [#tpu.dimension_semantics<parallel>], iteration_bounds = array<i64: 2>, scalar_prefetch = 0 : i64, scratch_operands = 0 : i64, tpu.core_type = #tpu.core_type<tc>, window_params = [{transform_indices = @transform_0, window_bounds = array<i64: 1, 16, 1152>}, {pipeline_mode = #tpu.pipeline_mode<synchronous>, transform_indices = @transform_1, window_bounds = array<i64: 1152, 128>}, {transform_indices = @transform_2, window_bounds = array<i64: 1, 16, 128>}]} {
    %c0 = arith.constant 0 : index
    %c0_0 = arith.constant 0 : index
    %c0_1 = arith.constant 0 : index
    %0 = vector.load %arg1[%c0, %c0_0, %c0_1] : memref<1x16x1152xbf16, #tpu.memory_space<vmem>>, vector<1x16x1152xbf16>
    %1 = vector.shape_cast %0 : vector<1x16x1152xbf16> to vector<16x1152xbf16>
    %c0_2 = arith.constant 0 : index
    %c0_3 = arith.constant 0 : index
    %2 = vector.load %arg2[%c0_2, %c0_3] : memref<1152x128xbf16, #tpu.memory_space<vmem>>, vector<1152x128xbf16>
    %cst = arith.constant dense<0.000000e+00> : vector<16x128xf32>
    %3 = tpu.matmul %1, %2, %cst {dimension_numbers = #tpu.dot_dimension_numbers<[1], [0], [0], [1], [0, 0, 1, 1], [], []>} : vector<16x1152xbf16>, vector<1152x128xbf16>, vector<16x128xf32> -> vector<16x128xf32>
    %cst_4 = arith.constant dense<0.000000e+00> : vector<128xf32>
    %4 = vector.multi_reduction <add>, %3, %cst_4 [0] : vector<16x128xf32> to vector<128xf32>
    %5 = vector.shape_cast %4 : vector<128xf32> to vector<1x128xf32>
    %cst_5 = arith.constant 1.600000e+01 : f32
    %6 = vector.broadcast %cst_5 : f32 to vector<1x128xf32>
    %7 = arith.divf %5, %6 : vector<1x128xf32>
    %8 = vector.broadcast %7 : vector<1x128xf32> to vector<16x128xf32>
    %9 = arith.subf %3, %8 : vector<16x128xf32>
    %10 = arith.mulf %9, %9 : vector<16x128xf32>
    %cst_6 = arith.constant dense<0.000000e+00> : vector<128xf32>
    %11 = vector.multi_reduction <add>, %10, %cst_6 [0] : vector<16x128xf32> to vector<128xf32>
    %12 = vector.shape_cast %11 : vector<128xf32> to vector<1x128xf32>
    %cst_7 = arith.constant 1.600000e+01 : f32
    %13 = vector.broadcast %cst_7 : f32 to vector<1x128xf32>
    %14 = arith.divf %12, %13 : vector<1x128xf32>
    %15 = vector.broadcast %7 : vector<1x128xf32> to vector<16x128xf32>
    %16 = arith.subf %3, %15 : vector<16x128xf32>
    %cst_8 = arith.constant 9.99999974E-6 : f32
    %17 = vector.broadcast %cst_8 : f32 to vector<1x128xf32>
    %18 = arith.addf %14, %17 : vector<1x128xf32>
    %19 = math.rsqrt %18 : vector<1x128xf32>
    %20 = vector.broadcast %19 : vector<1x128xf32> to vector<16x128xf32>
    %21 = arith.mulf %16, %20 : vector<16x128xf32>
    %cst_9 = arith.constant 0.000000e+00 : f32
    %22 = vector.broadcast %cst_9 : f32 to vector<16x128xf32>
    %23 = arith.maximumf %21, %22 : vector<16x128xf32>
    %c0_10 = arith.constant 0 : index
    %c0_11 = arith.constant 0 : index
    %c0_12 = arith.constant 0 : index
    %24 = vector.load %arg3[%c0_10, %c0_11, %c0_12] : memref<1x16x128xf32, #tpu.memory_space<vmem>>, vector<1x16x128xf32>
    %25 = vector.shape_cast %24 : vector<1x16x128xf32> to vector<16x128xf32>
    %26 = vector.shape_cast %23 : vector<16x128xf32> to vector<1x16x128xf32>
    tpu.vector_store %arg3[%c0_10, %c0_11, %c0_12], %26 {strides = array<i32>} : memref<1x16x128xf32, #tpu.memory_space<vmem>>, vector<1x16x128xf32>,
    return
  }
  func.func @transform_0(%arg0: i32) -> (i32, i32, i32) {
    %c0_i32 = arith.constant 0 : i32
    %c0_i32_0 = arith.constant 0 : i32
    %c0_i32_1 = arith.constant 0 : i32
    return %arg0, %c0_i32, %c0_i32_0 : i32, i32, i32
  }
  func.func @transform_1(%arg0: i32) -> (i32, i32) {
    %c0_i32 = arith.constant 0 : i32
    %c0_i32_0 = arith.constant 0 : i32
    %c0_i32_1 = arith.constant 0 : i32
    return %c0_i32, %c0_i32_0 : i32, i32
  }
  func.func @transform_2(%arg0: i32) -> (i32, i32, i32) {
    %c0_i32 = arith.constant 0 : i32
    %c0_i32_0 = arith.constant 0 : i32
    %c0_i32_1 = arith.constant 0 : i32
    return %arg0, %c0_i32, %c0_i32_0 : i32, i32, i32
  }
}

module attributes {stable_mosaic.version = 11 : i64} {
  func.func @_fused_conv_kernel(%arg0: i32, %arg1: memref<1x16x1152xbf16, #tpu.memory_space<vmem>>, %arg2: memref<1152x128xbf16, #tpu.memory_space<vmem>>, %arg3: memref<1x16x128xf32, #tpu.memory_space<vmem>>, %arg4: memref<1x16x128xf32, #tpu.memory_space<vmem>>) attributes {dimension_semantics = [#tpu.dimension_semantics<parallel>], iteration_bounds = array<i64: 2>, scalar_prefetch = 0 : i64, scratch_operands = 0 : i64, tpu.core_type = #tpu.core_type<tc>, window_params = [{transform_indices = @transform_0, window_bounds = array<i64: 1, 16, 1152>}, {pipeline_mode = #tpu.pipeline_mode<synchronous>, transform_indices = @transform_1, window_bounds = array<i64: 1152, 128>}, {transform_indices = @transform_2, window_bounds = array<i64: 1, 16, 128>}, {transform_indices = @transform_3, window_bounds = array<i64: 1, 16, 128>}]} {
    %c0 = arith.constant 0 : index
    %c0_0 = arith.constant 0 : index
    %c0_1 = arith.constant 0 : index
    %0 = vector.load %arg1[%c0, %c0_0, %c0_1] : memref<1x16x1152xbf16, #tpu.memory_space<vmem>>, vector<1x16x1152xbf16>
    %1 = vector.shape_cast %0 : vector<1x16x1152xbf16> to vector<16x1152xbf16>
    %c0_2 = arith.constant 0 : index
    %c0_3 = arith.constant 0 : index
    %2 = vector.load %arg2[%c0_2, %c0_3] : memref<1152x128xbf16, #tpu.memory_space<vmem>>, vector<1152x128xbf16>
    %cst = arith.constant dense<0.000000e+00> : vector<16x128xf32>
    %3 = tpu.matmul %1, %2, %cst {dimension_numbers = #tpu.dot_dimension_numbers<[1], [0], [0], [1], [0, 0, 1, 1], [], []>} : vector<16x1152xbf16>, vector<1152x128xbf16>, vector<16x128xf32> -> vector<16x128xf32>
    %cst_4 = arith.constant dense<0.000000e+00> : vector<128xf32>
    %4 = vector.multi_reduction <add>, %3, %cst_4 [0] : vector<16x128xf32> to vector<128xf32>
    %5 = vector.shape_cast %4 : vector<128xf32> to vector<1x128xf32>
    %cst_5 = arith.constant 1.600000e+01 : f32
    %6 = vector.broadcast %cst_5 : f32 to vector<1x128xf32>
    %7 = arith.divf %5, %6 : vector<1x128xf32>
    %8 = vector.broadcast %7 : vector<1x128xf32> to vector<16x128xf32>
    %9 = arith.subf %3, %8 : vector<16x128xf32>
    %10 = arith.mulf %9, %9 : vector<16x128xf32>
    %cst_6 = arith.constant dense<0.000000e+00> : vector<128xf32>
    %11 = vector.multi_reduction <add>, %10, %cst_6 [0] : vector<16x128xf32> to vector<128xf32>
    %12 = vector.shape_cast %11 : vector<128xf32> to vector<1x128xf32>
    %cst_7 = arith.constant 1.600000e+01 : f32
    %13 = vector.broadcast %cst_7 : f32 to vector<1x128xf32>
    %14 = arith.divf %12, %13 : vector<1x128xf32>
    %15 = vector.broadcast %7 : vector<1x128xf32> to vector<16x128xf32>
    %16 = arith.subf %3, %15 : vector<16x128xf32>
    %cst_8 = arith.constant 9.99999974E-6 : f32
    %17 = vector.broadcast %cst_8 : f32 to vector<1x128xf32>
    %18 = arith.addf %14, %17 : vector<1x128xf32>
    %19 = math.rsqrt %18 : vector<1x128xf32>
    %20 = vector.broadcast %19 : vector<1x128xf32> to vector<16x128xf32>
    %21 = arith.mulf %16, %20 : vector<16x128xf32>
    %c0_9 = arith.constant 0 : index
    %c0_10 = arith.constant 0 : index
    %c0_11 = arith.constant 0 : index
    %22 = vector.load %arg3[%c0_9, %c0_10, %c0_11] : memref<1x16x128xf32, #tpu.memory_space<vmem>>, vector<1x16x128xf32>
    %23 = vector.shape_cast %22 : vector<1x16x128xf32> to vector<16x128xf32>
    %24 = arith.addf %21, %23 : vector<16x128xf32>
    %c0_12 = arith.constant 0 : index
    %c0_13 = arith.constant 0 : index
    %c0_14 = arith.constant 0 : index
    %25 = vector.load %arg4[%c0_12, %c0_13, %c0_14] : memref<1x16x128xf32, #tpu.memory_space<vmem>>, vector<1x16x128xf32>
    %26 = vector.shape_cast %25 : vector<1x16x128xf32> to vector<16x128xf32>
    %27 = vector.shape_cast %24 : vector<16x128xf32> to vector<1x16x128xf32>
    tpu.vector_store %arg4[%c0_12, %c0_13, %c0_14], %27 {strides = array<i32>} : memref<1x16x128xf32, #tpu.memory_space<vmem>>, vector<1x16x128xf32>,
    return
  }
  func.func @transform_0(%arg0: i32) -> (i32, i32, i32) {
    %c0_i32 = arith.constant 0 : i32
    %c0_i32_0 = arith.constant 0 : i32
    %c0_i32_1 = arith.constant 0 : i32
    return %arg0, %c0_i32, %c0_i32_0 : i32, i32, i32
  }
  func.func @transform_1(%arg0: i32) -> (i32, i32) {
    %c0_i32 = arith.constant 0 : i32
    %c0_i32_0 = arith.constant 0 : i32
    %c0_i32_1 = arith.constant 0 : i32
    return %c0_i32, %c0_i32_0 : i32, i32
  }
  func.func @transform_2(%arg0: i32) -> (i32, i32, i32) {
    %c0_i32 = arith.constant 0 : i32
    %c0_i32_0 = arith.constant 0 : i32
    %c0_i32_1 = arith.constant 0 : i32
    return %arg0, %c0_i32, %c0_i32_0 : i32, i32, i32
  }
  func.func @transform_3(%arg0: i32) -> (i32, i32, i32) {
    %c0_i32 = arith.constant 0 : i32
    %c0_i32_0 = arith.constant 0 : i32
    %c0_i32_1 = arith.constant 0 : i32
    return %arg0, %c0_i32, %c0_i32_0 : i32, i32, i32
  }
}

module attributes {stable_mosaic.version = 11 : i64} {
  func.func @_fused_conv_kernel(%arg0: i32, %arg1: memref<1x64x1152xbf16, #tpu.memory_space<vmem>>, %arg2: memref<1152x64xbf16, #tpu.memory_space<vmem>>, %arg3: memref<1x64xf32, #tpu.memory_space<vmem>>, %arg4: memref<1x64x64xf32, #tpu.memory_space<vmem>>) attributes {dimension_semantics = [#tpu.dimension_semantics<parallel>], iteration_bounds = array<i64: 2>, scalar_prefetch = 0 : i64, scratch_operands = 0 : i64, tpu.core_type = #tpu.core_type<tc>, window_params = [{transform_indices = @transform_0, window_bounds = array<i64: 1, 64, 1152>}, {pipeline_mode = #tpu.pipeline_mode<synchronous>, transform_indices = @transform_1, window_bounds = array<i64: 1152, 64>}, {pipeline_mode = #tpu.pipeline_mode<synchronous>, transform_indices = @transform_2, window_bounds = array<i64: 1, 64>}, {transform_indices = @transform_3, window_bounds = array<i64: 1, 64, 64>}]} {
    %c0 = arith.constant 0 : index
    %c0_0 = arith.constant 0 : index
    %c0_1 = arith.constant 0 : index
    %0 = vector.load %arg1[%c0, %c0_0, %c0_1] : memref<1x64x1152xbf16, #tpu.memory_space<vmem>>, vector<1x64x1152xbf16>
    %1 = vector.shape_cast %0 : vector<1x64x1152xbf16> to vector<64x1152xbf16>
    %c0_2 = arith.constant 0 : index
    %c0_3 = arith.constant 0 : index
    %2 = vector.load %arg2[%c0_2, %c0_3] : memref<1152x64xbf16, #tpu.memory_space<vmem>>, vector<1152x64xbf16>
    %cst = arith.constant dense<0.000000e+00> : vector<64x64xf32>
    %3 = tpu.matmul %1, %2, %cst {dimension_numbers = #tpu.dot_dimension_numbers<[1], [0], [0], [1], [0, 0, 1, 1], [], []>} : vector<64x1152xbf16>, vector<1152x64xbf16>, vector<64x64xf32> -> vector<64x64xf32>
    %c0_4 = arith.constant 0 : index
    %c0_5 = arith.constant 0 : index
    %4 = vector.load %arg3[%c0_4, %c0_5] : memref<1x64xf32, #tpu.memory_space<vmem>>, vector<1x64xf32>
    %5 = vector.broadcast %4 : vector<1x64xf32> to vector<64x64xf32>
    %6 = arith.addf %3, %5 : vector<64x64xf32>
    %cst_6 = arith.constant dense<0.000000e+00> : vector<64xf32>
    %7 = vector.multi_reduction <add>, %6, %cst_6 [0] : vector<64x64xf32> to vector<64xf32>
    %8 = vector.shape_cast %7 : vector<64xf32> to vector<1x64xf32>
    %cst_7 = arith.constant 6.400000e+01 : f32
    %9 = vector.broadcast %cst_7 : f32 to vector<1x64xf32>
    %10 = arith.divf %8, %9 : vector<1x64xf32>
    %11 = vector.broadcast %10 : vector<1x64xf32> to vector<64x64xf32>
    %12 = arith.subf %6, %11 : vector<64x64xf32>
    %13 = arith.mulf %12, %12 : vector<64x64xf32>
    %cst_8 = arith.constant dense<0.000000e+00> : vector<64xf32>
    %14 = vector.multi_reduction <add>, %13, %cst_8 [0] : vector<64x64xf32> to vector<64xf32>
    %15 = vector.shape_cast %14 : vector<64xf32> to vector<1x64xf32>
    %cst_9 = arith.constant 6.400000e+01 : f32
    %16 = vector.broadcast %cst_9 : f32 to vector<1x64xf32>
    %17 = arith.divf %15, %16 : vector<1x64xf32>
    %18 = vector.broadcast %10 : vector<1x64xf32> to vector<64x64xf32>
    %19 = arith.subf %6, %18 : vector<64x64xf32>
    %cst_10 = arith.constant 9.99999974E-6 : f32
    %20 = vector.broadcast %cst_10 : f32 to vector<1x64xf32>
    %21 = arith.addf %17, %20 : vector<1x64xf32>
    %22 = math.rsqrt %21 : vector<1x64xf32>
    %23 = vector.broadcast %22 : vector<1x64xf32> to vector<64x64xf32>
    %24 = arith.mulf %19, %23 : vector<64x64xf32>
    %cst_11 = arith.constant 0.000000e+00 : f32
    %25 = vector.broadcast %cst_11 : f32 to vector<64x64xf32>
    %26 = arith.maximumf %24, %25 : vector<64x64xf32>
    %c0_12 = arith.constant 0 : index
    %c0_13 = arith.constant 0 : index
    %c0_14 = arith.constant 0 : index
    %27 = vector.load %arg4[%c0_12, %c0_13, %c0_14] : memref<1x64x64xf32, #tpu.memory_space<vmem>>, vector<1x64x64xf32>
    %28 = vector.shape_cast %27 : vector<1x64x64xf32> to vector<64x64xf32>
    %29 = vector.shape_cast %26 : vector<64x64xf32> to vector<1x64x64xf32>
    tpu.vector_store %arg4[%c0_12, %c0_13, %c0_14], %29 {strides = array<i32>} : memref<1x64x64xf32, #tpu.memory_space<vmem>>, vector<1x64x64xf32>,
    return
  }
  func.func @transform_0(%arg0: i32) -> (i32, i32, i32) {
    %c0_i32 = arith.constant 0 : i32
    %c0_i32_0 = arith.constant 0 : i32
    %c0_i32_1 = arith.constant 0 : i32
    return %arg0, %c0_i32, %c0_i32_0 : i32, i32, i32
  }
  func.func @transform_1(%arg0: i32) -> (i32, i32) {
    %c0_i32 = arith.constant 0 : i32
    %c0_i32_0 = arith.constant 0 : i32
    %c0_i32_1 = arith.constant 0 : i32
    return %c0_i32, %c0_i32_0 : i32, i32
  }
  func.func @transform_2(%arg0: i32) -> (i32, i32) {
    %c0_i32 = arith.constant 0 : i32
    %c0_i32_0 = arith.constant 0 : i32
    %c0_i32_1 = arith.constant 0 : i32
    return %c0_i32, %c0_i32_0 : i32, i32
  }
  func.func @transform_3(%arg0: i32) -> (i32, i32, i32) {
    %c0_i32 = arith.constant 0 : i32
    %c0_i32_0 = arith.constant 0 : i32
    %c0_i32_1 = arith.constant 0 : i32
    return %arg0, %c0_i32, %c0_i32_0 : i32, i32, i32
  }
}

module attributes {stable_mosaic.version = 11 : i64} {
  func.func @_fused_conv_kernel(%arg0: i32, %arg1: memref<1x256x640xbf16, #tpu.memory_space<vmem>>, %arg2: memref<640x32xbf16, #tpu.memory_space<vmem>>, %arg3: memref<1x32xf32, #tpu.memory_space<vmem>>, %arg4: memref<1x256x32xf32, #tpu.memory_space<vmem>>) attributes {dimension_semantics = [#tpu.dimension_semantics<parallel>], iteration_bounds = array<i64: 2>, scalar_prefetch = 0 : i64, scratch_operands = 0 : i64, tpu.core_type = #tpu.core_type<tc>, window_params = [{transform_indices = @transform_0, window_bounds = array<i64: 1, 256, 640>}, {pipeline_mode = #tpu.pipeline_mode<synchronous>, transform_indices = @transform_1, window_bounds = array<i64: 640, 32>}, {pipeline_mode = #tpu.pipeline_mode<synchronous>, transform_indices = @transform_2, window_bounds = array<i64: 1, 32>}, {transform_indices = @transform_3, window_bounds = array<i64: 1, 256, 32>}]} {
    %c0 = arith.constant 0 : index
    %c0_0 = arith.constant 0 : index
    %c0_1 = arith.constant 0 : index
    %0 = vector.load %arg1[%c0, %c0_0, %c0_1] : memref<1x256x640xbf16, #tpu.memory_space<vmem>>, vector<1x256x640xbf16>
    %1 = vector.shape_cast %0 : vector<1x256x640xbf16> to vector<256x640xbf16>
    %c0_2 = arith.constant 0 : index
    %c0_3 = arith.constant 0 : index
    %2 = vector.load %arg2[%c0_2, %c0_3] : memref<640x32xbf16, #tpu.memory_space<vmem>>, vector<640x32xbf16>
    %cst = arith.constant dense<0.000000e+00> : vector<256x32xf32>
    %3 = tpu.matmul %1, %2, %cst {dimension_numbers = #tpu.dot_dimension_numbers<[1], [0], [0], [1], [0, 0, 1, 1], [], []>} : vector<256x640xbf16>, vector<640x32xbf16>, vector<256x32xf32> -> vector<256x32xf32>
    %c0_4 = arith.constant 0 : index
    %c0_5 = arith.constant 0 : index
    %4 = vector.load %arg3[%c0_4, %c0_5] : memref<1x32xf32, #tpu.memory_space<vmem>>, vector<1x32xf32>
    %5 = vector.broadcast %4 : vector<1x32xf32> to vector<256x32xf32>
    %6 = arith.addf %3, %5 : vector<256x32xf32>
    %cst_6 = arith.constant dense<0.000000e+00> : vector<32xf32>
    %7 = vector.multi_reduction <add>, %6, %cst_6 [0] : vector<256x32xf32> to vector<32xf32>
    %8 = vector.shape_cast %7 : vector<32xf32> to vector<1x32xf32>
    %cst_7 = arith.constant 2.560000e+02 : f32
    %9 = vector.broadcast %cst_7 : f32 to vector<1x32xf32>
    %10 = arith.divf %8, %9 : vector<1x32xf32>
    %11 = vector.broadcast %10 : vector<1x32xf32> to vector<256x32xf32>
    %12 = arith.subf %6, %11 : vector<256x32xf32>
    %13 = arith.mulf %12, %12 : vector<256x32xf32>
    %cst_8 = arith.constant dense<0.000000e+00> : vector<32xf32>
    %14 = vector.multi_reduction <add>, %13, %cst_8 [0] : vector<256x32xf32> to vector<32xf32>
    %15 = vector.shape_cast %14 : vector<32xf32> to vector<1x32xf32>
    %cst_9 = arith.constant 2.560000e+02 : f32
    %16 = vector.broadcast %cst_9 : f32 to vector<1x32xf32>
    %17 = arith.divf %15, %16 : vector<1x32xf32>
    %18 = vector.broadcast %10 : vector<1x32xf32> to vector<256x32xf32>
    %19 = arith.subf %6, %18 : vector<256x32xf32>
    %cst_10 = arith.constant 9.99999974E-6 : f32
    %20 = vector.broadcast %cst_10 : f32 to vector<1x32xf32>
    %21 = arith.addf %17, %20 : vector<1x32xf32>
    %22 = math.rsqrt %21 : vector<1x32xf32>
    %23 = vector.broadcast %22 : vector<1x32xf32> to vector<256x32xf32>
    %24 = arith.mulf %19, %23 : vector<256x32xf32>
    %cst_11 = arith.constant 0.000000e+00 : f32
    %25 = vector.broadcast %cst_11 : f32 to vector<256x32xf32>
    %26 = arith.maximumf %24, %25 : vector<256x32xf32>
    %c0_12 = arith.constant 0 : index
    %c0_13 = arith.constant 0 : index
    %c0_14 = arith.constant 0 : index
    %27 = vector.load %arg4[%c0_12, %c0_13, %c0_14] : memref<1x256x32xf32, #tpu.memory_space<vmem>>, vector<1x256x32xf32>
    %28 = vector.shape_cast %27 : vector<1x256x32xf32> to vector<256x32xf32>
    %29 = vector.shape_cast %26 : vector<256x32xf32> to vector<1x256x32xf32>
    tpu.vector_store %arg4[%c0_12, %c0_13, %c0_14], %29 {strides = array<i32>} : memref<1x256x32xf32, #tpu.memory_space<vmem>>, vector<1x256x32xf32>,
    return
  }
  func.func @transform_0(%arg0: i32) -> (i32, i32, i32) {
    %c0_i32 = arith.constant 0 : i32
    %c0_i32_0 = arith.constant 0 : i32
    %c0_i32_1 = arith.constant 0 : i32
    return %arg0, %c0_i32, %c0_i32_0 : i32, i32, i32
  }
  func.func @transform_1(%arg0: i32) -> (i32, i32) {
    %c0_i32 = arith.constant 0 : i32
    %c0_i32_0 = arith.constant 0 : i32
    %c0_i32_1 = arith.constant 0 : i32
    return %c0_i32, %c0_i32_0 : i32, i32
  }
  func.func @transform_2(%arg0: i32) -> (i32, i32) {
    %c0_i32 = arith.constant 0 : i32
    %c0_i32_0 = arith.constant 0 : i32
    %c0_i32_1 = arith.constant 0 : i32
    return %c0_i32, %c0_i32_0 : i32, i32
  }
  func.func @transform_3(%arg0: i32) -> (i32, i32, i32) {
    %c0_i32 = arith.constant 0 : i32
    %c0_i32_0 = arith.constant 0 : i32
    %c0_i32_1 = arith.constant 0 : i32
    return %arg0, %c0_i32, %c0_i32_0 : i32, i32, i32
  }
}

module attributes {stable_mosaic.version = 11 : i64} {
  func.func @_fused_conv_kernel(%arg0: i32, %arg1: memref<1x256x1664xbf16, #tpu.memory_space<vmem>>, %arg2: memref<1664x3xbf16, #tpu.memory_space<vmem>>, %arg3: memref<1x3xf32, #tpu.memory_space<vmem>>, %arg4: memref<1x256x3xf32, #tpu.memory_space<vmem>>) attributes {dimension_semantics = [#tpu.dimension_semantics<parallel>], iteration_bounds = array<i64: 2>, scalar_prefetch = 0 : i64, scratch_operands = 0 : i64, tpu.core_type = #tpu.core_type<tc>, window_params = [{transform_indices = @transform_0, window_bounds = array<i64: 1, 256, 1664>}, {pipeline_mode = #tpu.pipeline_mode<synchronous>, transform_indices = @transform_1, window_bounds = array<i64: 1664, 3>}, {pipeline_mode = #tpu.pipeline_mode<synchronous>, transform_indices = @transform_2, window_bounds = array<i64: 1, 3>}, {transform_indices = @transform_3, window_bounds = array<i64: 1, 256, 3>}]} {
    %c0 = arith.constant 0 : index
    %c0_0 = arith.constant 0 : index
    %c0_1 = arith.constant 0 : index
    %0 = vector.load %arg1[%c0, %c0_0, %c0_1] : memref<1x256x1664xbf16, #tpu.memory_space<vmem>>, vector<1x256x1664xbf16>
    %1 = vector.shape_cast %0 : vector<1x256x1664xbf16> to vector<256x1664xbf16>
    %c0_2 = arith.constant 0 : index
    %c0_3 = arith.constant 0 : index
    %2 = vector.load %arg2[%c0_2, %c0_3] : memref<1664x3xbf16, #tpu.memory_space<vmem>>, vector<1664x3xbf16>
    %cst = arith.constant dense<0.000000e+00> : vector<256x3xf32>
    %3 = tpu.matmul %1, %2, %cst {dimension_numbers = #tpu.dot_dimension_numbers<[1], [0], [0], [1], [0, 0, 1, 1], [], []>} : vector<256x1664xbf16>, vector<1664x3xbf16>, vector<256x3xf32> -> vector<256x3xf32>
    %c0_4 = arith.constant 0 : index
    %c0_5 = arith.constant 0 : index
    %4 = vector.load %arg3[%c0_4, %c0_5] : memref<1x3xf32, #tpu.memory_space<vmem>>, vector<1x3xf32>
    %5 = vector.broadcast %4 : vector<1x3xf32> to vector<256x3xf32>
    %6 = arith.addf %3, %5 : vector<256x3xf32>
    %7 = math.tanh %6 : vector<256x3xf32>
    %c0_6 = arith.constant 0 : index
    %c0_7 = arith.constant 0 : index
    %c0_8 = arith.constant 0 : index
    %8 = vector.load %arg4[%c0_6, %c0_7, %c0_8] : memref<1x256x3xf32, #tpu.memory_space<vmem>>, vector<1x256x3xf32>
    %9 = vector.shape_cast %8 : vector<1x256x3xf32> to vector<256x3xf32>
    %10 = vector.shape_cast %7 : vector<256x3xf32> to vector<1x256x3xf32>
    tpu.vector_store %arg4[%c0_6, %c0_7, %c0_8], %10 {strides = array<i32>} : memref<1x256x3xf32, #tpu.memory_space<vmem>>, vector<1x256x3xf32>,
    return
  }
  func.func @transform_0(%arg0: i32) -> (i32, i32, i32) {
    %c0_i32 = arith.constant 0 : i32
    %c0_i32_0 = arith.constant 0 : i32
    %c0_i32_1 = arith.constant 0 : i32
    return %arg0, %c0_i32, %c0_i32_0 : i32, i32, i32
  }
  func.func @transform_1(%arg0: i32) -> (i32, i32) {
    %c0_i32 = arith.constant 0 : i32
    %c0_i32_0 = arith.constant 0 : i32
    %c0_i32_1 = arith.constant 0 : i32
    return %c0_i32, %c0_i32_0 : i32, i32
  }
  func.func @transform_2(%arg0: i32) -> (i32, i32) {
    %c0_i32 = arith.constant 0 : i32
    %c0_i32_0 = arith.constant 0 : i32
    %c0_i32_1 = arith.constant 0 : i32
    return %c0_i32, %c0_i32_0 : i32, i32
  }
  func.func @transform_3(%arg0: i32) -> (i32, i32, i32) {
    %c0_i32 = arith.constant 0 : i32
    %c0_i32_0 = arith.constant 0 : i32
    %c0_i32_1 = arith.constant 0 : i32
    return %arg0, %c0_i32, %c0_i32_0 : i32, i32, i32
  }
}

</mosaic_0001>

<bundles_post_ra>
// kernel: generator_forward.18
= control target key start
LH: loop header
LB: loop body
LE: loop exit
PB: predicated region body
PF: predicated region fallthrough
CT: control target
= control target key end

     0   :  { %s1359_s12 = smov 0   ;;  %s2070_s0 = inlined_call_operand.vmem [shape: bf16[2,256,256], index: 0, kind: input, shape index: {}]   ;;  %s2071_s1 = inlined_call_operand.vmem [shape: bf16[256,32], index: 1, kind: input, shape index: {}]   ;;  %s2072_s2 = inlined_call_operand.vmem [shape: f32[1,32], index: 2, kind: input, shape index: {}]   ;;  %s2073_s3 = inlined_call_operand.vmem [shape: f32[2,256,32], index: 3, kind: output, shape index: {}]  }
   0x1 LB: > { %s1047_s13 = sadd.s32 4294967295, %s1336_s12   ;;  %p1051_p0 = scmp.ge.s32.totalorder %s1336_s12, 1  ;;  %s1336_s12 = sphi %s1359_s12, %s13_s12  }
   0x2   : > { %p137_p1 = scmp.lt.s32.totalorder %s1336_s12, 3 }
   0x4   : > { %p138_p2 = pnand %p1051_p0, %p137_p1 }
   0x5   : > { %p161_p3 = scmp.lt.s32.totalorder (!%p138_p2), %s1047_s13, 1 }
   0x6   : > { %141 = sbr.rel (%p138_p2) target bundleno = 479 (0x1df), region = 32 }
   0xb   : > { %v1291_v0 = vld [vmem:[%s2071_s1 + $0x38] sm:$0xff]  ;;  %v1290_v2 = vld [vmem:[%s2071_s1 + $0x30] sm:$0xff]  ;;  %v1289_v4 = vld [vmem:[%s2071_s1 + $0x28] sm:$0xff]  ;;  %s2075_s13 = smov (!%p161_p3, %s1047_s13), 1  ;;  %vm673_vm0 = vcmask 261120  }
   0xc   : > { %v1299_v1 = vld [vmem:[%s2071_s1 + $0x78] sm:$0xff]  ;;  %495 = vmatpush.bf16.msra.mxu0 %v1291_v0  ;;  %v1298_v3 = vld [vmem:[%s2071_s1 + $0x70] sm:$0xff]  ;;  %1300 = vmatpush.bf16.msra.mxu2 %v1291_v0  ;;  %v1297_v5 = vld [vmem:[%s2071_s1 + $0x68] sm:$0xff]  ;;  %s1250_s11 = sshll.u32 %s2075_s13, 8 }
   0xd   : > { %584 = vmatpush.bf16.msra.mxu1 %v1299_v1  ;;  %1308 = vmatpush.bf16.msra.mxu3 %v1299_v1  ;;  %v1288_v6 = vld [vmem:[%s2071_s1 + $0x20] sm:$0xff]  ;;  %v1287_v8 = vld [vmem:[%s2071_s1 + $0x18] sm:$0xff]  ;;  %v1286_v10 = vld [vmem:[%s2071_s1 + $0x10] sm:$0xff]  ;;  %s1421_s20 = scalar_lea.vmem %s2070_s0, %s1250_s11  ;;  %s1947_s29 = scalar_lea.vmem %s2073_s3, %s1250_s11 }
   0xe   : > { %v1296_v7 = vld [vmem:[%s2071_s1 + $0x60] sm:$0xff]  ;;  %v1295_v9 = vld [vmem:[%s2071_s1 + $0x58] sm:$0xff]  ;;  %v1294_v11 = vld [vmem:[%s2071_s1 + $0x50] sm:$0xff] }
   0xf   : > { %v1285_v12 = vld [vmem:[%s2071_s1 + $0x8] sm:$0xff]  ;;  %v1284_v14 = vld [vmem:[%s2071_s1] sm:$0xff]  ;;  %v1066_v28 = vld [vmem:[%s1421_s20 + $0x10] sm:$0xf] }
  0x10   : > { %496 = vmatpush.bf16.msra.mxu0 %v1290_v2  ;;  %1301 = vmatpush.bf16.msra.mxu2 %v1290_v2  ;;  %v1293_v13 = vld [vmem:[%s2071_s1 + $0x48] sm:$0xff]  ;;  %v1292_v15 = vld [vmem:[%s2071_s1 + $0x40] sm:$0xff]  ;;  %v1255_v29 = vld [vmem:[%s1421_s20 + $0x14] sm:$0xf0] }
  0x11   : > { %585 = vmatpush.bf16.msra.mxu1 %v1298_v3  ;;  %1309 = vmatpush.bf16.msra.mxu3 %v1298_v3  ;;  %v1058_v16 = vld [vmem:[%s1421_s20] sm:$0xf]  ;;  %v1253_v17 = vld [vmem:[%s1421_s20 + $0x4] sm:$0xf0]  ;;  %v1252_v18 = vld [vmem:[%s1421_s20 + $0x4] sm:$0xf]  ;;  %v1067_v36 = vor.u32 %v1255_v29, %v1066_v28 }
  0x12   : > { %v1060_v19 = vld [vmem:[%s1421_s20 + $0x8] sm:$0xf0]  ;;  %v1122_v20 = vld [vmem:[%s1421_s20 + $0x80] sm:$0xf]  ;;  %v1269_v21 = vld [vmem:[%s1421_s20 + $0x84] sm:$0xf0]  ;;  %v1059_v24 = vor.u32 %v1253_v17, %v1058_v16 }
  0x13   : > { %v1268_v22 = vld [vmem:[%s1421_s20 + $0x84] sm:$0xf]  ;;  %v1124_v23 = vld [vmem:[%s1421_s20 + $0x88] sm:$0xf0]  ;;  %v1063_v25 = vor.u32 %v1252_v18, %v1060_v19  ;;  %v1123_v26 = vor.u32 %v1269_v21, %v1122_v20  ;;  %v1254_v30 = vld [vmem:[%s1421_s20 + $0x14] sm:$0xf] }
  0x14   : > { %497 = vmatpush.bf16.msra.mxu0 %v1289_v4  ;;  %1302 = vmatpush.bf16.msra.mxu2 %v1289_v4  ;;  %v1127_v27 = vor.u32 %v1268_v22, %v1124_v23  ;;  %v1068_v31 = vld [vmem:[%s1421_s20 + $0x18] sm:$0xf0]  ;;  %v1130_v32 = vld [vmem:[%s1421_s20 + $0x90] sm:$0xf]  ;;  %v1271_v33 = vld [vmem:[%s1421_s20 + $0x94] sm:$0xf0] }
  0x15   : > { %586 = vmatpush.bf16.msra.mxu1 %v1297_v5  ;;  %1310 = vmatpush.bf16.msra.mxu3 %v1297_v5  ;;  %v1270_v34 = vld [vmem:[%s1421_s20 + $0x94] sm:$0xf]  ;;  %v1132_v35 = vld [vmem:[%s1421_s20 + $0x98] sm:$0xf0]  ;;  %v1071_v37 = vor.u32 %v1254_v30, %v1068_v31  ;;  %v1131_v38 = vor.u32 %v1271_v33, %v1130_v32  ;;  %v1074_v40 = vld [vmem:[%s1421_s20 + $0x20] sm:$0xf] }
  0x16   : > { %v1135_v39 = vor.u32 %v1270_v34, %v1132_v35  ;;  %v1257_v41 = vld [vmem:[%s1421_s20 + $0x24] sm:$0xf0]  ;;  %v1256_v42 = vld [vmem:[%s1421_s20 + $0x24] sm:$0xf]  ;;  %v1076_v43 = vld [vmem:[%s1421_s20 + $0x28] sm:$0xf0] }
  0x17   : > { %v1138_v44 = vld [vmem:[%s1421_s20 + $0xa0] sm:$0xf]  ;;  %v1273_v45 = vld [vmem:[%s1421_s20 + $0xa4] sm:$0xf0]  ;;  %v1272_v46 = vld [vmem:[%s1421_s20 + $0xa4] sm:$0xf]  ;;  %v1075_v48 = vor.u32 %v1257_v41, %v1074_v40  ;;  %v1079_v49 = vor.u32 %v1256_v42, %v1076_v43 }
  0x18   : > { %498 = vmatpush.bf16.msra.mxu0 %v1288_v6  ;;  %1303 = vmatpush.bf16.msra.mxu2 %v1288_v6  ;;  %v1140_v47 = vld [vmem:[%s1421_s20 + $0xa8] sm:$0xf0]  ;;  %v1139_v50 = vor.u32 %v1273_v45, %v1138_v44  ;;  %v1082_v52 = vld [vmem:[%s1421_s20 + $0x30] sm:$0xf]  ;;  %v1259_v53 = vld [vmem:[%s1421_s20 + $0x34] sm:$0xf0] }
  0x19   : > { %587 = vmatpush.bf16.msra.mxu1 %v1296_v7  ;;  %1311 = vmatpush.bf16.msra.mxu3 %v1296_v7  ;;  %v1143_v51 = vor.u32 %v1272_v46, %v1140_v47  ;;  %v1258_v54 = vld [vmem:[%s1421_s20 + $0x34] sm:$0xf]  ;;  %v1084_v55 = vld [vmem:[%s1421_s20 + $0x38] sm:$0xf0]  ;;  %v1146_v56 = vld [vmem:[%s1421_s20 + $0xb0] sm:$0xf]  ;;  %v1083_v60 = vor.u32 %v1259_v53, %v1082_v52 }
  0x1a   : > { %v1275_v57 = vld [vmem:[%s1421_s20 + $0xb4] sm:$0xf0]  ;;  %v1274_v58 = vld [vmem:[%s1421_s20 + $0xb4] sm:$0xf]  ;;  %v1148_v59 = vld [vmem:[%s1421_s20 + $0xb8] sm:$0xf0]  ;;  %v1087_v61 = vor.u32 %v1258_v54, %v1084_v55 }
  0x1b   : > { %v1147_v62 = vor.u32 %v1275_v57, %v1146_v56  ;;  %v1151_v63 = vor.u32 %v1274_v58, %v1148_v59  ;;  %v1090_v0 = vld [vmem:[%s1421_s20 + $0x40] sm:$0xf]  ;;  %v1261_v1 = vld [vmem:[%s1421_s20 + $0x44] sm:$0xf0]  ;;  %v1260_v2 = vld [vmem:[%s1421_s20 + $0x44] sm:$0xf] }
  0x1c   : > { %499 = vmatpush.bf16.msra.mxu0 %v1287_v8  ;;  %1304 = vmatpush.bf16.msra.mxu2 %v1287_v8  ;;  %v1092_v3 = vld [vmem:[%s1421_s20 + $0x48] sm:$0xf0]  ;;  %v1154_v4 = vld [vmem:[%s1421_s20 + $0xc0] sm:$0xf]  ;;  %v1277_v5 = vld [vmem:[%s1421_s20 + $0xc4] sm:$0xf0]  ;;  %v1091_v8 = vor.u32 %v1261_v1, %v1090_v0 }
  0x1d   : > { %588 = vmatpush.bf16.msra.mxu1 %v1295_v9  ;;  %1312 = vmatpush.bf16.msra.mxu3 %v1295_v9  ;;  %v1276_v6 = vld [vmem:[%s1421_s20 + $0xc4] sm:$0xf]  ;;  %v1156_v7 = vld [vmem:[%s1421_s20 + $0xc8] sm:$0xf0]  ;;  %v1095_v9 = vor.u32 %v1260_v2, %v1092_v3  ;;  %v1162_v16 = vld [vmem:[%s1421_s20 + $0xd0] sm:$0xf] }
  0x1e   : > { %v1279_v17 = vld [vmem:[%s1421_s20 + $0xd4] sm:$0xf0]  ;;  %v1278_v18 = vld [vmem:[%s1421_s20 + $0xd4] sm:$0xf]  ;;  %v1164_v19 = vld [vmem:[%s1421_s20 + $0xd8] sm:$0xf0] }
  0x1f   : > { %v1163_v22 = vor.u32 %v1279_v17, %v1162_v16  ;;  %v1167_v23 = vor.u32 %v1278_v18, %v1164_v19  ;;  %v1170_v28 = vld [vmem:[%s1421_s20 + $0xe0] sm:$0xf]  ;;  %v1281_v29 = vld [vmem:[%s1421_s20 + $0xe4] sm:$0xf0]  ;;  %v1280_v30 = vld [vmem:[%s1421_s20 + $0xe4] sm:$0xf] }
  0x20   : > { %500 = vmatpush.bf16.msra.mxu0 %v1286_v10  ;;  %1305 = vmatpush.bf16.msra.mxu2 %v1286_v10  ;;  %v1155_v10 = vor.u32 %v1277_v5, %v1154_v4  ;;  %v1172_v31 = vld [vmem:[%s1421_s20 + $0xe8] sm:$0xf0]  ;;  %v1171_v34 = vor.u32 %v1281_v29, %v1170_v28  ;;  %v1178_v40 = vld [vmem:[%s1421_s20 + $0xf0] sm:$0xf]  ;;  %v1283_v41 = vld [vmem:[%s1421_s20 + $0xf4] sm:$0xf0] }
  0x21   : > { %589 = vmatpush.bf16.msra.mxu1 %v1294_v11  ;;  %1313 = vmatpush.bf16.msra.mxu3 %v1294_v11  ;;  %v1159_v11 = vor.u32 %v1276_v6, %v1156_v7  ;;  %v1175_v35 = vor.u32 %v1280_v30, %v1172_v31  ;;  %v1282_v42 = vld [vmem:[%s1421_s20 + $0xf4] sm:$0xf]  ;;  %v1180_v43 = vld [vmem:[%s1421_s20 + $0xf8] sm:$0xf0]  ;;  %v1179_v46 = vor.u32 %v1283_v41, %v1178_v40 }
  0x22   : > { %v1183_v47 = vor.u32 %v1282_v42, %v1180_v43 }
  0x24   : > { %501 = vmatpush.bf16.msra.mxu0 %v1285_v12  ;;  %1306 = vmatpush.bf16.msra.mxu2 %v1285_v12  ;;  %v1098_v12 = vld [vmem:[%s1421_s20 + $0x50] sm:$0xf] }
  0x25   : > { %590 = vmatpush.bf16.msra.mxu1 %v1293_v13  ;;  %1314 = vmatpush.bf16.msra.mxu3 %v1293_v13  ;;  %v1263_v13 = vld [vmem:[%s1421_s20 + $0x54] sm:$0xf0] }
  0x26   : > { %v1099_v20 = vor.u32 %v1263_v13, %v1098_v12 }
  0x28   : > { %502 = vmatpush.bf16.msra.mxu0 %v1284_v14  ;;  %1307 = vmatpush.bf16.msra.mxu2 %v1284_v14  ;;  %v1262_v14 = vld [vmem:[%s1421_s20 + $0x54] sm:$0xf] }
  0x29   : > { %591 = vmatpush.bf16.msra.mxu1 %v1292_v15  ;;  %1315 = vmatpush.bf16.msra.mxu3 %v1292_v15  ;;  %v1100_v15 = vld [vmem:[%s1421_s20 + $0x58] sm:$0xf0] }
  0x2a   : > { %v1103_v21 = vor.u32 %v1262_v14, %v1100_v15 }
  0x2b   : > { %503 = vmatmul.bf16.vlgmr.msra.gmra.mxu0 %v1059_v24  ;;  %543 = vmatmul.bf16.vlgmr.msra.gmra.mxu2 %v1123_v26  ;;  %v1106_v24 = vld [vmem:[%s1421_s20 + $0x60] sm:$0xf]  ;;  %v1264_v26 = vld [vmem:[%s1421_s20 + $0x64] sm:$0xf] }
  0x2c   : > { %592 = vmatmul.bf16.vlgmr.msra.gmra.mxu1 %v1063_v25  ;;  %632 = vmatmul.bf16.vlgmr.msra.gmra.mxu3 %v1127_v27  ;;  %v1265_v25 = vld [vmem:[%s1421_s20 + $0x64] sm:$0xf0]  ;;  %v1108_v27 = vld [vmem:[%s1421_s20 + $0x68] sm:$0xf0] }
  0x2d   : > { %v1107_v32 = vor.u32 %v1265_v25, %v1106_v24  ;;  %v1111_v33 = vor.u32 %v1264_v26, %v1108_v27 }
  0x3b   : > { %508 = vmatmul.bf16.gmra.mxu0 %v1067_v36  ;;  %548 = vmatmul.bf16.gmra.mxu2 %v1131_v38  ;;  %v1114_v36 = vld [vmem:[%s1421_s20 + $0x70] sm:$0xf]  ;;  %v1266_v38 = vld [vmem:[%s1421_s20 + $0x74] sm:$0xf] }
  0x3c   : > { %597 = vmatmul.bf16.gmra.mxu1 %v1071_v37  ;;  %637 = vmatmul.bf16.gmra.mxu3 %v1135_v39  ;;  %v1267_v37 = vld [vmem:[%s1421_s20 + $0x74] sm:$0xf0]  ;;  %v1116_v39 = vld [vmem:[%s1421_s20 + $0x78] sm:$0xf0] }
  0x3d   : > { %v1115_v44 = vor.u32 %v1267_v37, %v1114_v36  ;;  %v1119_v45 = vor.u32 %v1266_v38, %v1116_v39 }
  0x4b   : > { %513 = vmatmul.bf16.gmra.mxu0 %v1075_v48  ;;  %553 = vmatmul.bf16.gmra.mxu2 %v1139_v50  ;;  %v1496_v48 = vld [vmem:[%s2072_s2] ss:$0 sm:$0xff] }
  0x4c   : > { %602 = vmatmul.bf16.gmra.mxu1 %v1079_v49  ;;  %642 = vmatmul.bf16.gmra.mxu3 %v1143_v51 }
  0x5b   : > { %518 = vmatmul.bf16.gmra.mxu0 %v1083_v60  ;;  %558 = vmatmul.bf16.gmra.mxu2 %v1147_v62 }
  0x5c   : > { %607 = vmatmul.bf16.gmra.mxu1 %v1087_v61  ;;  %647 = vmatmul.bf16.gmra.mxu3 %v1151_v63 }
  0x6b   : > { %523 = vmatmul.bf16.gmra.mxu0 %v1091_v8  ;;  %563 = vmatmul.bf16.gmra.mxu2 %v1155_v10 }
  0x6c   : > { %612 = vmatmul.bf16.gmra.mxu1 %v1095_v9  ;;  %652 = vmatmul.bf16.gmra.mxu3 %v1159_v11 }
  0x7b   : > { %528 = vmatmul.bf16.gmra.mxu0 %v1099_v20  ;;  %568 = vmatmul.bf16.gmra.mxu2 %v1163_v22 }
  0x7c   : > { %617 = vmatmul.bf16.gmra.mxu1 %v1103_v21  ;;  %657 = vmatmul.bf16.gmra.mxu3 %v1167_v23 }
  0x8b   : > { %533 = vmatmul.bf16.gmra.mxu0 %v1107_v32  ;;  %573 = vmatmul.bf16.gmra.mxu2 %v1171_v34 }
  0x8c   : > { %622 = vmatmul.bf16.gmra.mxu1 %v1111_v33  ;;  %662 = vmatmul.bf16.gmra.mxu3 %v1175_v35 }
  0x9b   : > { %538 = vmatmul.bf16.gmra.mxu0 %v1115_v44  ;;  %578 = vmatmul.bf16.gmra.mxu2 %v1179_v46 }
  0x9c   : > { %627 = vmatmul.bf16.gmra.mxu1 %v1119_v45  ;;  %667 = vmatmul.bf16.gmra.mxu3 %v1183_v47 }
  0xa8   : > { %v504_v49 = vpop.f32.mrf.mxu0 }
  0xa9   : > { %v593_v50 = vpop.f32.mrf.mxu1  ;;  %v505_v51 = vadd.f32 %v1496_v48, %v504_v49 }
  0xab   : > { %v1499_v52 = vadd.f32 %v593_v50, %v505_v51 }
  0xae   : > { %v544_v53 = vpop.f32.mrf.mxu2 }
  0xaf   : > { %v633_v54 = vpop.f32.mrf.mxu3  ;;  %v545_v57 = vadd.f32 %v1496_v48, %v544_v53 }
  0xb0   : > { %v506_v55 = vpop.f32.mrf.mxu0 }
  0xb1   : > { %v595_v56 = vpop.f32.mrf.mxu1  ;;  %v507_v58 = vadd.f32 %v1496_v48, %v506_v55  ;;  %v1503_v59 = vadd.f32 %v633_v54, %v545_v57 }
  0xb3   : > { %v1505_v60 = vadd.f32 %v595_v56, %v507_v58  ;;  %v674_v56 = vsel %vm673_vm0, %v1499_v52, 0.0 }
  0xb5   : > { %v675_v50 = vsel %vm673_vm0, %v1505_v60, 0.0 }
  0xb6   : > { %v546_v61 = vpop.f32.mrf.mxu2 }
  0xb7   : > { %v635_v62 = vpop.f32.mrf.mxu3  ;;  %v547_v1 = vadd.f32 %v1496_v48, %v546_v61  ;;  %v676_v61 = vadd.f32 %v675_v50, %v674_v56 }
  0xb8   : > { %v509_v63 = vpop.f32.mrf.mxu0 }
  0xb9   : > { %v598_v0 = vpop.f32.mrf.mxu1  ;;  %v510_v2 = vadd.f32 %v1496_v48, %v509_v63  ;;  %v1509_v3 = vadd.f32 %v635_v62, %v547_v1 }
  0xbb   : > { %v1511_v4 = vadd.f32 %v598_v0, %v510_v2 }
  0xbd   : > { %v677_v57 = vsel %vm673_vm0, %v1511_v4, 0.0 }
  0xbe   : > { %v549_v5 = vpop.f32.mrf.mxu2  ;;  %v678_v1 = vadd.f32 %v677_v57, %v676_v61 }
  0xbf   : > { %v638_v6 = vpop.f32.mrf.mxu3  ;;  %v550_v9 = vadd.f32 %v1496_v48, %v549_v5 }
  0xc0   : > { %v511_v7 = vpop.f32.mrf.mxu0 }
  0xc1   : > { %v600_v8 = vpop.f32.mrf.mxu1  ;;  %v512_v10 = vadd.f32 %v1496_v48, %v511_v7  ;;  %v1515_v11 = vadd.f32 %v638_v6, %v550_v9 }
  0xc3   : > { %v1517_v12 = vadd.f32 %v600_v8, %v512_v10 }
  0xc5   : > { %v679_v62 = vsel %vm673_vm0, %v1517_v12, 0.0 }
  0xc6   : > { %v551_v13 = vpop.f32.mrf.mxu2  ;;  %v680_v8 = vadd.f32 %v679_v62, %v678_v1 }
  0xc7   : > { %v640_v14 = vpop.f32.mrf.mxu3  ;;  %v552_v17 = vadd.f32 %v1496_v48, %v551_v13 }
  0xc8   : > { %v514_v15 = vpop.f32.mrf.mxu0 }
  0xc9   : > { %v603_v16 = vpop.f32.mrf.mxu1  ;;  %v515_v18 = vadd.f32 %v1496_v48, %v514_v15  ;;  %v1521_v19 = vadd.f32 %v640_v14, %v552_v17 }
  0xcb   : > { %v1523_v20 = vadd.f32 %v603_v16, %v515_v18 }
  0xcd   : > { %v681_v5 = vsel %vm673_vm0, %v1523_v20, 0.0 }
  0xce   : > { %v554_v21 = vpop.f32.mrf.mxu2  ;;  %v682_v14 = vadd.f32 %v681_v5, %v680_v8 }
  0xcf   : > { %v643_v22 = vpop.f32.mrf.mxu3  ;;  %v555_v25 = vadd.f32 %v1496_v48, %v554_v21 }
  0xd0   : > { %v516_v23 = vpop.f32.mrf.mxu0 }
  0xd1   : > { %v605_v24 = vpop.f32.mrf.mxu1  ;;  %v1526_v26 = vadd.f32 %v643_v22, %v555_v25  ;;  %v517_v51 = vadd.f32 %v1496_v48, %v516_v23 }
  0xd3   : > { %v1560_v63 = vadd.f32 %v605_v24, %v517_v51 }
  0xd5   : > { %v683_v9 = vsel %vm673_vm0, %v1560_v63, 0.0 }
  0xd6   : > { %v1528_v27 = vpop.f32.mrf.mxu2  ;;  %v684_v22 = vadd.f32 %v683_v9, %v682_v14 }
  0xd7   : > { %v1530_v30 = vpop.f32.mrf.mxu3 }
  0xd8   : > { %v519_v28 = vpop.f32.mrf.mxu0 }
  0xd9   : > { %v608_v29 = vpop.f32.mrf.mxu1  ;;  %v520_v58 = vadd.f32 %v1496_v48, %v519_v28 }
  0xdb   : > { %v1567_v6 = vadd.f32 %v608_v29, %v520_v58 }
  0xdd   : > { %v685_v17 = vsel %vm673_vm0, %v1567_v6, 0.0 }
  0xde   : > { %v1532_v31 = vpop.f32.mrf.mxu2  ;;  %v686_v29 = vadd.f32 %v685_v17, %v684_v22 }
  0xdf   : > { %v1534_v34 = vpop.f32.mrf.mxu3 }
  0xe0   : > { %v521_v32 = vpop.f32.mrf.mxu0 }
  0xe1   : > { %v610_v33 = vpop.f32.mrf.mxu1  ;;  %v522_v0 = vadd.f32 %v1496_v48, %v521_v32 }
  0xe3   : > { %v1572_v10 = vadd.f32 %v610_v33, %v522_v0 }
  0xe5   : > { %v687_v24 = vsel %vm673_vm0, %v1572_v10, 0.0 }
  0xe6   : > { %v1536_v37 = vpop.f32.mrf.mxu2 }
  0xe7   : > { %v1538_v38 = vpop.f32.mrf.mxu3 }
  0xe8   : > { %v524_v35 = vpop.f32.mrf.mxu0 }
  0xe9   : > { %v613_v36 = vpop.f32.mrf.mxu1  ;;  %v525_v7 = vadd.f32 %v1496_v48, %v524_v35 }
  0xeb   : > { %v1577_v18 = vadd.f32 %v613_v36, %v525_v7  ;;  %v688_v36 = vadd.f32 %v687_v24, %v686_v29 }
  0xed   : > { %v689_v32 = vsel %vm673_vm0, %v1577_v18, 0.0 }
  0xee   : > { %v1540_v41 = vpop.f32.mrf.mxu2  ;;  %v690_v51 = vadd.f32 %v689_v32, %v688_v36  ;;  %v705_v32 = vsel %vm673_vm0, %v1503_v59, 0.0  ;;  %v707_v36 = vsel %vm673_vm0, %v1509_v3, 0.0 }
  0xef   : > { %v1542_v42 = vpop.f32.mrf.mxu3 }
  0xf0   : > { %v526_v39 = vpop.f32.mrf.mxu0 }
  0xf1   : > { %v615_v40 = vpop.f32.mrf.mxu1  ;;  %v527_v13 = vadd.f32 %v1496_v48, %v526_v39 }
  0xf3   : > { %v1584_v25 = vadd.f32 %v615_v40, %v527_v13 }
  0xf6   : > { %v1544_v45 = vpop.f32.mrf.mxu2 }
  0xf7   : > { %v1546_v49 = vpop.f32.mrf.mxu3 }
  0xf8   : > { %v529_v43 = vpop.f32.mrf.mxu0 }
  0xf9   : > { %v618_v44 = vpop.f32.mrf.mxu1  ;;  %v530_v21 = vadd.f32 %v1496_v48, %v529_v43  ;;  %v691_v43 = vsel %vm673_vm0, %v1584_v25, 0.0 }
  0xfa   : > { %v692_v58 = vadd.f32 %v691_v43, %v690_v51  ;;  %v557_v43 = vadd.f32 %v1496_v48, %v1528_v27  ;;  %v713_v27 = vsel %vm673_vm0, %v1526_v26, 0.0 }
  0xfb   : > { %v1589_v33 = vadd.f32 %v618_v44, %v530_v21 }
  0xfd   : > { %v693_v57 = vsel %vm673_vm0, %v1589_v33, 0.0 }
  0xfe   : > { %v1551_v53 = vpop.f32.mrf.mxu2 }
  0xff   : > { %v1563_v2 = vpop.f32.mrf.mxu3 }
 0x100   : > { %v531_v46 = vpop.f32.mrf.mxu0 }
 0x101   : > { %v620_v47 = vpop.f32.mrf.mxu1  ;;  %v532_v28 = vadd.f32 %v1496_v48, %v531_v46 }
 0x103   : > { %v1596_v50 = vadd.f32 %v620_v47, %v532_v28  ;;  %v694_v47 = vadd.f32 %v693_v57, %v692_v58  ;;  %v1634_v58 = vadd.f32 %v1530_v30, %v557_v43 }
 0x105   : > { %v695_v61 = vsel %vm673_vm0, %v1596_v50, 0.0 }
 0x106   : > { %v1580_v23 = vpop.f32.mrf.mxu2  ;;  %v696_v7 = vadd.f32 %v695_v61, %v694_v47  ;;  %v562_v61 = vadd.f32 %v1496_v48, %v1536_v37  ;;  %v567_v37 = vadd.f32 %v1496_v48, %v1544_v45 }
 0x107   : > { %v1592_v39 = vpop.f32.mrf.mxu3  ;;  %v572_v45 = vadd.f32 %v1496_v48, %v1580_v23 }
 0x108   : > { %v534_v54 = vpop.f32.mrf.mxu0  ;;  %v1648_v30 = vadd.f32 %v1538_v38, %v562_v61  ;;  %v1662_v38 = vadd.f32 %v1546_v49, %v567_v37 }
 0x109   : > { %v623_v55 = vpop.f32.mrf.mxu1  ;;  %v535_v35 = vadd.f32 %v1496_v48, %v534_v54 }
 0x10b   : > { %v1601_v44 = vadd.f32 %v623_v55, %v535_v35 }
 0x10d   : > { %v697_v1 = vsel %vm673_vm0, %v1601_v44, 0.0 }
 0x10e   : > { %v574_v0 = vpop.f32.mrf.mxu2  ;;  %v698_v8 = vadd.f32 %v697_v1, %v696_v7 }
 0x10f   : > { %v663_v13 = vpop.f32.mrf.mxu3 }
 0x110   : > { %v536_v15 = vpop.f32.mrf.mxu0 }
 0x111   : > { %v625_v16 = vpop.f32.mrf.mxu1  ;;  %v537_v40 = vadd.f32 %v1496_v48, %v536_v15 }
 0x113   : > { %v1606_v62 = vadd.f32 %v625_v16, %v537_v40 }
 0x115   : > { %v699_v55 = vsel %vm673_vm0, %v1606_v62, 0.0 }
 0x116   : > { %v700_v16 = vadd.f32 %v699_v55, %v698_v8  ;;  %v576_v29 = vpop.f32.mrf.mxu2  ;;  %v715_v8 = vsel %vm673_vm0, %v1634_v58, 0.0 }
 0x117   : > { %v665_v51 = vpop.f32.mrf.mxu3  ;;  %v577_v49 = vadd.f32 %v1496_v48, %v576_v29  ;;  %v1338_v29 = vmov 256.0  }
 0x118   : > { %v539_v46 = vpop.f32.mrf.mxu0  ;;  %1326 = vrcp.f32 %v1338_v29 }
 0x119   : > { %v628_v56 = vpop.f32.mrf.mxu1  ;;  %v540_v54 = vadd.f32 %v1496_v48, %v539_v46  ;;  %v709_v46 = vsel %vm673_vm0, %v1515_v11, 0.0 }
 0x11b   : > { %v1610_v5 = vadd.f32 %v628_v56, %v540_v54  ;;  %v560_v56 = vadd.f32 %v1496_v48, %v1532_v31  ;;  %v711_v54 = vsel %vm673_vm0, %v1521_v19, 0.0  ;;  %v565_v31 = vadd.f32 %v1496_v48, %v1540_v41 }
 0x11c   : > { %v570_v41 = vadd.f32 %v1496_v48, %v1551_v53  ;;  %v575_v53 = vadd.f32 %v1496_v48, %v574_v0 }
 0x11d   : > { %v701_v14 = vsel %vm673_vm0, %v1610_v5, 0.0  ;;  %v1641_v1 = vadd.f32 %v1534_v34, %v560_v56  ;;  %v1655_v34 = vadd.f32 %v1542_v42, %v565_v31  ;;  %v1685_v56 = vadd.f32 %v665_v51, %v577_v49 }
 0x11e   : > { %v702_v22 = vadd.f32 %v701_v14, %v700_v16  ;;  %v579_v55 = vpop.f32.mrf.mxu2  ;;  %v1669_v42 = vadd.f32 %v1563_v2, %v570_v41 }
 0x11f   : > { %v717_v14 = vsel %vm673_vm0, %v1641_v1, 0.0  ;;  %v668_v16 = vpop.f32.mrf.mxu3  ;;  %v580_v2 = vadd.f32 %v1496_v48, %v579_v55 }
 0x120   : > { %v541_v9 = vpop.f32.mrf.mxu0  ;;  %v725_v43 = vsel %vm673_vm0, %v1669_v42, 0.0 }
 0x121   : > { %v542_v15 = vadd.f32 %v1496_v48, %v541_v9  ;;  %v630_v17 = vpop.f32.mrf.mxu1 }
 0x123   : > { %v1617_v21 = vadd.f32 %v630_v17, %v542_v15  ;;  %v719_v17 = vsel %vm673_vm0, %v1648_v30, 0.0 }
 0x125   : > { %v703_v24 = vsel %vm673_vm0, %v1617_v21, 0.0 }
 0x126   : > { %v704_v28 = vadd.f32 %v703_v24, %v702_v22  ;;  %v721_v24 = vsel %vm673_vm0, %v1655_v34, 0.0  ;;  %v581_v23 = vpop.f32.mrf.mxu2 }
 0x128   : > { %v706_v35 = vadd.f32 %v705_v32, %v704_v28  ;;  %v723_v32 = vsel %vm673_vm0, %v1662_v38, 0.0 }
 0x12a   : > { %v708_v40 = vadd.f32 %v707_v36, %v706_v35  ;;  %v1675_v35 = vadd.f32 %v1592_v39, %v572_v45  ;;  %v582_v39 = vadd.f32 %v1496_v48, %v581_v23  ;;  %v1327_v48 = vpop.eup %1326 }
 0x12b   : > { %vm748_vm1 = vweird.f32 %v1327_v48 }
 0x12c   : > { %v710_v57 = vadd.f32 %v709_v46, %v708_v40  ;;  %v1680_v40 = vadd.f32 %v663_v13, %v575_v53  ;;  %v727_v0 = vsel %vm673_vm0, %v1675_v35, 0.0 }
 0x12e   : > { %v712_v47 = vadd.f32 %v711_v54, %v710_v57  ;;  %v670_v54 = vpop.f32.mrf.mxu3  ;;  %v729_v61 = vsel %vm673_vm0, %v1680_v40, 0.0 }
 0x12f   : > { %v1694_v31 = vadd.f32 %v670_v54, %v582_v39 }
 0x130   : > { %v714_v7 = vadd.f32 %v713_v27, %v712_v47  ;;  %v1690_v47 = vadd.f32 %v668_v16, %v580_v2  ;;  %v731_v27 = vsel %vm673_vm0, %v1685_v56, 0.0 }
 0x132   : > { %v716_v9 = vadd.f32 %v715_v8, %v714_v7  ;;  %v733_v51 = vsel %vm673_vm0, %v1690_v47, 0.0  ;;  %v735_v8 = vsel %vm673_vm0, %v1694_v31, 0.0 }
 0x134   : > { %v718_v15 = vadd.f32 %v717_v14, %v716_v9  ;;  %v744_v9 = vmul.f32 256.0, %v1327_v48 }
 0x136   : > { %v720_v22 = vadd.f32 %v719_v17, %v718_v15  ;;  %v745_v15 = vsub.f32 1.0, %v744_v9 }
 0x138   : > { %v722_v28 = vadd.f32 %v721_v24, %v720_v22  ;;  %v746_v45 = vmul.f32 %v1327_v48, %v745_v15 }
 0x13a   : > { %v724_v36 = vadd.f32 %v723_v32, %v722_v28  ;;  %v747_v24 = vadd.f32 %v1327_v48, %v746_v45 }
 0x13c   : > { %v726_v46 = vadd.f32 %v725_v43, %v724_v36  ;;  %v1700_v28 = vsel %vm748_vm1, %v1327_v48, %v747_v24 }
 0x13e   : > { %v728_v57 = vadd.f32 %v727_v0, %v726_v46 }
 0x140   : > { %v730_v13 = vadd.f32 %v729_v61, %v728_v57 }
 0x142   : > { %v732_v7 = vadd.f32 %v731_v27, %v730_v13 }
 0x144   : > { %v734_v55 = vadd.f32 %v733_v51, %v732_v7 }
 0x146   : > { %v736_v37 = vadd.f32 %v735_v8, %v734_v55 }
 0x148   : > { %v737_v14 = vrot.slane %v736_v37, 4 }
 0x14a   : > { %v738_v41 = vadd.f32 %v737_v14, %v736_v37 }
 0x14c   : > { %v739_v16 = vrot.slane %v738_v41, 2 }
 0x14e   : > { %v740_v17 = vadd.f32 %v739_v16, %v738_v41 }
 0x150   : > { %v741_v22 = vrot.slane %v740_v17, 1 }
 0x152   : > { %v742_v53 = vadd.f32 %v741_v22, %v740_v17 }
 0x154   : > { %v1703_v32 = vmul.f32 %v1700_v28, %v742_v53 }
 0x156   : > { %v1707_v49 = vsub.f32 %v1499_v52, %v1703_v32  ;;  %v1711_v36 = vsub.f32 %v1505_v60, %v1703_v32  ;;  %v1715_v23 = vsub.f32 %v1511_v4, %v1703_v32  ;;  %v1719_v43 = vsub.f32 %v1517_v12, %v1703_v32 }
 0x157   : > { %v1727_v52 = vsub.f32 %v1523_v20, %v1703_v32  ;;  %v1733_v4 = vsub.f32 %v1560_v63, %v1703_v32  ;;  %v1741_v54 = vsub.f32 %v1567_v6, %v1703_v32  ;;  %v1748_v63 = vsub.f32 %v1572_v10, %v1703_v32 }
 0x158   : > { %v783_v2 = vmul.f32 %v1707_v49, %v1707_v49  ;;  %v784_v46 = vmul.f32 %v1711_v36, %v1711_v36  ;;  %v785_v60 = vmul.f32 %v1715_v23, %v1715_v23  ;;  %v786_v12 = vmul.f32 %v1719_v43, %v1719_v43 }
 0x159   : > { %v787_v20 = vmul.f32 %v1727_v52, %v1727_v52  ;;  %v788_v13 = vmul.f32 %v1733_v4, %v1733_v4  ;;  %v1755_v6 = vsub.f32 %v1577_v18, %v1703_v32  ;;  %v789_v51 = vmul.f32 %v1741_v54, %v1741_v54 }
 0x15a   : > { %v815_v0 = vsel %vm673_vm0, %v783_v2, 0.0  ;;  %v816_v39 = vsel %vm673_vm0, %v784_v46, 0.0  ;;  %v818_v29 = vsel %vm673_vm0, %v785_v60, 0.0  ;;  %v820_v27 = vsel %vm673_vm0, %v786_v12, 0.0 }
 0x15b   : > { %v817_v57 = vadd.f32 %v816_v39, %v815_v0  ;;  %v822_v48 = vsel %vm673_vm0, %v787_v20, 0.0  ;;  %v1762_v10 = vsub.f32 %v1584_v25, %v1703_v32  ;;  %v790_v8 = vmul.f32 %v1748_v63, %v1748_v63 }
 0x15c   : > { %v824_v37 = vsel %vm673_vm0, %v788_v13, 0.0  ;;  %v1769_v18 = vsub.f32 %v1589_v33, %v1703_v32  ;;  %v791_v14 = vmul.f32 %v1755_v6, %v1755_v6  ;;  %v826_v41 = vsel %vm673_vm0, %v789_v51, 0.0 }
 0x15d   : > { %v819_v61 = vadd.f32 %v818_v29, %v817_v57  ;;  %v1776_v25 = vsub.f32 %v1596_v50, %v1703_v32  ;;  %v792_v16 = vmul.f32 %v1762_v10, %v1762_v10  ;;  %v828_v17 = vsel %vm673_vm0, %v790_v8, 0.0 }
 0x15e   : > { %v1783_v33 = vsub.f32 %v1601_v44, %v1703_v32  ;;  %v793_v22 = vmul.f32 %v1769_v18, %v1769_v18  ;;  %v830_v24 = vsel %vm673_vm0, %v791_v14, 0.0  ;;  %v1790_v50 = vsub.f32 %v1606_v62, %v1703_v32 }
 0x15f   : > { %v821_v7 = vadd.f32 %v820_v27, %v819_v61  ;;  %v794_v2 = vmul.f32 %v1776_v25, %v1776_v25  ;;  %v832_v46 = vsel %vm673_vm0, %v792_v16, 0.0  ;;  %v1797_v44 = vsub.f32 %v1610_v5, %v1703_v32 }
 0x160   : > { %v795_v12 = vmul.f32 %v1783_v33, %v1783_v33  ;;  %v834_v0 = vsel %vm673_vm0, %v793_v22, 0.0  ;;  %v1804_v62 = vsub.f32 %v1617_v21, %v1703_v32  ;;  %v796_v57 = vmul.f32 %v1790_v50, %v1790_v50 }
 0x161   : > { %v823_v55 = vadd.f32 %v822_v48, %v821_v7  ;;  %v836_v20 = vsel %vm673_vm0, %v794_v2, 0.0  ;;  %v1811_v5 = vsub.f32 %v1503_v59, %v1703_v32  ;;  %v797_v61 = vmul.f32 %v1797_v44, %v1797_v44 }
 0x162   : > { %v838_v13 = vsel %vm673_vm0, %v795_v12, 0.0  ;;  %v1818_v21 = vsub.f32 %v1509_v3, %v1703_v32  ;;  %v798_v7 = vmul.f32 %v1804_v62, %v1804_v62  ;;  %v840_v51 = vsel %vm673_vm0, %v796_v57, 0.0 }
 0x163   : > { %v825_v9 = vadd.f32 %v824_v37, %v823_v55  ;;  %v1825_v59 = vsub.f32 %v1515_v11, %v1703_v32  ;;  %v799_v55 = vmul.f32 %v1811_v5, %v1811_v5  ;;  %v842_v8 = vsel %vm673_vm0, %v797_v61, 0.0 }
 0x164   : > { %v1832_v3 = vsub.f32 %v1521_v19, %v1703_v32  ;;  %v844_v14 = vsel %vm673_vm0, %v798_v7, 0.0  ;;  %v1839_v11 = vsub.f32 %v1526_v26, %v1703_v32  ;;  %v1846_v19 = vsub.f32 %v1634_v58, %v1703_v32 }
 0x165   : > { %v827_v15 = vadd.f32 %v826_v41, %v825_v9  ;;  %v800_v9 = vmul.f32 %v1818_v21, %v1818_v21  ;;  %v846_v16 = vsel %vm673_vm0, %v799_v55, 0.0  ;;  %v1853_v26 = vsub.f32 %v1641_v1, %v1703_v32 }
 0x166   : > { %v1860_v58 = vsub.f32 %v1648_v30, %v1703_v32  ;;  %v1867_v1 = vsub.f32 %v1655_v34, %v1703_v32  ;;  %v1874_v30 = vsub.f32 %v1662_v38, %v1703_v32  ;;  %v1881_v34 = vsub.f32 %v1669_v42, %v1703_v32 }
 0x167   : > { %v829_v45 = vadd.f32 %v828_v17, %v827_v15  ;;  %v801_v15 = vmul.f32 %v1825_v59, %v1825_v59  ;;  %v848_v22 = vsel %vm673_vm0, %v800_v9, 0.0  ;;  %v1888_v38 = vsub.f32 %v1675_v35, %v1703_v32 }
 0x168   : > { %v1895_v42 = vsub.f32 %v1680_v40, %v1703_v32  ;;  %v1902_v35 = vsub.f32 %v1685_v56, %v1703_v32  ;;  %v1909_v40 = vsub.f32 %v1690_v47, %v1703_v32  ;;  %v1916_v56 = vsub.f32 %v1694_v31, %v1703_v32 }
 0x169   : > { %v831_v53 = vadd.f32 %v830_v24, %v829_v45  ;;  %v802_v45 = vmul.f32 %v1832_v3, %v1832_v3  ;;  %v850_v2 = vsel %vm673_vm0, %v801_v15, 0.0 }
 0x16a   : > { %v813_v47 = vmul.f32 %v1909_v40, %v1909_v40 }
 0x16b   : > { %v833_v60 = vadd.f32 %v832_v46, %v831_v53  ;;  %v803_v53 = vmul.f32 %v1839_v11, %v1839_v11  ;;  %v852_v12 = vsel %vm673_vm0, %v802_v45, 0.0 }
 0x16c   : > { %v874_v31 = vsel %vm673_vm0, %v813_v47, 0.0 }
 0x16d   : > { %v835_v39 = vadd.f32 %v834_v0, %v833_v60  ;;  %v804_v60 = vmul.f32 %v1846_v19, %v1846_v19  ;;  %v854_v57 = vsel %vm673_vm0, %v803_v53, 0.0 }
 0x16f   : > { %v837_v29 = vadd.f32 %v836_v20, %v835_v39  ;;  %v805_v39 = vmul.f32 %v1853_v26, %v1853_v26  ;;  %v856_v61 = vsel %vm673_vm0, %v804_v60, 0.0 }
 0x171   : > { %v839_v27 = vadd.f32 %v838_v13, %v837_v29  ;;  %v806_v29 = vmul.f32 %v1860_v58, %v1860_v58  ;;  %v858_v7 = vsel %vm673_vm0, %v805_v39, 0.0 }
 0x173   : > { %v841_v48 = vadd.f32 %v840_v51, %v839_v27  ;;  %v807_v27 = vmul.f32 %v1867_v1, %v1867_v1  ;;  %v860_v55 = vsel %vm673_vm0, %v806_v29, 0.0 }
 0x175   : > { %v843_v37 = vadd.f32 %v842_v8, %v841_v48  ;;  %v808_v48 = vmul.f32 %v1874_v30, %v1874_v30  ;;  %v862_v9 = vsel %vm673_vm0, %v807_v27, 0.0 }
 0x177   : > { %v845_v41 = vadd.f32 %v844_v14, %v843_v37  ;;  %v809_v37 = vmul.f32 %v1881_v34, %v1881_v34  ;;  %v864_v15 = vsel %vm673_vm0, %v808_v48, 0.0 }
 0x179   : > { %v847_v17 = vadd.f32 %v846_v16, %v845_v41  ;;  %v810_v41 = vmul.f32 %v1888_v38, %v1888_v38  ;;  %v866_v45 = vsel %vm673_vm0, %v809_v37, 0.0 }
 0x17b   : > { %v849_v24 = vadd.f32 %v848_v22, %v847_v17  ;;  %v811_v17 = vmul.f32 %v1895_v42, %v1895_v42  ;;  %v868_v53 = vsel %vm673_vm0, %v810_v41, 0.0 }
 0x17d   : > { %v851_v46 = vadd.f32 %v850_v2, %v849_v24  ;;  %v812_v24 = vmul.f32 %v1902_v35, %v1902_v35 }
 0x17f   : > { %v853_v0 = vadd.f32 %v852_v12, %v851_v46  ;;  %v870_v46 = vsel %vm673_vm0, %v811_v17, 0.0  ;;  %v814_v12 = vmul.f32 %v1916_v56, %v1916_v56 }
 0x181   : > { %v855_v20 = vadd.f32 %v854_v57, %v853_v0  ;;  %v872_v0 = vsel %vm673_vm0, %v812_v24, 0.0  ;;  %v876_v57 = vsel %vm673_vm0, %v814_v12, 0.0 }
 0x183   : > { %v857_v13 = vadd.f32 %v856_v61, %v855_v20 }
 0x185   : > { %v859_v51 = vadd.f32 %v858_v7, %v857_v13 }
 0x187   : > { %v861_v8 = vadd.f32 %v860_v55, %v859_v51 }
 0x189   : > { %v863_v14 = vadd.f32 %v862_v9, %v861_v8 }
 0x18b   : > { %v865_v16 = vadd.f32 %v864_v15, %v863_v14 }
 0x18d   : > { %v867_v22 = vadd.f32 %v866_v45, %v865_v16 }
 0x18f   : > { %v869_v2 = vadd.f32 %v868_v53, %v867_v22 }
 0x191   : > { %v871_v60 = vadd.f32 %v870_v46, %v869_v2 }
 0x193   : > { %v873_v39 = vadd.f32 %v872_v0, %v871_v60 }
 0x195   : > { %v875_v32 = vadd.f32 %v874_v31, %v873_v39 }
 0x197   : > { %v877_v20 = vadd.f32 %v876_v57, %v875_v32 }
 0x199   : > { %v878_v29 = vrot.slane %v877_v20, 4 }
 0x19b   : > { %v879_v61 = vadd.f32 %v878_v29, %v877_v20 }
 0x19d   : > { %v880_v13 = vrot.slane %v879_v61, 2 }
 0x19f   : > { %v881_v27 = vadd.f32 %v880_v13, %v879_v61 }
 0x1a1   : > { %v882_v7 = vrot.slane %v881_v27, 1 }
 0x1a3   : > { %v883_v51 = vadd.f32 %v882_v7, %v881_v27 }
 0x1a5   : > { %v884_v48 = vmul.f32 %v883_v51, %v1700_v28 }
 0x1a7   : > { %v885_v55 = vadd.f32 1e-05, %v884_v48 }
 0x1a9   : > { %1328 = vrsqrt.f32 %v885_v55  ;;  %vm892_vm3 = vweird.f32 %v885_v55 }
 0x1af   : > { %v1329_v8 = vpop.eup %1328 }
 0x1b0   : > { %v887_v37 = vmul.f32 %v1329_v8, %v885_v55  ;;  %vm893_vm2 = vweird.f32 %v1329_v8 }
 0x1b1   : > { %vm894_vm4 = vmor %vm892_vm3, %vm893_vm2 }
 0x1b2   : > { %v888_v9 = vmul.f32 %v1329_v8, %v887_v37 }
 0x1b4   : > { %v889_v14 = vmul.f32 0.5, %v888_v9 }
 0x1b6   : > { %v890_v41 = vsub.f32 1.5, %v889_v14 }
 0x1b8   : > { %v891_v15 = vmul.f32 %v1329_v8, %v890_v41 }
 0x1ba   : > { %v1930_v16 = vsel %vm894_vm4, %v1329_v8, %v891_v15 }
 0x1bb   : > { %v896_v17 = vmul.f32 %v1930_v16, %v1707_v49  ;;  %v897_v28 = vmul.f32 %v1930_v16, %v1711_v36  ;;  %v898_v45 = vmul.f32 %v1930_v16, %v1715_v23  ;;  %v899_v22 = vmul.f32 %v1930_v16, %v1719_v43 }
 0x1bc   : > { %v900_v24 = vmul.f32 %v1930_v16, %v1727_v52  ;;  %v901_v49 = vmul.f32 %v1930_v16, %v1733_v4  ;;  %v902_v36 = vmul.f32 %v1930_v16, %v1741_v54  ;;  %v903_v52 = vmul.f32 %v1930_v16, %v1748_v63 }
 0x1bd   : > { %v928_v23 = vmax.f32 %v896_v17, 0.0  ;;  %v929_v43 = vmax.f32 %v897_v28, 0.0  ;;  %v930_v53 = vmax.f32 %v898_v45, 0.0  ;;  %v931_v2 = vmax.f32 %v899_v22, 0.0 }
 0x1be   : > { %v904_v47 = vmul.f32 %v1930_v16, %v1755_v6  ;;  %v932_v46 = vmax.f32 %v900_v24, 0.0  ;;  %v905_v4 = vmul.f32 %v1930_v16, %v1762_v10  ;;  %v933_v54 = vmax.f32 %v901_v49, 0.0 }
 0x1bf   : > { %960 = vst.msk [vmem:[%s1947_s29] sm:$0xff] %vm673_vm0, %v928_v23  ;;  %v906_v60 = vmul.f32 %v1930_v16, %v1769_v18  ;;  %v934_v63 = vmax.f32 %v902_v36, 0.0  ;;  %v907_v6 = vmul.f32 %v1930_v16, %v1776_v25  ;;  %v935_v12 = vmax.f32 %v903_v52, 0.0 }
 0x1c0   : > { %961 = vst.msk [vmem:[%s1947_s29 + $0x8] sm:$0xff] %vm673_vm0, %v929_v43  ;;  %v908_v10 = vmul.f32 %v1930_v16, %v1783_v33  ;;  %v936_v0 = vmax.f32 %v904_v47, 0.0  ;;  %v909_v18 = vmul.f32 %v1930_v16, %v1790_v50  ;;  %v937_v39 = vmax.f32 %v905_v4, 0.0 }
 0x1c1   : > { %962 = vst.msk [vmem:[%s1947_s29 + $0x10] sm:$0xff] %vm673_vm0, %v930_v53  ;;  %v910_v25 = vmul.f32 %v1930_v16, %v1797_v44  ;;  %v938_v31 = vmax.f32 %v906_v60, 0.0  ;;  %v911_v33 = vmul.f32 %v1930_v16, %v1804_v62  ;;  %v939_v32 = vmax.f32 %v907_v6, 0.0 }
 0x1c2   : > { %963 = vst.msk [vmem:[%s1947_s29 + $0x18] sm:$0xff] %vm673_vm0, %v931_v2  ;;  %v912_v50 = vmul.f32 %v1930_v16, %v1811_v5  ;;  %v940_v57 = vmax.f32 %v908_v10, 0.0  ;;  %v913_v44 = vmul.f32 %v1930_v16, %v1818_v21  ;;  %v941_v20 = vmax.f32 %v909_v18, 0.0 }
 0x1c3   : > { %964 = vst.msk [vmem:[%s1947_s29 + $0x20] sm:$0xff] %vm673_vm0, %v932_v46  ;;  %v914_v62 = vmul.f32 %v1930_v16, %v1825_v59  ;;  %v942_v29 = vmax.f32 %v910_v25, 0.0  ;;  %v915_v5 = vmul.f32 %v1930_v16, %v1832_v3  ;;  %v943_v61 = vmax.f32 %v911_v33, 0.0 }
 0x1c4   : > { %965 = vst.msk [vmem:[%s1947_s29 + $0x28] sm:$0xff] %vm673_vm0, %v933_v54  ;;  %v916_v21 = vmul.f32 %v1930_v16, %v1839_v11  ;;  %v944_v13 = vmax.f32 %v912_v50, 0.0  ;;  %v917_v59 = vmul.f32 %v1930_v16, %v1846_v19  ;;  %v945_v27 = vmax.f32 %v913_v44, 0.0 }
 0x1c5   : > { %966 = vst.msk [vmem:[%s1947_s29 + $0x30] sm:$0xff] %vm673_vm0, %v934_v63  ;;  %v918_v3 = vmul.f32 %v1930_v16, %v1853_v26  ;;  %v946_v7 = vmax.f32 %v914_v62, 0.0  ;;  %v919_v11 = vmul.f32 %v1930_v16, %v1860_v58  ;;  %v947_v51 = vmax.f32 %v915_v5, 0.0 }
 0x1c6   : > { %967 = vst.msk [vmem:[%s1947_s29 + $0x38] sm:$0xff] %vm673_vm0, %v935_v12  ;;  %v920_v19 = vmul.f32 %v1930_v16, %v1867_v1  ;;  %v948_v48 = vmax.f32 %v916_v21, 0.0  ;;  %v921_v26 = vmul.f32 %v1930_v16, %v1874_v30  ;;  %v949_v55 = vmax.f32 %v917_v59, 0.0 }
 0x1c7   : > { %968 = vst.msk [vmem:[%s1947_s29 + $0x40] sm:$0xff] %vm673_vm0, %v936_v0  ;;  %v922_v58 = vmul.f32 %v1930_v16, %v1881_v34  ;;  %v950_v8 = vmax.f32 %v918_v3, 0.0  ;;  %v923_v1 = vmul.f32 %v1930_v16, %v1888_v38  ;;  %v951_v37 = vmax.f32 %v919_v11, 0.0 }
 0x1c8   : > { %969 = vst.msk [vmem:[%s1947_s29 + $0x48] sm:$0xff] %vm673_vm0, %v937_v39  ;;  %v924_v30 = vmul.f32 %v1930_v16, %v1895_v42  ;;  %v952_v9 = vmax.f32 %v920_v19, 0.0  ;;  %v925_v34 = vmul.f32 %v1930_v16, %v1902_v35  ;;  %v953_v14 = vmax.f32 %v921_v26, 0.0 }
 0x1c9   : > { %970 = vst.msk [vmem:[%s1947_s29 + $0x50] sm:$0xff] %vm673_vm0, %v938_v31  ;;  %v926_v38 = vmul.f32 %v1930_v16, %v1909_v40  ;;  %v954_v41 = vmax.f32 %v922_v58, 0.0  ;;  %v927_v42 = vmul.f32 %v1930_v16, %v1916_v56  ;;  %v955_v15 = vmax.f32 %v923_v1, 0.0 }
 0x1ca   : > { %971 = vst.msk [vmem:[%s1947_s29 + $0x58] sm:$0xff] %vm673_vm0, %v939_v32  ;;  %v956_v35 = vmax.f32 %v924_v30, 0.0  ;;  %v957_v17 = vmax.f32 %v925_v34, 0.0 }
 0x1cb   : > { %972 = vst.msk [vmem:[%s1947_s29 + $0x60] sm:$0xff] %vm673_vm0, %v940_v57  ;;  %v958_v28 = vmax.f32 %v926_v38, 0.0  ;;  %v959_v40 = vmax.f32 %v927_v42, 0.0 }
 0x1cc   : > { %973 = vst.msk [vmem:[%s1947_s29 + $0x68] sm:$0xff] %vm673_vm0, %v941_v20 }
 0x1cd   : > { %974 = vst.msk [vmem:[%s1947_s29 + $0x70] sm:$0xff] %vm673_vm0, %v942_v29 }
 0x1ce   : > { %975 = vst.msk [vmem:[%s1947_s29 + $0x78] sm:$0xff] %vm673_vm0, %v943_v61 }
 0x1cf   : > { %976 = vst.msk [vmem:[%s1947_s29 + $0x80] sm:$0xff] %vm673_vm0, %v944_v13 }
 0x1d0   : > { %977 = vst.msk [vmem:[%s1947_s29 + $0x88] sm:$0xff] %vm673_vm0, %v945_v27 }
 0x1d1   : > { %978 = vst.msk [vmem:[%s1947_s29 + $0x90] sm:$0xff] %vm673_vm0, %v946_v7 }
 0x1d2   : > { %979 = vst.msk [vmem:[%s1947_s29 + $0x98] sm:$0xff] %vm673_vm0, %v947_v51 }
 0x1d3   : > { %980 = vst.msk [vmem:[%s1947_s29 + $0xa0] sm:$0xff] %vm673_vm0, %v948_v48 }
 0x1d4   : > { %981 = vst.msk [vmem:[%s1947_s29 + $0xa8] sm:$0xff] %vm673_vm0, %v949_v55 }
 0x1d5   : > { %982 = vst.msk [vmem:[%s1947_s29 + $0xb0] sm:$0xff] %vm673_vm0, %v950_v8 }
 0x1d6   : > { %983 = vst.msk [vmem:[%s1947_s29 + $0xb8] sm:$0xff] %vm673_vm0, %v951_v37 }
 0x1d7   : > { %984 = vst.msk [vmem:[%s1947_s29 + $0xc0] sm:$0xff] %vm673_vm0, %v952_v9 }
 0x1d8   : > { %985 = vst.msk [vmem:[%s1947_s29 + $0xc8] sm:$0xff] %vm673_vm0, %v953_v14 }
 0x1d9   : > { %986 = vst.msk [vmem:[%s1947_s29 + $0xd0] sm:$0xff] %vm673_vm0, %v954_v41 }
 0x1da   : > { %987 = vst.msk [vmem:[%s1947_s29 + $0xd8] sm:$0xff] %vm673_vm0, %v955_v15 }
 0x1db   : > { %988 = vst.msk [vmem:[%s1947_s29 + $0xe0] sm:$0xff] %vm673_vm0, %v956_v35 }
 0x1dc   : > { %989 = vst.msk [vmem:[%s1947_s29 + $0xe8] sm:$0xff] %vm673_vm0, %v957_v17 }
 0x1dd   : > { %990 = vst.msk [vmem:[%s1947_s29 + $0xf0] sm:$0xff] %vm673_vm0, %v958_v28 }
 0x1de   : > { %991 = vst.msk [vmem:[%s1947_s29 + $0xf8] sm:$0xff] %vm673_vm0, %v959_v40 }
 0x1df PF: > { %s13_s12 = sadd.s32 1, %s1336_s12  }
 0x1e0   : > { %p10_p4 = scmp.ge.s32.totalorder %s13_s12, 4  }
 0x1e2   :  { %12 = sbr.rel (!%p10_p4) target bundleno = 1 (0x1), region = 62 }

// kernel: generator_forward.19
= control target key start
LH: loop header
LB: loop body
LE: loop exit
PB: predicated region body
PF: predicated region fallthrough
CT: control target
= control target key end

     0   :  { %s935_s12 = smov 0   ;;  %s1085_s0 = inlined_call_operand.vmem [shape: bf16[2,64,384], index: 0, kind: input, shape index: {}]   ;;  %s1086_s1 = inlined_call_operand.vmem [shape: bf16[384,64], index: 1, kind: input, shape index: {}]   ;;  %s1087_s2 = inlined_call_operand.vmem [shape: f32[1,64], index: 2, kind: input, shape index: {}]   ;;  %s1088_s3 = inlined_call_operand.vmem [shape: f32[2,64,64], index: 3, kind: output, shape index: {}]  }
   0x1 LB: > { %s692_s13 = sadd.s32 4294967295, %s912_s12   ;;  %p696_p0 = scmp.ge.s32.totalorder %s912_s12, 1  ;;  %s912_s12 = sphi %s935_s12, %s13_s12  }
   0x2   : > { %p137_p1 = scmp.lt.s32.totalorder %s912_s12, 3 }
   0x4   : > { %p138_p2 = pnand %p696_p0, %p137_p1 }
   0x5   : > { %p161_p3 = scmp.lt.s32.totalorder (!%p138_p2), %s692_s13, 1 }
   0x6   : > { %141 = sbr.rel (%p138_p2) target bundleno = 317 (0x13d), region = 32 }
   0xb   : > { %v866_v0 = vld [vmem:[%s1086_s1 + $0x38] sm:$0xff]  ;;  %v865_v3 = vld [vmem:[%s1086_s1 + $0x30] sm:$0xff]  ;;  %v864_v6 = vld [vmem:[%s1086_s1 + $0x28] sm:$0xff]  ;;  %s1090_s13 = smov (!%p161_p3, %s692_s13), 1  ;;  %vm534_vm0 = vcmask 523264  }
   0xc   : > { %v874_v1 = vld [vmem:[%s1086_s1 + $0x78] sm:$0xff]  ;;  %447 = vmatpush.bf16.msra.mxu0 %v866_v0  ;;  %v873_v4 = vld [vmem:[%s1086_s1 + $0x70] sm:$0xff]  ;;  %883 = vmatpush.bf16.msra.mxu3 %v866_v0  ;;  %v872_v7 = vld [vmem:[%s1086_s1 + $0x68] sm:$0xff]  ;;  %s891_s23 = smul.u32 96, %s1090_s13  ;;  %s846_s18 = sshll.u32 %s1090_s13, 6 }
   0xd   : > { %v882_v2 = vld [vmem:[%s1086_s1 + $0xb8] sm:$0xff]  ;;  %476 = vmatpush.bf16.msra.mxu1 %v874_v1  ;;  %v881_v5 = vld [vmem:[%s1086_s1 + $0xb0] sm:$0xff]  ;;  %v880_v8 = vld [vmem:[%s1086_s1 + $0xa8] sm:$0xff]  ;;  %s170_s21 = scalar_lea.vmem %s1088_s3, %s846_s18 }
   0xe   : > { %505 = vmatpush.bf16.msra.mxu2 %v882_v2  ;;  %v863_v9 = vld [vmem:[%s1086_s1 + $0x20] sm:$0xff]  ;;  %v862_v12 = vld [vmem:[%s1086_s1 + $0x18] sm:$0xff]  ;;  %v861_v15 = vld [vmem:[%s1086_s1 + $0x10] sm:$0xff]  ;;  %s1013_s5 = scalar_lea.vmem %s1085_s0, %s891_s23 }
   0xf   : > { %v871_v10 = vld [vmem:[%s1086_s1 + $0x60] sm:$0xff]  ;;  %v870_v13 = vld [vmem:[%s1086_s1 + $0x58] sm:$0xff]  ;;  %v869_v16 = vld [vmem:[%s1086_s1 + $0x50] sm:$0xff] }
  0x10   : > { %448 = vmatpush.bf16.msra.mxu0 %v865_v3  ;;  %884 = vmatpush.bf16.msra.mxu3 %v865_v3  ;;  %v879_v11 = vld [vmem:[%s1086_s1 + $0xa0] sm:$0xff]  ;;  %v878_v14 = vld [vmem:[%s1086_s1 + $0x98] sm:$0xff]  ;;  %v877_v17 = vld [vmem:[%s1086_s1 + $0x90] sm:$0xff] }
  0x11   : > { %477 = vmatpush.bf16.msra.mxu1 %v873_v4  ;;  %v860_v18 = vld [vmem:[%s1086_s1 + $0x8] sm:$0xff]  ;;  %v859_v21 = vld [vmem:[%s1086_s1] sm:$0xff]  ;;  %v704_v27 = vld [vmem:[%s1013_s5 + $0xc] sm:$0xf0] }
  0x12   : > { %506 = vmatpush.bf16.msra.mxu2 %v881_v5  ;;  %v868_v19 = vld [vmem:[%s1086_s1 + $0x48] sm:$0xff]  ;;  %v867_v22 = vld [vmem:[%s1086_s1 + $0x40] sm:$0xff]  ;;  %v849_v29 = vld [vmem:[%s1013_s5 + $0x10] sm:$0xf0] }
  0x13   : > { %v876_v20 = vld [vmem:[%s1086_s1 + $0x88] sm:$0xff]  ;;  %v875_v23 = vld [vmem:[%s1086_s1 + $0x80] sm:$0xff]  ;;  %v714_v30 = vld [vmem:[%s1013_s5 + $0x18] sm:$0xf] }
  0x14   : > { %449 = vmatpush.bf16.msra.mxu0 %v864_v6  ;;  %885 = vmatpush.bf16.msra.mxu3 %v864_v6  ;;  %v702_v24 = vld [vmem:[%s1013_s5] sm:$0xf]  ;;  %v848_v25 = vld [vmem:[%s1013_s5 + $0x8] sm:$0xf0]  ;;  %v847_v26 = vld [vmem:[%s1013_s5 + $0x4] sm:$0xf] }
  0x15   : > { %478 = vmatpush.bf16.msra.mxu1 %v872_v7  ;;  %v710_v28 = vld [vmem:[%s1013_s5 + $0x8] sm:$0xf]  ;;  %v851_v31 = vld [vmem:[%s1013_s5 + $0x20] sm:$0xf0]  ;;  %v703_v32 = vor.u32 %v848_v25, %v702_v24  ;;  %v707_v33 = vor.u32 %v847_v26, %v704_v27  ;;  %v850_v36 = vld [vmem:[%s1013_s5 + $0x1c] sm:$0xf] }
  0x16   : > { %507 = vmatpush.bf16.msra.mxu2 %v880_v8  ;;  %v711_v34 = vor.u32 %v849_v29, %v710_v28  ;;  %v715_v35 = vor.u32 %v851_v31, %v714_v30  ;;  %v716_v37 = vld [vmem:[%s1013_s5 + $0x24] sm:$0xf0]  ;;  %v722_v38 = vld [vmem:[%s1013_s5 + $0x20] sm:$0xf]  ;;  %v852_v39 = vld [vmem:[%s1013_s5 + $0x28] sm:$0xf0] }
  0x17   : > { %v726_v40 = vld [vmem:[%s1013_s5 + $0x30] sm:$0xf]  ;;  %v854_v41 = vld [vmem:[%s1013_s5 + $0x38] sm:$0xf0]  ;;  %v719_v42 = vor.u32 %v850_v36, %v716_v37  ;;  %v723_v43 = vor.u32 %v852_v39, %v722_v38  ;;  %v853_v45 = vld [vmem:[%s1013_s5 + $0x34] sm:$0xf] }
  0x18   : > { %450 = vmatpush.bf16.msra.mxu0 %v863_v9  ;;  %886 = vmatpush.bf16.msra.mxu3 %v863_v9  ;;  %v727_v44 = vor.u32 %v854_v41, %v726_v40  ;;  %v728_v46 = vld [vmem:[%s1013_s5 + $0x3c] sm:$0xf0]  ;;  %v734_v47 = vld [vmem:[%s1013_s5 + $0x38] sm:$0xf]  ;;  %v855_v48 = vld [vmem:[%s1013_s5 + $0x40] sm:$0xf0] }
  0x19   : > { %479 = vmatpush.bf16.msra.mxu1 %v871_v10  ;;  %v738_v49 = vld [vmem:[%s1013_s5 + $0x48] sm:$0xf]  ;;  %v857_v50 = vld [vmem:[%s1013_s5 + $0x50] sm:$0xf0]  ;;  %v731_v51 = vor.u32 %v853_v45, %v728_v46  ;;  %v735_v52 = vor.u32 %v855_v48, %v734_v47  ;;  %v856_v54 = vld [vmem:[%s1013_s5 + $0x4c] sm:$0xf] }
  0x1a   : > { %508 = vmatpush.bf16.msra.mxu2 %v879_v11  ;;  %v739_v53 = vor.u32 %v857_v50, %v738_v49  ;;  %v740_v55 = vld [vmem:[%s1013_s5 + $0x54] sm:$0xf0]  ;;  %v746_v56 = vld [vmem:[%s1013_s5 + $0x50] sm:$0xf]  ;;  %v858_v57 = vld [vmem:[%s1013_s5 + $0x58] sm:$0xf0] }
  0x1b   : > { %v743_v58 = vor.u32 %v856_v54, %v740_v55  ;;  %v747_v59 = vor.u32 %v858_v57, %v746_v56  ;;  %v901_v9 = vld [vmem:[%s1087_s2] ss:$0 sm:$0xff] }
  0x1c   : > { %451 = vmatpush.bf16.msra.mxu0 %v862_v12  ;;  %887 = vmatpush.bf16.msra.mxu3 %v862_v12 }
  0x1d   : > { %480 = vmatpush.bf16.msra.mxu1 %v870_v13 }
  0x1e   : > { %509 = vmatpush.bf16.msra.mxu2 %v878_v14 }
  0x20   : > { %452 = vmatpush.bf16.msra.mxu0 %v861_v15  ;;  %888 = vmatpush.bf16.msra.mxu3 %v861_v15 }
  0x21   : > { %481 = vmatpush.bf16.msra.mxu1 %v869_v16 }
  0x22   : > { %510 = vmatpush.bf16.msra.mxu2 %v877_v17 }
  0x24   : > { %453 = vmatpush.bf16.msra.mxu0 %v860_v18  ;;  %889 = vmatpush.bf16.msra.mxu3 %v860_v18 }
  0x25   : > { %482 = vmatpush.bf16.msra.mxu1 %v868_v19 }
  0x26   : > { %511 = vmatpush.bf16.msra.mxu2 %v876_v20 }
  0x28   : > { %454 = vmatpush.bf16.msra.mxu0 %v859_v21  ;;  %890 = vmatpush.bf16.msra.mxu3 %v859_v21 }
  0x29   : > { %483 = vmatpush.bf16.msra.mxu1 %v867_v22 }
  0x2a   : > { %512 = vmatpush.bf16.msra.mxu2 %v875_v23 }
  0x2b   : > { %455 = vmatmul.bf16.vlgmr.msra.gmra.mxu0 %v703_v32  ;;  %460 = vmatmul.bf16.vlgmr.msra.gmra.mxu3 %v715_v35  ;;  %v914_v35 = vmov 64.0  }
  0x2c   : > { %484 = vmatmul.bf16.vlgmr.msra.gmra.mxu1 %v707_v33  ;;  %902 = vrcp.f32 %v914_v35 }
  0x2d   : > { %513 = vmatmul.bf16.vlgmr.msra.gmra.mxu2 %v711_v34 }
  0x32   : > { %v903_v48 = vpop.eup %902 }
  0x33   : > { %v557_v56 = vmul.f32 64.0, %v903_v48  ;;  %vm561_vm1 = vweird.f32 %v903_v48 }
  0x3b   : > { %465 = vmatmul.bf16.gmra.mxu3 %v727_v44 }
  0x3c   : > { %489 = vmatmul.bf16.gmra.mxu1 %v719_v42 }
  0x3d   : > { %518 = vmatmul.bf16.gmra.mxu2 %v723_v43 }
  0x4b   : > { %470 = vmatmul.bf16.gmra.mxu3 %v739_v53 }
  0x4c   : > { %494 = vmatmul.bf16.gmra.mxu1 %v731_v51 }
  0x4d   : > { %523 = vmatmul.bf16.gmra.mxu2 %v735_v52 }
  0x5c   : > { %499 = vmatmul.bf16.gmra.mxu1 %v743_v58 }
  0x5d   : > { %528 = vmatmul.bf16.gmra.mxu2 %v747_v59 }
  0xa8   : > { %v456_v6 = vpop.f32.mrf.mxu0 }
  0xa9   : > { %v485_v60 = vpop.f32.mrf.mxu1  ;;  %v457_v14 = vadd.f32 %v901_v9, %v456_v6 }
  0xab   : > { %v486_v17 = vadd.f32 %v485_v60, %v457_v14 }
  0xae   : > { %v461_v62 = vpop.f32.mrf.mxu3 }
  0xaf   : > { %v462_v15 = vadd.f32 %v901_v9, %v461_v62  ;;  %v558_v62 = vsub.f32 1.0, %v557_v56 }
  0xb0   : > { %v514_v61 = vpop.f32.mrf.mxu2  ;;  %v458_v11 = vpop.f32.mrf.mxu0 }
  0xb1   : > { %v487_v63 = vpop.f32.mrf.mxu1  ;;  %v459_v16 = vadd.f32 %v901_v9, %v458_v11  ;;  %v515_v25 = vadd.f32 %v514_v61, %v486_v17 }
  0xb3   : > { %v488_v19 = vadd.f32 %v487_v63, %v459_v16  ;;  %v535_v34 = vsel %vm534_vm0, %v515_v25, 0.0 }
  0xb6   : > { %v463_v2 = vpop.f32.mrf.mxu3 }
  0xb7   : > { %v464_v24 = vadd.f32 %v901_v9, %v463_v2 }
  0xb8   : > { %v516_v0 = vpop.f32.mrf.mxu2 }
  0xb9   : > { %v490_v1 = vpop.f32.mrf.mxu1  ;;  %v517_v23 = vadd.f32 %v516_v0, %v488_v19 }
  0xba   : > { %v491_v18 = vadd.f32 %v490_v1, %v462_v15  ;;  %v559_v1 = vmul.f32 %v903_v48, %v558_v62 }
  0xbb   : > { %v536_v31 = vsel %vm534_vm0, %v517_v23, 0.0 }
  0xbc   : > { %v537_v40 = vadd.f32 %v536_v31, %v535_v34 }
  0xbe   : > { %v466_v5 = vpop.f32.mrf.mxu3 }
  0xbf   : > { %v467_v20 = vadd.f32 %v901_v9, %v466_v5 }
  0xc0   : > { %v519_v3 = vpop.f32.mrf.mxu2 }
  0xc1   : > { %v492_v4 = vpop.f32.mrf.mxu1  ;;  %v520_v26 = vadd.f32 %v519_v3, %v491_v18 }
  0xc2   : > { %v493_v28 = vadd.f32 %v492_v4, %v464_v24  ;;  %v560_v4 = vadd.f32 %v903_v48, %v559_v1 }
  0xc3   : > { %v538_v36 = vsel %vm534_vm0, %v520_v26, 0.0 }
  0xc4   : > { %v539_v44 = vadd.f32 %v538_v36, %v537_v40 }
  0xc6   : > { %v468_v10 = vpop.f32.mrf.mxu3 }
  0xc7   : > { %v469_v33 = vadd.f32 %v901_v9, %v468_v10 }
  0xc8   : > { %v521_v7 = vpop.f32.mrf.mxu2 }
  0xc9   : > { %v495_v8 = vpop.f32.mrf.mxu1  ;;  %v522_v32 = vadd.f32 %v521_v7, %v493_v28  ;;  %v562_v7 = vsel %vm561_vm1, %v903_v48, %v560_v4 }
  0xca   : > { %v496_v29 = vadd.f32 %v495_v8, %v467_v20 }
  0xcb   : > { %v540_v42 = vsel %vm534_vm0, %v522_v32, 0.0 }
  0xcc   : > { %v541_v49 = vadd.f32 %v540_v42, %v539_v44 }
  0xce   : > { %v471_v21 = vpop.f32.mrf.mxu3 }
  0xcf   : > { %v472_v30 = vadd.f32 %v901_v9, %v471_v21 }
  0xd0   : > { %v524_v12 = vpop.f32.mrf.mxu2 }
  0xd1   : > { %v497_v13 = vpop.f32.mrf.mxu1  ;;  %v525_v37 = vadd.f32 %v524_v12, %v496_v29 }
  0xd2   : > { %v498_v38 = vadd.f32 %v497_v13, %v469_v33 }
  0xd3   : > { %v542_v46 = vsel %vm534_vm0, %v525_v37, 0.0 }
  0xd4   : > { %v543_v53 = vadd.f32 %v542_v46, %v541_v49 }
  0xd6   : > { %v473_v45 = vpop.f32.mrf.mxu3 }
  0xd7   : > { %v474_v52 = vadd.f32 %v901_v9, %v473_v45 }
  0xd8   : > { %v526_v22 = vpop.f32.mrf.mxu2 }
  0xd9   : > { %v500_v27 = vpop.f32.mrf.mxu1  ;;  %v527_v43 = vadd.f32 %v526_v22, %v498_v38 }
  0xda   : > { %v501_v39 = vadd.f32 %v500_v27, %v472_v30 }
  0xdb   : > { %v544_v51 = vsel %vm534_vm0, %v527_v43, 0.0 }
  0xdc   : > { %v545_v57 = vadd.f32 %v544_v51, %v543_v53 }
  0xe0   : > { %v529_v41 = vpop.f32.mrf.mxu2 }
  0xe1   : > { %v530_v47 = vadd.f32 %v529_v41, %v501_v39  ;;  %v502_v50 = vpop.f32.mrf.mxu1 }
  0xe2   : > { %v503_v55 = vadd.f32 %v502_v50, %v474_v52 }
  0xe3   : > { %v546_v54 = vsel %vm534_vm0, %v530_v47, 0.0 }
  0xe4   : > { %v547_v60 = vadd.f32 %v546_v54, %v545_v57 }
  0xe8   : > { %v531_v58 = vpop.f32.mrf.mxu2 }
  0xe9   : > { %v532_v59 = vadd.f32 %v531_v58, %v503_v55 }
  0xeb   : > { %v548_v61 = vsel %vm534_vm0, %v532_v59, 0.0 }
  0xec   : > { %v549_v63 = vadd.f32 %v548_v61, %v547_v60 }
  0xee   : > { %v550_v0 = vrot.slane %v549_v63, 4 }
  0xf0   : > { %v551_v2 = vadd.f32 %v550_v0, %v549_v63 }
  0xf2   : > { %v552_v3 = vrot.slane %v551_v2, 2 }
  0xf4   : > { %v553_v5 = vadd.f32 %v552_v3, %v551_v2 }
  0xf6   : > { %v554_v6 = vrot.slane %v553_v5, 1 }
  0xf8   : > { %v555_v8 = vadd.f32 %v554_v6, %v553_v5 }
  0xfa   : > { %v563_v9 = vmul.f32 %v562_v7, %v555_v8 }
  0xfc   : > { %v564_v10 = vsub.f32 %v515_v25, %v563_v9  ;;  %v565_v11 = vsub.f32 %v517_v23, %v563_v9  ;;  %v566_v12 = vsub.f32 %v520_v26, %v563_v9  ;;  %v567_v13 = vsub.f32 %v522_v32, %v563_v9 }
  0xfd   : > { %v568_v14 = vsub.f32 %v525_v37, %v563_v9  ;;  %v569_v18 = vsub.f32 %v527_v43, %v563_v9  ;;  %v570_v24 = vsub.f32 %v530_v47, %v563_v9  ;;  %v571_v25 = vsub.f32 %v532_v59, %v563_v9 }
  0xfe   : > { %v572_v15 = vmul.f32 %v564_v10, %v564_v10  ;;  %v573_v16 = vmul.f32 %v565_v11, %v565_v11  ;;  %v574_v17 = vmul.f32 %v566_v12, %v566_v12  ;;  %v575_v19 = vmul.f32 %v567_v13, %v567_v13 }
  0xff   : > { %v576_v27 = vmul.f32 %v568_v14, %v568_v14  ;;  %v577_v23 = vmul.f32 %v569_v18, %v569_v18  ;;  %v578_v31 = vmul.f32 %v570_v24, %v570_v24  ;;  %v579_v34 = vmul.f32 %v571_v25, %v571_v25 }
 0x100   : > { %v580_v20 = vsel %vm534_vm0, %v572_v15, 0.0  ;;  %v581_v21 = vsel %vm534_vm0, %v573_v16, 0.0  ;;  %v583_v28 = vsel %vm534_vm0, %v574_v17, 0.0  ;;  %v585_v26 = vsel %vm534_vm0, %v575_v19, 0.0 }
 0x101   : > { %v582_v22 = vadd.f32 %v581_v21, %v580_v20  ;;  %v587_v32 = vsel %vm534_vm0, %v576_v27, 0.0  ;;  %v589_v35 = vsel %vm534_vm0, %v577_v23, 0.0  ;;  %v591_v37 = vsel %vm534_vm0, %v578_v31, 0.0 }
 0x102   : > { %v593_v39 = vsel %vm534_vm0, %v579_v34, 0.0 }
 0x103   : > { %v584_v29 = vadd.f32 %v583_v28, %v582_v22 }
 0x105   : > { %v586_v30 = vadd.f32 %v585_v26, %v584_v29 }
 0x107   : > { %v588_v33 = vadd.f32 %v587_v32, %v586_v30 }
 0x109   : > { %v590_v36 = vadd.f32 %v589_v35, %v588_v33 }
 0x10b   : > { %v592_v38 = vadd.f32 %v591_v37, %v590_v36 }
 0x10d   : > { %v594_v40 = vadd.f32 %v593_v39, %v592_v38 }
 0x10f   : > { %v595_v41 = vrot.slane %v594_v40, 4 }
 0x111   : > { %v596_v42 = vadd.f32 %v595_v41, %v594_v40 }
 0x113   : > { %v597_v43 = vrot.slane %v596_v42, 2 }
 0x115   : > { %v598_v44 = vadd.f32 %v597_v43, %v596_v42 }
 0x117   : > { %v599_v45 = vrot.slane %v598_v44, 1 }
 0x119   : > { %v600_v46 = vadd.f32 %v599_v45, %v598_v44 }
 0x11b   : > { %v601_v47 = vmul.f32 %v600_v46, %v562_v7 }
 0x11d   : > { %v602_v48 = vadd.f32 1e-05, %v601_v47 }
 0x11f   : > { %904 = vrsqrt.f32 %v602_v48  ;;  %vm609_vm3 = vweird.f32 %v602_v48 }
 0x125   : > { %v905_v49 = vpop.eup %904 }
 0x126   : > { %v604_v50 = vmul.f32 %v905_v49, %v602_v48  ;;  %vm610_vm2 = vweird.f32 %v905_v49 }
 0x127   : > { %vm611_vm4 = vmor %vm609_vm3, %vm610_vm2 }
 0x128   : > { %v605_v51 = vmul.f32 %v905_v49, %v604_v50 }
 0x12a   : > { %v606_v52 = vmul.f32 0.5, %v605_v51 }
 0x12c   : > { %v607_v53 = vsub.f32 1.5, %v606_v52 }
 0x12e   : > { %v608_v54 = vmul.f32 %v905_v49, %v607_v53 }
 0x130   : > { %v612_v55 = vsel %vm611_vm4, %v905_v49, %v608_v54 }
 0x131   : > { %v613_v56 = vmul.f32 %v612_v55, %v564_v10  ;;  %v614_v57 = vmul.f32 %v612_v55, %v565_v11  ;;  %v615_v58 = vmul.f32 %v612_v55, %v566_v12  ;;  %v616_v59 = vmul.f32 %v612_v55, %v567_v13 }
 0x132   : > { %v617_v60 = vmul.f32 %v612_v55, %v568_v14  ;;  %v618_v61 = vmul.f32 %v612_v55, %v569_v18  ;;  %v619_v62 = vmul.f32 %v612_v55, %v570_v24  ;;  %v620_v2 = vmul.f32 %v612_v55, %v571_v25 }
 0x133   : > { %v621_v63 = vmax.f32 %v613_v56, 0.0  ;;  %v622_v0 = vmax.f32 %v614_v57, 0.0  ;;  %v623_v1 = vmax.f32 %v615_v58, 0.0  ;;  %v624_v3 = vmax.f32 %v616_v59, 0.0 }
 0x134   : > { %v625_v4 = vmax.f32 %v617_v60, 0.0  ;;  %v626_v5 = vmax.f32 %v618_v61, 0.0  ;;  %v627_v6 = vmax.f32 %v619_v62, 0.0  ;;  %v628_v7 = vmax.f32 %v620_v2, 0.0 }
 0x135   : > { %629 = vst.msk [vmem:[%s170_s21] sm:$0xff] %vm534_vm0, %v621_v63 }
 0x136   : > { %630 = vst.msk [vmem:[%s170_s21 + $0x8] sm:$0xff] %vm534_vm0, %v622_v0 }
 0x137   : > { %631 = vst.msk [vmem:[%s170_s21 + $0x10] sm:$0xff] %vm534_vm0, %v623_v1 }
 0x138   : > { %632 = vst.msk [vmem:[%s170_s21 + $0x18] sm:$0xff] %vm534_vm0, %v624_v3 }
 0x139   : > { %633 = vst.msk [vmem:[%s170_s21 + $0x20] sm:$0xff] %vm534_vm0, %v625_v4 }
 0x13a   : > { %634 = vst.msk [vmem:[%s170_s21 + $0x28] sm:$0xff] %vm534_vm0, %v626_v5 }
 0x13b   : > { %635 = vst.msk [vmem:[%s170_s21 + $0x30] sm:$0xff] %vm534_vm0, %v627_v6 }
 0x13c   : > { %636 = vst.msk [vmem:[%s170_s21 + $0x38] sm:$0xff] %vm534_vm0, %v628_v7 }
 0x13d PF: > { %s13_s12 = sadd.s32 1, %s912_s12  }
 0x13e   : > { %p10_p4 = scmp.ge.s32.totalorder %s13_s12, 4  }
 0x140   :  { %12 = sbr.rel (!%p10_p4) target bundleno = 1 (0x1), region = 62 }

// kernel: generator_forward.20
= control target key start
LH: loop header
LB: loop body
LE: loop exit
PB: predicated region body
PF: predicated region fallthrough
CT: control target
= control target key end

     0   :  { %s976_s12 = smov 0   ;;  %s1136_s0 = inlined_call_operand.vmem [shape: bf16[2,16,640], index: 0, kind: input, shape index: {}]   ;;  %s1137_s1 = inlined_call_operand.vmem [shape: bf16[640,128], index: 1, kind: input, shape index: {}]   ;;  %s1138_s2 = inlined_call_operand.vmem [shape: f32[1,128], index: 2, kind: input, shape index: {}]   ;;  %s1139_s3 = inlined_call_operand.vmem [shape: f32[2,16,128], index: 3, kind: output, shape index: {}]  }
   0x1 LB: > { %s696_s13 = sadd.s32 4294967295, %s953_s12   ;;  %p700_p0 = scmp.ge.s32.totalorder %s953_s12, 1  ;;  %s953_s12 = sphi %s976_s12, %s13_s12  }
   0x2   : > { %p137_p1 = scmp.lt.s32.totalorder %s953_s12, 3 }
   0x4   : > { %p138_p2 = pnand %p700_p0, %p137_p1 }
   0x5   : > { %p161_p3 = scmp.lt.s32.totalorder (!%p138_p2), %s696_s13, 1 }
   0x6   : > { %141 = sbr.rel (%p138_p2) target bundleno = 273 (0x111), region = 32 }
   0xb   : > { %v899_v0 = vld [vmem:[%s1137_s1 + $0x38] sm:$0xff]  ;;  %v898_v4 = vld [vmem:[%s1137_s1 + $0x30] sm:$0xff]  ;;  %v897_v8 = vld [vmem:[%s1137_s1 + $0x28] sm:$0xff]  ;;  %s1141_s13 = smov (!%p161_p3, %s696_s13), 1 }
   0xc   : > { %v915_v1 = vld [vmem:[%s1137_s1 + $0xb8] sm:$0xff]  ;;  %527 = vmatpush.bf16.msra.mxu0 %v899_v0  ;;  %v914_v5 = vld [vmem:[%s1137_s1 + $0xb0] sm:$0xff]  ;;  %v913_v9 = vld [vmem:[%s1137_s1 + $0xa8] sm:$0xff]  ;;  %s932_s6 = smul.u32 40, %s1141_s13  ;;  %v955_v0 = vmov 16.0  }
   0xd   : > { %v923_v2 = vld [vmem:[%s1137_s1 + $0xf8] sm:$0xff]  ;;  %555 = vmatpush.bf16.msra.mxu2 %v915_v1  ;;  %v922_v6 = vld [vmem:[%s1137_s1 + $0xf0] sm:$0xff]  ;;  %v921_v10 = vld [vmem:[%s1137_s1 + $0xe8] sm:$0xff]  ;;  %943 = vrcp.f32 %v955_v0 }
   0xe   : > { %v907_v3 = vld [vmem:[%s1137_s1 + $0x78] sm:$0xff]  ;;  %569 = vmatpush.bf16.msra.mxu3 %v923_v2  ;;  %v906_v7 = vld [vmem:[%s1137_s1 + $0x70] sm:$0xff]  ;;  %v905_v11 = vld [vmem:[%s1137_s1 + $0x68] sm:$0xff]  ;;  %s1072_s19 = scalar_lea.vmem %s1136_s0, %s932_s6 }
   0xf   : > { %541 = vmatpush.bf16.msra.mxu1 %v907_v3  ;;  %v896_v12 = vld [vmem:[%s1137_s1 + $0x20] sm:$0xff]  ;;  %v895_v16 = vld [vmem:[%s1137_s1 + $0x18] sm:$0xff]  ;;  %v894_v20 = vld [vmem:[%s1137_s1 + $0x10] sm:$0xff] }
  0x10   : > { %528 = vmatpush.bf16.msra.mxu0 %v898_v4  ;;  %v912_v13 = vld [vmem:[%s1137_s1 + $0xa0] sm:$0xff]  ;;  %v911_v17 = vld [vmem:[%s1137_s1 + $0x98] sm:$0xff]  ;;  %v910_v21 = vld [vmem:[%s1137_s1 + $0x90] sm:$0xff] }
  0x11   : > { %556 = vmatpush.bf16.msra.mxu2 %v914_v5  ;;  %v920_v14 = vld [vmem:[%s1137_s1 + $0xe0] sm:$0xff]  ;;  %v919_v18 = vld [vmem:[%s1137_s1 + $0xd8] sm:$0xff]  ;;  %v918_v22 = vld [vmem:[%s1137_s1 + $0xd0] sm:$0xff] }
  0x12   : > { %570 = vmatpush.bf16.msra.mxu3 %v922_v6  ;;  %v904_v15 = vld [vmem:[%s1137_s1 + $0x60] sm:$0xff]  ;;  %v903_v19 = vld [vmem:[%s1137_s1 + $0x58] sm:$0xff]  ;;  %v902_v23 = vld [vmem:[%s1137_s1 + $0x50] sm:$0xff] }
  0x13   : > { %542 = vmatpush.bf16.msra.mxu1 %v906_v7  ;;  %v893_v24 = vld [vmem:[%s1137_s1 + $0x8] sm:$0xff]  ;;  %v892_v28 = vld [vmem:[%s1137_s1] sm:$0xff]  ;;  %v931_v29 = vld [vmem:[%s1137_s1 + $0x138] sm:$0xff]  ;;  %v944_v5 = vpop.eup %943 }
  0x14   : > { %529 = vmatpush.bf16.msra.mxu0 %v897_v8  ;;  %v909_v25 = vld [vmem:[%s1137_s1 + $0x88] sm:$0xff]  ;;  %v908_v30 = vld [vmem:[%s1137_s1 + $0x80] sm:$0xff]  ;;  %v890_v32 = vld [vmem:[%s1072_s19 + $0x18] sm:$0xf0]  ;;  %vm609_vm0 = vweird.f32 %v944_v5 }
  0x15   : > { %557 = vmatpush.bf16.msra.mxu2 %v913_v9  ;;  %v917_v26 = vld [vmem:[%s1137_s1 + $0xc8] sm:$0xff]  ;;  %v706_v33 = vld [vmem:[%s1072_s19] sm:$0xf]  ;;  %v889_v34 = vld [vmem:[%s1072_s19 + $0x10] sm:$0xf0]  ;;  %v605_v9 = vmul.f32 16.0, %v944_v5 }
  0x16   : > { %571 = vmatpush.bf16.msra.mxu3 %v921_v10  ;;  %v901_v27 = vld [vmem:[%s1137_s1 + $0x48] sm:$0xff]  ;;  %v916_v35 = vld [vmem:[%s1137_s1 + $0xc0] sm:$0xff]  ;;  %v708_v40 = vld [vmem:[%s1072_s19 + $0x14] sm:$0xf0]  ;;  %v707_v42 = vor.u32 %v889_v34, %v706_v33 }
  0x17   : > { %543 = vmatpush.bf16.msra.mxu1 %v905_v11  ;;  %v714_v31 = vld [vmem:[%s1072_s19 + $0x8] sm:$0xf]  ;;  %v888_v36 = vld [vmem:[%s1072_s19 + $0xc] sm:$0xf]  ;;  %v716_v37 = vld [vmem:[%s1072_s19 + $0x1c] sm:$0xf0] }
  0x18   : > { %530 = vmatpush.bf16.msra.mxu0 %v896_v12  ;;  %v900_v38 = vld [vmem:[%s1137_s1 + $0x40] sm:$0xff]  ;;  %v715_v41 = vor.u32 %v890_v32, %v714_v31  ;;  %v719_v43 = vor.u32 %v888_v36, %v716_v37  ;;  %v930_v44 = vld [vmem:[%s1137_s1 + $0x130] sm:$0xff]  ;;  %v929_v46 = vld [vmem:[%s1137_s1 + $0x128] sm:$0xff] }
  0x19   : > { %558 = vmatpush.bf16.msra.mxu2 %v912_v13  ;;  %v887_v39 = vld [vmem:[%s1072_s19 + $0x4] sm:$0xf]  ;;  %v927_v48 = vld [vmem:[%s1137_s1 + $0x118] sm:$0xff]  ;;  %v926_v49 = vld [vmem:[%s1137_s1 + $0x110] sm:$0xff] }
  0x1a   : > { %572 = vmatpush.bf16.msra.mxu3 %v920_v14  ;;  %v711_v45 = vor.u32 %v887_v39, %v708_v40  ;;  %v928_v47 = vld [vmem:[%s1137_s1 + $0x120] sm:$0xff]  ;;  %v925_v50 = vld [vmem:[%s1137_s1 + $0x108] sm:$0xff]  ;;  %v722_v52 = vld [vmem:[%s1072_s19 + $0x10] sm:$0xf] }
  0x1b   : > { %544 = vmatpush.bf16.msra.mxu1 %v904_v15  ;;  %v924_v51 = vld [vmem:[%s1137_s1 + $0x100] sm:$0xff]  ;;  %v606_v15 = vsub.f32 1.0, %v605_v9 }
  0x1c   : > { %531 = vmatpush.bf16.msra.mxu0 %v895_v16  ;;  %v891_v53 = vld [vmem:[%s1072_s19 + $0x20] sm:$0xf0]  ;;  %v942_v58 = vld [vmem:[%s1138_s2] ss:$0 sm:$0xff]  ;;  %s886_s19 = sshll.u32 %s1141_s13, 4 }
  0x1d   : > { %559 = vmatpush.bf16.msra.mxu2 %v911_v17  ;;  %v723_v54 = vor.u32 %v891_v53, %v722_v52  ;;  %s170_s28 = scalar_lea.vmem %s1139_s3, %s886_s19 }
  0x1e   : > { %573 = vmatpush.bf16.msra.mxu3 %v919_v18  ;;  %v607_v18 = vmul.f32 %v944_v5, %v606_v15 }
  0x1f   : > { %545 = vmatpush.bf16.msra.mxu1 %v903_v19 }
  0x20   : > { %532 = vmatpush.bf16.msra.mxu0 %v894_v20 }
  0x21   : > { %560 = vmatpush.bf16.msra.mxu2 %v910_v21  ;;  %v608_v21 = vadd.f32 %v944_v5, %v607_v18 }
  0x22   : > { %574 = vmatpush.bf16.msra.mxu3 %v918_v22 }
  0x23   : > { %546 = vmatpush.bf16.msra.mxu1 %v902_v23 }
  0x24   : > { %533 = vmatpush.bf16.msra.mxu0 %v893_v24  ;;  %v610_v24 = vsel %vm609_vm0, %v944_v5, %v608_v21 }
  0x25   : > { %561 = vmatpush.bf16.msra.mxu2 %v909_v25 }
  0x26   : > { %575 = vmatpush.bf16.msra.mxu3 %v917_v26 }
  0x27   : > { %547 = vmatpush.bf16.msra.mxu1 %v901_v27 }
  0x28   : > { %534 = vmatpush.bf16.msra.mxu0 %v892_v28 }
  0x29   : > { %562 = vmatpush.bf16.msra.mxu2 %v908_v30 }
  0x2a   : > { %576 = vmatpush.bf16.msra.mxu3 %v916_v35 }
  0x2b   : > { %548 = vmatpush.bf16.msra.mxu1 %v900_v38  ;;  %535 = vmatmul.bf16.vlgmr.msra.gmra.mxu0 %v707_v42 }
  0x2c   : > { %583 = vmatpush.bf16.msrb.mxu0 %v931_v29  ;;  %563 = vmatmul.bf16.vlgmr.msra.gmra.mxu2 %v715_v41 }
  0x2d   : > { %577 = vmatmul.bf16.vlgmr.msra.gmra.mxu3 %v719_v43 }
  0x2e   : > { %549 = vmatmul.bf16.vlgmr.msra.gmra.mxu1 %v711_v45 }
  0x30   : > { %584 = vmatpush.bf16.msrb.mxu0 %v930_v44 }
  0x34   : > { %585 = vmatpush.bf16.msrb.mxu0 %v929_v46 }
  0x38   : > { %586 = vmatpush.bf16.msrb.mxu0 %v928_v47 }
  0x3c   : > { %587 = vmatpush.bf16.msrb.mxu0 %v927_v48 }
  0x40   : > { %588 = vmatpush.bf16.msrb.mxu0 %v926_v49 }
  0x44   : > { %589 = vmatpush.bf16.msrb.mxu0 %v925_v50 }
  0x48   : > { %590 = vmatpush.bf16.msrb.mxu0 %v924_v51 }
  0x4b   : > { %591 = vmatmul.bf16.vlgmr.msrb.gmra.mxu0 %v723_v54 }
  0xa8   : > { %v536_v55 = vpop.f32.mrf.mxu0 }
  0xa9   : > { %v537_v61 = vadd.f32 %v942_v58, %v536_v55 }
  0xab   : > { %v550_v56 = vpop.f32.mrf.mxu1 }
  0xac   : > { %v551_v1 = vadd.f32 %v550_v56, %v537_v61 }
  0xaf   : > { %v564_v57 = vpop.f32.mrf.mxu2 }
  0xb0   : > { %v538_v59 = vpop.f32.mrf.mxu0  ;;  %v578_v60 = vpop.f32.mrf.mxu3  ;;  %v565_v6 = vadd.f32 %v564_v57, %v551_v1 }
  0xb1   : > { %v539_v62 = vadd.f32 %v942_v58, %v538_v59 }
  0xb2   : > { %v579_v10 = vadd.f32 %v578_v60, %v565_v6 }
  0xb3   : > { %v552_v63 = vpop.f32.mrf.mxu1 }
  0xb4   : > { %v553_v2 = vadd.f32 %v552_v63, %v539_v62 }
  0xb7   : > { %v566_v3 = vpop.f32.mrf.mxu2 }
  0xb8   : > { %v567_v7 = vadd.f32 %v566_v3, %v553_v2  ;;  %v580_v8 = vpop.f32.mrf.mxu3 }
  0xba   : > { %v581_v11 = vadd.f32 %v580_v8, %v567_v7 }
  0xc8   : > { %v592_v4 = vpop.f32.mrf.mxu0 }
  0xc9   : > { %v593_v13 = vadd.f32 %v592_v4, %v579_v10 }
  0xd0   : > { %v594_v12 = vpop.f32.mrf.mxu0 }
  0xd1   : > { %v595_v14 = vadd.f32 %v594_v12, %v581_v11 }
  0xd3   : > { %v597_v16 = vadd.f32 %v595_v14, %v593_v13 }
  0xd5   : > { %v598_v17 = vrot.slane %v597_v16, 4 }
  0xd7   : > { %v599_v19 = vadd.f32 %v598_v17, %v597_v16 }
  0xd9   : > { %v600_v20 = vrot.slane %v599_v19, 2 }
  0xdb   : > { %v601_v22 = vadd.f32 %v600_v20, %v599_v19 }
  0xdd   : > { %v602_v23 = vrot.slane %v601_v22, 1 }
  0xdf   : > { %v603_v25 = vadd.f32 %v602_v23, %v601_v22 }
  0xe1   : > { %v611_v26 = vmul.f32 %v610_v24, %v603_v25 }
  0xe3   : > { %v612_v27 = vsub.f32 %v593_v13, %v611_v26  ;;  %v613_v28 = vsub.f32 %v595_v14, %v611_v26 }
  0xe5   : > { %v614_v29 = vmul.f32 %v612_v27, %v612_v27  ;;  %v615_v30 = vmul.f32 %v613_v28, %v613_v28 }
  0xe7   : > { %v616_v31 = vadd.f32 %v615_v30, %v614_v29 }
  0xe9   : > { %v617_v32 = vrot.slane %v616_v31, 4 }
  0xeb   : > { %v618_v33 = vadd.f32 %v617_v32, %v616_v31 }
  0xed   : > { %v619_v34 = vrot.slane %v618_v33, 2 }
  0xef   : > { %v620_v35 = vadd.f32 %v619_v34, %v618_v33 }
  0xf1   : > { %v621_v36 = vrot.slane %v620_v35, 1 }
  0xf3   : > { %v622_v37 = vadd.f32 %v621_v36, %v620_v35 }
  0xf5   : > { %v623_v38 = vmul.f32 %v622_v37, %v610_v24 }
  0xf7   : > { %v624_v39 = vadd.f32 1e-05, %v623_v38 }
  0xf9   : > { %945 = vrsqrt.f32 %v624_v39  ;;  %vm631_vm2 = vweird.f32 %v624_v39 }
  0xff   : > { %v946_v40 = vpop.eup %945 }
 0x100   : > { %v626_v41 = vmul.f32 %v946_v40, %v624_v39  ;;  %vm632_vm1 = vweird.f32 %v946_v40 }
 0x101   : > { %vm633_vm3 = vmor %vm631_vm2, %vm632_vm1 }
 0x102   : > { %v627_v42 = vmul.f32 %v946_v40, %v626_v41 }
 0x104   : > { %v628_v43 = vmul.f32 0.5, %v627_v42 }
 0x106   : > { %v629_v44 = vsub.f32 1.5, %v628_v43 }
 0x108   : > { %v630_v45 = vmul.f32 %v946_v40, %v629_v44 }
 0x10a   : > { %v634_v46 = vsel %vm633_vm3, %v946_v40, %v630_v45 }
 0x10b   : > { %v635_v47 = vmul.f32 %v634_v46, %v612_v27  ;;  %v636_v48 = vmul.f32 %v634_v46, %v613_v28 }
 0x10d   : > { %v637_v49 = vmax.f32 %v635_v47, 0.0  ;;  %v638_v50 = vmax.f32 %v636_v48, 0.0 }
 0x10f   : > { %639 = vst [vmem:[%s170_s28] sm:$0xff] %v637_v49 }
 0x110   : > { %640 = vst [vmem:[%s170_s28 + $0x8] sm:$0xff] %v638_v50 }
 0x111 PF: > { %s13_s12 = sadd.s32 1, %s953_s12  }
 0x112   : > { %p10_p4 = scmp.ge.s32.totalorder %s13_s12, 4  }
 0x114   :  { %12 = sbr.rel (!%p10_p4) target bundleno = 1 (0x1), region = 62 }

// kernel: generator_forward.21
= control target key start
LH: loop header
LB: loop body
LE: loop exit
PB: predicated region body
PF: predicated region fallthrough
CT: control target
= control target key end

     0   :  { %s1455_s9 = smov 0   ;;  %s1716_s0 = inlined_call_operand.vmem [shape: bf16[2,16,1152], index: 0, kind: input, shape index: {}]   ;;  %s1717_s1 = inlined_call_operand.vmem [shape: bf16[1152,128], index: 1, kind: input, shape index: {}]   ;;  %s1718_s2 = inlined_call_operand.vmem [shape: f32[2,16,128], index: 2, kind: output, shape index: {}]  }
   0x1 LB: > { %s1001_s10 = sadd.s32 4294967295, %s1437_s9   ;;  %p1005_p0 = scmp.ge.s32.totalorder %s1437_s9, 1  ;;  %s1437_s9 = sphi %s1455_s9, %s12_s9  }
   0x2   : > { %p112_p1 = scmp.lt.s32.totalorder %s1437_s9, 3 }
   0x4   : > { %p113_p2 = pnand %p1005_p0, %p112_p1 }
   0x5   : > { %p134_p3 = scmp.lt.s32.totalorder (!%p113_p2), %s1001_s10, 1 }
   0x6   : > { %116 = sbr.rel (%p113_p2) target bundleno = 305 (0x131), region = 28 }
   0xb   : > { %v1352_v0 = vld [vmem:[%s1717_s1 + $0x38] sm:$0xff]  ;;  %v1351_v4 = vld [vmem:[%s1717_s1 + $0x30] sm:$0xff]  ;;  %v1350_v8 = vld [vmem:[%s1717_s1 + $0x28] sm:$0xff]  ;;  %s1720_s10 = smov (!%p134_p3, %s1001_s10), 1 }
   0xc   : > { %v1368_v1 = vld [vmem:[%s1717_s1 + $0xb8] sm:$0xff]  ;;  %776 = vmatpush.bf16.msra.mxu0 %v1352_v0  ;;  %v1367_v5 = vld [vmem:[%s1717_s1 + $0xb0] sm:$0xff]  ;;  %v1366_v9 = vld [vmem:[%s1717_s1 + $0xa8] sm:$0xff]  ;;  %s1417_s5 = smul.u32 72, %s1720_s10 }
   0xd   : > { %v1360_v2 = vld [vmem:[%s1717_s1 + $0x78] sm:$0xff]  ;;  %804 = vmatpush.bf16.msra.mxu2 %v1368_v1  ;;  %v1359_v6 = vld [vmem:[%s1717_s1 + $0x70] sm:$0xff]  ;;  %v1358_v10 = vld [vmem:[%s1717_s1 + $0x68] sm:$0xff] }
   0xe   : > { %v1376_v3 = vld [vmem:[%s1717_s1 + $0xf8] sm:$0xff]  ;;  %790 = vmatpush.bf16.msra.mxu1 %v1360_v2  ;;  %v1375_v7 = vld [vmem:[%s1717_s1 + $0xf0] sm:$0xff]  ;;  %v1374_v11 = vld [vmem:[%s1717_s1 + $0xe8] sm:$0xff]  ;;  %s1557_s18 = scalar_lea.vmem %s1716_s0, %s1417_s5 }
   0xf   : > { %818 = vmatpush.bf16.msra.mxu3 %v1376_v3  ;;  %v1349_v12 = vld [vmem:[%s1717_s1 + $0x20] sm:$0xff]  ;;  %v1348_v16 = vld [vmem:[%s1717_s1 + $0x18] sm:$0xff]  ;;  %v1347_v20 = vld [vmem:[%s1717_s1 + $0x10] sm:$0xff] }
  0x10   : > { %777 = vmatpush.bf16.msra.mxu0 %v1351_v4  ;;  %v1365_v13 = vld [vmem:[%s1717_s1 + $0xa0] sm:$0xff]  ;;  %v1364_v17 = vld [vmem:[%s1717_s1 + $0x98] sm:$0xff]  ;;  %v1363_v21 = vld [vmem:[%s1717_s1 + $0x90] sm:$0xff] }
  0x11   : > { %805 = vmatpush.bf16.msra.mxu2 %v1367_v5  ;;  %v1357_v14 = vld [vmem:[%s1717_s1 + $0x60] sm:$0xff]  ;;  %v1356_v18 = vld [vmem:[%s1717_s1 + $0x58] sm:$0xff]  ;;  %v1355_v22 = vld [vmem:[%s1717_s1 + $0x50] sm:$0xff] }
  0x12   : > { %791 = vmatpush.bf16.msra.mxu1 %v1359_v6  ;;  %v1373_v15 = vld [vmem:[%s1717_s1 + $0xe0] sm:$0xff]  ;;  %v1372_v19 = vld [vmem:[%s1717_s1 + $0xd8] sm:$0xff]  ;;  %v1371_v23 = vld [vmem:[%s1717_s1 + $0xd0] sm:$0xff] }
  0x13   : > { %819 = vmatpush.bf16.msra.mxu3 %v1375_v7  ;;  %v1346_v24 = vld [vmem:[%s1717_s1 + $0x8] sm:$0xff]  ;;  %v1345_v28 = vld [vmem:[%s1717_s1] sm:$0xff]  ;;  %v1384_v30 = vld [vmem:[%s1717_s1 + $0x138] sm:$0xff] }
  0x14   : > { %778 = vmatpush.bf16.msra.mxu0 %v1350_v8  ;;  %v1362_v25 = vld [vmem:[%s1717_s1 + $0x88] sm:$0xff]  ;;  %v1361_v29 = vld [vmem:[%s1717_s1 + $0x80] sm:$0xff]  ;;  %v1400_v31 = vld [vmem:[%s1717_s1 + $0x1b8] sm:$0xff] }
  0x15   : > { %806 = vmatpush.bf16.msra.mxu2 %v1366_v9  ;;  %v1354_v26 = vld [vmem:[%s1717_s1 + $0x48] sm:$0xff]  ;;  %v1353_v32 = vld [vmem:[%s1717_s1 + $0x40] sm:$0xff]  ;;  %v1392_v38 = vld [vmem:[%s1717_s1 + $0x178] sm:$0xff] }
  0x16   : > { %792 = vmatpush.bf16.msra.mxu1 %v1358_v10  ;;  %v1370_v27 = vld [vmem:[%s1717_s1 + $0xc8] sm:$0xff]  ;;  %v1369_v33 = vld [vmem:[%s1717_s1 + $0xc0] sm:$0xff]  ;;  %v1408_v39 = vld [vmem:[%s1717_s1 + $0x1f8] sm:$0xff] }
  0x17   : > { %820 = vmatpush.bf16.msra.mxu3 %v1374_v11  ;;  %v1011_v34 = vld [vmem:[%s1557_s18] sm:$0xf]  ;;  %v1340_v35 = vld [vmem:[%s1557_s18 + $0x20] sm:$0xf0]  ;;  %v1019_v36 = vld [vmem:[%s1557_s18 + $0x8] sm:$0xf] }
  0x18   : > { %779 = vmatpush.bf16.msra.mxu0 %v1349_v12  ;;  %v1341_v37 = vld [vmem:[%s1557_s18 + $0x28] sm:$0xf0]  ;;  %v1336_v40 = vld [vmem:[%s1557_s18 + $0x4] sm:$0xf]  ;;  %v1013_v41 = vld [vmem:[%s1557_s18 + $0x24] sm:$0xf0]  ;;  %v1012_v44 = vor.u32 %v1340_v35, %v1011_v34 }
  0x19   : > { %807 = vmatpush.bf16.msra.mxu2 %v1365_v13  ;;  %v1337_v42 = vld [vmem:[%s1557_s18 + $0xc] sm:$0xf]  ;;  %v1021_v43 = vld [vmem:[%s1557_s18 + $0x2c] sm:$0xf0]  ;;  %v1020_v45 = vor.u32 %v1341_v37, %v1019_v36  ;;  %v1016_v48 = vor.u32 %v1336_v40, %v1013_v41  ;;  %v1381_v56 = vld [vmem:[%s1717_s1 + $0x120] sm:$0xff] }
  0x1a   : > { %793 = vmatpush.bf16.msra.mxu1 %v1357_v14  ;;  %v1383_v46 = vld [vmem:[%s1717_s1 + $0x130] sm:$0xff]  ;;  %v1024_v49 = vor.u32 %v1337_v42, %v1021_v43  ;;  %v1382_v52 = vld [vmem:[%s1717_s1 + $0x128] sm:$0xff]  ;;  %v1397_v57 = vld [vmem:[%s1717_s1 + $0x1a0] sm:$0xff] }
  0x1b   : > { %821 = vmatpush.bf16.msra.mxu3 %v1373_v15  ;;  %v1399_v47 = vld [vmem:[%s1717_s1 + $0x1b0] sm:$0xff]  ;;  %v1398_v53 = vld [vmem:[%s1717_s1 + $0x1a8] sm:$0xff]  ;;  %v1389_v58 = vld [vmem:[%s1717_s1 + $0x160] sm:$0xff] }
  0x1c   : > { %780 = vmatpush.bf16.msra.mxu0 %v1348_v16  ;;  %v1391_v50 = vld [vmem:[%s1717_s1 + $0x170] sm:$0xff]  ;;  %v1390_v54 = vld [vmem:[%s1717_s1 + $0x168] sm:$0xff]  ;;  %v1405_v59 = vld [vmem:[%s1717_s1 + $0x1e0] sm:$0xff] }
  0x1d   : > { %808 = vmatpush.bf16.msra.mxu2 %v1364_v17  ;;  %v1407_v51 = vld [vmem:[%s1717_s1 + $0x1f0] sm:$0xff]  ;;  %v1406_v55 = vld [vmem:[%s1717_s1 + $0x1e8] sm:$0xff]  ;;  %v1380_v60 = vld [vmem:[%s1717_s1 + $0x118] sm:$0xff] }
  0x1e   : > { %794 = vmatpush.bf16.msra.mxu1 %v1356_v18  ;;  %v1396_v61 = vld [vmem:[%s1717_s1 + $0x198] sm:$0xff]  ;;  %v1379_v0 = vld [vmem:[%s1717_s1 + $0x110] sm:$0xff]  ;;  %v1378_v4 = vld [vmem:[%s1717_s1 + $0x108] sm:$0xff] }
  0x1f   : > { %822 = vmatpush.bf16.msra.mxu3 %v1372_v19  ;;  %v1388_v62 = vld [vmem:[%s1717_s1 + $0x158] sm:$0xff]  ;;  %v1395_v1 = vld [vmem:[%s1717_s1 + $0x190] sm:$0xff]  ;;  %v1394_v5 = vld [vmem:[%s1717_s1 + $0x188] sm:$0xff] }
  0x20   : > { %781 = vmatpush.bf16.msra.mxu0 %v1347_v20  ;;  %v1404_v63 = vld [vmem:[%s1717_s1 + $0x1d8] sm:$0xff]  ;;  %v1387_v2 = vld [vmem:[%s1717_s1 + $0x150] sm:$0xff]  ;;  %v1386_v6 = vld [vmem:[%s1717_s1 + $0x148] sm:$0xff] }
  0x21   : > { %809 = vmatpush.bf16.msra.mxu2 %v1363_v21  ;;  %v1403_v3 = vld [vmem:[%s1717_s1 + $0x1d0] sm:$0xff]  ;;  %v1402_v7 = vld [vmem:[%s1717_s1 + $0x1c8] sm:$0xff]  ;;  %v1377_v8 = vld [vmem:[%s1717_s1 + $0x100] sm:$0xff] }
  0x22   : > { %795 = vmatpush.bf16.msra.mxu1 %v1355_v22  ;;  %v1393_v9 = vld [vmem:[%s1717_s1 + $0x180] sm:$0xff]  ;;  %v1416_v10 = vld [vmem:[%s1717_s1 + $0x238] sm:$0xff]  ;;  %v1027_v11 = vld [vmem:[%s1557_s18 + $0x10] sm:$0xf] }
  0x23   : > { %823 = vmatpush.bf16.msra.mxu3 %v1371_v23  ;;  %v1342_v12 = vld [vmem:[%s1557_s18 + $0x30] sm:$0xf0]  ;;  %v1035_v13 = vld [vmem:[%s1557_s18 + $0x18] sm:$0xf]  ;;  %v1343_v14 = vld [vmem:[%s1557_s18 + $0x38] sm:$0xf0] }
  0x24   : > { %782 = vmatpush.bf16.msra.mxu0 %v1346_v24  ;;  %v1385_v15 = vld [vmem:[%s1717_s1 + $0x140] sm:$0xff]  ;;  %v1338_v17 = vld [vmem:[%s1557_s18 + $0x14] sm:$0xf]  ;;  %v1029_v18 = vld [vmem:[%s1557_s18 + $0x34] sm:$0xf0]  ;;  %v1028_v21 = vor.u32 %v1342_v12, %v1027_v11  ;;  %v1036_v22 = vor.u32 %v1343_v14, %v1035_v13 }
  0x25   : > { %810 = vmatpush.bf16.msra.mxu2 %v1362_v25  ;;  %v1401_v16 = vld [vmem:[%s1717_s1 + $0x1c0] sm:$0xff]  ;;  %v1339_v19 = vld [vmem:[%s1557_s18 + $0x1c] sm:$0xf]  ;;  %v1032_v23 = vor.u32 %v1338_v17, %v1029_v18  ;;  %v1415_v25 = vld [vmem:[%s1717_s1 + $0x230] sm:$0xff] }
  0x26   : > { %796 = vmatpush.bf16.msra.mxu1 %v1354_v26  ;;  %v1037_v20 = vld [vmem:[%s1557_s18 + $0x3c] sm:$0xf0]  ;;  %v1414_v26 = vld [vmem:[%s1717_s1 + $0x228] sm:$0xff] }
  0x27   : > { %824 = vmatpush.bf16.msra.mxu3 %v1370_v27  ;;  %v1040_v24 = vor.u32 %v1339_v19, %v1037_v20  ;;  %v1413_v27 = vld [vmem:[%s1717_s1 + $0x220] sm:$0xff] }
  0x28   : > { %783 = vmatpush.bf16.msra.mxu0 %v1345_v28  ;;  %v1412_v28 = vld [vmem:[%s1717_s1 + $0x218] sm:$0xff] }
  0x29   : > { %811 = vmatpush.bf16.msra.mxu2 %v1361_v29  ;;  %v1411_v29 = vld [vmem:[%s1717_s1 + $0x210] sm:$0xff] }
  0x2a   : > { %797 = vmatpush.bf16.msra.mxu1 %v1353_v32  ;;  %v1043_v32 = vld [vmem:[%s1557_s18 + $0x20] sm:$0xf] }
  0x2b   : > { %825 = vmatpush.bf16.msra.mxu3 %v1369_v33  ;;  %784 = vmatmul.bf16.vlgmr.msra.gmra.mxu0 %v1012_v44  ;;  %v1344_v33 = vld [vmem:[%s1557_s18 + $0x40] sm:$0xf0]  ;;  %s1335_s18 = sshll.u32 %s1720_s10, 4 }
  0x2c   : > { %832 = vmatpush.bf16.msrb.mxu0 %v1384_v30  ;;  %812 = vmatmul.bf16.vlgmr.msra.gmra.mxu2 %v1020_v45  ;;  %v1410_v30 = vld [vmem:[%s1717_s1 + $0x208] sm:$0xff]  ;;  %v1044_v34 = vor.u32 %v1344_v33, %v1043_v32  ;;  %s143_s6 = scalar_lea.vmem %s1718_s2, %s1335_s18 }
  0x2d   : > { %860 = vmatpush.bf16.msrb.mxu2 %v1400_v31  ;;  %798 = vmatmul.bf16.vlgmr.msra.gmra.mxu1 %v1016_v48  ;;  %v1409_v31 = vld [vmem:[%s1717_s1 + $0x200] sm:$0xff] }
  0x2e   : > { %846 = vmatpush.bf16.msrb.mxu1 %v1392_v38  ;;  %826 = vmatmul.bf16.vlgmr.msra.gmra.mxu3 %v1024_v49 }
  0x2f   : > { %874 = vmatpush.bf16.msrb.mxu3 %v1408_v39 }
  0x30   : > { %833 = vmatpush.bf16.msrb.mxu0 %v1383_v46 }
  0x31   : > { %861 = vmatpush.bf16.msrb.mxu2 %v1399_v47 }
  0x32   : > { %847 = vmatpush.bf16.msrb.mxu1 %v1391_v50 }
  0x33   : > { %875 = vmatpush.bf16.msrb.mxu3 %v1407_v51 }
  0x34   : > { %834 = vmatpush.bf16.msrb.mxu0 %v1382_v52 }
  0x35   : > { %862 = vmatpush.bf16.msrb.mxu2 %v1398_v53 }
  0x36   : > { %848 = vmatpush.bf16.msrb.mxu1 %v1390_v54 }
  0x37   : > { %876 = vmatpush.bf16.msrb.mxu3 %v1406_v55 }
  0x38   : > { %835 = vmatpush.bf16.msrb.mxu0 %v1381_v56  ;;  %v1439_v56 = vmov 16.0  }
  0x39   : > { %863 = vmatpush.bf16.msrb.mxu2 %v1397_v57  ;;  %1427 = vrcp.f32 %v1439_v56 }
  0x3a   : > { %849 = vmatpush.bf16.msrb.mxu1 %v1389_v58 }
  0x3b   : > { %877 = vmatpush.bf16.msrb.mxu3 %v1405_v59 }
  0x3c   : > { %836 = vmatpush.bf16.msrb.mxu0 %v1380_v60 }
  0x3d   : > { %864 = vmatpush.bf16.msrb.mxu2 %v1396_v61 }
  0x3e   : > { %850 = vmatpush.bf16.msrb.mxu1 %v1388_v62 }
  0x3f   : > { %878 = vmatpush.bf16.msrb.mxu3 %v1404_v63  ;;  %v1428_v62 = vpop.eup %1427 }
  0x40   : > { %837 = vmatpush.bf16.msrb.mxu0 %v1379_v0  ;;  %vm914_vm0 = vweird.f32 %v1428_v62 }
  0x41   : > { %865 = vmatpush.bf16.msrb.mxu2 %v1395_v1 }
  0x42   : > { %851 = vmatpush.bf16.msrb.mxu1 %v1387_v2  ;;  %v910_v2 = vmul.f32 16.0, %v1428_v62 }
  0x43   : > { %879 = vmatpush.bf16.msrb.mxu3 %v1403_v3 }
  0x44   : > { %838 = vmatpush.bf16.msrb.mxu0 %v1378_v4 }
  0x45   : > { %866 = vmatpush.bf16.msrb.mxu2 %v1394_v5 }
  0x46   : > { %852 = vmatpush.bf16.msrb.mxu1 %v1386_v6 }
  0x47   : > { %880 = vmatpush.bf16.msrb.mxu3 %v1402_v7 }
  0x48   : > { %839 = vmatpush.bf16.msrb.mxu0 %v1377_v8  ;;  %v911_v8 = vsub.f32 1.0, %v910_v2 }
  0x49   : > { %867 = vmatpush.bf16.msrb.mxu2 %v1393_v9 }
  0x4a   : > { %853 = vmatpush.bf16.msrb.mxu1 %v1385_v15  ;;  %v912_v11 = vmul.f32 %v1428_v62, %v911_v8 }
  0x4b   : > { %881 = vmatpush.bf16.msrb.mxu3 %v1401_v16  ;;  %840 = vmatmul.bf16.vlgmr.msrb.gmra.mxu0 %v1028_v21 }
  0x4c   : > { %888 = vmatpush.bf16.msra.mxu0 %v1416_v10  ;;  %868 = vmatmul.bf16.vlgmr.msrb.gmra.mxu2 %v1036_v22  ;;  %v913_v14 = vadd.f32 %v1428_v62, %v912_v11 }
  0x4d   : > { %854 = vmatmul.bf16.vlgmr.msrb.gmra.mxu1 %v1032_v23 }
  0x4e   : > { %882 = vmatmul.bf16.vlgmr.msrb.gmra.mxu3 %v1040_v24  ;;  %v915_v17 = vsel %vm914_vm0, %v1428_v62, %v913_v14 }
  0x50   : > { %889 = vmatpush.bf16.msra.mxu0 %v1415_v25 }
  0x54   : > { %890 = vmatpush.bf16.msra.mxu0 %v1414_v26 }
  0x58   : > { %891 = vmatpush.bf16.msra.mxu0 %v1413_v27 }
  0x5c   : > { %892 = vmatpush.bf16.msra.mxu0 %v1412_v28 }
  0x60   : > { %893 = vmatpush.bf16.msra.mxu0 %v1411_v29 }
  0x64   : > { %894 = vmatpush.bf16.msra.mxu0 %v1410_v30 }
  0x68   : > { %895 = vmatpush.bf16.msra.mxu0 %v1409_v31 }
  0x6b   : > { %896 = vmatmul.bf16.vlgmr.msra.gmra.mxu0 %v1044_v34 }
  0xa8   : > { %v785_v35 = vpop.f32.mrf.mxu0 }
  0xaa   : > { %v799_v36 = vpop.f32.mrf.mxu1 }
  0xab   : > { %v800_v43 = vadd.f32 %v799_v36, %v785_v35 }
  0xaf   : > { %v813_v37 = vpop.f32.mrf.mxu2 }
  0xb0   : > { %v787_v38 = vpop.f32.mrf.mxu0  ;;  %v814_v45 = vadd.f32 %v813_v37, %v800_v43 }
  0xb1   : > { %v827_v39 = vpop.f32.mrf.mxu3 }
  0xb2   : > { %v801_v40 = vpop.f32.mrf.mxu1  ;;  %v828_v49 = vadd.f32 %v827_v39, %v814_v45 }
  0xb3   : > { %v802_v46 = vadd.f32 %v801_v40, %v787_v38 }
  0xb7   : > { %v815_v41 = vpop.f32.mrf.mxu2 }
  0xb8   : > { %v816_v50 = vadd.f32 %v815_v41, %v802_v46 }
  0xb9   : > { %v829_v44 = vpop.f32.mrf.mxu3 }
  0xba   : > { %v830_v53 = vadd.f32 %v829_v44, %v816_v50 }
  0xc8   : > { %v841_v42 = vpop.f32.mrf.mxu0 }
  0xc9   : > { %v842_v54 = vadd.f32 %v841_v42, %v828_v49 }
  0xca   : > { %v855_v47 = vpop.f32.mrf.mxu1 }
  0xcb   : > { %v856_v58 = vadd.f32 %v855_v47, %v842_v54 }
  0xcf   : > { %v869_v48 = vpop.f32.mrf.mxu2 }
  0xd0   : > { %v843_v51 = vpop.f32.mrf.mxu0  ;;  %v870_v63 = vadd.f32 %v869_v48, %v856_v58 }
  0xd1   : > { %v883_v52 = vpop.f32.mrf.mxu3  ;;  %v844_v55 = vadd.f32 %v843_v51, %v830_v53 }
  0xd2   : > { %v857_v57 = vpop.f32.mrf.mxu1  ;;  %v884_v3 = vadd.f32 %v883_v52, %v870_v63 }
  0xd3   : > { %v858_v61 = vadd.f32 %v857_v57, %v844_v55 }
  0xd7   : > { %v871_v59 = vpop.f32.mrf.mxu2 }
  0xd8   : > { %v872_v0 = vadd.f32 %v871_v59, %v858_v61 }
  0xd9   : > { %v885_v1 = vpop.f32.mrf.mxu3 }
  0xda   : > { %v886_v4 = vadd.f32 %v885_v1, %v872_v0 }
  0xe8   : > { %v897_v60 = vpop.f32.mrf.mxu0 }
  0xe9   : > { %v898_v6 = vadd.f32 %v897_v60, %v884_v3 }
  0xf0   : > { %v899_v5 = vpop.f32.mrf.mxu0 }
  0xf1   : > { %v900_v7 = vadd.f32 %v899_v5, %v886_v4 }
  0xf3   : > { %v902_v9 = vadd.f32 %v900_v7, %v898_v6 }
  0xf5   : > { %v903_v10 = vrot.slane %v902_v9, 4 }
  0xf7   : > { %v904_v12 = vadd.f32 %v903_v10, %v902_v9 }
  0xf9   : > { %v905_v13 = vrot.slane %v904_v12, 2 }
  0xfb   : > { %v906_v15 = vadd.f32 %v905_v13, %v904_v12 }
  0xfd   : > { %v907_v16 = vrot.slane %v906_v15, 1 }
  0xff   : > { %v908_v18 = vadd.f32 %v907_v16, %v906_v15 }
 0x101   : > { %v916_v19 = vmul.f32 %v915_v17, %v908_v18 }
 0x103   : > { %v917_v20 = vsub.f32 %v898_v6, %v916_v19  ;;  %v918_v21 = vsub.f32 %v900_v7, %v916_v19 }
 0x105   : > { %v919_v22 = vmul.f32 %v917_v20, %v917_v20  ;;  %v920_v23 = vmul.f32 %v918_v21, %v918_v21 }
 0x107   : > { %v921_v24 = vadd.f32 %v920_v23, %v919_v22 }
 0x109   : > { %v922_v25 = vrot.slane %v921_v24, 4 }
 0x10b   : > { %v923_v26 = vadd.f32 %v922_v25, %v921_v24 }
 0x10d   : > { %v924_v27 = vrot.slane %v923_v26, 2 }
 0x10f   : > { %v925_v28 = vadd.f32 %v924_v27, %v923_v26 }
 0x111   : > { %v926_v29 = vrot.slane %v925_v28, 1 }
 0x113   : > { %v927_v30 = vadd.f32 %v926_v29, %v925_v28 }
 0x115   : > { %v928_v31 = vmul.f32 %v927_v30, %v915_v17 }
 0x117   : > { %v929_v32 = vadd.f32 1e-05, %v928_v31 }
 0x119   : > { %1429 = vrsqrt.f32 %v929_v32  ;;  %vm936_vm2 = vweird.f32 %v929_v32 }
 0x11f   : > { %v1430_v33 = vpop.eup %1429 }
 0x120   : > { %v931_v34 = vmul.f32 %v1430_v33, %v929_v32  ;;  %vm937_vm1 = vweird.f32 %v1430_v33 }
 0x121   : > { %vm938_vm3 = vmor %vm936_vm2, %vm937_vm1 }
 0x122   : > { %v932_v35 = vmul.f32 %v1430_v33, %v931_v34 }
 0x124   : > { %v933_v36 = vmul.f32 0.5, %v932_v35 }
 0x126   : > { %v934_v37 = vsub.f32 1.5, %v933_v36 }
 0x128   : > { %v935_v38 = vmul.f32 %v1430_v33, %v934_v37 }
 0x12a   : > { %v939_v39 = vsel %vm938_vm3, %v1430_v33, %v935_v38 }
 0x12b   : > { %v940_v40 = vmul.f32 %v939_v39, %v917_v20  ;;  %v941_v41 = vmul.f32 %v939_v39, %v918_v21 }
 0x12d   : > { %v942_v42 = vmax.f32 %v940_v40, 0.0  ;;  %v943_v43 = vmax.f32 %v941_v41, 0.0 }
 0x12f   : > { %944 = vst [vmem:[%s143_s6] sm:$0xff] %v942_v42 }
 0x130   : > { %945 = vst [vmem:[%s143_s6 + $0x8] sm:$0xff] %v943_v43 }
 0x131 PF: > { %s12_s9 = sadd.s32 1, %s1437_s9  }
 0x132   : > { %p9_p4 = scmp.ge.s32.totalorder %s12_s9, 4  }
 0x134   :  { %11 = sbr.rel (!%p9_p4) target bundleno = 1 (0x1), region = 58 }

// kernel: generator_forward.22
= control target key start
LH: loop header
LB: loop body
LE: loop exit
PB: predicated region body
PF: predicated region fallthrough
CT: control target
= control target key end

     0   :  { %s1524_s12 = smov 0   ;;  %s1788_s0 = inlined_call_operand.vmem [shape: bf16[2,16,1152], index: 0, kind: input, shape index: {}]   ;;  %s1789_s1 = inlined_call_operand.vmem [shape: bf16[1152,128], index: 1, kind: input, shape index: {}]   ;;  %s1790_s2 = inlined_call_operand.vmem [shape: f32[2,16,128], index: 2, kind: input, shape index: {}]   ;;  %s1791_s3 = inlined_call_operand.vmem [shape: f32[2,16,128], index: 3, kind: output, shape index: {}]  }
   0x1 LB: > { %s1062_s13 = sadd.s32 4294967295, %s1501_s12   ;;  %p1066_p0 = scmp.ge.s32.totalorder %s1501_s12, 1  ;;  %s1501_s12 = sphi %s1524_s12, %s13_s12  }
   0x2   : > { %p147_p1 = scmp.lt.s32.totalorder %s1501_s12, 3 }
   0x4   : > { %p148_p2 = pnand %p1066_p0, %p147_p1 }
   0x5   : > { %p176_p3 = scmp.lt.s32.totalorder (!%p148_p2), %s1062_s13, 1 }
   0x6   : > { %151 = sbr.rel (%p148_p2) target bundleno = 305 (0x131), region = 32 }
   0xb   : > { %v1416_v0 = vld [vmem:[%s1789_s1 + $0x38] sm:$0xff]  ;;  %v1415_v4 = vld [vmem:[%s1789_s1 + $0x30] sm:$0xff]  ;;  %v1414_v8 = vld [vmem:[%s1789_s1 + $0x28] sm:$0xff]  ;;  %s1793_s13 = smov (!%p176_p3, %s1062_s13), 1 }
   0xc   : > { %v1432_v1 = vld [vmem:[%s1789_s1 + $0xb8] sm:$0xff]  ;;  %823 = vmatpush.bf16.msra.mxu0 %v1416_v0  ;;  %v1431_v5 = vld [vmem:[%s1789_s1 + $0xb0] sm:$0xff]  ;;  %v1430_v9 = vld [vmem:[%s1789_s1 + $0xa8] sm:$0xff]  ;;  %s1481_s10 = smul.u32 72, %s1793_s13 }
   0xd   : > { %v1424_v2 = vld [vmem:[%s1789_s1 + $0x78] sm:$0xff]  ;;  %851 = vmatpush.bf16.msra.mxu2 %v1432_v1  ;;  %v1423_v6 = vld [vmem:[%s1789_s1 + $0x70] sm:$0xff]  ;;  %v1422_v10 = vld [vmem:[%s1789_s1 + $0x68] sm:$0xff] }
   0xe   : > { %v1440_v3 = vld [vmem:[%s1789_s1 + $0xf8] sm:$0xff]  ;;  %837 = vmatpush.bf16.msra.mxu1 %v1424_v2  ;;  %v1439_v7 = vld [vmem:[%s1789_s1 + $0xf0] sm:$0xff]  ;;  %v1438_v11 = vld [vmem:[%s1789_s1 + $0xe8] sm:$0xff]  ;;  %s1626_s23 = scalar_lea.vmem %s1788_s0, %s1481_s10 }
   0xf   : > { %865 = vmatpush.bf16.msra.mxu3 %v1440_v3  ;;  %v1413_v12 = vld [vmem:[%s1789_s1 + $0x20] sm:$0xff]  ;;  %v1412_v16 = vld [vmem:[%s1789_s1 + $0x18] sm:$0xff]  ;;  %v1411_v20 = vld [vmem:[%s1789_s1 + $0x10] sm:$0xff] }
  0x10   : > { %824 = vmatpush.bf16.msra.mxu0 %v1415_v4  ;;  %v1429_v13 = vld [vmem:[%s1789_s1 + $0xa0] sm:$0xff]  ;;  %v1428_v17 = vld [vmem:[%s1789_s1 + $0x98] sm:$0xff]  ;;  %v1427_v21 = vld [vmem:[%s1789_s1 + $0x90] sm:$0xff] }
  0x11   : > { %852 = vmatpush.bf16.msra.mxu2 %v1431_v5  ;;  %v1421_v14 = vld [vmem:[%s1789_s1 + $0x60] sm:$0xff]  ;;  %v1420_v18 = vld [vmem:[%s1789_s1 + $0x58] sm:$0xff]  ;;  %v1419_v22 = vld [vmem:[%s1789_s1 + $0x50] sm:$0xff] }
  0x12   : > { %838 = vmatpush.bf16.msra.mxu1 %v1423_v6  ;;  %v1437_v15 = vld [vmem:[%s1789_s1 + $0xe0] sm:$0xff]  ;;  %v1436_v19 = vld [vmem:[%s1789_s1 + $0xd8] sm:$0xff]  ;;  %v1435_v23 = vld [vmem:[%s1789_s1 + $0xd0] sm:$0xff] }
  0x13   : > { %866 = vmatpush.bf16.msra.mxu3 %v1439_v7  ;;  %v1410_v24 = vld [vmem:[%s1789_s1 + $0x8] sm:$0xff]  ;;  %v1409_v28 = vld [vmem:[%s1789_s1] sm:$0xff]  ;;  %v1448_v30 = vld [vmem:[%s1789_s1 + $0x138] sm:$0xff] }
  0x14   : > { %825 = vmatpush.bf16.msra.mxu0 %v1414_v8  ;;  %v1426_v25 = vld [vmem:[%s1789_s1 + $0x88] sm:$0xff]  ;;  %v1425_v29 = vld [vmem:[%s1789_s1 + $0x80] sm:$0xff]  ;;  %v1464_v31 = vld [vmem:[%s1789_s1 + $0x1b8] sm:$0xff] }
  0x15   : > { %853 = vmatpush.bf16.msra.mxu2 %v1430_v9  ;;  %v1418_v26 = vld [vmem:[%s1789_s1 + $0x48] sm:$0xff]  ;;  %v1417_v32 = vld [vmem:[%s1789_s1 + $0x40] sm:$0xff]  ;;  %v1456_v38 = vld [vmem:[%s1789_s1 + $0x178] sm:$0xff] }
  0x16   : > { %839 = vmatpush.bf16.msra.mxu1 %v1422_v10  ;;  %v1434_v27 = vld [vmem:[%s1789_s1 + $0xc8] sm:$0xff]  ;;  %v1433_v33 = vld [vmem:[%s1789_s1 + $0xc0] sm:$0xff]  ;;  %v1472_v39 = vld [vmem:[%s1789_s1 + $0x1f8] sm:$0xff] }
  0x17   : > { %867 = vmatpush.bf16.msra.mxu3 %v1438_v11  ;;  %v1074_v34 = vld [vmem:[%s1626_s23] sm:$0xf]  ;;  %v1404_v35 = vld [vmem:[%s1626_s23 + $0x20] sm:$0xf0]  ;;  %v1082_v36 = vld [vmem:[%s1626_s23 + $0x8] sm:$0xf] }
  0x18   : > { %826 = vmatpush.bf16.msra.mxu0 %v1413_v12  ;;  %v1405_v37 = vld [vmem:[%s1626_s23 + $0x28] sm:$0xf0]  ;;  %v1400_v40 = vld [vmem:[%s1626_s23 + $0x4] sm:$0xf]  ;;  %v1076_v41 = vld [vmem:[%s1626_s23 + $0x24] sm:$0xf0]  ;;  %v1075_v44 = vor.u32 %v1404_v35, %v1074_v34 }
  0x19   : > { %854 = vmatpush.bf16.msra.mxu2 %v1429_v13  ;;  %v1401_v42 = vld [vmem:[%s1626_s23 + $0xc] sm:$0xf]  ;;  %v1084_v43 = vld [vmem:[%s1626_s23 + $0x2c] sm:$0xf0]  ;;  %v1083_v45 = vor.u32 %v1405_v37, %v1082_v36  ;;  %v1079_v48 = vor.u32 %v1400_v40, %v1076_v41  ;;  %v1445_v56 = vld [vmem:[%s1789_s1 + $0x120] sm:$0xff] }
  0x1a   : > { %840 = vmatpush.bf16.msra.mxu1 %v1421_v14  ;;  %v1447_v46 = vld [vmem:[%s1789_s1 + $0x130] sm:$0xff]  ;;  %v1087_v49 = vor.u32 %v1401_v42, %v1084_v43  ;;  %v1446_v52 = vld [vmem:[%s1789_s1 + $0x128] sm:$0xff]  ;;  %v1461_v57 = vld [vmem:[%s1789_s1 + $0x1a0] sm:$0xff] }
  0x1b   : > { %868 = vmatpush.bf16.msra.mxu3 %v1437_v15  ;;  %v1463_v47 = vld [vmem:[%s1789_s1 + $0x1b0] sm:$0xff]  ;;  %v1462_v53 = vld [vmem:[%s1789_s1 + $0x1a8] sm:$0xff]  ;;  %v1453_v58 = vld [vmem:[%s1789_s1 + $0x160] sm:$0xff] }
  0x1c   : > { %827 = vmatpush.bf16.msra.mxu0 %v1412_v16  ;;  %v1455_v50 = vld [vmem:[%s1789_s1 + $0x170] sm:$0xff]  ;;  %v1454_v54 = vld [vmem:[%s1789_s1 + $0x168] sm:$0xff]  ;;  %v1469_v59 = vld [vmem:[%s1789_s1 + $0x1e0] sm:$0xff] }
  0x1d   : > { %855 = vmatpush.bf16.msra.mxu2 %v1428_v17  ;;  %v1471_v51 = vld [vmem:[%s1789_s1 + $0x1f0] sm:$0xff]  ;;  %v1470_v55 = vld [vmem:[%s1789_s1 + $0x1e8] sm:$0xff]  ;;  %v1444_v60 = vld [vmem:[%s1789_s1 + $0x118] sm:$0xff] }
  0x1e   : > { %841 = vmatpush.bf16.msra.mxu1 %v1420_v18  ;;  %v1460_v61 = vld [vmem:[%s1789_s1 + $0x198] sm:$0xff]  ;;  %v1443_v0 = vld [vmem:[%s1789_s1 + $0x110] sm:$0xff]  ;;  %v1442_v4 = vld [vmem:[%s1789_s1 + $0x108] sm:$0xff] }
  0x1f   : > { %869 = vmatpush.bf16.msra.mxu3 %v1436_v19  ;;  %v1452_v62 = vld [vmem:[%s1789_s1 + $0x158] sm:$0xff]  ;;  %v1459_v1 = vld [vmem:[%s1789_s1 + $0x190] sm:$0xff]  ;;  %v1458_v5 = vld [vmem:[%s1789_s1 + $0x188] sm:$0xff] }
  0x20   : > { %828 = vmatpush.bf16.msra.mxu0 %v1411_v20  ;;  %v1468_v63 = vld [vmem:[%s1789_s1 + $0x1d8] sm:$0xff]  ;;  %v1451_v2 = vld [vmem:[%s1789_s1 + $0x150] sm:$0xff]  ;;  %v1450_v6 = vld [vmem:[%s1789_s1 + $0x148] sm:$0xff] }
  0x21   : > { %856 = vmatpush.bf16.msra.mxu2 %v1427_v21  ;;  %v1467_v3 = vld [vmem:[%s1789_s1 + $0x1d0] sm:$0xff]  ;;  %v1466_v7 = vld [vmem:[%s1789_s1 + $0x1c8] sm:$0xff]  ;;  %v1441_v8 = vld [vmem:[%s1789_s1 + $0x100] sm:$0xff] }
  0x22   : > { %842 = vmatpush.bf16.msra.mxu1 %v1419_v22  ;;  %v1457_v9 = vld [vmem:[%s1789_s1 + $0x180] sm:$0xff]  ;;  %v1480_v10 = vld [vmem:[%s1789_s1 + $0x238] sm:$0xff]  ;;  %v1090_v11 = vld [vmem:[%s1626_s23 + $0x10] sm:$0xf] }
  0x23   : > { %870 = vmatpush.bf16.msra.mxu3 %v1435_v23  ;;  %v1406_v12 = vld [vmem:[%s1626_s23 + $0x30] sm:$0xf0]  ;;  %v1098_v13 = vld [vmem:[%s1626_s23 + $0x18] sm:$0xf]  ;;  %v1407_v14 = vld [vmem:[%s1626_s23 + $0x38] sm:$0xf0] }
  0x24   : > { %829 = vmatpush.bf16.msra.mxu0 %v1410_v24  ;;  %v1449_v15 = vld [vmem:[%s1789_s1 + $0x140] sm:$0xff]  ;;  %v1402_v17 = vld [vmem:[%s1626_s23 + $0x14] sm:$0xf]  ;;  %v1092_v18 = vld [vmem:[%s1626_s23 + $0x34] sm:$0xf0]  ;;  %v1091_v21 = vor.u32 %v1406_v12, %v1090_v11  ;;  %v1099_v22 = vor.u32 %v1407_v14, %v1098_v13 }
  0x25   : > { %857 = vmatpush.bf16.msra.mxu2 %v1426_v25  ;;  %v1465_v16 = vld [vmem:[%s1789_s1 + $0x1c0] sm:$0xff]  ;;  %v1403_v19 = vld [vmem:[%s1626_s23 + $0x1c] sm:$0xf]  ;;  %v1095_v23 = vor.u32 %v1402_v17, %v1092_v18  ;;  %v1479_v25 = vld [vmem:[%s1789_s1 + $0x230] sm:$0xff] }
  0x26   : > { %843 = vmatpush.bf16.msra.mxu1 %v1418_v26  ;;  %v1100_v20 = vld [vmem:[%s1626_s23 + $0x3c] sm:$0xf0]  ;;  %v1478_v26 = vld [vmem:[%s1789_s1 + $0x228] sm:$0xff] }
  0x27   : > { %871 = vmatpush.bf16.msra.mxu3 %v1434_v27  ;;  %v1103_v24 = vor.u32 %v1403_v19, %v1100_v20  ;;  %v1477_v27 = vld [vmem:[%s1789_s1 + $0x220] sm:$0xff] }
  0x28   : > { %830 = vmatpush.bf16.msra.mxu0 %v1409_v28  ;;  %v1476_v28 = vld [vmem:[%s1789_s1 + $0x218] sm:$0xff] }
  0x29   : > { %858 = vmatpush.bf16.msra.mxu2 %v1425_v29  ;;  %v1475_v29 = vld [vmem:[%s1789_s1 + $0x210] sm:$0xff] }
  0x2a   : > { %844 = vmatpush.bf16.msra.mxu1 %v1417_v32  ;;  %v1106_v32 = vld [vmem:[%s1626_s23 + $0x20] sm:$0xf] }
  0x2b   : > { %872 = vmatpush.bf16.msra.mxu3 %v1433_v33  ;;  %831 = vmatmul.bf16.vlgmr.msra.gmra.mxu0 %v1075_v44  ;;  %v1408_v33 = vld [vmem:[%s1626_s23 + $0x40] sm:$0xf0]  ;;  %s1398_s23 = sshll.u32 %s1793_s13, 4 }
  0x2c   : > { %879 = vmatpush.bf16.msrb.mxu0 %v1448_v30  ;;  %859 = vmatmul.bf16.vlgmr.msra.gmra.mxu2 %v1083_v45  ;;  %v1474_v30 = vld [vmem:[%s1789_s1 + $0x208] sm:$0xff]  ;;  %v1107_v34 = vor.u32 %v1408_v33, %v1106_v32  ;;  %s185_s17 = scalar_lea.vmem %s1790_s2, %s1398_s23  ;;  %s190_s20 = scalar_lea.vmem %s1791_s3, %s1398_s23 }
  0x2d   : > { %907 = vmatpush.bf16.msrb.mxu2 %v1464_v31  ;;  %845 = vmatmul.bf16.vlgmr.msra.gmra.mxu1 %v1079_v48  ;;  %v1473_v31 = vld [vmem:[%s1789_s1 + $0x200] sm:$0xff] }
  0x2e   : > { %893 = vmatpush.bf16.msrb.mxu1 %v1456_v38  ;;  %873 = vmatmul.bf16.vlgmr.msra.gmra.mxu3 %v1087_v49 }
  0x2f   : > { %921 = vmatpush.bf16.msrb.mxu3 %v1472_v39 }
  0x30   : > { %880 = vmatpush.bf16.msrb.mxu0 %v1447_v46 }
  0x31   : > { %908 = vmatpush.bf16.msrb.mxu2 %v1463_v47 }
  0x32   : > { %894 = vmatpush.bf16.msrb.mxu1 %v1455_v50 }
  0x33   : > { %922 = vmatpush.bf16.msrb.mxu3 %v1471_v51 }
  0x34   : > { %881 = vmatpush.bf16.msrb.mxu0 %v1446_v52 }
  0x35   : > { %909 = vmatpush.bf16.msrb.mxu2 %v1462_v53 }
  0x36   : > { %895 = vmatpush.bf16.msrb.mxu1 %v1454_v54 }
  0x37   : > { %923 = vmatpush.bf16.msrb.mxu3 %v1470_v55 }
  0x38   : > { %882 = vmatpush.bf16.msrb.mxu0 %v1445_v56  ;;  %v1503_v56 = vmov 16.0  }
  0x39   : > { %910 = vmatpush.bf16.msrb.mxu2 %v1461_v57  ;;  %1491 = vrcp.f32 %v1503_v56 }
  0x3a   : > { %896 = vmatpush.bf16.msrb.mxu1 %v1453_v58 }
  0x3b   : > { %924 = vmatpush.bf16.msrb.mxu3 %v1469_v59 }
  0x3c   : > { %883 = vmatpush.bf16.msrb.mxu0 %v1444_v60 }
  0x3d   : > { %911 = vmatpush.bf16.msrb.mxu2 %v1460_v61 }
  0x3e   : > { %897 = vmatpush.bf16.msrb.mxu1 %v1452_v62 }
  0x3f   : > { %925 = vmatpush.bf16.msrb.mxu3 %v1468_v63  ;;  %v1492_v62 = vpop.eup %1491 }
  0x40   : > { %884 = vmatpush.bf16.msrb.mxu0 %v1443_v0  ;;  %vm961_vm0 = vweird.f32 %v1492_v62 }
  0x41   : > { %912 = vmatpush.bf16.msrb.mxu2 %v1459_v1 }
  0x42   : > { %898 = vmatpush.bf16.msrb.mxu1 %v1451_v2  ;;  %v957_v2 = vmul.f32 16.0, %v1492_v62 }
  0x43   : > { %926 = vmatpush.bf16.msrb.mxu3 %v1467_v3 }
  0x44   : > { %885 = vmatpush.bf16.msrb.mxu0 %v1442_v4 }
  0x45   : > { %913 = vmatpush.bf16.msrb.mxu2 %v1458_v5 }
  0x46   : > { %899 = vmatpush.bf16.msrb.mxu1 %v1450_v6 }
  0x47   : > { %927 = vmatpush.bf16.msrb.mxu3 %v1466_v7 }
  0x48   : > { %886 = vmatpush.bf16.msrb.mxu0 %v1441_v8  ;;  %v958_v8 = vsub.f32 1.0, %v957_v2 }
  0x49   : > { %914 = vmatpush.bf16.msrb.mxu2 %v1457_v9 }
  0x4a   : > { %900 = vmatpush.bf16.msrb.mxu1 %v1449_v15  ;;  %v959_v11 = vmul.f32 %v1492_v62, %v958_v8 }
  0x4b   : > { %928 = vmatpush.bf16.msrb.mxu3 %v1465_v16  ;;  %887 = vmatmul.bf16.vlgmr.msrb.gmra.mxu0 %v1091_v21 }
  0x4c   : > { %935 = vmatpush.bf16.msra.mxu0 %v1480_v10  ;;  %915 = vmatmul.bf16.vlgmr.msrb.gmra.mxu2 %v1099_v22  ;;  %v960_v14 = vadd.f32 %v1492_v62, %v959_v11 }
  0x4d   : > { %901 = vmatmul.bf16.vlgmr.msrb.gmra.mxu1 %v1095_v23 }
  0x4e   : > { %929 = vmatmul.bf16.vlgmr.msrb.gmra.mxu3 %v1103_v24  ;;  %v962_v17 = vsel %vm961_vm0, %v1492_v62, %v960_v14 }
  0x50   : > { %936 = vmatpush.bf16.msra.mxu0 %v1479_v25 }
  0x54   : > { %937 = vmatpush.bf16.msra.mxu0 %v1478_v26 }
  0x58   : > { %938 = vmatpush.bf16.msra.mxu0 %v1477_v27 }
  0x5c   : > { %939 = vmatpush.bf16.msra.mxu0 %v1476_v28 }
  0x60   : > { %940 = vmatpush.bf16.msra.mxu0 %v1475_v29 }
  0x64   : > { %941 = vmatpush.bf16.msra.mxu0 %v1474_v30 }
  0x68   : > { %942 = vmatpush.bf16.msra.mxu0 %v1473_v31 }
  0x6b   : > { %943 = vmatmul.bf16.vlgmr.msra.gmra.mxu0 %v1107_v34 }
  0xa8   : > { %v832_v35 = vpop.f32.mrf.mxu0 }
  0xaa   : > { %v846_v36 = vpop.f32.mrf.mxu1 }
  0xab   : > { %v847_v43 = vadd.f32 %v846_v36, %v832_v35 }
  0xaf   : > { %v860_v37 = vpop.f32.mrf.mxu2 }
  0xb0   : > { %v834_v38 = vpop.f32.mrf.mxu0  ;;  %v861_v45 = vadd.f32 %v860_v37, %v847_v43 }
  0xb1   : > { %v874_v39 = vpop.f32.mrf.mxu3 }
  0xb2   : > { %v848_v40 = vpop.f32.mrf.mxu1  ;;  %v875_v49 = vadd.f32 %v874_v39, %v861_v45 }
  0xb3   : > { %v849_v46 = vadd.f32 %v848_v40, %v834_v38  ;;  %v989_v40 = vld [vmem:[%s185_s17] sm:$0xff] }
  0xb7   : > { %v862_v41 = vpop.f32.mrf.mxu2 }
  0xb8   : > { %v863_v50 = vadd.f32 %v862_v41, %v849_v46  ;;  %v990_v41 = vld [vmem:[%s185_s17 + $0x8] sm:$0xff] }
  0xb9   : > { %v876_v44 = vpop.f32.mrf.mxu3 }
  0xba   : > { %v877_v53 = vadd.f32 %v876_v44, %v863_v50 }
  0xc8   : > { %v888_v42 = vpop.f32.mrf.mxu0 }
  0xc9   : > { %v889_v54 = vadd.f32 %v888_v42, %v875_v49 }
  0xca   : > { %v902_v47 = vpop.f32.mrf.mxu1 }
  0xcb   : > { %v903_v58 = vadd.f32 %v902_v47, %v889_v54 }
  0xcf   : > { %v916_v48 = vpop.f32.mrf.mxu2 }
  0xd0   : > { %v890_v51 = vpop.f32.mrf.mxu0  ;;  %v917_v63 = vadd.f32 %v916_v48, %v903_v58 }
  0xd1   : > { %v930_v52 = vpop.f32.mrf.mxu3  ;;  %v891_v55 = vadd.f32 %v890_v51, %v877_v53 }
  0xd2   : > { %v904_v57 = vpop.f32.mrf.mxu1  ;;  %v931_v3 = vadd.f32 %v930_v52, %v917_v63 }
  0xd3   : > { %v905_v61 = vadd.f32 %v904_v57, %v891_v55 }
  0xd7   : > { %v918_v59 = vpop.f32.mrf.mxu2 }
  0xd8   : > { %v919_v0 = vadd.f32 %v918_v59, %v905_v61 }
  0xd9   : > { %v932_v1 = vpop.f32.mrf.mxu3 }
  0xda   : > { %v933_v4 = vadd.f32 %v932_v1, %v919_v0 }
  0xe8   : > { %v944_v60 = vpop.f32.mrf.mxu0 }
  0xe9   : > { %v945_v6 = vadd.f32 %v944_v60, %v931_v3 }
  0xf0   : > { %v946_v5 = vpop.f32.mrf.mxu0 }
  0xf1   : > { %v947_v7 = vadd.f32 %v946_v5, %v933_v4 }
  0xf3   : > { %v949_v9 = vadd.f32 %v947_v7, %v945_v6 }
  0xf5   : > { %v950_v10 = vrot.slane %v949_v9, 4 }
  0xf7   : > { %v951_v12 = vadd.f32 %v950_v10, %v949_v9 }
  0xf9   : > { %v952_v13 = vrot.slane %v951_v12, 2 }
  0xfb   : > { %v953_v15 = vadd.f32 %v952_v13, %v951_v12 }
  0xfd   : > { %v954_v16 = vrot.slane %v953_v15, 1 }
  0xff   : > { %v955_v18 = vadd.f32 %v954_v16, %v953_v15 }
 0x101   : > { %v963_v19 = vmul.f32 %v962_v17, %v955_v18 }
 0x103   : > { %v964_v20 = vsub.f32 %v945_v6, %v963_v19  ;;  %v965_v21 = vsub.f32 %v947_v7, %v963_v19 }
 0x105   : > { %v966_v22 = vmul.f32 %v964_v20, %v964_v20  ;;  %v967_v23 = vmul.f32 %v965_v21, %v965_v21 }
 0x107   : > { %v968_v24 = vadd.f32 %v967_v23, %v966_v22 }
 0x109   : > { %v969_v25 = vrot.slane %v968_v24, 4 }
 0x10b   : > { %v970_v26 = vadd.f32 %v969_v25, %v968_v24 }
 0x10d   : > { %v971_v27 = vrot.slane %v970_v26, 2 }
 0x10f   : > { %v972_v28 = vadd.f32 %v971_v27, %v970_v26 }
 0x111   : > { %v973_v29 = vrot.slane %v972_v28, 1 }
 0x113   : > { %v974_v30 = vadd.f32 %v973_v29, %v972_v28 }
 0x115   : > { %v975_v31 = vmul.f32 %v974_v30, %v962_v17 }
 0x117   : > { %v976_v32 = vadd.f32 1e-05, %v975_v31 }
 0x119   : > { %1493 = vrsqrt.f32 %v976_v32  ;;  %vm983_vm2 = vweird.f32 %v976_v32 }
 0x11f   : > { %v1494_v33 = vpop.eup %1493 }
 0x120   : > { %v978_v34 = vmul.f32 %v1494_v33, %v976_v32  ;;  %vm984_vm1 = vweird.f32 %v1494_v33 }
 0x121   : > { %vm985_vm3 = vmor %vm983_vm2, %vm984_vm1 }
 0x122   : > { %v979_v35 = vmul.f32 %v1494_v33, %v978_v34 }
 0x124   : > { %v980_v36 = vmul.f32 0.5, %v979_v35 }
 0x126   : > { %v981_v37 = vsub.f32 1.5, %v980_v36 }
 0x128   : > { %v982_v38 = vmul.f32 %v1494_v33, %v981_v37 }
 0x12a   : > { %v986_v39 = vsel %vm985_vm3, %v1494_v33, %v982_v38 }
 0x12b   : > { %v987_v42 = vmul.f32 %v986_v39, %v964_v20  ;;  %v988_v43 = vmul.f32 %v986_v39, %v965_v21 }
 0x12d   : > { %v991_v44 = vadd.f32 %v989_v40, %v987_v42  ;;  %v992_v45 = vadd.f32 %v990_v41, %v988_v43 }
 0x12f   : > { %993 = vst [vmem:[%s190_s20] sm:$0xff] %v991_v44 }
 0x130   : > { %994 = vst [vmem:[%s190_s20 + $0x8] sm:$0xff] %v992_v45 }
 0x131 PF: > { %s13_s12 = sadd.s32 1, %s1501_s12  }
 0x132   : > { %p10_p4 = scmp.ge.s32.totalorder %s13_s12, 4  }
 0x134   :  { %12 = sbr.rel (!%p10_p4) target bundleno = 1 (0x1), region = 65 }

// kernel: generator_forward.33
= control target key start
LH: loop header
LB: loop body
LE: loop exit
PB: predicated region body
PF: predicated region fallthrough
CT: control target
= control target key end

     0   :  { %s2005_s12 = smov 0   ;;  %s2381_s0 = inlined_call_operand.vmem [shape: bf16[2,64,1152], index: 0, kind: input, shape index: {}]   ;;  %s2382_s1 = inlined_call_operand.vmem [shape: bf16[1152,64], index: 1, kind: input, shape index: {}]   ;;  %s2383_s2 = inlined_call_operand.vmem [shape: f32[1,64], index: 2, kind: input, shape index: {}]   ;;  %s2384_s3 = inlined_call_operand.vmem [shape: f32[2,64,64], index: 3, kind: output, shape index: {}]  }
   0x1 LB: > { %s1394_s13 = sadd.s32 4294967295, %s1982_s12   ;;  %p1398_p0 = scmp.ge.s32.totalorder %s1982_s12, 1  ;;  %s1982_s12 = sphi %s2005_s12, %s13_s12  }
   0x2   : > { %p137_p1 = scmp.lt.s32.totalorder %s1982_s12, 3 }
   0x4   : > { %p138_p2 = pnand %p1398_p0, %p137_p1 }
   0x5   : > { %p161_p3 = scmp.lt.s32.totalorder (!%p138_p2), %s1394_s13, 1 }
   0x6   : > { %141 = sbr.rel (%p138_p2) target bundleno = 411 (0x19b), region = 32 }
   0xb   : > { %v1880_v0 = vld [vmem:[%s2382_s1 + $0x38] sm:$0xff]  ;;  %v1879_v2 = vld [vmem:[%s2382_s1 + $0x30] sm:$0xff]  ;;  %v1878_v6 = vld [vmem:[%s2382_s1 + $0x28] sm:$0xff]  ;;  %s2386_s13 = smov (!%p161_p3, %s1394_s13), 1  ;;  %vm1236_vm0 = vcmask 523264  }
   0xc   : > { %v1896_v1 = vld [vmem:[%s2382_s1 + $0xb8] sm:$0xff]  ;;  %1945 = vmatpush.bf16.msra.mxu1 %v1880_v0  ;;  %975 = vmatpush.bf16.msra.mxu0 %v1880_v0  ;;  %v1895_v3 = vld [vmem:[%s2382_s1 + $0xb0] sm:$0xff]  ;;  %v1894_v7 = vld [vmem:[%s2382_s1 + $0xa8] sm:$0xff]  ;;  %s1961_s21 = smul.u32 288, %s2386_s13 }
   0xd   : > { %1033 = vmatpush.bf16.msra.mxu2 %v1896_v1  ;;  %v1904_v4 = vld [vmem:[%s2382_s1 + $0xf8] sm:$0xff]  ;;  %v1903_v5 = vld [vmem:[%s2382_s1 + $0xf0] sm:$0xff]  ;;  %v1902_v8 = vld [vmem:[%s2382_s1 + $0xe8] sm:$0xff] }
   0xe   : > { %1062 = vmatpush.bf16.msra.mxu3 %v1904_v4  ;;  %v1877_v9 = vld [vmem:[%s2382_s1 + $0x20] sm:$0xff]  ;;  %v1876_v12 = vld [vmem:[%s2382_s1 + $0x18] sm:$0xff]  ;;  %v1875_v15 = vld [vmem:[%s2382_s1 + $0x10] sm:$0xff]  ;;  %s2080_s30 = scalar_lea.vmem %s2381_s0, %s1961_s21 }
   0xf   : > { %v1893_v10 = vld [vmem:[%s2382_s1 + $0xa0] sm:$0xff]  ;;  %v1892_v13 = vld [vmem:[%s2382_s1 + $0x98] sm:$0xff]  ;;  %v1891_v16 = vld [vmem:[%s2382_s1 + $0x90] sm:$0xff] }
  0x10   : > { %1946 = vmatpush.bf16.msra.mxu1 %v1879_v2  ;;  %976 = vmatpush.bf16.msra.mxu0 %v1879_v2  ;;  %v1901_v11 = vld [vmem:[%s2382_s1 + $0xe0] sm:$0xff]  ;;  %v1900_v14 = vld [vmem:[%s2382_s1 + $0xd8] sm:$0xff]  ;;  %v1899_v17 = vld [vmem:[%s2382_s1 + $0xd0] sm:$0xff] }
  0x11   : > { %1034 = vmatpush.bf16.msra.mxu2 %v1895_v3  ;;  %v1874_v18 = vld [vmem:[%s2382_s1 + $0x8] sm:$0xff]  ;;  %v1873_v20 = vld [vmem:[%s2382_s1] sm:$0xff]  ;;  %v1476_v21 = vld [vmem:[%s2080_s30 + $0x90] sm:$0xf] }
  0x12   : > { %1063 = vmatpush.bf16.msra.mxu3 %v1903_v5  ;;  %v1890_v19 = vld [vmem:[%s2382_s1 + $0x88] sm:$0xff]  ;;  %v1888_v22 = vld [vmem:[%s2382_s1 + $0x78] sm:$0xff]  ;;  %v1859_v24 = vld [vmem:[%s2080_s30 + $0xb0] sm:$0xf0] }
  0x13   : > { %v1898_v23 = vld [vmem:[%s2382_s1 + $0xc8] sm:$0xff]  ;;  %v1404_v25 = vld [vmem:[%s2080_s30] sm:$0xf]  ;;  %v1841_v26 = vld [vmem:[%s2080_s30 + $0x20] sm:$0xf0]  ;;  %v1477_v32 = vor.u32 %v1859_v24, %v1476_v21 }
  0x14   : > { %1947 = vmatpush.bf16.msra.mxu1 %v1878_v6  ;;  %977 = vmatpush.bf16.msra.mxu0 %v1878_v6  ;;  %v1889_v27 = vld [vmem:[%s2382_s1 + $0x80] sm:$0xff]  ;;  %v1412_v28 = vld [vmem:[%s2080_s30 + $0x8] sm:$0xf]  ;;  %v1842_v29 = vld [vmem:[%s2080_s30 + $0x28] sm:$0xf0]  ;;  %v1405_v33 = vor.u32 %v1841_v26, %v1404_v25 }
  0x15   : > { %1035 = vmatpush.bf16.msra.mxu2 %v1894_v7  ;;  %v1912_v30 = vld [vmem:[%s2382_s1 + $0x138] sm:$0xff]  ;;  %v1413_v34 = vor.u32 %v1842_v29, %v1412_v28  ;;  %v1897_v35 = vld [vmem:[%s2382_s1 + $0xc0] sm:$0xff]  ;;  %v1838_v36 = vld [vmem:[%s2080_s30 + $0xc] sm:$0xf] }
  0x16   : > { %1064 = vmatpush.bf16.msra.mxu3 %v1902_v8  ;;  %v1928_v31 = vld [vmem:[%s2382_s1 + $0x1b8] sm:$0xff]  ;;  %v1414_v37 = vld [vmem:[%s2080_s30 + $0x2c] sm:$0xf0]  ;;  %v1886_v43 = vld [vmem:[%s2382_s1 + $0x68] sm:$0xff] }
  0x17   : > { %v1887_v38 = vld [vmem:[%s2382_s1 + $0x70] sm:$0xff]  ;;  %v1936_v39 = vld [vmem:[%s2382_s1 + $0x1f8] sm:$0xff]  ;;  %v1417_v42 = vor.u32 %v1838_v36, %v1414_v37  ;;  %v1910_v45 = vld [vmem:[%s2382_s1 + $0x128] sm:$0xff] }
  0x18   : > { %1948 = vmatpush.bf16.msra.mxu1 %v1877_v9  ;;  %978 = vmatpush.bf16.msra.mxu0 %v1877_v9  ;;  %v1911_v40 = vld [vmem:[%s2382_s1 + $0x130] sm:$0xff]  ;;  %v1926_v46 = vld [vmem:[%s2382_s1 + $0x1a8] sm:$0xff]  ;;  %v1885_v47 = vld [vmem:[%s2382_s1 + $0x60] sm:$0xff] }
  0x19   : > { %1036 = vmatpush.bf16.msra.mxu2 %v1893_v10  ;;  %v1927_v41 = vld [vmem:[%s2382_s1 + $0x1b0] sm:$0xff]  ;;  %v1934_v48 = vld [vmem:[%s2382_s1 + $0x1e8] sm:$0xff]  ;;  %v1909_v49 = vld [vmem:[%s2382_s1 + $0x120] sm:$0xff] }
  0x1a   : > { %1065 = vmatpush.bf16.msra.mxu3 %v1901_v11  ;;  %v1935_v44 = vld [vmem:[%s2382_s1 + $0x1f0] sm:$0xff]  ;;  %v1925_v50 = vld [vmem:[%s2382_s1 + $0x1a0] sm:$0xff]  ;;  %v1512_v51 = vld [vmem:[%s2080_s30 + $0xd8] sm:$0xf] }
  0x1b   : > { %v1868_v52 = vld [vmem:[%s2080_s30 + $0xf8] sm:$0xf0]  ;;  %v1440_v53 = vld [vmem:[%s2080_s30 + $0x48] sm:$0xf]  ;;  %v1850_v54 = vld [vmem:[%s2080_s30 + $0x68] sm:$0xf0] }
  0x1c   : > { %1949 = vmatpush.bf16.msra.mxu1 %v1876_v12  ;;  %979 = vmatpush.bf16.msra.mxu0 %v1876_v12  ;;  %v1884_v55 = vld [vmem:[%s2382_s1 + $0x58] sm:$0xff]  ;;  %v1448_v56 = vld [vmem:[%s2080_s30 + $0x50] sm:$0xf]  ;;  %v1851_v57 = vld [vmem:[%s2080_s30 + $0x70] sm:$0xf0]  ;;  %v1513_v59 = vor.u32 %v1868_v52, %v1512_v51  ;;  %v1441_v60 = vor.u32 %v1850_v54, %v1440_v53 }
  0x1d   : > { %1037 = vmatpush.bf16.msra.mxu2 %v1892_v13  ;;  %v1908_v58 = vld [vmem:[%s2382_s1 + $0x118] sm:$0xff]  ;;  %v1449_v61 = vor.u32 %v1851_v57, %v1448_v56  ;;  %v1847_v62 = vld [vmem:[%s2080_s30 + $0x54] sm:$0xf]  ;;  %v1882_v4 = vld [vmem:[%s2382_s1 + $0x48] sm:$0xff] }
  0x1e   : > { %1066 = vmatpush.bf16.msra.mxu3 %v1900_v14  ;;  %v1450_v63 = vld [vmem:[%s2080_s30 + $0x74] sm:$0xf0]  ;;  %v1883_v0 = vld [vmem:[%s2382_s1 + $0x50] sm:$0xff]  ;;  %v1933_v5 = vld [vmem:[%s2382_s1 + $0x1e0] sm:$0xff] }
  0x1f   : > { %v1907_v1 = vld [vmem:[%s2382_s1 + $0x110] sm:$0xff]  ;;  %v1453_v2 = vor.u32 %v1847_v62, %v1450_v63  ;;  %v1924_v3 = vld [vmem:[%s2382_s1 + $0x198] sm:$0xff]  ;;  %v1906_v6 = vld [vmem:[%s2382_s1 + $0x108] sm:$0xff] }
  0x20   : > { %1950 = vmatpush.bf16.msra.mxu1 %v1875_v15  ;;  %980 = vmatpush.bf16.msra.mxu0 %v1875_v15  ;;  %v1923_v7 = vld [vmem:[%s2382_s1 + $0x190] sm:$0xff]  ;;  %v1932_v8 = vld [vmem:[%s2382_s1 + $0x1d8] sm:$0xff]  ;;  %v1881_v9 = vld [vmem:[%s2382_s1 + $0x40] sm:$0xff] }
  0x21   : > { %1038 = vmatpush.bf16.msra.mxu2 %v1891_v16  ;;  %v1920_v10 = vld [vmem:[%s2382_s1 + $0x178] sm:$0xff]  ;;  %v1905_v11 = vld [vmem:[%s2382_s1 + $0x100] sm:$0xff]  ;;  %v1406_v14 = vld [vmem:[%s2080_s30 + $0x24] sm:$0xf0] }
  0x22   : > { %1067 = vmatpush.bf16.msra.mxu3 %v1899_v17  ;;  %v1837_v12 = vld [vmem:[%s2080_s30 + $0x4] sm:$0xf]  ;;  %v1944_v13 = vld [vmem:[%s2382_s1 + $0x238] sm:$0xff]  ;;  %v1420_v15 = vld [vmem:[%s2080_s30 + $0x10] sm:$0xf] }
  0x23   : > { %v1843_v16 = vld [vmem:[%s2080_s30 + $0x30] sm:$0xf0]  ;;  %v1484_v17 = vld [vmem:[%s2080_s30 + $0x98] sm:$0xf]  ;;  %v1486_v24 = vld [vmem:[%s2080_s30 + $0xbc] sm:$0xf0] }
  0x24   : > { %1951 = vmatpush.bf16.msra.mxu1 %v1874_v18  ;;  %981 = vmatpush.bf16.msra.mxu0 %v1874_v18  ;;  %v1860_v18 = vld [vmem:[%s2080_s30 + $0xb8] sm:$0xf0]  ;;  %v1421_v21 = vor.u32 %v1843_v16, %v1420_v15  ;;  %v1943_v25 = vld [vmem:[%s2382_s1 + $0x230] sm:$0xff]  ;;  %v1918_v26 = vld [vmem:[%s2382_s1 + $0x168] sm:$0xff] }
  0x25   : > { %1039 = vmatpush.bf16.msra.mxu2 %v1890_v19  ;;  %v1919_v19 = vld [vmem:[%s2382_s1 + $0x170] sm:$0xff]  ;;  %v1942_v29 = vld [vmem:[%s2382_s1 + $0x228] sm:$0xff]  ;;  %v1929_v51 = vld [vmem:[%s2382_s1 + $0x1c0] sm:$0xff] }
  0x26   : > { %1068 = vmatpush.bf16.msra.mxu3 %v1898_v23  ;;  %v1856_v23 = vld [vmem:[%s2080_s30 + $0x9c] sm:$0xf]  ;;  %v1846_v36 = vld [vmem:[%s2080_s30 + $0x4c] sm:$0xf]  ;;  %v1442_v37 = vld [vmem:[%s2080_s30 + $0x6c] sm:$0xf0] }
  0x27   : > { %v1489_v28 = vor.u32 %v1856_v23, %v1486_v24  ;;  %v1913_v52 = vld [vmem:[%s2382_s1 + $0x140] sm:$0xff]  ;;  %v1939_v53 = vld [vmem:[%s2382_s1 + $0x210] sm:$0xff]  ;;  %v1938_v54 = vld [vmem:[%s2382_s1 + $0x208] sm:$0xff] }
  0x28   : > { %1952 = vmatpush.bf16.msra.mxu1 %v1873_v20  ;;  %982 = vmatpush.bf16.msra.mxu0 %v1873_v20  ;;  %v1409_v20 = vor.u32 %v1837_v12, %v1406_v14  ;;  %v1478_v56 = vld [vmem:[%s2080_s30 + $0xb4] sm:$0xf0]  ;;  %v1492_v57 = vld [vmem:[%s2080_s30 + $0xa0] sm:$0xf]  ;;  %v1466_v14 = vld [vmem:[%s2080_s30 + $0x84] sm:$0xf0] }
  0x29   : > { %1040 = vmatpush.bf16.msra.mxu2 %v1889_v27  ;;  %v1922_v27 = vld [vmem:[%s2382_s1 + $0x188] sm:$0xff]  ;;  %v1839_v16 = vld [vmem:[%s2080_s30 + $0x14] sm:$0xf] }
  0x2a   : > { %1069 = vmatpush.bf16.msra.mxu3 %v1897_v35  ;;  %v1916_v35 = vld [vmem:[%s2382_s1 + $0x158] sm:$0xff] }
  0x2b   : > { %993 = vmatmul.bf16.vlgmr.msra.gmra.mxu1 %v1477_v32  ;;  %983 = vmatmul.bf16.vlgmr.msra.gmra.mxu0 %v1405_v33  ;;  %v1917_v32 = vld [vmem:[%s2382_s1 + $0x160] sm:$0xff] }
  0x2c   : > { %1004 = vmatpush.bf16.msrb.mxu1 %v1888_v22  ;;  %1091 = vmatpush.bf16.msrb.mxu0 %v1912_v30  ;;  %v1485_v22 = vor.u32 %v1860_v18, %v1484_v17  ;;  %v1921_v30 = vld [vmem:[%s2382_s1 + $0x180] sm:$0xff]  ;;  %v1422_v17 = vld [vmem:[%s2080_s30 + $0x34] sm:$0xf0] }
  0x2d   : > { %1149 = vmatpush.bf16.msrb.mxu2 %v1928_v31  ;;  %1070 = vmatmul.bf16.vlgmr.msra.gmra.mxu3 %v1417_v42  ;;  %v1931_v31 = vld [vmem:[%s2382_s1 + $0x1d0] sm:$0xff]  ;;  %v1941_v33 = vld [vmem:[%s2382_s1 + $0x220] sm:$0xff] }
  0x2e   : > { %1041 = vmatmul.bf16.vlgmr.msra.gmra.mxu2 %v1413_v34  ;;  %1178 = vmatpush.bf16.msrb.mxu3 %v1936_v39  ;;  %v1930_v34 = vld [vmem:[%s2382_s1 + $0x1c8] sm:$0xff]  ;;  %v1852_v39 = vld [vmem:[%s2080_s30 + $0x78] sm:$0xf0]  ;;  %v1915_v42 = vld [vmem:[%s2382_s1 + $0x150] sm:$0xff] }
  0x2f   : > { %v1436_v18 = vld [vmem:[%s2080_s30 + $0x20] sm:$0xf] }
  0x30   : > { %1005 = vmatpush.bf16.msrb.mxu1 %v1887_v38  ;;  %1092 = vmatpush.bf16.msrb.mxu0 %v1911_v40  ;;  %v1456_v38 = vld [vmem:[%s2080_s30 + $0x58] sm:$0xf]  ;;  %v1520_v40 = vld [vmem:[%s2080_s30 + $0xe0] sm:$0xf] }
  0x31   : > { %1150 = vmatpush.bf16.msrb.mxu2 %v1927_v41  ;;  %v1869_v41 = vld [vmem:[%s2080_s30 + $0x100] sm:$0xf0] }
  0x32   : > { %1179 = vmatpush.bf16.msrb.mxu3 %v1935_v44  ;;  %v1457_v44 = vor.u32 %v1852_v39, %v1456_v38  ;;  %v1538_v38 = vld [vmem:[%s2080_s30 + $0x114] sm:$0xf0] }
  0x34   : > { %1006 = vmatpush.bf16.msrb.mxu1 %v1886_v43  ;;  %1093 = vmatpush.bf16.msrb.mxu0 %v1910_v45  ;;  %v1445_v43 = vor.u32 %v1846_v36, %v1442_v37  ;;  %v1521_v45 = vor.u32 %v1869_v41, %v1520_v40  ;;  %v1867_v37 = vld [vmem:[%s2080_s30 + $0xf4] sm:$0xf]  ;;  %v1857_v40 = vld [vmem:[%s2080_s30 + $0xa4] sm:$0xf]  ;;  %v1494_v41 = vld [vmem:[%s2080_s30 + $0xc4] sm:$0xf0] }
  0x35   : > { %1151 = vmatpush.bf16.msrb.mxu2 %v1926_v46  ;;  %v1865_v46 = vld [vmem:[%s2080_s30 + $0xe4] sm:$0xf]  ;;  %v1541_v39 = vor.u32 %v1867_v37, %v1538_v38 }
  0x36   : > { %1180 = vmatpush.bf16.msrb.mxu3 %v1934_v48 }
  0x38   : > { %1007 = vmatpush.bf16.msrb.mxu1 %v1885_v47  ;;  %1094 = vmatpush.bf16.msrb.mxu0 %v1909_v49  ;;  %v1522_v47 = vld [vmem:[%s2080_s30 + $0x104] sm:$0xf0] }
  0x39   : > { %1152 = vmatpush.bf16.msrb.mxu2 %v1925_v50  ;;  %v1525_v48 = vor.u32 %v1865_v46, %v1522_v47  ;;  %v1914_v49 = vld [vmem:[%s2382_s1 + $0x148] sm:$0xff]  ;;  %v1940_v50 = vld [vmem:[%s2382_s1 + $0x218] sm:$0xff]  ;;  %v1497_v46 = vor.u32 %v1857_v40, %v1494_v41 }
  0x3a   : > { %1181 = vmatpush.bf16.msrb.mxu3 %v1933_v5  ;;  %v1514_v5 = vld [vmem:[%s2080_s30 + $0xfc] sm:$0xf0] }
  0x3b   : > { %998 = vmatmul.bf16.gmra.mxu1 %v1513_v59  ;;  %988 = vmatmul.bf16.gmra.mxu0 %v1441_v60  ;;  %v1428_v59 = vld [vmem:[%s2080_s30 + $0x18] sm:$0xf]  ;;  %v1844_v60 = vld [vmem:[%s2080_s30 + $0x38] sm:$0xf0] }
  0x3c   : > { %1008 = vmatpush.bf16.msrb.mxu1 %v1884_v55  ;;  %1095 = vmatpush.bf16.msrb.mxu0 %v1908_v58  ;;  %v1855_v55 = vld [vmem:[%s2080_s30 + $0x94] sm:$0xf]  ;;  %v1861_v58 = vld [vmem:[%s2080_s30 + $0xc0] sm:$0xf0]  ;;  %v1429_v63 = vor.u32 %v1844_v60, %v1428_v59 }
  0x3d   : > { %1153 = vmatpush.bf16.msrb.mxu2 %v1924_v3  ;;  %1075 = vmatmul.bf16.gmra.mxu3 %v1453_v2  ;;  %v1493_v62 = vor.u32 %v1861_v58, %v1492_v57  ;;  %v1937_v3 = vld [vmem:[%s2382_s1 + $0x200] sm:$0xff] }
  0x3e   : > { %1046 = vmatmul.bf16.gmra.mxu2 %v1449_v61  ;;  %1182 = vmatpush.bf16.msrb.mxu3 %v1932_v8  ;;  %v1481_v61 = vor.u32 %v1855_v55, %v1478_v56  ;;  %v1464_v8 = vld [vmem:[%s2080_s30 + $0x60] sm:$0xf]  ;;  %v1866_v55 = vld [vmem:[%s2080_s30 + $0xec] sm:$0xf]  ;;  %v1530_v56 = vld [vmem:[%s2080_s30 + $0x10c] sm:$0xf0] }
  0x3f   : > { %v1533_v57 = vor.u32 %v1866_v55, %v1530_v56 }
  0x40   : > { %1009 = vmatpush.bf16.msrb.mxu1 %v1883_v0  ;;  %1096 = vmatpush.bf16.msrb.mxu0 %v1907_v1  ;;  %v1840_v0 = vld [vmem:[%s2080_s30 + $0x1c] sm:$0xf]  ;;  %v1430_v1 = vld [vmem:[%s2080_s30 + $0x3c] sm:$0xf0] }
  0x41   : > { %1154 = vmatpush.bf16.msrb.mxu2 %v1923_v7  ;;  %v1433_v2 = vor.u32 %v1840_v0, %v1430_v1  ;;  %v1870_v7 = vld [vmem:[%s2080_s30 + $0x108] sm:$0xf0] }
  0x42   : > { %1183 = vmatpush.bf16.msrb.mxu3 %v1931_v31  ;;  %v1854_v31 = vld [vmem:[%s2080_s30 + $0x88] sm:$0xf0] }
  0x44   : > { %1010 = vmatpush.bf16.msrb.mxu1 %v1882_v4  ;;  %1097 = vmatpush.bf16.msrb.mxu0 %v1906_v6  ;;  %v1864_v4 = vld [vmem:[%s2080_s30 + $0xdc] sm:$0xf]  ;;  %v1528_v6 = vld [vmem:[%s2080_s30 + $0xe8] sm:$0xf] }
  0x45   : > { %1155 = vmatpush.bf16.msrb.mxu2 %v1922_v27 }
  0x46   : > { %1184 = vmatpush.bf16.msrb.mxu3 %v1930_v34 }
  0x48   : > { %1011 = vmatpush.bf16.msrb.mxu1 %v1881_v9  ;;  %1098 = vmatpush.bf16.msrb.mxu0 %v1905_v11  ;;  %v1853_v9 = vld [vmem:[%s2080_s30 + $0x80] sm:$0xf0]  ;;  %v1529_v11 = vor.u32 %v1870_v7, %v1528_v6 }
  0x49   : > { %1156 = vmatpush.bf16.msrb.mxu2 %v1921_v30  ;;  %v1465_v12 = vor.u32 %v1853_v9, %v1464_v8  ;;  %v1472_v30 = vld [vmem:[%s2080_s30 + $0x68] sm:$0xf] }
  0x4a   : > { %1185 = vmatpush.bf16.msrb.mxu3 %v1929_v51 }
  0x4b   : > { %1012 = vmatmul.bf16.vlgmr.msrb.gmra.mxu1 %v1409_v20  ;;  %1099 = vmatmul.bf16.vlgmr.msrb.gmra.mxu0 %v1421_v21  ;;  %v1500_v20 = vld [vmem:[%s2080_s30 + $0xa8] sm:$0xf]  ;;  %v1862_v21 = vld [vmem:[%s2080_s30 + $0xc8] sm:$0xf0] }
  0x4c   : > { %1120 = vmatpush.bf16.msra.mxu1 %v1920_v10  ;;  %1207 = vmatpush.bf16.msra.mxu0 %v1944_v13  ;;  %v1517_v10 = vor.u32 %v1864_v4, %v1514_v5  ;;  %v1501_v24 = vor.u32 %v1862_v21, %v1500_v20 }
  0x4d   : > { %1080 = vmatmul.bf16.gmra.mxu3 %v1489_v28  ;;  %1953 = vmatpush.bf16.msra.mxu2 %v1944_v13  ;;  %v1849_v13 = vld [vmem:[%s2080_s30 + $0x64] sm:$0xf]  ;;  %v1848_v28 = vld [vmem:[%s2080_s30 + $0x5c] sm:$0xf] }
  0x4e   : > { %1051 = vmatmul.bf16.gmra.mxu2 %v1485_v22  ;;  %v1469_v15 = vor.u32 %v1849_v13, %v1466_v14  ;;  %v1425_v22 = vor.u32 %v1839_v16, %v1422_v17 }
  0x50   : > { %1121 = vmatpush.bf16.msra.mxu1 %v1919_v19  ;;  %1208 = vmatpush.bf16.msra.mxu0 %v1943_v25  ;;  %v1845_v19 = vld [vmem:[%s2080_s30 + $0x40] sm:$0xf0] }
  0x51   : > { %1954 = vmatpush.bf16.msra.mxu2 %v1943_v25  ;;  %v1437_v23 = vor.u32 %v1845_v19, %v1436_v18  ;;  %v1858_v25 = vld [vmem:[%s2080_s30 + $0xac] sm:$0xf] }
  0x54   : > { %1122 = vmatpush.bf16.msra.mxu1 %v1918_v26  ;;  %1209 = vmatpush.bf16.msra.mxu0 %v1942_v29  ;;  %v1502_v26 = vld [vmem:[%s2080_s30 + $0xcc] sm:$0xf0] }
  0x55   : > { %1955 = vmatpush.bf16.msra.mxu2 %v1942_v29  ;;  %v1505_v27 = vor.u32 %v1858_v25, %v1502_v26  ;;  %v1458_v29 = vld [vmem:[%s2080_s30 + $0x7c] sm:$0xf0] }
  0x56   : > { %v1461_v34 = vor.u32 %v1848_v28, %v1458_v29 }
  0x58   : > { %1123 = vmatpush.bf16.msra.mxu1 %v1917_v32  ;;  %1210 = vmatpush.bf16.msra.mxu0 %v1941_v33  ;;  %v1536_v32 = vld [vmem:[%s2080_s30 + $0xf0] sm:$0xf] }
  0x59   : > { %1956 = vmatpush.bf16.msra.mxu2 %v1941_v33  ;;  %v1871_v33 = vld [vmem:[%s2080_s30 + $0x110] sm:$0xf0] }
  0x5a   : > { %v1537_v36 = vor.u32 %v1871_v33, %v1536_v32 }
  0x5b   : > { %1017 = vmatmul.bf16.gmra.mxu1 %v1445_v43  ;;  %1104 = vmatmul.bf16.gmra.mxu0 %v1457_v44  ;;  %v1863_v43 = vld [vmem:[%s2080_s30 + $0xd0] sm:$0xf0]  ;;  %v1544_v44 = vld [vmem:[%s2080_s30 + $0xf8] sm:$0xf] }
  0x5c   : > { %1124 = vmatpush.bf16.msra.mxu1 %v1916_v35  ;;  %1211 = vmatpush.bf16.msra.mxu0 %v1940_v50  ;;  %v1473_v35 = vor.u32 %v1854_v31, %v1472_v30 }
  0x5d   : > { %1085 = vmatmul.bf16.gmra.mxu3 %v1525_v48  ;;  %1957 = vmatpush.bf16.msra.mxu2 %v1940_v50 }
  0x5e   : > { %1056 = vmatmul.bf16.gmra.mxu2 %v1521_v45  ;;  %v1872_v45 = vld [vmem:[%s2080_s30 + $0x118] sm:$0xf0] }
  0x5f   : > { %v1545_v50 = vor.u32 %v1872_v45, %v1544_v44 }
  0x60   : > { %1125 = vmatpush.bf16.msra.mxu1 %v1915_v42  ;;  %1212 = vmatpush.bf16.msra.mxu0 %v1939_v53  ;;  %v1508_v42 = vld [vmem:[%s2080_s30 + $0xb0] sm:$0xf]  ;;  %s1836_s30 = sshll.u32 %s2386_s13, 6 }
  0x61   : > { %1958 = vmatpush.bf16.msra.mxu2 %v1939_v53  ;;  %v1509_v47 = vor.u32 %v1863_v43, %v1508_v42  ;;  %s170_s20 = scalar_lea.vmem %s2384_s3, %s1836_s30 }
  0x64   : > { %1126 = vmatpush.bf16.msra.mxu1 %v1914_v49  ;;  %1213 = vmatpush.bf16.msra.mxu0 %v1938_v54 }
  0x65   : > { %1959 = vmatpush.bf16.msra.mxu2 %v1938_v54 }
  0x68   : > { %1127 = vmatpush.bf16.msra.mxu1 %v1913_v52  ;;  %1214 = vmatpush.bf16.msra.mxu0 %v1937_v3 }
  0x69   : > { %1960 = vmatpush.bf16.msra.mxu2 %v1937_v3 }
  0x6b   : > { %1022 = vmatmul.bf16.gmra.mxu1 %v1481_v61  ;;  %1109 = vmatmul.bf16.gmra.mxu0 %v1493_v62 }
  0x6d   : > { %1186 = vmatmul.bf16.vlgmr.msrb.gmra.mxu3 %v1433_v2  ;;  %v1971_v2 = vld [vmem:[%s2383_s2] ss:$0 sm:$0xff] }
  0x6e   : > { %1157 = vmatmul.bf16.vlgmr.msrb.gmra.mxu2 %v1429_v63 }
  0x7b   : > { %1027 = vmatmul.bf16.gmra.mxu1 %v1517_v10  ;;  %1114 = vmatmul.bf16.gmra.mxu0 %v1529_v11 }
  0x7d   : > { %1191 = vmatmul.bf16.gmra.mxu3 %v1469_v15 }
  0x7e   : > { %1162 = vmatmul.bf16.gmra.mxu2 %v1465_v12 }
  0x8b   : > { %1128 = vmatmul.bf16.vlgmr.msra.gmra.mxu1 %v1425_v22  ;;  %1215 = vmatmul.bf16.vlgmr.msra.gmra.mxu0 %v1437_v23 }
  0x8d   : > { %1196 = vmatmul.bf16.gmra.mxu3 %v1505_v27 }
  0x8e   : > { %1167 = vmatmul.bf16.gmra.mxu2 %v1501_v24 }
  0x9b   : > { %1133 = vmatmul.bf16.gmra.mxu1 %v1461_v34  ;;  %1220 = vmatmul.bf16.gmra.mxu0 %v1473_v35 }
  0x9d   : > { %1201 = vmatmul.bf16.gmra.mxu3 %v1541_v39 }
  0x9e   : > { %1172 = vmatmul.bf16.gmra.mxu2 %v1537_v36 }
  0xa8   : > { %v994_v48 = vpop.f32.mrf.mxu1  ;;  %v984_v49 = vpop.f32.mrf.mxu0 }
  0xa9   : > { %v985_v3 = vadd.f32 %v1971_v2, %v984_v49  ;;  %v995_v37 = vadd.f32 %v1971_v2, %v994_v48 }
  0xab   : > { %1138 = vmatmul.bf16.gmra.mxu1 %v1497_v46  ;;  %1225 = vmatmul.bf16.gmra.mxu0 %v1509_v47 }
  0xae   : > { %1230 = vmatmul.bf16.vlgmr.msra.gmra.mxu2 %v1545_v50 }
  0xb0   : > { %v996_v52 = vpop.f32.mrf.mxu1  ;;  %v986_v53 = vpop.f32.mrf.mxu0 }
  0xb1   : > { %v1042_v51 = vpop.f32.mrf.mxu2  ;;  %v1071_v54 = vpop.f32.mrf.mxu3  ;;  %v987_v11 = vadd.f32 %v1971_v2, %v986_v53  ;;  %v997_v46 = vadd.f32 %v1971_v2, %v996_v52 }
  0xb8   : > { %v999_v59 = vpop.f32.mrf.mxu1  ;;  %v989_v60 = vpop.f32.mrf.mxu0 }
  0xb9   : > { %v1044_v58 = vpop.f32.mrf.mxu2  ;;  %v1073_v61 = vpop.f32.mrf.mxu3  ;;  %v990_v20 = vadd.f32 %v1971_v2, %v989_v60  ;;  %v1000_v48 = vadd.f32 %v1971_v2, %v999_v59 }
  0xbb   : > { %1143 = vmatmul.bf16.gmra.mxu1 %v1533_v57 }
  0xc0   : > { %v1001_v63 = vpop.f32.mrf.mxu1  ;;  %v991_v0 = vpop.f32.mrf.mxu0 }
  0xc1   : > { %v1047_v62 = vpop.f32.mrf.mxu2  ;;  %v1076_v1 = vpop.f32.mrf.mxu3  ;;  %v992_v28 = vadd.f32 %v1971_v2, %v991_v0  ;;  %v1002_v0 = vadd.f32 %v1971_v2, %v1001_v63 }
  0xc8   : > { %v1013_v5 = vpop.f32.mrf.mxu1  ;;  %v1100_v6 = vpop.f32.mrf.mxu0 }
  0xc9   : > { %v1049_v4 = vpop.f32.mrf.mxu2  ;;  %v1014_v7 = vadd.f32 %v1013_v5, %v985_v3  ;;  %v1078_v9 = vpop.f32.mrf.mxu3 }
  0xcb   : > { %v1043_v8 = vadd.f32 %v1042_v51, %v1014_v7 }
  0xcd   : > { %v1072_v10 = vadd.f32 %v1071_v54, %v1043_v8 }
  0xcf   : > { %v1101_v12 = vadd.f32 %v1100_v6, %v1072_v10 }
  0xd0   : > { %v1015_v14 = vpop.f32.mrf.mxu1  ;;  %v1102_v15 = vpop.f32.mrf.mxu0 }
  0xd1   : > { %v1052_v13 = vpop.f32.mrf.mxu2  ;;  %v1016_v16 = vadd.f32 %v1015_v14, %v987_v11  ;;  %v1081_v19 = vpop.f32.mrf.mxu3 }
  0xd3   : > { %v1045_v17 = vadd.f32 %v1044_v58, %v1016_v16 }
  0xd5   : > { %v1074_v18 = vadd.f32 %v1073_v61, %v1045_v17 }
  0xd7   : > { %v1103_v21 = vadd.f32 %v1102_v15, %v1074_v18 }
  0xd8   : > { %v1018_v23 = vpop.f32.mrf.mxu1  ;;  %v1105_v24 = vpop.f32.mrf.mxu0 }
  0xd9   : > { %v1054_v22 = vpop.f32.mrf.mxu2  ;;  %v1019_v25 = vadd.f32 %v1018_v23, %v990_v20  ;;  %v1083_v31 = vpop.f32.mrf.mxu3 }
  0xdb   : > { %v1048_v26 = vadd.f32 %v1047_v62, %v1019_v25 }
  0xdd   : > { %v1077_v27 = vadd.f32 %v1076_v1, %v1048_v26 }
  0xdf   : > { %v1106_v29 = vadd.f32 %v1105_v24, %v1077_v27 }
  0xe0   : > { %v1020_v32 = vpop.f32.mrf.mxu1  ;;  %v1107_v33 = vpop.f32.mrf.mxu0 }
  0xe1   : > { %v1057_v30 = vpop.f32.mrf.mxu2  ;;  %v1021_v34 = vadd.f32 %v1020_v32, %v992_v28  ;;  %v2316_v43 = vpop.f32.mrf.mxu3 }
  0xe3   : > { %v1050_v35 = vadd.f32 %v1049_v4, %v1021_v34 }
  0xe5   : > { %v1079_v36 = vadd.f32 %v1078_v9, %v1050_v35 }
  0xe7   : > { %v1108_v38 = vadd.f32 %v1107_v33, %v1079_v36 }
  0xe8   : > { %v1023_v40 = vpop.f32.mrf.mxu1  ;;  %v1110_v41 = vpop.f32.mrf.mxu0 }
  0xe9   : > { %v1059_v39 = vpop.f32.mrf.mxu2  ;;  %v1024_v42 = vadd.f32 %v1023_v40, %v995_v37  ;;  %v2320_v54 = vpop.f32.mrf.mxu3 }
  0xeb   : > { %v1053_v44 = vadd.f32 %v1052_v13, %v1024_v42 }
  0xed   : > { %v1082_v45 = vadd.f32 %v1081_v19, %v1053_v44 }
  0xef   : > { %v1111_v40 = vadd.f32 %v1110_v41, %v1082_v45 }
  0xf0   : > { %v1025_v49 = vpop.f32.mrf.mxu1  ;;  %v2318_v50 = vpop.f32.mrf.mxu0 }
  0xf1   : > { %v1158_v47 = vpop.f32.mrf.mxu2  ;;  %v1026_v51 = vadd.f32 %v1025_v49, %v997_v46  ;;  %v1187_v62 = vpop.f32.mrf.mxu3 }
  0xf3   : > { %v1055_v53 = vadd.f32 %v1054_v22, %v1026_v51 }
  0xf5   : > { %v1084_v55 = vadd.f32 %v1083_v31, %v1055_v53 }
  0xf8   : > { %v1028_v57 = vpop.f32.mrf.mxu1  ;;  %v2322_v58 = vpop.f32.mrf.mxu0 }
  0xf9   : > { %v1160_v56 = vpop.f32.mrf.mxu2  ;;  %v1029_v60 = vadd.f32 %v1028_v57, %v1000_v48  ;;  %v1189_v6 = vpop.f32.mrf.mxu3 }
  0xfb   : > { %v1058_v61 = vadd.f32 %v1057_v30, %v1029_v60 }
 0x100   : > { %v1030_v52 = vpop.f32.mrf.mxu1  ;;  %v2324_v3 = vpop.f32.mrf.mxu0 }
 0x101   : > { %v1163_v1 = vpop.f32.mrf.mxu2  ;;  %v1031_v4 = vadd.f32 %v1030_v52, %v1002_v0  ;;  %v1192_v16 = vpop.f32.mrf.mxu3 }
 0x103   : > { %v2326_v5 = vadd.f32 %v1059_v39, %v1031_v4 }
 0x108   : > { %v1129_v7 = vpop.f32.mrf.mxu1  ;;  %v1216_v8 = vpop.f32.mrf.mxu0 }
 0x109   : > { %v1130_v9 = vadd.f32 %v1129_v7, %v1101_v12  ;;  %v1165_v59 = vpop.f32.mrf.mxu2  ;;  %v1194_v26 = vpop.f32.mrf.mxu3 }
 0x10b   : > { %v1159_v10 = vadd.f32 %v1158_v47, %v1130_v9 }
 0x10d   : > { %v1188_v14 = vadd.f32 %v1187_v62, %v1159_v10 }
 0x10f   : > { %v2328_v2 = vadd.f32 %v1216_v8, %v1188_v14 }
 0x110   : > { %v1131_v11 = vpop.f32.mrf.mxu1  ;;  %v1218_v13 = vpop.f32.mrf.mxu0 }
 0x111   : > { %v1132_v15 = vadd.f32 %v1131_v11, %v1103_v21  ;;  %v1168_v63 = vpop.f32.mrf.mxu2  ;;  %v1237_v12 = vsel %vm1236_vm0, %v2328_v2, 0.0  ;;  %v1197_v39 = vpop.f32.mrf.mxu3  ;;  %v1089_v11 = vadd.f32 %v2320_v54, %v2326_v5 }
 0x113   : > { %v1161_v17 = vadd.f32 %v1160_v56, %v1132_v15  ;;  %v1113_v56 = vadd.f32 %v2318_v50, %v1084_v55  ;;  %v1984_v15 = vmov 64.0  }
 0x114   : > { %1972 = vrcp.f32 %v1984_v15 }
 0x115   : > { %v1190_v18 = vadd.f32 %v1189_v6, %v1161_v17 }
 0x117   : > { %v2330_v19 = vadd.f32 %v1218_v13, %v1190_v18 }
 0x118   : > { %v1134_v20 = vpop.f32.mrf.mxu1  ;;  %v1221_v22 = vpop.f32.mrf.mxu0 }
 0x119   : > { %v1238_v23 = vsel %vm1236_vm0, %v2330_v19, 0.0  ;;  %v1135_v24 = vadd.f32 %v1134_v20, %v1106_v29  ;;  %v1170_v28 = vpop.f32.mrf.mxu2  ;;  %v1199_v57 = vpop.f32.mrf.mxu3 }
 0x11a   : > { %v1239_v25 = vadd.f32 %v1238_v23, %v1237_v12  ;;  %v1973_v18 = vpop.eup %1972 }
 0x11b   : > { %v1164_v21 = vadd.f32 %v1163_v1, %v1135_v24  ;;  %v1087_v1 = vadd.f32 %v2316_v43, %v1058_v61  ;;  %v1118_v61 = vadd.f32 %v2324_v3, %v1089_v11  ;;  %v1259_v24 = vmul.f32 64.0, %v1973_v18 }
 0x11c   : > { %vm1263_vm1 = vweird.f32 %v1973_v18 }
 0x11d   : > { %v1193_v27 = vadd.f32 %v1192_v16, %v1164_v21  ;;  %v1116_v7 = vadd.f32 %v2322_v58, %v1087_v1  ;;  %v1260_v21 = vsub.f32 1.0, %v1259_v24 }
 0x11f   : > { %v2336_v30 = vadd.f32 %v1221_v22, %v1193_v27 }
 0x120   : > { %v1136_v31 = vpop.f32.mrf.mxu1  ;;  %v1223_v32 = vpop.f32.mrf.mxu0 }
 0x121   : > { %v1240_v33 = vsel %vm1236_vm0, %v2336_v30, 0.0  ;;  %v1137_v34 = vadd.f32 %v1136_v31, %v1108_v38  ;;  %v1173_v29 = vpop.f32.mrf.mxu2  ;;  %v1202_v55 = vpop.f32.mrf.mxu3 }
 0x122   : > { %v1241_v35 = vadd.f32 %v1240_v33, %v1239_v25 }
 0x123   : > { %v1166_v36 = vadd.f32 %v1165_v59, %v1137_v34 }
 0x125   : > { %v1195_v37 = vadd.f32 %v1194_v26, %v1166_v36 }
 0x127   : > { %v2340_v42 = vadd.f32 %v1223_v32, %v1195_v37 }
 0x128   : > { %v1139_v44 = vpop.f32.mrf.mxu1  ;;  %v1226_v51 = vpop.f32.mrf.mxu0 }
 0x129   : > { %v1242_v46 = vsel %vm1236_vm0, %v2340_v42, 0.0  ;;  %v1140_v47 = vadd.f32 %v1139_v44, %v1111_v40  ;;  %v1175_v45 = vpop.f32.mrf.mxu2  ;;  %v1204_v12 = vpop.f32.mrf.mxu3 }
 0x12a   : > { %v1243_v49 = vadd.f32 %v1242_v46, %v1241_v35 }
 0x12b   : > { %v1169_v53 = vadd.f32 %v1168_v63, %v1140_v47 }
 0x12d   : > { %v1198_v48 = vadd.f32 %v1197_v39, %v1169_v53 }
 0x12f   : > { %v1227_v38 = vadd.f32 %v1226_v51, %v1198_v48 }
 0x130   : > { %v1141_v60 = vpop.f32.mrf.mxu1  ;;  %v1228_v4 = vpop.f32.mrf.mxu0 }
 0x131   : > { %v1244_v62 = vsel %vm1236_vm0, %v1227_v38, 0.0  ;;  %v1142_v41 = vadd.f32 %v1141_v60, %v1113_v56  ;;  %v1231_v14 = vpop.f32.mrf.mxu2 }
 0x132   : > { %v1245_v0 = vadd.f32 %v1244_v62, %v1243_v49 }
 0x133   : > { %v1171_v52 = vadd.f32 %v1170_v28, %v1142_v41  ;;  %v1261_v28 = vmul.f32 %v1973_v18, %v1260_v21 }
 0x135   : > { %v1200_v6 = vadd.f32 %v1199_v57, %v1171_v52  ;;  %v1262_v32 = vadd.f32 %v1973_v18, %v1261_v28 }
 0x137   : > { %v1229_v8 = vadd.f32 %v1228_v4, %v1200_v6  ;;  %v1264_v35 = vsel %vm1263_vm1, %v1973_v18, %v1262_v32 }
 0x138   : > { %v1144_v9 = vpop.f32.mrf.mxu1 }
 0x139   : > { %v1246_v59 = vsel %vm1236_vm0, %v1229_v8, 0.0  ;;  %v1145_v50 = vadd.f32 %v1144_v9, %v1116_v7  ;;  %v1233_v25 = vpop.f32.mrf.mxu2 }
 0x13a   : > { %v1247_v10 = vadd.f32 %v1246_v59, %v1245_v0 }
 0x13b   : > { %v1174_v13 = vadd.f32 %v1173_v29, %v1145_v50 }
 0x13d   : > { %v1203_v43 = vadd.f32 %v1202_v55, %v1174_v13 }
 0x13f   : > { %v1232_v16 = vadd.f32 %v1231_v14, %v1203_v43 }
 0x140   : > { %v1146_v17 = vpop.f32.mrf.mxu1 }
 0x141   : > { %v1248_v58 = vsel %vm1236_vm0, %v1232_v16, 0.0  ;;  %v1147_v63 = vadd.f32 %v1146_v17, %v1118_v61 }
 0x142   : > { %v1249_v20 = vadd.f32 %v1248_v58, %v1247_v10 }
 0x143   : > { %v1176_v22 = vadd.f32 %v1175_v45, %v1147_v63 }
 0x145   : > { %v1205_v23 = vadd.f32 %v1204_v12, %v1176_v22 }
 0x147   : > { %v1234_v54 = vadd.f32 %v1233_v25, %v1205_v23 }
 0x149   : > { %v1250_v5 = vsel %vm1236_vm0, %v1234_v54, 0.0 }
 0x14a   : > { %v1251_v26 = vadd.f32 %v1250_v5, %v1249_v20 }
 0x14c   : > { %v1252_v27 = vrot.slane %v1251_v26, 4 }
 0x14e   : > { %v1253_v3 = vadd.f32 %v1252_v27, %v1251_v26 }
 0x150   : > { %v1254_v31 = vrot.slane %v1253_v3, 2 }
 0x152   : > { %v1255_v33 = vadd.f32 %v1254_v31, %v1253_v3 }
 0x154   : > { %v1256_v34 = vrot.slane %v1255_v33, 1 }
 0x156   : > { %v1257_v36 = vadd.f32 %v1256_v34, %v1255_v33 }
 0x158   : > { %v1265_v37 = vmul.f32 %v1264_v35, %v1257_v36 }
 0x15a   : > { %v1266_v39 = vsub.f32 %v2328_v2, %v1265_v37  ;;  %v1267_v40 = vsub.f32 %v2330_v19, %v1265_v37  ;;  %v1268_v29 = vsub.f32 %v2336_v30, %v1265_v37  ;;  %v1269_v44 = vsub.f32 %v2340_v42, %v1265_v37 }
 0x15b   : > { %v1270_v46 = vsub.f32 %v1227_v38, %v1265_v37  ;;  %v1271_v47 = vsub.f32 %v1229_v8, %v1265_v37  ;;  %v1272_v49 = vsub.f32 %v1232_v16, %v1265_v37  ;;  %v1273_v51 = vsub.f32 %v1234_v54, %v1265_v37 }
 0x15c   : > { %v1274_v53 = vmul.f32 %v1266_v39, %v1266_v39  ;;  %v1275_v48 = vmul.f32 %v1267_v40, %v1267_v40  ;;  %v1276_v56 = vmul.f32 %v1268_v29, %v1268_v29  ;;  %v1277_v57 = vmul.f32 %v1269_v44, %v1269_v44 }
 0x15d   : > { %v1278_v2 = vmul.f32 %v1270_v46, %v1270_v46  ;;  %v1279_v30 = vmul.f32 %v1271_v47, %v1271_v47  ;;  %v1280_v0 = vmul.f32 %v1272_v49, %v1272_v49  ;;  %v1281_v4 = vmul.f32 %v1273_v51, %v1273_v51 }
 0x15e   : > { %v1282_v60 = vsel %vm1236_vm0, %v1274_v53, 0.0  ;;  %v1283_v62 = vsel %vm1236_vm0, %v1275_v48, 0.0  ;;  %v1285_v19 = vsel %vm1236_vm0, %v1276_v56, 0.0  ;;  %v1287_v42 = vsel %vm1236_vm0, %v1277_v57, 0.0 }
 0x15f   : > { %v1284_v41 = vadd.f32 %v1283_v62, %v1282_v60  ;;  %v1289_v1 = vsel %vm1236_vm0, %v1278_v2, 0.0  ;;  %v1291_v6 = vsel %vm1236_vm0, %v1279_v30, 0.0  ;;  %v1293_v8 = vsel %vm1236_vm0, %v1280_v0, 0.0 }
 0x160   : > { %v1295_v59 = vsel %vm1236_vm0, %v1281_v4, 0.0 }
 0x161   : > { %v1286_v45 = vadd.f32 %v1285_v19, %v1284_v41 }
 0x163   : > { %v1288_v38 = vadd.f32 %v1287_v42, %v1286_v45 }
 0x165   : > { %v1290_v52 = vadd.f32 %v1289_v1, %v1288_v38 }
 0x167   : > { %v1292_v7 = vadd.f32 %v1291_v6, %v1290_v52 }
 0x169   : > { %v1294_v9 = vadd.f32 %v1293_v8, %v1292_v7 }
 0x16b   : > { %v1296_v50 = vadd.f32 %v1295_v59, %v1294_v9 }
 0x16d   : > { %v1297_v55 = vrot.slane %v1296_v50, 4 }
 0x16f   : > { %v1298_v10 = vadd.f32 %v1297_v55, %v1296_v50 }
 0x171   : > { %v1299_v11 = vrot.slane %v1298_v10, 2 }
 0x173   : > { %v1300_v13 = vadd.f32 %v1299_v11, %v1298_v10 }
 0x175   : > { %v1301_v14 = vrot.slane %v1300_v13, 1 }
 0x177   : > { %v1302_v15 = vadd.f32 %v1301_v14, %v1300_v13 }
 0x179   : > { %v1303_v43 = vmul.f32 %v1302_v15, %v1264_v35 }
 0x17b   : > { %v1304_v61 = vadd.f32 1e-05, %v1303_v43 }
 0x17d   : > { %1974 = vrsqrt.f32 %v1304_v61  ;;  %vm1311_vm3 = vweird.f32 %v1304_v61 }
 0x183   : > { %v1975_v16 = vpop.eup %1974 }
 0x184   : > { %v1306_v17 = vmul.f32 %v1975_v16, %v1304_v61  ;;  %vm1312_vm2 = vweird.f32 %v1975_v16 }
 0x185   : > { %vm1313_vm4 = vmor %vm1311_vm3, %vm1312_vm2 }
 0x186   : > { %v1307_v58 = vmul.f32 %v1975_v16, %v1306_v17 }
 0x188   : > { %v1308_v63 = vmul.f32 0.5, %v1307_v58 }
 0x18a   : > { %v1309_v18 = vsub.f32 1.5, %v1308_v63 }
 0x18c   : > { %v1310_v20 = vmul.f32 %v1975_v16, %v1309_v18 }
 0x18e   : > { %v1314_v22 = vsel %vm1313_vm4, %v1975_v16, %v1310_v20 }
 0x18f   : > { %v1315_v12 = vmul.f32 %v1314_v22, %v1266_v39  ;;  %v1316_v23 = vmul.f32 %v1314_v22, %v1267_v40  ;;  %v1317_v24 = vmul.f32 %v1314_v22, %v1268_v29  ;;  %v1318_v25 = vmul.f32 %v1314_v22, %v1269_v44 }
 0x190   : > { %v1319_v54 = vmul.f32 %v1314_v22, %v1270_v46  ;;  %v1320_v5 = vmul.f32 %v1314_v22, %v1271_v47  ;;  %v1321_v21 = vmul.f32 %v1314_v22, %v1272_v49  ;;  %v1322_v26 = vmul.f32 %v1314_v22, %v1273_v51 }
 0x191   : > { %v1323_v27 = vmax.f32 %v1315_v12, 0.0  ;;  %v1324_v28 = vmax.f32 %v1316_v23, 0.0  ;;  %v1325_v3 = vmax.f32 %v1317_v24, 0.0  ;;  %v1326_v31 = vmax.f32 %v1318_v25, 0.0 }
 0x192   : > { %v1327_v32 = vmax.f32 %v1319_v54, 0.0  ;;  %v1328_v33 = vmax.f32 %v1320_v5, 0.0  ;;  %v1329_v34 = vmax.f32 %v1321_v21, 0.0  ;;  %v1330_v35 = vmax.f32 %v1322_v26, 0.0 }
 0x193   : > { %1331 = vst.msk [vmem:[%s170_s20] sm:$0xff] %vm1236_vm0, %v1323_v27 }
 0x194   : > { %1332 = vst.msk [vmem:[%s170_s20 + $0x8] sm:$0xff] %vm1236_vm0, %v1324_v28 }
 0x195   : > { %1333 = vst.msk [vmem:[%s170_s20 + $0x10] sm:$0xff] %vm1236_vm0, %v1325_v3 }
 0x196   : > { %1334 = vst.msk [vmem:[%s170_s20 + $0x18] sm:$0xff] %vm1236_vm0, %v1326_v31 }
 0x197   : > { %1335 = vst.msk [vmem:[%s170_s20 + $0x20] sm:$0xff] %vm1236_vm0, %v1327_v32 }
 0x198   : > { %1336 = vst.msk [vmem:[%s170_s20 + $0x28] sm:$0xff] %vm1236_vm0, %v1328_v33 }
 0x199   : > { %1337 = vst.msk [vmem:[%s170_s20 + $0x30] sm:$0xff] %vm1236_vm0, %v1329_v34 }
 0x19a   : > { %1338 = vst.msk [vmem:[%s170_s20 + $0x38] sm:$0xff] %vm1236_vm0, %v1330_v35 }
 0x19b PF: > { %s13_s12 = sadd.s32 1, %s1982_s12  }
 0x19c   : > { %p10_p4 = scmp.ge.s32.totalorder %s13_s12, 4  }
 0x19e   :  { %12 = sbr.rel (!%p10_p4) target bundleno = 1 (0x1), region = 62 }

// kernel: generator_forward.34
= control target key start
LH: loop header
LB: loop body
LE: loop exit
PB: predicated region body
PF: predicated region fallthrough
CT: control target
= control target key end

     0   :  { %s2505_s12 = smov 0   ;;  %s3424_s0 = inlined_call_operand.vmem [shape: bf16[2,256,640], index: 0, kind: input, shape index: {}]   ;;  %s3425_s1 = inlined_call_operand.vmem [shape: bf16[640,32], index: 1, kind: input, shape index: {}]   ;;  %s3426_s2 = inlined_call_operand.vmem [shape: f32[1,32], index: 2, kind: input, shape index: {}]   ;;  %s3427_s3 = inlined_call_operand.vmem [shape: f32[2,256,32], index: 3, kind: output, shape index: {}]  }
   0x1 LB: > { %s1826_s13 = sadd.s32 4294967295, %s2482_s12   ;;  %p1830_p0 = scmp.ge.s32.totalorder %s2482_s12, 1  ;;  %s2482_s12 = sphi %s2505_s12, %s13_s12  }
   0x2   : > { %p137_p1 = scmp.lt.s32.totalorder %s2482_s12, 3 }
   0x4   : > { %p138_p2 = pnand %p1830_p0, %p137_p1 }
   0x6   : > { %141 = sbr.rel (%p138_p2) target bundleno = 648 (0x288), region = 32 }
   0xb   : > { %v2404_v0 = vld [vmem:[%s3425_s1 + $0x38] sm:$0xff]  ;;  %v2403_v1 = vld [vmem:[%s3425_s1 + $0x30] sm:$0xff]  ;;  %v2402_v2 = vld [vmem:[%s3425_s1 + $0x28] sm:$0xff]  ;;  %p161_p3 = scmp.lt.s32.totalorder %s1826_s13, 1  ;;  %vm1452_vm0 = vcmask 261120  }
   0xc   : > { %2437 = vmatpush.bf16.msra.mxu1 %v2404_v0  ;;  %2438 = vmatpush.bf16.msra.mxu2 %v2404_v0  ;;  %v2401_v3 = vld [vmem:[%s3425_s1 + $0x20] sm:$0xff]  ;;  %v2400_v4 = vld [vmem:[%s3425_s1 + $0x18] sm:$0xff]  ;;  %v2399_v5 = vld [vmem:[%s3425_s1 + $0x10] sm:$0xff] }
   0xd   : > { %2439 = vmatpush.bf16.msra.mxu3 %v2404_v0  ;;  %1007 = vmatpush.bf16.msra.mxu0 %v2404_v0  ;;  %s3432_s13 = smov (!%p161_p3, %s1826_s13), 1  ;;  %v2398_v6 = vld [vmem:[%s3425_s1 + $0x8] sm:$0xff]  ;;  %v2397_v7 = vld [vmem:[%s3425_s1] sm:$0xff]  ;;  %v2420_v16 = vld [vmem:[%s3425_s1 + $0xb8] sm:$0xff] }
   0xe   : > { %s2461_s26 = smul.u32 640, %s3432_s13  ;;  %v2428_v17 = vld [vmem:[%s3425_s1 + $0xf8] sm:$0xff]  ;;  %v2419_v24 = vld [vmem:[%s3425_s1 + $0xb0] sm:$0xff]  ;;  %v2418_v28 = vld [vmem:[%s3425_s1 + $0xa8] sm:$0xff] }
   0xf   : > { %v2412_v22 = vld [vmem:[%s3425_s1 + $0x78] sm:$0xff]  ;;  %v2427_v25 = vld [vmem:[%s3425_s1 + $0xf0] sm:$0xff]  ;;  %v2426_v29 = vld [vmem:[%s3425_s1 + $0xe8] sm:$0xff] }
  0x10   : > { %2440 = vmatpush.bf16.msra.mxu1 %v2403_v1  ;;  %2441 = vmatpush.bf16.msra.mxu2 %v2403_v1  ;;  %s2540_s4 = scalar_lea.vmem %s3424_s0, %s2461_s26  ;;  %v2436_v23 = vld [vmem:[%s3425_s1 + $0x138] sm:$0xff]  ;;  %v2411_v26 = vld [vmem:[%s3425_s1 + $0x70] sm:$0xff]  ;;  %v2410_v30 = vld [vmem:[%s3425_s1 + $0x68] sm:$0xff] }
  0x11   : > { %2442 = vmatpush.bf16.msra.mxu3 %v2403_v1  ;;  %1008 = vmatpush.bf16.msra.mxu0 %v2403_v1  ;;  %v1916_v8 = vld [vmem:[%s2540_s4 + $0xa0] sm:$0xf]  ;;  %v2339_v9 = vld [vmem:[%s2540_s4 + $0xb0] sm:$0xf0]  ;;  %v2434_v31 = vld [vmem:[%s3425_s1 + $0x128] sm:$0xff] }
  0x12   : > { %v1996_v10 = vld [vmem:[%s2540_s4 + $0x140] sm:$0xf]  ;;  %v2359_v11 = vld [vmem:[%s2540_s4 + $0x150] sm:$0xf0]  ;;  %v1917_v18 = vor.u32 %v2339_v9, %v1916_v8  ;;  %v1936_v32 = vld [vmem:[%s2540_s4 + $0xc8] sm:$0xf] }
  0x13   : > { %v2076_v12 = vld [vmem:[%s2540_s4 + $0x1e0] sm:$0xf]  ;;  %v2379_v13 = vld [vmem:[%s2540_s4 + $0x1f0] sm:$0xf0]  ;;  %v1997_v19 = vor.u32 %v2359_v11, %v1996_v10  ;;  %v2344_v35 = vld [vmem:[%s2540_s4 + $0xd8] sm:$0xf0] }
  0x14   : > { %2443 = vmatpush.bf16.msra.mxu1 %v2402_v2  ;;  %2444 = vmatpush.bf16.msra.mxu2 %v2402_v2  ;;  %v1836_v14 = vld [vmem:[%s2540_s4] sm:$0xf]  ;;  %v2319_v15 = vld [vmem:[%s2540_s4 + $0x10] sm:$0xf0]  ;;  %v2077_v20 = vor.u32 %v2379_v13, %v2076_v12  ;;  %v2016_v36 = vld [vmem:[%s2540_s4 + $0x168] sm:$0xf]  ;;  %v1937_v46 = vor.u32 %v2344_v35, %v1936_v32 }
  0x15   : > { %2445 = vmatpush.bf16.msra.mxu3 %v2402_v2  ;;  %1009 = vmatpush.bf16.msra.mxu0 %v2402_v2  ;;  %v1837_v21 = vor.u32 %v2319_v15, %v1836_v14  ;;  %v2435_v27 = vld [vmem:[%s3425_s1 + $0x130] sm:$0xff]  ;;  %v2417_v33 = vld [vmem:[%s3425_s1 + $0xa0] sm:$0xff]  ;;  %v2364_v37 = vld [vmem:[%s2540_s4 + $0x178] sm:$0xf0] }
  0x16   : > { %v2425_v34 = vld [vmem:[%s3425_s1 + $0xe0] sm:$0xff]  ;;  %v2096_v38 = vld [vmem:[%s2540_s4 + $0x208] sm:$0xf]  ;;  %v2384_v39 = vld [vmem:[%s2540_s4 + $0x218] sm:$0xf0]  ;;  %v2017_v47 = vor.u32 %v2364_v37, %v2016_v36 }
  0x17   : > { %v1856_v40 = vld [vmem:[%s2540_s4 + $0x28] sm:$0xf]  ;;  %v2324_v41 = vld [vmem:[%s2540_s4 + $0x38] sm:$0xf0]  ;;  %v2409_v42 = vld [vmem:[%s3425_s1 + $0x60] sm:$0xff]  ;;  %v2097_v48 = vor.u32 %v2384_v39, %v2096_v38 }
  0x18   : > { %2446 = vmatpush.bf16.msra.mxu1 %v2401_v3  ;;  %2447 = vmatpush.bf16.msra.mxu2 %v2401_v3  ;;  %v2433_v43 = vld [vmem:[%s3425_s1 + $0x120] sm:$0xff]  ;;  %v2416_v44 = vld [vmem:[%s3425_s1 + $0x98] sm:$0xff]  ;;  %v1857_v49 = vor.u32 %v2324_v41, %v1856_v40  ;;  %v2415_v52 = vld [vmem:[%s3425_s1 + $0x90] sm:$0xff] }
  0x19   : > { %2448 = vmatpush.bf16.msra.mxu3 %v2401_v3  ;;  %1010 = vmatpush.bf16.msra.mxu0 %v2401_v3  ;;  %v2424_v45 = vld [vmem:[%s3425_s1 + $0xd8] sm:$0xff]  ;;  %v2423_v53 = vld [vmem:[%s3425_s1 + $0xd0] sm:$0xff]  ;;  %v2414_v56 = vld [vmem:[%s3425_s1 + $0x88] sm:$0xff] }
  0x1a   : > { %v2408_v50 = vld [vmem:[%s3425_s1 + $0x58] sm:$0xff]  ;;  %v2407_v54 = vld [vmem:[%s3425_s1 + $0x50] sm:$0xff]  ;;  %v2422_v57 = vld [vmem:[%s3425_s1 + $0xc8] sm:$0xff] }
  0x1b   : > { %v2432_v51 = vld [vmem:[%s3425_s1 + $0x118] sm:$0xff]  ;;  %v2431_v55 = vld [vmem:[%s3425_s1 + $0x110] sm:$0xff]  ;;  %v2406_v58 = vld [vmem:[%s3425_s1 + $0x48] sm:$0xff] }
  0x1c   : > { %2449 = vmatpush.bf16.msra.mxu1 %v2400_v4  ;;  %2450 = vmatpush.bf16.msra.mxu2 %v2400_v4  ;;  %v2430_v59 = vld [vmem:[%s3425_s1 + $0x108] sm:$0xff]  ;;  %v1956_v60 = vld [vmem:[%s2540_s4 + $0xf0] sm:$0xf]  ;;  %v2413_v61 = vld [vmem:[%s3425_s1 + $0x80] sm:$0xff] }
  0x1d   : > { %2451 = vmatpush.bf16.msra.mxu3 %v2400_v4  ;;  %1011 = vmatpush.bf16.msra.mxu0 %v2400_v4  ;;  %v2421_v62 = vld [vmem:[%s3425_s1 + $0xc0] sm:$0xff]  ;;  %v2036_v0 = vld [vmem:[%s2540_s4 + $0x190] sm:$0xf]  ;;  %v1976_v12 = vld [vmem:[%s2540_s4 + $0x118] sm:$0xf] }
  0x1e   : > { %v2349_v63 = vld [vmem:[%s2540_s4 + $0x100] sm:$0xf0]  ;;  %v2116_v2 = vld [vmem:[%s2540_s4 + $0x230] sm:$0xf]  ;;  %v2354_v13 = vld [vmem:[%s2540_s4 + $0x128] sm:$0xf0] }
  0x1f   : > { %v2369_v1 = vld [vmem:[%s2540_s4 + $0x1a0] sm:$0xf0]  ;;  %v1876_v4 = vld [vmem:[%s2540_s4 + $0x50] sm:$0xf]  ;;  %v1957_v8 = vor.u32 %v2349_v63, %v1956_v60  ;;  %v2056_v14 = vld [vmem:[%s2540_s4 + $0x1b8] sm:$0xf] }
  0x20   : > { %2452 = vmatpush.bf16.msra.mxu1 %v2399_v5  ;;  %2453 = vmatpush.bf16.msra.mxu2 %v2399_v5  ;;  %v2389_v3 = vld [vmem:[%s2540_s4 + $0x240] sm:$0xf0]  ;;  %v2037_v9 = vor.u32 %v2369_v1, %v2036_v0  ;;  %v2374_v15 = vld [vmem:[%s2540_s4 + $0x1c8] sm:$0xf0]  ;;  %v1858_v37 = vld [vmem:[%s2540_s4 + $0x3c] sm:$0xf0] }
  0x21   : > { %2454 = vmatpush.bf16.msra.mxu3 %v2399_v5  ;;  %1012 = vmatpush.bf16.msra.mxu0 %v2399_v5  ;;  %v2329_v5 = vld [vmem:[%s2540_s4 + $0x60] sm:$0xf0]  ;;  %v2117_v10 = vor.u32 %v2389_v3, %v2116_v2  ;;  %v2322_v36 = vld [vmem:[%s2540_s4 + $0x2c] sm:$0xf]  ;;  %v1864_v38 = vld [vmem:[%s2540_s4 + $0x30] sm:$0xf] }
  0x22   : > { %v1877_v11 = vor.u32 %v2329_v5, %v1876_v4  ;;  %v2325_v39 = vld [vmem:[%s2540_s4 + $0x40] sm:$0xf0]  ;;  %v2323_v40 = vld [vmem:[%s2540_s4 + $0x34] sm:$0xf]  ;;  %v1866_v41 = vld [vmem:[%s2540_s4 + $0x44] sm:$0xf0] }
  0x23   : > { %v2332_v60 = vld [vmem:[%s2540_s4 + $0x7c] sm:$0xf]  ;;  %v2335_v63 = vld [vmem:[%s2540_s4 + $0x90] sm:$0xf0]  ;;  %v2333_v0 = vld [vmem:[%s2540_s4 + $0x84] sm:$0xf] }
  0x24   : > { %2455 = vmatpush.bf16.msra.mxu1 %v2398_v6  ;;  %2456 = vmatpush.bf16.msra.mxu2 %v2398_v6  ;;  %v1906_v1 = vld [vmem:[%s2540_s4 + $0x94] sm:$0xf0]  ;;  %v1912_v2 = vld [vmem:[%s2540_s4 + $0x88] sm:$0xf]  ;;  %v2336_v3 = vld [vmem:[%s2540_s4 + $0x98] sm:$0xf0] }
  0x25   : > { %2457 = vmatpush.bf16.msra.mxu3 %v2398_v6  ;;  %1013 = vmatpush.bf16.msra.mxu0 %v2398_v6  ;;  %v2405_v6 = vld [vmem:[%s3425_s1 + $0x40] sm:$0xff] }
  0x28   : > { %2458 = vmatpush.bf16.msra.mxu1 %v2397_v7  ;;  %2459 = vmatpush.bf16.msra.mxu2 %v2397_v7 }
  0x29   : > { %2460 = vmatpush.bf16.msra.mxu3 %v2397_v7  ;;  %1014 = vmatpush.bf16.msra.mxu0 %v2397_v7  ;;  %v2429_v7 = vld [vmem:[%s3425_s1 + $0x100] sm:$0xff] }
  0x2b   : > { %1035 = vmatmul.bf16.vlgmr.msra.gmra.mxu1 %v1917_v18  ;;  %1055 = vmatmul.bf16.vlgmr.msra.gmra.mxu2 %v1997_v19  ;;  %v1896_v18 = vld [vmem:[%s2540_s4 + $0x78] sm:$0xf]  ;;  %v2334_v19 = vld [vmem:[%s2540_s4 + $0x88] sm:$0xf0] }
  0x2c   : > { %1185 = vmatpush.bf16.msrb.mxu2 %v2420_v16  ;;  %1075 = vmatmul.bf16.vlgmr.msra.gmra.mxu3 %v2077_v20  ;;  %v2136_v16 = vld [vmem:[%s2540_s4 + $0x258] sm:$0xf]  ;;  %v1977_v20 = vor.u32 %v2354_v13, %v1976_v12  ;;  %v2338_v12 = vld [vmem:[%s2540_s4 + $0xac] sm:$0xf]  ;;  %v1926_v13 = vld [vmem:[%s2540_s4 + $0xbc] sm:$0xf0] }
  0x2d   : > { %1274 = vmatpush.bf16.msrb.mxu3 %v2428_v17  ;;  %1015 = vmatmul.bf16.vlgmr.msra.gmra.mxu0 %v1837_v21  ;;  %v2394_v17 = vld [vmem:[%s2540_s4 + $0x268] sm:$0xf0]  ;;  %v2057_v21 = vor.u32 %v2374_v15, %v2056_v14  ;;  %v1932_v14 = vld [vmem:[%s2540_s4 + $0xb0] sm:$0xf]  ;;  %v2341_v15 = vld [vmem:[%s2540_s4 + $0xc0] sm:$0xf0] }
  0x2e   : > { %1096 = vmatpush.bf16.msrb.mxu1 %v2412_v22  ;;  %1363 = vmatpush.bf16.msrb.mxu0 %v2436_v23  ;;  %v2137_v22 = vor.u32 %v2394_v17, %v2136_v16  ;;  %v1897_v23 = vor.u32 %v2334_v19, %v1896_v18  ;;  %v1929_v19 = vor.u32 %v2338_v12, %v1926_v13 }
  0x30   : > { %1186 = vmatpush.bf16.msrb.mxu2 %v2419_v24  ;;  %v2317_v24 = vld [vmem:[%s2540_s4 + $0x4] sm:$0xf] }
  0x31   : > { %1275 = vmatpush.bf16.msrb.mxu3 %v2427_v25  ;;  %v1838_v25 = vld [vmem:[%s2540_s4 + $0x14] sm:$0xf0] }
  0x32   : > { %1097 = vmatpush.bf16.msrb.mxu1 %v2411_v26  ;;  %1364 = vmatpush.bf16.msrb.mxu0 %v2435_v27  ;;  %v1844_v26 = vld [vmem:[%s2540_s4 + $0x8] sm:$0xf]  ;;  %v2320_v27 = vld [vmem:[%s2540_s4 + $0x18] sm:$0xf0]  ;;  %v1841_v32 = vor.u32 %v2317_v24, %v1838_v25 }
  0x34   : > { %1187 = vmatpush.bf16.msrb.mxu2 %v2418_v28  ;;  %v2318_v28 = vld [vmem:[%s2540_s4 + $0xc] sm:$0xf] }
  0x35   : > { %1276 = vmatpush.bf16.msrb.mxu3 %v2426_v29  ;;  %v1846_v29 = vld [vmem:[%s2540_s4 + $0x1c] sm:$0xf0] }
  0x36   : > { %1098 = vmatpush.bf16.msrb.mxu1 %v2410_v30  ;;  %1365 = vmatpush.bf16.msrb.mxu0 %v2434_v31  ;;  %v1852_v30 = vld [vmem:[%s2540_s4 + $0x10] sm:$0xf]  ;;  %v2321_v31 = vld [vmem:[%s2540_s4 + $0x20] sm:$0xf0] }
  0x37   : > { %v1853_v35 = vor.u32 %v2321_v31, %v1852_v30  ;;  %v2343_v30 = vld [vmem:[%s2540_s4 + $0xd4] sm:$0xf]  ;;  %v1946_v31 = vld [vmem:[%s2540_s4 + $0xe4] sm:$0xf0] }
  0x38   : > { %1188 = vmatpush.bf16.msrb.mxu2 %v2417_v33  ;;  %v1845_v33 = vor.u32 %v2320_v27, %v1844_v26  ;;  %v2342_v26 = vld [vmem:[%s2540_s4 + $0xcc] sm:$0xf]  ;;  %v1938_v27 = vld [vmem:[%s2540_s4 + $0xdc] sm:$0xf0] }
  0x39   : > { %1277 = vmatpush.bf16.msrb.mxu3 %v2425_v34  ;;  %v1849_v34 = vor.u32 %v2318_v28, %v1846_v29  ;;  %v1944_v28 = vld [vmem:[%s2540_s4 + $0xd0] sm:$0xf]  ;;  %v2345_v29 = vld [vmem:[%s2540_s4 + $0xe0] sm:$0xf0] }
  0x3a   : > { %1099 = vmatpush.bf16.msrb.mxu1 %v2409_v42  ;;  %1366 = vmatpush.bf16.msrb.mxu0 %v2433_v43  ;;  %v1872_v42 = vld [vmem:[%s2540_s4 + $0x38] sm:$0xf]  ;;  %v2326_v43 = vld [vmem:[%s2540_s4 + $0x48] sm:$0xf0] }
  0x3b   : > { %1040 = vmatmul.bf16.gmra.mxu1 %v1937_v46  ;;  %1060 = vmatmul.bf16.gmra.mxu2 %v2017_v47  ;;  %v1869_v46 = vor.u32 %v2323_v40, %v1866_v41  ;;  %v1873_v47 = vor.u32 %v2326_v43, %v1872_v42 }
  0x3c   : > { %1189 = vmatpush.bf16.msrb.mxu2 %v2416_v44  ;;  %1080 = vmatmul.bf16.gmra.mxu3 %v2097_v48  ;;  %v1861_v44 = vor.u32 %v2322_v36, %v1858_v37  ;;  %v2327_v48 = vld [vmem:[%s2540_s4 + $0x54] sm:$0xf]  ;;  %v1941_v36 = vor.u32 %v2342_v26, %v1938_v27  ;;  %v1945_v37 = vor.u32 %v2345_v29, %v1944_v28  ;;  %v2800_v28 = vld [vmem:[%s3426_s2] ss:$0 sm:$0xff]  ;;  %v2357_v29 = vld [vmem:[%s2540_s4 + $0x144] sm:$0xf] }
  0x3d   : > { %1278 = vmatpush.bf16.msrb.mxu3 %v2424_v45  ;;  %1020 = vmatmul.bf16.gmra.mxu0 %v1857_v49  ;;  %v1865_v45 = vor.u32 %v2325_v39, %v1864_v38  ;;  %v1878_v49 = vld [vmem:[%s2540_s4 + $0x64] sm:$0xf0]  ;;  %v1949_v39 = vor.u32 %v2343_v30, %v1946_v31  ;;  %v1998_v30 = vld [vmem:[%s2540_s4 + $0x154] sm:$0xf0] }
  0x3e   : > { %1100 = vmatpush.bf16.msrb.mxu1 %v2408_v50  ;;  %1367 = vmatpush.bf16.msrb.mxu0 %v2432_v51  ;;  %v1884_v50 = vld [vmem:[%s2540_s4 + $0x58] sm:$0xf]  ;;  %v2330_v51 = vld [vmem:[%s2540_s4 + $0x68] sm:$0xf0]  ;;  %v2004_v31 = vld [vmem:[%s2540_s4 + $0x148] sm:$0xf] }
  0x40   : > { %1190 = vmatpush.bf16.msrb.mxu2 %v2415_v52  ;;  %v2328_v52 = vld [vmem:[%s2540_s4 + $0x5c] sm:$0xf] }
  0x41   : > { %1279 = vmatpush.bf16.msrb.mxu3 %v2423_v53  ;;  %v1886_v53 = vld [vmem:[%s2540_s4 + $0x6c] sm:$0xf0] }
  0x42   : > { %1101 = vmatpush.bf16.msrb.mxu1 %v2407_v54  ;;  %1368 = vmatpush.bf16.msrb.mxu0 %v2431_v55  ;;  %v1892_v54 = vld [vmem:[%s2540_s4 + $0x60] sm:$0xf]  ;;  %v2331_v55 = vld [vmem:[%s2540_s4 + $0x70] sm:$0xf0] }
  0x44   : > { %1191 = vmatpush.bf16.msrb.mxu2 %v2414_v56  ;;  %v1881_v56 = vor.u32 %v2327_v48, %v1878_v49  ;;  %v1964_v48 = vld [vmem:[%s2540_s4 + $0xf8] sm:$0xf]  ;;  %v2350_v49 = vld [vmem:[%s2540_s4 + $0x108] sm:$0xf0] }
  0x45   : > { %1280 = vmatpush.bf16.msrb.mxu3 %v2422_v57  ;;  %v1885_v57 = vor.u32 %v2330_v51, %v1884_v50  ;;  %v2348_v50 = vld [vmem:[%s2540_s4 + $0xfc] sm:$0xf]  ;;  %v1966_v51 = vld [vmem:[%s2540_s4 + $0x10c] sm:$0xf0] }
  0x46   : > { %1102 = vmatpush.bf16.msrb.mxu1 %v2406_v58  ;;  %1369 = vmatpush.bf16.msrb.mxu0 %v2430_v59  ;;  %v1889_v58 = vor.u32 %v2328_v52, %v1886_v53  ;;  %v1893_v59 = vor.u32 %v2331_v55, %v1892_v54  ;;  %v1972_v52 = vld [vmem:[%s2540_s4 + $0x100] sm:$0xf]  ;;  %v2351_v53 = vld [vmem:[%s2540_s4 + $0x110] sm:$0xf0] }
  0x48   : > { %1192 = vmatpush.bf16.msrb.mxu2 %v2413_v61  ;;  %v1898_v61 = vld [vmem:[%s2540_s4 + $0x8c] sm:$0xf0] }
  0x49   : > { %1281 = vmatpush.bf16.msrb.mxu3 %v2421_v62  ;;  %v1904_v62 = vld [vmem:[%s2540_s4 + $0x80] sm:$0xf]  ;;  %v1901_v4 = vor.u32 %v2332_v60, %v1898_v61  ;;  %v1973_v60 = vor.u32 %v2351_v53, %v1972_v52 }
  0x4a   : > { %1103 = vmatpush.bf16.msrb.mxu1 %v2405_v6  ;;  %1370 = vmatpush.bf16.msrb.mxu0 %v2429_v7  ;;  %v1905_v5 = vor.u32 %v2335_v63, %v1904_v62  ;;  %v1909_v6 = vor.u32 %v2333_v0, %v1906_v1  ;;  %v1913_v7 = vor.u32 %v2336_v3, %v1912_v2  ;;  %v2352_v2 = vld [vmem:[%s2540_s4 + $0x11c] sm:$0xf]  ;;  %v1978_v3 = vld [vmem:[%s2540_s4 + $0x12c] sm:$0xf0] }
  0x4b   : > { %1045 = vmatmul.bf16.gmra.mxu1 %v1957_v8  ;;  %1065 = vmatmul.bf16.gmra.mxu2 %v2037_v9  ;;  %v2337_v8 = vld [vmem:[%s2540_s4 + $0xa4] sm:$0xf]  ;;  %v1918_v9 = vld [vmem:[%s2540_s4 + $0xb4] sm:$0xf0]  ;;  %v1981_v12 = vor.u32 %v2352_v2, %v1978_v3 }
  0x4c   : > { %1085 = vmatmul.bf16.gmra.mxu3 %v2117_v10  ;;  %v1924_v10 = vld [vmem:[%s2540_s4 + $0xa8] sm:$0xf]  ;;  %v1921_v16 = vor.u32 %v2337_v8, %v1918_v9  ;;  %v2356_v9 = vld [vmem:[%s2540_s4 + $0x138] sm:$0xf0] }
  0x4d   : > { %1025 = vmatmul.bf16.gmra.mxu0 %v1877_v11  ;;  %v2340_v11 = vld [vmem:[%s2540_s4 + $0xb8] sm:$0xf0]  ;;  %v1992_v8 = vld [vmem:[%s2540_s4 + $0x128] sm:$0xf] }
  0x4e   : > { %v1925_v17 = vor.u32 %v2340_v11, %v1924_v10 }
  0x5b   : > { %1050 = vmatmul.bf16.gmra.mxu1 %v1977_v20  ;;  %1070 = vmatmul.bf16.gmra.mxu2 %v2057_v21  ;;  %v1933_v20 = vor.u32 %v2341_v15, %v1932_v14 }
  0x5c   : > { %1090 = vmatmul.bf16.gmra.mxu3 %v2137_v22 }
  0x5d   : > { %1030 = vmatmul.bf16.gmra.mxu0 %v1897_v23 }
  0x6b   : > { %1104 = vmatmul.bf16.vlgmr.msrb.gmra.mxu1 %v1841_v32  ;;  %1193 = vmatmul.bf16.vlgmr.msrb.gmra.mxu2 %v1845_v33  ;;  %v1952_v32 = vld [vmem:[%s2540_s4 + $0xd8] sm:$0xf]  ;;  %v2346_v33 = vld [vmem:[%s2540_s4 + $0xe8] sm:$0xf0] }
  0x6c   : > { %1282 = vmatmul.bf16.vlgmr.msrb.gmra.mxu3 %v1849_v34  ;;  %v1953_v40 = vor.u32 %v2346_v33, %v1952_v32  ;;  %v2360_v32 = vld [vmem:[%s2540_s4 + $0x158] sm:$0xf0]  ;;  %v2358_v33 = vld [vmem:[%s2540_s4 + $0x14c] sm:$0xf] }
  0x6d   : > { %1371 = vmatmul.bf16.vlgmr.msrb.gmra.mxu0 %v1853_v35 }
  0x7b   : > { %1109 = vmatmul.bf16.gmra.mxu1 %v1861_v44  ;;  %1198 = vmatmul.bf16.gmra.mxu2 %v1865_v45 }
  0x7c   : > { %1287 = vmatmul.bf16.gmra.mxu3 %v1869_v46  ;;  %v2347_v46 = vld [vmem:[%s2540_s4 + $0xf4] sm:$0xf] }
  0x7d   : > { %1376 = vmatmul.bf16.gmra.mxu0 %v1873_v47  ;;  %v1958_v47 = vld [vmem:[%s2540_s4 + $0x104] sm:$0xf0] }
  0x8b   : > { %1114 = vmatmul.bf16.gmra.mxu1 %v1881_v56  ;;  %1203 = vmatmul.bf16.gmra.mxu2 %v1885_v57  ;;  %v1961_v56 = vor.u32 %v2347_v46, %v1958_v47  ;;  %v1965_v57 = vor.u32 %v2350_v49, %v1964_v48  ;;  %v2001_v48 = vor.u32 %v2357_v29, %v1998_v30  ;;  %v2366_v29 = vld [vmem:[%s2540_s4 + $0x188] sm:$0xf0] }
  0x8c   : > { %1292 = vmatmul.bf16.gmra.mxu3 %v1889_v58  ;;  %v2005_v49 = vor.u32 %v2360_v32, %v2004_v31 }
  0x8d   : > { %1381 = vmatmul.bf16.gmra.mxu0 %v1893_v59  ;;  %v1969_v59 = vor.u32 %v2348_v50, %v1966_v51 }
  0x9b   : > { %1119 = vmatmul.bf16.gmra.mxu1 %v1901_v4  ;;  %1208 = vmatmul.bf16.gmra.mxu2 %v1905_v5  ;;  %v1984_v4 = vld [vmem:[%s2540_s4 + $0x120] sm:$0xf]  ;;  %v2355_v5 = vld [vmem:[%s2540_s4 + $0x130] sm:$0xf0] }
  0x9c   : > { %1297 = vmatmul.bf16.gmra.mxu3 %v1909_v6  ;;  %v2353_v6 = vld [vmem:[%s2540_s4 + $0x124] sm:$0xf]  ;;  %v1985_v13 = vor.u32 %v2355_v5, %v1984_v4 }
  0x9d   : > { %1386 = vmatmul.bf16.gmra.mxu0 %v1913_v7  ;;  %v1986_v7 = vld [vmem:[%s2540_s4 + $0x134] sm:$0xf0] }
  0x9e   : > { %v1989_v15 = vor.u32 %v2353_v6, %v1986_v7  ;;  %v2362_v7 = vld [vmem:[%s2540_s4 + $0x16c] sm:$0xf] }
  0xa8   : > { %v2713_v18 = vpop.f32.mrf.mxu1 }
  0xaa   : > { %v2715_v21 = vpop.f32.mrf.mxu0 }
  0xab   : > { %1124 = vmatmul.bf16.gmra.mxu1 %v1921_v16  ;;  %1213 = vmatmul.bf16.gmra.mxu2 %v1925_v17  ;;  %v1993_v16 = vor.u32 %v2356_v9, %v1992_v8  ;;  %v1017_v46 = vadd.f32 %v2800_v28, %v2715_v21  ;;  %v2018_v8 = vld [vmem:[%s2540_s4 + $0x17c] sm:$0xf0]  ;;  %v2024_v9 = vld [vmem:[%s2540_s4 + $0x170] sm:$0xf] }
  0xac   : > { %1302 = vmatmul.bf16.gmra.mxu3 %v1929_v19 }
  0xad   : > { %1391 = vmatmul.bf16.gmra.mxu0 %v1933_v20 }
  0xae   : > { %v2717_v22 = vpop.f32.mrf.mxu2 }
  0xaf   : > { %v2719_v23 = vpop.f32.mrf.mxu3 }
  0xb0   : > { %v2721_v24 = vpop.f32.mrf.mxu1 }
  0xb2   : > { %v2723_v25 = vpop.f32.mrf.mxu0 }
  0xb6   : > { %v2733_v34 = vpop.f32.mrf.mxu2 }
  0xb7   : > { %v2735_v35 = vpop.f32.mrf.mxu3 }
  0xb8   : > { %v2737_v38 = vpop.f32.mrf.mxu1 }
  0xba   : > { %v2739_v41 = vpop.f32.mrf.mxu0 }
  0xbb   : > { %1129 = vmatmul.bf16.gmra.mxu1 %v1941_v36  ;;  %1218 = vmatmul.bf16.gmra.mxu2 %v1945_v37  ;;  %v2006_v36 = vld [vmem:[%s2540_s4 + $0x15c] sm:$0xf0]  ;;  %v2012_v37 = vld [vmem:[%s2540_s4 + $0x150] sm:$0xf] }
  0xbc   : > { %1307 = vmatmul.bf16.gmra.mxu3 %v1949_v39  ;;  %v2361_v39 = vld [vmem:[%s2540_s4 + $0x160] sm:$0xf0]  ;;  %v2009_v51 = vor.u32 %v2358_v33, %v2006_v36  ;;  %v2021_v33 = vor.u32 %v2362_v7, %v2018_v8  ;;  %v2370_v7 = vld [vmem:[%s2540_s4 + $0x1a8] sm:$0xf0]  ;;  %v2368_v8 = vld [vmem:[%s2540_s4 + $0x19c] sm:$0xf] }
  0xbd   : > { %1396 = vmatmul.bf16.gmra.mxu0 %v1953_v40  ;;  %v2013_v52 = vor.u32 %v2361_v39, %v2012_v37 }
  0xbe   : > { %v2741_v42 = vpop.f32.mrf.mxu2 }
  0xbf   : > { %v2743_v43 = vpop.f32.mrf.mxu3 }
  0xc0   : > { %v2745_v44 = vpop.f32.mrf.mxu1 }
  0xc2   : > { %v2747_v45 = vpop.f32.mrf.mxu0 }
  0xc6   : > { %v2757_v54 = vpop.f32.mrf.mxu2 }
  0xc7   : > { %v2759_v55 = vpop.f32.mrf.mxu3 }
  0xc8   : > { %v2761_v58 = vpop.f32.mrf.mxu1 }
  0xca   : > { %v2763_v61 = vpop.f32.mrf.mxu0 }
  0xcb   : > { %1134 = vmatmul.bf16.gmra.mxu1 %v1961_v56  ;;  %1223 = vmatmul.bf16.gmra.mxu2 %v1965_v57  ;;  %v1019_v57 = vadd.f32 %v2800_v28, %v2723_v25  ;;  %v1022_v25 = vadd.f32 %v2800_v28, %v2739_v41 }
  0xcc   : > { %1312 = vmatmul.bf16.gmra.mxu3 %v1969_v59 }
  0xcd   : > { %1401 = vmatmul.bf16.gmra.mxu0 %v1973_v60 }
  0xce   : > { %v2765_v62 = vpop.f32.mrf.mxu2 }
  0xcf   : > { %v2767_v63 = vpop.f32.mrf.mxu3 }
  0xd0   : > { %v2769_v0 = vpop.f32.mrf.mxu1 }
  0xd2   : > { %v2771_v1 = vpop.f32.mrf.mxu0 }
  0xd6   : > { %v2781_v10 = vpop.f32.mrf.mxu2 }
  0xd7   : > { %v2783_v11 = vpop.f32.mrf.mxu3 }
  0xd8   : > { %v2785_v14 = vpop.f32.mrf.mxu1 }
  0xda   : > { %v2787_v17 = vpop.f32.mrf.mxu0 }
  0xdb   : > { %1139 = vmatmul.bf16.gmra.mxu1 %v1981_v12  ;;  %1228 = vmatmul.bf16.gmra.mxu2 %v1985_v13  ;;  %v2365_v12 = vld [vmem:[%s2540_s4 + $0x180] sm:$0xf0]  ;;  %v2363_v13 = vld [vmem:[%s2540_s4 + $0x174] sm:$0xf] }
  0xdc   : > { %1317 = vmatmul.bf16.gmra.mxu3 %v1989_v15  ;;  %v2026_v15 = vld [vmem:[%s2540_s4 + $0x184] sm:$0xf0]  ;;  %v2025_v36 = vor.u32 %v2365_v12, %v2024_v9  ;;  %v2046_v9 = vld [vmem:[%s2540_s4 + $0x1ac] sm:$0xf0]  ;;  %v2052_v12 = vld [vmem:[%s2540_s4 + $0x1a0] sm:$0xf] }
  0xdd   : > { %1406 = vmatmul.bf16.gmra.mxu0 %v1993_v16  ;;  %v2032_v16 = vld [vmem:[%s2540_s4 + $0x178] sm:$0xf]  ;;  %v2029_v39 = vor.u32 %v2363_v13, %v2026_v15  ;;  %v2371_v13 = vld [vmem:[%s2540_s4 + $0x1b0] sm:$0xf0] }
  0xde   : > { %v2789_v19 = vpop.f32.mrf.mxu2 }
  0xdf   : > { %v2791_v20 = vpop.f32.mrf.mxu3 }
  0xe0   : > { %v2793_v26 = vpop.f32.mrf.mxu1 }
  0xe2   : > { %v2795_v27 = vpop.f32.mrf.mxu0 }
  0xe6   : > { %v2810_v40 = vpop.f32.mrf.mxu2 }
  0xe7   : > { %v2814_v47 = vpop.f32.mrf.mxu3 }
  0xe8   : > { %v1105_v50 = vpop.f32.mrf.mxu1 }
  0xe9   : > { %v1106_v53 = vadd.f32 %v1105_v50, %v1017_v46  ;;  %v2033_v46 = vor.u32 %v2366_v29, %v2032_v16 }
  0xea   : > { %v1372_v56 = vpop.f32.mrf.mxu0 }
  0xeb   : > { %1144 = vmatmul.bf16.gmra.mxu1 %v2001_v48  ;;  %1233 = vmatmul.bf16.gmra.mxu2 %v2005_v49 }
  0xec   : > { %1322 = vmatmul.bf16.gmra.mxu3 %v2009_v51 }
  0xed   : > { %1411 = vmatmul.bf16.gmra.mxu0 %v2013_v52  ;;  %v1024_v52 = vadd.f32 %v2800_v28, %v2747_v45  ;;  %v1027_v45 = vadd.f32 %v2800_v28, %v2763_v61 }
  0xee   : > { %v1194_v21 = vpop.f32.mrf.mxu2 }
  0xef   : > { %v1195_v59 = vadd.f32 %v1194_v21, %v1106_v53  ;;  %v1283_v60 = vpop.f32.mrf.mxu3 }
  0xf0   : > { %v1107_v2 = vpop.f32.mrf.mxu1 }
  0xf1   : > { %v1284_v3 = vadd.f32 %v1283_v60, %v1195_v59  ;;  %v1108_v4 = vadd.f32 %v1107_v2, %v1019_v57 }
  0xf2   : > { %v1374_v5 = vpop.f32.mrf.mxu0 }
  0xf3   : > { %v2818_v6 = vadd.f32 %v1372_v56, %v1284_v3  ;;  %v2367_v3 = vld [vmem:[%s2540_s4 + $0x194] sm:$0xf] }
  0xf6   : > { %v1196_v30 = vpop.f32.mrf.mxu2 }
  0xf7   : > { %v1197_v31 = vadd.f32 %v1196_v30, %v1108_v4  ;;  %v1285_v32 = vpop.f32.mrf.mxu3  ;;  %v2038_v4 = vld [vmem:[%s2540_s4 + $0x1a4] sm:$0xf0] }
  0xf8   : > { %v1110_v37 = vpop.f32.mrf.mxu1  ;;  %v2041_v30 = vor.u32 %v2367_v3, %v2038_v4  ;;  %v2375_v3 = vld [vmem:[%s2540_s4 + $0x1d0] sm:$0xf0]  ;;  %v2373_v4 = vld [vmem:[%s2540_s4 + $0x1c4] sm:$0xf] }
  0xf9   : > { %v1286_v48 = vadd.f32 %v1285_v32, %v1197_v31  ;;  %v1111_v49 = vadd.f32 %v1110_v37, %v1022_v25  ;;  %v2049_v32 = vor.u32 %v2368_v8, %v2046_v9  ;;  %v2376_v8 = vld [vmem:[%s2540_s4 + $0x1d8] sm:$0xf0] }
  0xfa   : > { %v1377_v50 = vpop.f32.mrf.mxu0 }
  0xfb   : > { %v2830_v51 = vadd.f32 %v1374_v5, %v1286_v48  ;;  %1149 = vmatmul.bf16.gmra.mxu1 %v2021_v33  ;;  %1238 = vmatmul.bf16.gmra.mxu2 %v2025_v36  ;;  %v2044_v5 = vld [vmem:[%s2540_s4 + $0x198] sm:$0xf]  ;;  %v2053_v33 = vor.u32 %v2371_v13, %v2052_v12  ;;  %v1029_v48 = vadd.f32 %v2800_v28, %v2771_v1 }
  0xfc   : > { %1327 = vmatmul.bf16.gmra.mxu3 %v2029_v39  ;;  %v2045_v25 = vor.u32 %v2370_v7, %v2044_v5  ;;  %v2066_v5 = vld [vmem:[%s2540_s4 + $0x1d4] sm:$0xf0]  ;;  %v2072_v7 = vld [vmem:[%s2540_s4 + $0x1c8] sm:$0xf]  ;;  %v1032_v1 = vadd.f32 %v2800_v28, %v2787_v17 }
  0xfd   : > { %1416 = vmatmul.bf16.gmra.mxu0 %v2033_v46 }
  0xfe   : > { %v1199_v41 = vpop.f32.mrf.mxu2 }
  0xff   : > { %v1200_v53 = vadd.f32 %v1199_v41, %v1111_v49  ;;  %v1288_v56 = vpop.f32.mrf.mxu3 }
 0x100   : > { %v1112_v21 = vpop.f32.mrf.mxu1 }
 0x101   : > { %v1289_v57 = vadd.f32 %v1288_v56, %v1200_v53  ;;  %v1113_v59 = vadd.f32 %v1112_v21, %v1024_v52 }
 0x102   : > { %v1379_v60 = vpop.f32.mrf.mxu0 }
 0x103   : > { %v2834_v2 = vadd.f32 %v1377_v50, %v1289_v57  ;;  %v2372_v57 = vld [vmem:[%s2540_s4 + $0x1bc] sm:$0xf] }
 0x106   : > { %v1201_v15 = vpop.f32.mrf.mxu2 }
 0x107   : > { %v1202_v16 = vadd.f32 %v1201_v15, %v1113_v59  ;;  %v1290_v29 = vpop.f32.mrf.mxu3  ;;  %v2058_v59 = vld [vmem:[%s2540_s4 + $0x1cc] sm:$0xf0] }
 0x108   : > { %v1115_v31 = vpop.f32.mrf.mxu1  ;;  %v2061_v15 = vor.u32 %v2372_v57, %v2058_v59  ;;  %v2380_v57 = vld [vmem:[%s2540_s4 + $0x1f8] sm:$0xf0]  ;;  %v2378_v59 = vld [vmem:[%s2540_s4 + $0x1ec] sm:$0xf] }
 0x109   : > { %v1291_v36 = vadd.f32 %v1290_v29, %v1202_v16  ;;  %v1116_v37 = vadd.f32 %v1115_v31, %v1027_v45  ;;  %v2069_v29 = vor.u32 %v2373_v4, %v2066_v5  ;;  %v2381_v4 = vld [vmem:[%s2540_s4 + $0x200] sm:$0xf0] }
 0x10a   : > { %v1382_v39 = vpop.f32.mrf.mxu0 }
 0x10b   : > { %v2846_v46 = vadd.f32 %v1379_v60, %v1291_v36  ;;  %1154 = vmatmul.bf16.gmra.mxu1 %v2041_v30  ;;  %1243 = vmatmul.bf16.gmra.mxu2 %v2045_v25  ;;  %v2064_v60 = vld [vmem:[%s2540_s4 + $0x1c0] sm:$0xf]  ;;  %v2073_v30 = vor.u32 %v2376_v8, %v2072_v7  ;;  %v1034_v36 = vadd.f32 %v2800_v28, %v2795_v27 }
 0x10c   : > { %1332 = vmatmul.bf16.gmra.mxu3 %v2049_v32  ;;  %v2065_v45 = vor.u32 %v2375_v3, %v2064_v60  ;;  %v2086_v60 = vld [vmem:[%s2540_s4 + $0x1fc] sm:$0xf0]  ;;  %v2092_v3 = vld [vmem:[%s2540_s4 + $0x1f0] sm:$0xf]  ;;  %v1037_v27 = vadd.f32 %v2800_v28, %v2713_v18 }
 0x10d   : > { %1421 = vmatmul.bf16.gmra.mxu0 %v2053_v33 }
 0x10e   : > { %v1204_v61 = vpop.f32.mrf.mxu2 }
 0x10f   : > { %v1205_v49 = vadd.f32 %v1204_v61, %v1116_v37  ;;  %v1293_v50 = vpop.f32.mrf.mxu3 }
 0x110   : > { %v1117_v41 = vpop.f32.mrf.mxu1 }
 0x111   : > { %v1294_v52 = vadd.f32 %v1293_v50, %v1205_v49  ;;  %v1118_v53 = vadd.f32 %v1117_v41, %v1029_v48 }
 0x112   : > { %v1384_v56 = vpop.f32.mrf.mxu0 }
 0x113   : > { %v2850_v21 = vadd.f32 %v1382_v39, %v1294_v52  ;;  %v2377_v52 = vld [vmem:[%s2540_s4 + $0x1e4] sm:$0xf] }
 0x116   : > { %v1206_v9 = vpop.f32.mrf.mxu2 }
 0x117   : > { %v1207_v12 = vadd.f32 %v1206_v9, %v1118_v53  ;;  %v1295_v13 = vpop.f32.mrf.mxu3  ;;  %v2078_v53 = vld [vmem:[%s2540_s4 + $0x1f4] sm:$0xf0] }
 0x118   : > { %v1120_v16 = vpop.f32.mrf.mxu1  ;;  %v2081_v9 = vor.u32 %v2377_v52, %v2078_v53  ;;  %v2385_v52 = vld [vmem:[%s2540_s4 + $0x220] sm:$0xf0]  ;;  %v2383_v53 = vld [vmem:[%s2540_s4 + $0x214] sm:$0xf] }
 0x119   : > { %v1296_v25 = vadd.f32 %v1295_v13, %v1207_v12  ;;  %v1121_v31 = vadd.f32 %v1120_v16, %v1032_v1  ;;  %v2089_v13 = vor.u32 %v2378_v59, %v2086_v60  ;;  %v2386_v59 = vld [vmem:[%s2540_s4 + $0x228] sm:$0xf0] }
 0x11a   : > { %v1387_v32 = vpop.f32.mrf.mxu0 }
 0x11b   : > { %v2862_v33 = vadd.f32 %v1384_v56, %v1296_v25  ;;  %1159 = vmatmul.bf16.gmra.mxu1 %v2061_v15  ;;  %1248 = vmatmul.bf16.gmra.mxu2 %v2065_v45  ;;  %v2084_v56 = vld [vmem:[%s2540_s4 + $0x1e8] sm:$0xf]  ;;  %v2093_v15 = vor.u32 %v2381_v4, %v2092_v3  ;;  %v1039_v25 = vadd.f32 %v2800_v28, %v2721_v24 }
 0x11c   : > { %1337 = vmatmul.bf16.gmra.mxu3 %v2069_v29  ;;  %v2085_v1 = vor.u32 %v2380_v57, %v2084_v56  ;;  %v2106_v56 = vld [vmem:[%s2540_s4 + $0x224] sm:$0xf0]  ;;  %v2112_v57 = vld [vmem:[%s2540_s4 + $0x218] sm:$0xf]  ;;  %v1042_v24 = vadd.f32 %v2800_v28, %v2737_v38 }
 0x11d   : > { %1426 = vmatmul.bf16.gmra.mxu0 %v2073_v30 }
 0x11e   : > { %v1209_v17 = vpop.f32.mrf.mxu2 }
 0x11f   : > { %v1210_v37 = vadd.f32 %v1209_v17, %v1121_v31  ;;  %v1298_v39 = vpop.f32.mrf.mxu3 }
 0x120   : > { %v1122_v61 = vpop.f32.mrf.mxu1 }
 0x121   : > { %v1299_v48 = vadd.f32 %v1298_v39, %v1210_v37  ;;  %v1123_v49 = vadd.f32 %v1122_v61, %v1034_v36 }
 0x122   : > { %v1389_v50 = vpop.f32.mrf.mxu0 }
 0x123   : > { %v2866_v41 = vadd.f32 %v1387_v32, %v1299_v48  ;;  %v2382_v48 = vld [vmem:[%s2540_s4 + $0x20c] sm:$0xf] }
 0x126   : > { %v1211_v5 = vpop.f32.mrf.mxu2 }
 0x127   : > { %v1212_v7 = vadd.f32 %v1211_v5, %v1123_v49  ;;  %v1300_v8 = vpop.f32.mrf.mxu3  ;;  %v2098_v49 = vld [vmem:[%s2540_s4 + $0x21c] sm:$0xf0] }
 0x128   : > { %v1125_v12 = vpop.f32.mrf.mxu1  ;;  %v2101_v5 = vor.u32 %v2382_v48, %v2098_v49  ;;  %v2390_v48 = vld [vmem:[%s2540_s4 + $0x248] sm:$0xf0]  ;;  %v2388_v49 = vld [vmem:[%s2540_s4 + $0x23c] sm:$0xf] }
 0x129   : > { %v1301_v45 = vadd.f32 %v1300_v8, %v1212_v7  ;;  %v1126_v16 = vadd.f32 %v1125_v12, %v1037_v27  ;;  %v2109_v8 = vor.u32 %v2383_v53, %v2106_v56  ;;  %v2391_v53 = vld [vmem:[%s2540_s4 + $0x250] sm:$0xf0] }
 0x12a   : > { %v1392_v29 = vpop.f32.mrf.mxu0 }
 0x12b   : > { %v2878_v30 = vadd.f32 %v1389_v50, %v1301_v45  ;;  %1164 = vmatmul.bf16.gmra.mxu1 %v2081_v9  ;;  %1253 = vmatmul.bf16.gmra.mxu2 %v2085_v1  ;;  %v2104_v50 = vld [vmem:[%s2540_s4 + $0x210] sm:$0xf]  ;;  %v2113_v9 = vor.u32 %v2386_v59, %v2112_v57  ;;  %v1044_v45 = vadd.f32 %v2800_v28, %v2745_v44 }
 0x12c   : > { %1342 = vmatmul.bf16.gmra.mxu3 %v2089_v13  ;;  %v2105_v27 = vor.u32 %v2385_v52, %v2104_v50  ;;  %v2126_v50 = vld [vmem:[%s2540_s4 + $0x24c] sm:$0xf0]  ;;  %v2132_v52 = vld [vmem:[%s2540_s4 + $0x240] sm:$0xf]  ;;  %v1047_v44 = vadd.f32 %v2800_v28, %v2761_v58 }
 0x12d   : > { %1431 = vmatmul.bf16.gmra.mxu0 %v2093_v15 }
 0x12e   : > { %v1214_v18 = vpop.f32.mrf.mxu2 }
 0x12f   : > { %v1215_v31 = vadd.f32 %v1214_v18, %v1126_v16  ;;  %v1303_v32 = vpop.f32.mrf.mxu3 }
 0x130   : > { %v1127_v17 = vpop.f32.mrf.mxu1 }
 0x131   : > { %v1304_v36 = vadd.f32 %v1303_v32, %v1215_v31  ;;  %v1128_v37 = vadd.f32 %v1127_v17, %v1039_v25 }
 0x132   : > { %v1394_v39 = vpop.f32.mrf.mxu0 }
 0x133   : > { %v2882_v61 = vadd.f32 %v1392_v29, %v1304_v36  ;;  %v2387_v36 = vld [vmem:[%s2540_s4 + $0x234] sm:$0xf] }
 0x136   : > { %v1216_v60 = vpop.f32.mrf.mxu2 }
 0x137   : > { %v1217_v3 = vadd.f32 %v1216_v60, %v1128_v37  ;;  %v1305_v4 = vpop.f32.mrf.mxu3  ;;  %v2118_v37 = vld [vmem:[%s2540_s4 + $0x244] sm:$0xf0] }
 0x138   : > { %v1130_v7 = vpop.f32.mrf.mxu1  ;;  %v2121_v60 = vor.u32 %v2387_v36, %v2118_v37  ;;  %v2395_v36 = vld [vmem:[%s2540_s4 + $0x270] sm:$0xf0]  ;;  %v2393_v37 = vld [vmem:[%s2540_s4 + $0x264] sm:$0xf] }
 0x139   : > { %v1306_v1 = vadd.f32 %v1305_v4, %v1217_v3  ;;  %v1131_v12 = vadd.f32 %v1130_v7, %v1042_v24  ;;  %v2129_v4 = vor.u32 %v2388_v49, %v2126_v50  ;;  %v2396_v49 = vld [vmem:[%s2540_s4 + $0x278] sm:$0xf0] }
 0x13a   : > { %v1397_v13 = vpop.f32.mrf.mxu0 }
 0x13b   : > { %v2894_v15 = vadd.f32 %v1394_v39, %v1306_v1  ;;  %1169 = vmatmul.bf16.gmra.mxu1 %v2101_v5  ;;  %1258 = vmatmul.bf16.gmra.mxu2 %v2105_v27  ;;  %v2124_v39 = vld [vmem:[%s2540_s4 + $0x238] sm:$0xf]  ;;  %v2133_v5 = vor.u32 %v2391_v53, %v2132_v52  ;;  %v1049_v1 = vadd.f32 %v2800_v28, %v2769_v0 }
 0x13c   : > { %1347 = vmatmul.bf16.gmra.mxu3 %v2109_v8  ;;  %v2125_v24 = vor.u32 %v2390_v48, %v2124_v39  ;;  %v2146_v39 = vld [vmem:[%s2540_s4 + $0x274] sm:$0xf0]  ;;  %v2152_v48 = vld [vmem:[%s2540_s4 + $0x268] sm:$0xf]  ;;  %v1052_v0 = vadd.f32 %v2800_v28, %v2785_v14  ;;  %v1054_v14 = vadd.f32 %v2800_v28, %v2793_v26 }
 0x13d   : > { %1436 = vmatmul.bf16.gmra.mxu0 %v2113_v9 }
 0x13e   : > { %v1219_v38 = vpop.f32.mrf.mxu2 }
 0x13f   : > { %v1220_v16 = vadd.f32 %v1219_v38, %v1131_v12  ;;  %v1308_v29 = vpop.f32.mrf.mxu3 }
 0x140   : > { %v1132_v18 = vpop.f32.mrf.mxu1 }
 0x141   : > { %v1309_v25 = vadd.f32 %v1308_v29, %v1220_v16  ;;  %v1133_v31 = vadd.f32 %v1132_v18, %v1044_v45 }
 0x142   : > { %v1399_v32 = vpop.f32.mrf.mxu0 }
 0x143   : > { %v2898_v17 = vadd.f32 %v1397_v13, %v1309_v25  ;;  %v2392_v25 = vld [vmem:[%s2540_s4 + $0x25c] sm:$0xf] }
 0x146   : > { %v1221_v56 = vpop.f32.mrf.mxu2 }
 0x147   : > { %v1222_v57 = vadd.f32 %v1221_v56, %v1133_v31  ;;  %v1310_v59 = vpop.f32.mrf.mxu3  ;;  %v2138_v31 = vld [vmem:[%s2540_s4 + $0x26c] sm:$0xf0] }
 0x148   : > { %v1135_v3 = vpop.f32.mrf.mxu1  ;;  %v2141_v56 = vor.u32 %v2392_v25, %v2138_v31 }
 0x149   : > { %v1311_v27 = vadd.f32 %v1310_v59, %v1222_v57  ;;  %v1136_v7 = vadd.f32 %v1135_v3, %v1047_v44  ;;  %v2149_v59 = vor.u32 %v2393_v37, %v2146_v39 }
 0x14a   : > { %v1402_v8 = vpop.f32.mrf.mxu0 }
 0x14b   : > { %v2910_v9 = vadd.f32 %v1399_v32, %v1311_v27  ;;  %1174 = vmatmul.bf16.gmra.mxu1 %v2121_v60  ;;  %1263 = vmatmul.bf16.gmra.mxu2 %v2125_v24  ;;  %v2144_v32 = vld [vmem:[%s2540_s4 + $0x260] sm:$0xf]  ;;  %v2153_v60 = vor.u32 %v2396_v49, %v2152_v48  ;;  %v1059_v48 = vadd.f32 %v2800_v28, %v2733_v34  ;;  %s2316_s4 = sshll.u32 %s3432_s13, 8 }
 0x14c   : > { %1352 = vmatmul.bf16.gmra.mxu3 %v2129_v4  ;;  %v2145_v44 = vor.u32 %v2395_v36, %v2144_v32  ;;  %s3301_s29 = scalar_lea.vmem %s3427_s3, %s2316_s4 }
 0x14d   : > { %1441 = vmatmul.bf16.gmra.mxu0 %v2133_v5 }
 0x14e   : > { %v1224_v58 = vpop.f32.mrf.mxu2 }
 0x14f   : > { %v1225_v12 = vadd.f32 %v1224_v58, %v1136_v7  ;;  %v1313_v13 = vpop.f32.mrf.mxu3 }
 0x150   : > { %v1137_v38 = vpop.f32.mrf.mxu1 }
 0x151   : > { %v1314_v45 = vadd.f32 %v1313_v13, %v1225_v12  ;;  %v1138_v16 = vadd.f32 %v1137_v38, %v1049_v1 }
 0x152   : > { %v1404_v29 = vpop.f32.mrf.mxu0 }
 0x153   : > { %v2914_v18 = vadd.f32 %v1402_v8, %v1314_v45 }
 0x156   : > { %v1226_v50 = vpop.f32.mrf.mxu2 }
 0x157   : > { %v1227_v52 = vadd.f32 %v1226_v50, %v1138_v16  ;;  %v1315_v53 = vpop.f32.mrf.mxu3  ;;  %v1057_v16 = vadd.f32 %v2800_v28, %v2717_v22 }
 0x158   : > { %v1140_v57 = vpop.f32.mrf.mxu1 }
 0x159   : > { %v1316_v24 = vadd.f32 %v1315_v53, %v1227_v52  ;;  %v1141_v3 = vadd.f32 %v1140_v57, %v1052_v0  ;;  %v1062_v57 = vadd.f32 %v2800_v28, %v2741_v42 }
 0x15a   : > { %v1407_v4 = vpop.f32.mrf.mxu0 }
 0x15b   : > { %v2926_v5 = vadd.f32 %v1404_v29, %v1316_v24  ;;  %1179 = vmatmul.bf16.gmra.mxu1 %v2141_v56  ;;  %1268 = vmatmul.bf16.gmra.mxu2 %v2145_v44 }
 0x15c   : > { %1357 = vmatmul.bf16.gmra.mxu3 %v2149_v59 }
 0x15d   : > { %1446 = vmatmul.bf16.gmra.mxu0 %v2153_v60 }
 0x15e   : > { %v1229_v27 = vpop.f32.mrf.mxu2 }
 0x15f   : > { %v1230_v7 = vadd.f32 %v1229_v27, %v1141_v3  ;;  %v1318_v8 = vpop.f32.mrf.mxu3 }
 0x160   : > { %v1142_v58 = vpop.f32.mrf.mxu1 }
 0x161   : > { %v1319_v1 = vadd.f32 %v1318_v8, %v1230_v7  ;;  %v1143_v12 = vadd.f32 %v1142_v58, %v1054_v14  ;;  %v1064_v7 = vadd.f32 %v2800_v28, %v2757_v54 }
 0x162   : > { %v1409_v13 = vpop.f32.mrf.mxu0 }
 0x163   : > { %v2930_v38 = vadd.f32 %v1407_v4, %v1319_v1 }
 0x165   : > { %3429 = vst [vmem:[#allocation2_spill] sm:$0xff] %v2930_v38 }
 0x166   : > { %v1231_v45 = vpop.f32.mrf.mxu2 }
 0x167   : > { %v1232_v29 = vadd.f32 %v1231_v45, %v1143_v12  ;;  %v1320_v25 = vpop.f32.mrf.mxu3 }
 0x168   : > { %v1145_v31 = vpop.f32.mrf.mxu1 }
 0x169   : > { %v1321_v32 = vadd.f32 %v1320_v25, %v1232_v29  ;;  %v1146_v36 = vadd.f32 %v1145_v31, %v1057_v16  ;;  %v1067_v29 = vadd.f32 %v2800_v28, %v2765_v62  ;;  %v1454_v62 = vsel %vm1452_vm0, %v2830_v51, 0.0 }
 0x16a   : > { %v1412_v37 = vpop.f32.mrf.mxu0 }
 0x16b   : > { %v2934_v39 = vadd.f32 %v1409_v13, %v1321_v32 }
 0x16e   : > { %v1234_v26 = vpop.f32.mrf.mxu2 }
 0x16f   : > { %v1235_v49 = vadd.f32 %v1234_v26, %v1146_v36  ;;  %v1323_v50 = vpop.f32.mrf.mxu3 }
 0x170   : > { %v1147_v0 = vpop.f32.mrf.mxu1 }
 0x171   : > { %v1324_v52 = vadd.f32 %v1323_v50, %v1235_v49  ;;  %v1148_v53 = vadd.f32 %v1147_v0, %v1059_v48 }
 0x172   : > { %v1414_v56 = vpop.f32.mrf.mxu0 }
 0x173   : > { %v2938_v44 = vadd.f32 %v1412_v37, %v1324_v52 }
 0x176   : > { %v1236_v22 = vpop.f32.mrf.mxu2 }
 0x177   : > { %v1237_v59 = vadd.f32 %v1236_v22, %v1148_v53  ;;  %v1325_v60 = vpop.f32.mrf.mxu3 }
 0x178   : > { %v1150_v24 = vpop.f32.mrf.mxu1 }
 0x179   : > { %v1326_v3 = vadd.f32 %v1325_v60, %v1237_v59  ;;  %v1151_v4 = vadd.f32 %v1150_v24, %v1062_v57  ;;  %v1453_v60 = vsel %vm1452_vm0, %v2818_v6, 0.0  ;;  %v1456_v24 = vsel %vm1452_vm0, %v2834_v2, 0.0 }
 0x17a   : > { %v1417_v27 = vpop.f32.mrf.mxu0 }
 0x17b   : > { %v2942_v14 = vadd.f32 %v1414_v56, %v1326_v3 }
 0x17e   : > { %v1239_v34 = vpop.f32.mrf.mxu2 }
 0x17f   : > { %v1240_v8 = vadd.f32 %v1239_v34, %v1151_v4  ;;  %v1328_v58 = vpop.f32.mrf.mxu3  ;;  %v1455_v4 = vadd.f32 %v1454_v62, %v1453_v60  ;;  %v1472_v62 = vsel %vm1452_vm0, %v2898_v17, 0.0 }
 0x180   : > { %v1152_v1 = vpop.f32.mrf.mxu1 }
 0x181   : > { %v1329_v12 = vadd.f32 %v1328_v58, %v1240_v8  ;;  %v1153_v13 = vadd.f32 %v1152_v1, %v1064_v7  ;;  %v1457_v34 = vadd.f32 %v1456_v24, %v1455_v4  ;;  %v1460_v7 = vsel %vm1452_vm0, %v2850_v21, 0.0 }
 0x182   : > { %v1419_v45 = vpop.f32.mrf.mxu0  ;;  %v1462_v1 = vsel %vm1452_vm0, %v2862_v33, 0.0  ;;  %v1474_v4 = vsel %vm1452_vm0, %v2910_v9, 0.0 }
 0x183   : > { %v2946_v16 = vadd.f32 %v1417_v27, %v1329_v12  ;;  %v1458_v27 = vsel %vm1452_vm0, %v2846_v46, 0.0 }
 0x184   : > { %v1459_v8 = vadd.f32 %v1458_v27, %v1457_v34  ;;  %v1476_v34 = vsel %vm1452_vm0, %v2914_v18, 0.0 }
 0x186   : > { %v1241_v42 = vpop.f32.mrf.mxu2 }
 0x187   : > { %v1242_v25 = vadd.f32 %v1241_v42, %v1153_v13  ;;  %v1330_v31 = vpop.f32.mrf.mxu3  ;;  %v1461_v13 = vadd.f32 %v1460_v7, %v1459_v8  ;;  %v1464_v42 = vsel %vm1452_vm0, %v2866_v41, 0.0 }
 0x188   : > { %v1155_v32 = vpop.f32.mrf.mxu1 }
 0x189   : > { %v1331_v36 = vadd.f32 %v1330_v31, %v1242_v25  ;;  %v1156_v37 = vadd.f32 %v1155_v32, %v1067_v29  ;;  %v1463_v25 = vadd.f32 %v1462_v1, %v1461_v13  ;;  %v1466_v31 = vsel %vm1452_vm0, %v2878_v30, 0.0 }
 0x18a   : > { %v1422_v26 = vpop.f32.mrf.mxu0  ;;  %v1069_v1 = vadd.f32 %v2800_v28, %v2781_v10  ;;  %v1478_v13 = vsel %vm1452_vm0, %v2926_v5, 0.0  ;;  %v1482_v10 = vsel %vm1452_vm0, %v2934_v39, 0.0 }
 0x18b   : > { %v2950_v48 = vadd.f32 %v1419_v45, %v1331_v36  ;;  %v1465_v32 = vadd.f32 %v1464_v42, %v1463_v25  ;;  %v1468_v36 = vsel %vm1452_vm0, %v2882_v61, 0.0 }
 0x18e   : > { %v1244_v54 = vpop.f32.mrf.mxu2 }
 0x18f   : > { %v1245_v49 = vadd.f32 %v1244_v54, %v1156_v37  ;;  %v1333_v50 = vpop.f32.mrf.mxu3  ;;  %v1467_v37 = vadd.f32 %v1466_v31, %v1465_v32  ;;  %v1470_v54 = vsel %vm1452_vm0, %v2894_v15, 0.0  ;;  %v1072_v32 = vadd.f32 %v2800_v28, %v2789_v19 }
 0x190   : > { %v1157_v0 = vpop.f32.mrf.mxu1  ;;  %v1484_v19 = vsel %vm1452_vm0, %v2938_v44, 0.0 }
 0x191   : > { %v1334_v52 = vadd.f32 %v1333_v50, %v1245_v49  ;;  %v1469_v50 = vadd.f32 %v1468_v36, %v1467_v37  ;;  %v1480_v36 = vsel %vm1452_vm0, %v2930_v38, 0.0  ;;  %v1158_v37 = vadd.f32 %v1157_v0, %v1069_v1 }
 0x192   : > { %v2952_v53 = vpop.f32.mrf.mxu0  ;;  %v1079_v0 = vadd.f32 %v2800_v28, %v2735_v35  ;;  %v1082_v35 = vadd.f32 %v2800_v28, %v2743_v43 }
 0x193   : > { %v2954_v56 = vadd.f32 %v1422_v26, %v1334_v52  ;;  %v1471_v24 = vadd.f32 %v1470_v54, %v1469_v50 }
 0x195   : > { %v1473_v27 = vadd.f32 %v1472_v62, %v1471_v24  ;;  %v1074_v62 = vadd.f32 %v2800_v28, %v2810_v40  ;;  %v1486_v40 = vsel %vm1452_vm0, %v2942_v14, 0.0 }
 0x196   : > { %v1246_v22 = vpop.f32.mrf.mxu2 }
 0x197   : > { %v1335_v57 = vpop.f32.mrf.mxu3  ;;  %v1475_v7 = vadd.f32 %v1474_v4, %v1473_v27  ;;  %v1247_v24 = vadd.f32 %v1246_v22, %v1158_v37 }
 0x198   : > { %v1160_v59 = vpop.f32.mrf.mxu1 }
 0x199   : > { %v1477_v25 = vadd.f32 %v1476_v34, %v1475_v7  ;;  %v1161_v4 = vadd.f32 %v1160_v59, %v1072_v32  ;;  %v1077_v34 = vadd.f32 %v2800_v28, %v2719_v23  ;;  %v1488_v23 = vsel %vm1452_vm0, %v2946_v16, 0.0 }
 0x19a   : > { %v2962_v3 = vpop.f32.mrf.mxu0 }
 0x19b   : > { %v1479_v50 = vadd.f32 %v1478_v13, %v1477_v25  ;;  %v1336_v25 = vadd.f32 %v1335_v57, %v1247_v24  ;;  %v1492_v24 = vsel %vm1452_vm0, %v2954_v56, 0.0 }
 0x19d   : > { %v1481_v27 = vadd.f32 %v1480_v36, %v1479_v50 }
 0x19e   : > { %v1249_v58 = vpop.f32.mrf.mxu2 }
 0x19f   : > { %v1338_v12 = vpop.f32.mrf.mxu3  ;;  %v1250_v7 = vadd.f32 %v1249_v58, %v1161_v4  ;;  %v1483_v1 = vadd.f32 %v1482_v10, %v1481_v27  ;;  %v1490_v4 = vsel %vm1452_vm0, %v2950_v48, 0.0 }
 0x1a0   : > { %v1162_v45 = vpop.f32.mrf.mxu1 }
 0x1a1   : > { %v1163_v38 = vadd.f32 %v1162_v45, %v1074_v62  ;;  %v1485_v36 = vadd.f32 %v1484_v19, %v1483_v1  ;;  %v1339_v50 = vadd.f32 %v1338_v12, %v1250_v7 }
 0x1a2   : > { %v2972_v29 = vpop.f32.mrf.mxu0 }
 0x1a3   : > { %v1487_v10 = vadd.f32 %v1486_v40, %v1485_v36  ;;  %v3018_v12 = vadd.f32 %v2962_v3, %v1339_v50 }
 0x1a6   : > { %v1251_v26 = vpop.f32.mrf.mxu2 }
 0x1a7   : > { %v1340_v49 = vpop.f32.mrf.mxu3  ;;  %v1252_v22 = vadd.f32 %v1251_v26, %v1163_v38  ;;  %v3013_v38 = vadd.f32 %v2952_v53, %v1336_v25 }
 0x1a8   : > { %v1165_v52 = vpop.f32.mrf.mxu1 }
 0x1a9   : > { %v1166_v59 = vadd.f32 %v1165_v52, %v1077_v34  ;;  %v1341_v57 = vadd.f32 %v1340_v49, %v1252_v22  ;;  %v1489_v52 = vadd.f32 %v1488_v23, %v1487_v10  ;;  %v1494_v34 = vsel %vm1452_vm0, %v3013_v38, 0.0 }
 0x1aa   : > { %v1432_v60 = vpop.f32.mrf.mxu0  ;;  %v1084_v22 = vadd.f32 %v2800_v28, %v2759_v55 }
 0x1ab   : > { %v1491_v27 = vadd.f32 %v1490_v4, %v1489_v52  ;;  %v3023_v19 = vadd.f32 %v2972_v29, %v1341_v57 }
 0x1ad   : > { %v1498_v29 = vsel %vm1452_vm0, %v3023_v19, 0.0 }
 0x1ae   : > { %v1254_v8 = vpop.f32.mrf.mxu2 }
 0x1af   : > { %v1343_v42 = vpop.f32.mrf.mxu3  ;;  %v1255_v58 = vadd.f32 %v1254_v8, %v1166_v59 }
 0x1b0   : > { %v1167_v31 = vpop.f32.mrf.mxu1 }
 0x1b1   : > { %v1168_v45 = vadd.f32 %v1167_v31, %v1079_v0  ;;  %v1344_v8 = vadd.f32 %v1343_v42, %v1255_v58  ;;  %v1493_v0 = vadd.f32 %v1492_v24, %v1491_v27 }
 0x1b2   : > { %v1434_v54 = vpop.f32.mrf.mxu0 }
 0x1b3   : > { %v3027_v3 = vadd.f32 %v1432_v60, %v1344_v8  ;;  %v1495_v40 = vadd.f32 %v1494_v34, %v1493_v0  ;;  %v1089_v0 = vadd.f32 %v2800_v28, %v2783_v11 }
 0x1b5   : > { %v1500_v36 = vsel %vm1452_vm0, %v3027_v3, 0.0 }
 0x1b6   : > { %v1256_v13 = vpop.f32.mrf.mxu2 }
 0x1b7   : > { %v1345_v32 = vpop.f32.mrf.mxu3  ;;  %v1257_v26 = vadd.f32 %v1256_v13, %v1168_v45  ;;  %v1496_v13 = vsel %vm1452_vm0, %v3018_v12, 0.0 }
 0x1b8   : > { %v1170_v37 = vpop.f32.mrf.mxu1 }
 0x1b9   : > { %v1171_v31 = vadd.f32 %v1170_v37, %v1082_v35  ;;  %v1346_v53 = vadd.f32 %v1345_v32, %v1257_v26  ;;  %v1497_v32 = vadd.f32 %v1496_v13, %v1495_v40  ;;  %v1087_v26 = vadd.f32 %v2800_v28, %v2767_v63 }
 0x1ba   : > { %v1437_v62 = vpop.f32.mrf.mxu0 }
 0x1bb   : > { %v3033_v59 = vadd.f32 %v1434_v54, %v1346_v53  ;;  %v1499_v60 = vadd.f32 %v1498_v29, %v1497_v32 }
 0x1bd   : > { %v1502_v58 = vsel %vm1452_vm0, %v3033_v59, 0.0  ;;  %v1501_v55 = vadd.f32 %v1500_v36, %v1499_v60 }
 0x1be   : > { %v1259_v43 = vpop.f32.mrf.mxu2 }
 0x1bf   : > { %v1260_v49 = vadd.f32 %v1259_v43, %v1171_v31  ;;  %v1348_v7 = vpop.f32.mrf.mxu3  ;;  %v1503_v57 = vadd.f32 %v1502_v58, %v1501_v55 }
 0x1c0   : > { %v1172_v1 = vpop.f32.mrf.mxu1 }
 0x1c1   : > { %v1349_v42 = vadd.f32 %v1348_v7, %v1260_v49  ;;  %v1173_v23 = vadd.f32 %v1172_v1, %v1084_v22 }
 0x1c2   : > { %v1439_v25 = vpop.f32.mrf.mxu0 }
 0x1c3   : > { %v3037_v37 = vadd.f32 %v1437_v62, %v1349_v42 }
 0x1c5   : > { %v1504_v54 = vsel %vm1452_vm0, %v3037_v37, 0.0 }
 0x1c6   : > { %v1261_v50 = vpop.f32.mrf.mxu2  ;;  %v1505_v52 = vadd.f32 %v1504_v54, %v1503_v57  ;;  %v1094_v57 = vadd.f32 %v2800_v28, %v2814_v47 }
 0x1c7   : > { %v1262_v45 = vadd.f32 %v1261_v50, %v1173_v23  ;;  %v1350_v35 = vpop.f32.mrf.mxu3  ;;  %v1092_v23 = vadd.f32 %v2800_v28, %v2791_v20 }
 0x1c8   : > { %v1175_v10 = vpop.f32.mrf.mxu1 }
 0x1c9   : > { %v1351_v4 = vadd.f32 %v1350_v35, %v1262_v45  ;;  %v1176_v31 = vadd.f32 %v1175_v10, %v1087_v26 }
 0x1ca   : > { %v1442_v24 = vpop.f32.mrf.mxu0 }
 0x1cb   : > { %v3045_v62 = vadd.f32 %v1439_v25, %v1351_v4 }
 0x1cd   : > { %v1506_v8 = vsel %vm1452_vm0, %v3045_v62, 0.0 }
 0x1ce   : > { %v1507_v27 = vadd.f32 %v1506_v8, %v1505_v52  ;;  %v1264_v43 = vpop.f32.mrf.mxu2  ;;  %v2484_v52 = vmov 256.0  }
 0x1cf   : > { %v1265_v34 = vadd.f32 %v1264_v43, %v1176_v31  ;;  %v1353_v53 = vpop.f32.mrf.mxu3  ;;  %2472 = vrcp.f32 %v2484_v52 }
 0x1d0   : > { %v1177_v49 = vpop.f32.mrf.mxu1 }
 0x1d1   : > { %v1354_v7 = vadd.f32 %v1353_v53, %v1265_v34  ;;  %v1178_v13 = vadd.f32 %v1177_v49, %v1089_v0 }
 0x1d2   : > { %v1444_v40 = vpop.f32.mrf.mxu0 }
 0x1d3   : > { %v1443_v1 = vadd.f32 %v1442_v24, %v1354_v7 }
 0x1d5   : > { %v1508_v63 = vsel %vm1452_vm0, %v1443_v1, 0.0  ;;  %v2473_v53 = vpop.eup %2472 }
 0x1d6   : > { %v1509_v42 = vadd.f32 %v1508_v63, %v1507_v27  ;;  %v1266_v25 = vpop.f32.mrf.mxu2  ;;  %v1523_v63 = vmul.f32 256.0, %v2473_v53  ;;  %vm1527_vm1 = vweird.f32 %v2473_v53 }
 0x1d7   : > { %v1267_v22 = vadd.f32 %v1266_v25, %v1178_v13  ;;  %v1355_v29 = vpop.f32.mrf.mxu3 }
 0x1d8   : > { %v1180_v32 = vpop.f32.mrf.mxu1  ;;  %v1524_v28 = vsub.f32 1.0, %v1523_v63 }
 0x1d9   : > { %v1356_v36 = vadd.f32 %v1355_v29, %v1267_v22  ;;  %v1181_v58 = vadd.f32 %v1180_v32, %v1092_v23 }
 0x1da   : > { %v1447_v10 = vpop.f32.mrf.mxu0  ;;  %v1525_v25 = vmul.f32 %v2473_v53, %v1524_v28 }
 0x1db   : > { %v1445_v60 = vadd.f32 %v1444_v40, %v1356_v36 }
 0x1dc   : > { %v1526_v32 = vadd.f32 %v2473_v53, %v1525_v25 }
 0x1dd   : > { %v1510_v50 = vsel %vm1452_vm0, %v1445_v60, 0.0 }
 0x1de   : > { %v1511_v45 = vadd.f32 %v1510_v50, %v1509_v42  ;;  %v1269_v11 = vpop.f32.mrf.mxu2  ;;  %v3059_v23 = vsel %vm1527_vm1, %v2473_v53, %v1526_v32 }
 0x1df   : > { %v1270_v35 = vadd.f32 %v1269_v11, %v1181_v58  ;;  %v1358_v55 = vpop.f32.mrf.mxu3 }
 0x1e0   : > { %v1182_v4 = vpop.f32.mrf.mxu1 }
 0x1e1   : > { %v1359_v54 = vadd.f32 %v1358_v55, %v1270_v35  ;;  %v1183_v20 = vadd.f32 %v1182_v4, %v1094_v57 }
 0x1e2   : > { %v1449_v49 = vpop.f32.mrf.mxu0 }
 0x1e3   : > { %v1448_v26 = vadd.f32 %v1447_v10, %v1359_v54 }
 0x1e5   : > { %v1512_v24 = vsel %vm1452_vm0, %v1448_v26, 0.0 }
 0x1e6   : > { %v1513_v8 = vadd.f32 %v1512_v24, %v1511_v45  ;;  %v1271_v31 = vpop.f32.mrf.mxu2 }
 0x1e7   : > { %v1272_v27 = vadd.f32 %v1271_v31, %v1183_v20  ;;  %v1360_v43 = vpop.f32.mrf.mxu3 }
 0x1e9   : > { %v1361_v34 = vadd.f32 %v1360_v43, %v1272_v27 }
 0x1eb   : > { %v1450_v7 = vadd.f32 %v1449_v49, %v1361_v34 }
 0x1ed   : > { %v1514_v0 = vsel %vm1452_vm0, %v1450_v7, 0.0 }
 0x1ee   : > { %v1515_v13 = vadd.f32 %v1514_v0, %v1513_v8 }
 0x1f0   : > { %v1516_v42 = vrot.slane %v1515_v13, 4 }
 0x1f2   : > { %v1517_v47 = vadd.f32 %v1516_v42, %v1515_v13 }
 0x1f4   : > { %v1518_v40 = vrot.slane %v1517_v47, 2 }
 0x1f6   : > { %v1519_v22 = vadd.f32 %v1518_v40, %v1517_v47 }
 0x1f8   : > { %v1520_v29 = vrot.slane %v1519_v22, 1 }
 0x1fa   : > { %v1521_v36 = vadd.f32 %v1520_v29, %v1519_v22 }
 0x1fc   : > { %v3062_v50 = vmul.f32 %v3059_v23, %v1521_v36 }
 0x1fe   : > { %v3066_v58 = vsub.f32 %v3037_v37, %v3062_v50  ;;  %v3070_v45 = vsub.f32 %v3045_v62, %v3062_v50  ;;  %v3073_v11 = vsub.f32 %v1443_v1, %v3062_v50  ;;  %v3076_v35 = vsub.f32 %v1445_v60, %v3062_v50 }
 0x1ff   : > { %v3079_v55 = vsub.f32 %v1448_v26, %v3062_v50  ;;  %v3082_v10 = vsub.f32 %v1450_v7, %v3062_v50  ;;  %v3086_v37 = vsub.f32 %v2818_v6, %v3062_v50  ;;  %v3090_v62 = vsub.f32 %v2830_v51, %v3062_v50 }
 0x200   : > { %v3094_v1 = vsub.f32 %v2834_v2, %v3062_v50  ;;  %v3098_v60 = vsub.f32 %v2846_v46, %v3062_v50  ;;  %v3106_v6 = vsub.f32 %v2850_v21, %v3062_v50  ;;  %v3112_v2 = vsub.f32 %v2862_v33, %v3062_v50 }
 0x201   : > { %v1562_v54 = vmul.f32 %v3086_v37, %v3086_v37  ;;  %v1563_v4 = vmul.f32 %v3090_v62, %v3090_v62  ;;  %v3120_v24 = vsub.f32 %v2866_v41, %v3062_v50  ;;  %v3127_v33 = vsub.f32 %v2878_v30, %v3062_v50 }
 0x202   : > { %v1564_v51 = vmul.f32 %v3094_v1, %v3094_v1  ;;  %v1565_v46 = vmul.f32 %v3098_v60, %v3098_v60  ;;  %v1566_v21 = vmul.f32 %v3106_v6, %v3106_v6  ;;  %v1567_v31 = vmul.f32 %v3112_v2, %v3112_v2 }
 0x203   : > { %v1594_v57 = vsel %vm1452_vm0, %v1562_v54, 0.0  ;;  %v1595_v26 = vsel %vm1452_vm0, %v1563_v4, 0.0  ;;  %v3134_v41 = vsub.f32 %v2882_v61, %v3062_v50  ;;  %v1568_v34 = vmul.f32 %v3120_v24, %v3120_v24 }
 0x204   : > { %v1596_v52 = vadd.f32 %v1595_v26, %v1594_v57  ;;  %v1597_v20 = vsel %vm1452_vm0, %v1564_v51, 0.0  ;;  %v1599_v27 = vsel %vm1452_vm0, %v1565_v46, 0.0  ;;  %v1601_v53 = vsel %vm1452_vm0, %v1566_v21, 0.0  ;;  %v3430_v51 = vld [vmem:[#allocation2_spill] sm:$0xff] }
 0x205   : > { %v3141_v30 = vsub.f32 %v2894_v15, %v3062_v50  ;;  %v1569_v7 = vmul.f32 %v3127_v33, %v3127_v33  ;;  %v1603_v0 = vsel %vm1452_vm0, %v1567_v31, 0.0  ;;  %v3148_v61 = vsub.f32 %v2898_v17, %v3062_v50 }
 0x206   : > { %v1598_v8 = vadd.f32 %v1597_v20, %v1596_v52  ;;  %v1570_v13 = vmul.f32 %v3134_v41, %v3134_v41  ;;  %v1605_v42 = vsel %vm1452_vm0, %v1568_v34, 0.0  ;;  %v3155_v15 = vsub.f32 %v2910_v9, %v3062_v50 }
 0x207   : > { %v1571_v47 = vmul.f32 %v3141_v30, %v3141_v30  ;;  %v1607_v40 = vsel %vm1452_vm0, %v1569_v7, 0.0  ;;  %v3162_v17 = vsub.f32 %v2914_v18, %v3062_v50  ;;  %v1572_v22 = vmul.f32 %v3148_v61, %v3148_v61 }
 0x208   : > { %v1600_v43 = vadd.f32 %v1599_v27, %v1598_v8  ;;  %v1609_v29 = vsel %vm1452_vm0, %v1570_v13, 0.0  ;;  %v3169_v9 = vsub.f32 %v2926_v5, %v3062_v50  ;;  %v1573_v36 = vmul.f32 %v3155_v15, %v3155_v15 }
 0x209   : > { %v1611_v54 = vsel %vm1452_vm0, %v1571_v47, 0.0  ;;  %v3176_v18 = vsub.f32 %v3430_v51, %v3062_v50  ;;  %v1574_v46 = vmul.f32 %v3162_v17, %v3162_v17  ;;  %v1613_v57 = vsel %vm1452_vm0, %v1572_v22, 0.0 }
 0x20a   : > { %v1602_v49 = vadd.f32 %v1601_v53, %v1600_v43  ;;  %v3183_v5 = vsub.f32 %v2934_v39, %v3062_v50  ;;  %v1575_v52 = vmul.f32 %v3169_v9, %v3169_v9  ;;  %v1615_v21 = vsel %vm1452_vm0, %v1573_v36, 0.0 }
 0x20b   : > { %v3190_v8 = vsub.f32 %v2938_v44, %v3062_v50  ;;  %v1576_v31 = vmul.f32 %v3176_v18, %v3176_v18  ;;  %v1617_v27 = vsel %vm1452_vm0, %v1574_v46, 0.0  ;;  %v3197_v39 = vsub.f32 %v2942_v14, %v3062_v50 }
 0x20c   : > { %v1604_v63 = vadd.f32 %v1603_v0, %v1602_v49  ;;  %v1577_v34 = vmul.f32 %v3183_v5, %v3183_v5  ;;  %v1619_v53 = vsel %vm1452_vm0, %v1575_v52, 0.0  ;;  %v3204_v44 = vsub.f32 %v2946_v16, %v3062_v50 }
 0x20d   : > { %v1578_v7 = vmul.f32 %v3190_v8, %v3190_v8  ;;  %v1621_v0 = vsel %vm1452_vm0, %v1576_v31, 0.0  ;;  %v3211_v14 = vsub.f32 %v2950_v48, %v3062_v50  ;;  %v1579_v13 = vmul.f32 %v3197_v39, %v3197_v39 }
 0x20e   : > { %v1606_v28 = vadd.f32 %v1605_v42, %v1604_v63  ;;  %v1623_v42 = vsel %vm1452_vm0, %v1577_v34, 0.0  ;;  %v3218_v16 = vsub.f32 %v2954_v56, %v3062_v50  ;;  %v1580_v47 = vmul.f32 %v3204_v44, %v3204_v44 }
 0x20f   : > { %v3225_v48 = vsub.f32 %v3013_v38, %v3062_v50  ;;  %v1581_v22 = vmul.f32 %v3211_v14, %v3211_v14  ;;  %v3232_v56 = vsub.f32 %v3018_v12, %v3062_v50  ;;  %v3239_v38 = vsub.f32 %v3023_v19, %v3062_v50 }
 0x210   : > { %v1608_v25 = vadd.f32 %v1607_v40, %v1606_v28  ;;  %v1625_v40 = vsel %vm1452_vm0, %v1578_v7, 0.0  ;;  %v1582_v36 = vmul.f32 %v3218_v16, %v3218_v16  ;;  %v3246_v12 = vsub.f32 %v3027_v3, %v3062_v50 }
 0x211   : > { %v1583_v51 = vmul.f32 %v3225_v48, %v3225_v48  ;;  %v1631_v46 = vsel %vm1452_vm0, %v1581_v22, 0.0  ;;  %v3253_v19 = vsub.f32 %v3033_v59, %v3062_v50  ;;  %v1588_v59 = vmul.f32 %v3066_v58, %v3066_v58 }
 0x212   : > { %v1610_v32 = vadd.f32 %v1609_v29, %v1608_v25  ;;  %v1627_v29 = vsel %vm1452_vm0, %v1579_v13, 0.0  ;;  %v1633_v52 = vsel %vm1452_vm0, %v1582_v36, 0.0  ;;  %v1586_v3 = vmul.f32 %v3246_v12, %v3246_v12 }
 0x213   : > { %v1635_v31 = vsel %vm1452_vm0, %v1583_v51, 0.0 }
 0x214   : > { %v1612_v4 = vadd.f32 %v1611_v54, %v1610_v32  ;;  %v1629_v54 = vsel %vm1452_vm0, %v1580_v47, 0.0  ;;  %v1641_v50 = vsel %vm1452_vm0, %v1586_v3, 0.0  ;;  %v1645_v47 = vsel %vm1452_vm0, %v1588_v59, 0.0 }
 0x216   : > { %v1614_v26 = vadd.f32 %v1613_v57, %v1612_v4 }
 0x218   : > { %v1616_v20 = vadd.f32 %v1615_v21, %v1614_v26  ;;  %v1584_v26 = vmul.f32 %v3232_v56, %v3232_v56 }
 0x21a   : > { %v1618_v43 = vadd.f32 %v1617_v27, %v1616_v20  ;;  %v1585_v20 = vmul.f32 %v3239_v38, %v3239_v38 }
 0x21c   : > { %v1620_v49 = vadd.f32 %v1619_v53, %v1618_v43  ;;  %v1637_v43 = vsel %vm1452_vm0, %v1584_v26, 0.0  ;;  %v1587_v53 = vmul.f32 %v3253_v19, %v3253_v19 }
 0x21e   : > { %v1622_v63 = vadd.f32 %v1621_v0, %v1620_v49  ;;  %v1639_v49 = vsel %vm1452_vm0, %v1585_v20, 0.0  ;;  %v1643_v13 = vsel %vm1452_vm0, %v1587_v53, 0.0 }
 0x220   : > { %v1624_v28 = vadd.f32 %v1623_v42, %v1622_v63  ;;  %v1589_v63 = vmul.f32 %v3070_v45, %v3070_v45 }
 0x222   : > { %v1626_v25 = vadd.f32 %v1625_v40, %v1624_v28  ;;  %v1590_v28 = vmul.f32 %v3073_v11, %v3073_v11  ;;  %v1647_v22 = vsel %vm1452_vm0, %v1589_v63, 0.0 }
 0x224   : > { %v1628_v32 = vadd.f32 %v1627_v29, %v1626_v25  ;;  %v1591_v25 = vmul.f32 %v3076_v35, %v3076_v35  ;;  %v1649_v36 = vsel %vm1452_vm0, %v1590_v28, 0.0 }
 0x226   : > { %v1630_v4 = vadd.f32 %v1629_v54, %v1628_v32  ;;  %v1592_v32 = vmul.f32 %v3079_v55, %v3079_v55  ;;  %v1651_v51 = vsel %vm1452_vm0, %v1591_v25, 0.0 }
 0x228   : > { %v1632_v57 = vadd.f32 %v1631_v46, %v1630_v4  ;;  %v1593_v4 = vmul.f32 %v3082_v10, %v3082_v10 }
 0x22a   : > { %v1634_v21 = vadd.f32 %v1633_v52, %v1632_v57  ;;  %v1653_v57 = vsel %vm1452_vm0, %v1592_v32, 0.0  ;;  %v1655_v52 = vsel %vm1452_vm0, %v1593_v4, 0.0 }
 0x22c   : > { %v1636_v27 = vadd.f32 %v1635_v31, %v1634_v21 }
 0x22e   : > { %v1638_v34 = vadd.f32 %v1637_v43, %v1636_v27 }
 0x230   : > { %v1640_v7 = vadd.f32 %v1639_v49, %v1638_v34 }
 0x232   : > { %v1642_v0 = vadd.f32 %v1641_v50, %v1640_v7 }
 0x234   : > { %v1644_v42 = vadd.f32 %v1643_v13, %v1642_v0 }
 0x236   : > { %v1646_v40 = vadd.f32 %v1645_v47, %v1644_v42 }
 0x238   : > { %v1648_v29 = vadd.f32 %v1647_v22, %v1646_v40 }
 0x23a   : > { %v1650_v54 = vadd.f32 %v1649_v36, %v1648_v29 }
 0x23c   : > { %v1652_v46 = vadd.f32 %v1651_v51, %v1650_v54 }
 0x23e   : > { %v1654_v26 = vadd.f32 %v1653_v57, %v1652_v46 }
 0x240   : > { %v1656_v21 = vadd.f32 %v1655_v52, %v1654_v26 }
 0x242   : > { %v1657_v20 = vrot.slane %v1656_v21, 4 }
 0x244   : > { %v1658_v31 = vadd.f32 %v1657_v20, %v1656_v21 }
 0x246   : > { %v1659_v27 = vrot.slane %v1658_v31, 2 }
 0x248   : > { %v1660_v3 = vadd.f32 %v1659_v27, %v1658_v31 }
 0x24a   : > { %v1661_v43 = vrot.slane %v1660_v3, 1 }
 0x24c   : > { %v1662_v34 = vadd.f32 %v1661_v43, %v1660_v3 }
 0x24e   : > { %v1663_v53 = vmul.f32 %v1662_v34, %v3059_v23 }
 0x250   : > { %v1664_v49 = vadd.f32 1e-05, %v1663_v53 }
 0x252   : > { %2474 = vrsqrt.f32 %v1664_v49  ;;  %vm1671_vm3 = vweird.f32 %v1664_v49 }
 0x258   : > { %v2475_v7 = vpop.eup %2474 }
 0x259   : > { %v1666_v59 = vmul.f32 %v2475_v7, %v1664_v49  ;;  %vm1672_vm2 = vweird.f32 %v2475_v7 }
 0x25a   : > { %vm1673_vm4 = vmor %vm1671_vm3, %vm1672_vm2 }
 0x25b   : > { %v1667_v50 = vmul.f32 %v2475_v7, %v1666_v59 }
 0x25d   : > { %v1668_v0 = vmul.f32 0.5, %v1667_v50 }
 0x25f   : > { %v1669_v63 = vsub.f32 1.5, %v1668_v0 }
 0x261   : > { %v1670_v13 = vmul.f32 %v2475_v7, %v1669_v63 }
 0x263   : > { %v3285_v42 = vsel %vm1673_vm4, %v2475_v7, %v1670_v13 }
 0x264   : > { %v1675_v28 = vmul.f32 %v3285_v42, %v3086_v37  ;;  %v1676_v23 = vmul.f32 %v3285_v42, %v3090_v62  ;;  %v1677_v47 = vmul.f32 %v3285_v42, %v3094_v1  ;;  %v1678_v40 = vmul.f32 %v3285_v42, %v3098_v60 }
 0x265   : > { %v1679_v25 = vmul.f32 %v3285_v42, %v3106_v6  ;;  %v1680_v37 = vmul.f32 %v3285_v42, %v3112_v2  ;;  %v1681_v62 = vmul.f32 %v3285_v42, %v3120_v24  ;;  %v1682_v6 = vmul.f32 %v3285_v42, %v3127_v33 }
 0x266   : > { %v1707_v1 = vmax.f32 %v1675_v28, 0.0  ;;  %v1708_v60 = vmax.f32 %v1676_v23, 0.0  ;;  %v1709_v22 = vmax.f32 %v1677_v47, 0.0  ;;  %v1710_v29 = vmax.f32 %v1678_v40, 0.0 }
 0x267   : > { %v1683_v32 = vmul.f32 %v3285_v42, %v3134_v41  ;;  %v1711_v36 = vmax.f32 %v1679_v25, 0.0  ;;  %v1684_v2 = vmul.f32 %v3285_v42, %v3141_v30  ;;  %v1712_v24 = vmax.f32 %v1680_v37, 0.0 }
 0x268   : > { %1739 = vst.msk [vmem:[%s3301_s29] sm:$0xff] %vm1452_vm0, %v1707_v1  ;;  %v1685_v54 = vmul.f32 %v3285_v42, %v3148_v61  ;;  %v1713_v33 = vmax.f32 %v1681_v62, 0.0  ;;  %v1686_v41 = vmul.f32 %v3285_v42, %v3155_v15  ;;  %v1714_v4 = vmax.f32 %v1682_v6, 0.0 }
 0x269   : > { %1740 = vst.msk [vmem:[%s3301_s29 + $0x8] sm:$0xff] %vm1452_vm0, %v1708_v60  ;;  %v1687_v30 = vmul.f32 %v3285_v42, %v3162_v17  ;;  %v1715_v51 = vmax.f32 %v1683_v32, 0.0  ;;  %v1688_v61 = vmul.f32 %v3285_v42, %v3169_v9  ;;  %v1716_v46 = vmax.f32 %v1684_v2, 0.0 }
 0x26a   : > { %1741 = vst.msk [vmem:[%s3301_s29 + $0x10] sm:$0xff] %vm1452_vm0, %v1709_v22  ;;  %v1689_v15 = vmul.f32 %v3285_v42, %v3176_v18  ;;  %v1717_v57 = vmax.f32 %v1685_v54, 0.0  ;;  %v1690_v17 = vmul.f32 %v3285_v42, %v3183_v5  ;;  %v1718_v26 = vmax.f32 %v1686_v41, 0.0 }
 0x26b   : > { %1742 = vst.msk [vmem:[%s3301_s29 + $0x18] sm:$0xff] %vm1452_vm0, %v1710_v29  ;;  %v1691_v9 = vmul.f32 %v3285_v42, %v3190_v8  ;;  %v1719_v52 = vmax.f32 %v1687_v30, 0.0  ;;  %v1692_v18 = vmul.f32 %v3285_v42, %v3197_v39  ;;  %v1720_v21 = vmax.f32 %v1688_v61, 0.0 }
 0x26c   : > { %1743 = vst.msk [vmem:[%s3301_s29 + $0x20] sm:$0xff] %vm1452_vm0, %v1711_v36  ;;  %v1693_v5 = vmul.f32 %v3285_v42, %v3204_v44  ;;  %v1721_v20 = vmax.f32 %v1689_v15, 0.0  ;;  %v1694_v8 = vmul.f32 %v3285_v42, %v3211_v14  ;;  %v1722_v31 = vmax.f32 %v1690_v17, 0.0 }
 0x26d   : > { %1744 = vst.msk [vmem:[%s3301_s29 + $0x28] sm:$0xff] %vm1452_vm0, %v1712_v24  ;;  %v1695_v39 = vmul.f32 %v3285_v42, %v3218_v16  ;;  %v1723_v27 = vmax.f32 %v1691_v9, 0.0  ;;  %v1696_v44 = vmul.f32 %v3285_v42, %v3225_v48  ;;  %v1724_v3 = vmax.f32 %v1692_v18, 0.0 }
 0x26e   : > { %1745 = vst.msk [vmem:[%s3301_s29 + $0x30] sm:$0xff] %vm1452_vm0, %v1713_v33  ;;  %v1697_v14 = vmul.f32 %v3285_v42, %v3232_v56  ;;  %v1725_v43 = vmax.f32 %v1693_v5, 0.0  ;;  %v1698_v16 = vmul.f32 %v3285_v42, %v3239_v38  ;;  %v1726_v34 = vmax.f32 %v1694_v8, 0.0 }
 0x26f   : > { %1746 = vst.msk [vmem:[%s3301_s29 + $0x38] sm:$0xff] %vm1452_vm0, %v1714_v4  ;;  %v1699_v48 = vmul.f32 %v3285_v42, %v3246_v12  ;;  %v1727_v53 = vmax.f32 %v1695_v39, 0.0  ;;  %v1700_v56 = vmul.f32 %v3285_v42, %v3253_v19  ;;  %v1728_v49 = vmax.f32 %v1696_v44, 0.0 }
 0x270   : > { %1747 = vst.msk [vmem:[%s3301_s29 + $0x40] sm:$0xff] %vm1452_vm0, %v1715_v51  ;;  %v1701_v38 = vmul.f32 %v3285_v42, %v3066_v58  ;;  %v1729_v7 = vmax.f32 %v1697_v14, 0.0  ;;  %v1702_v12 = vmul.f32 %v3285_v42, %v3070_v45  ;;  %v1730_v59 = vmax.f32 %v1698_v16, 0.0 }
 0x271   : > { %1748 = vst.msk [vmem:[%s3301_s29 + $0x48] sm:$0xff] %vm1452_vm0, %v1716_v46  ;;  %v1703_v19 = vmul.f32 %v3285_v42, %v3073_v11  ;;  %v1731_v50 = vmax.f32 %v1699_v48, 0.0  ;;  %v1704_v58 = vmul.f32 %v3285_v42, %v3076_v35  ;;  %v1732_v0 = vmax.f32 %v1700_v56, 0.0 }
 0x272   : > { %1749 = vst.msk [vmem:[%s3301_s29 + $0x50] sm:$0xff] %vm1452_vm0, %v1717_v57  ;;  %v1705_v45 = vmul.f32 %v3285_v42, %v3079_v55  ;;  %v1733_v63 = vmax.f32 %v1701_v38, 0.0  ;;  %v1706_v11 = vmul.f32 %v3285_v42, %v3082_v10  ;;  %v1734_v13 = vmax.f32 %v1702_v12, 0.0 }
 0x273   : > { %1750 = vst.msk [vmem:[%s3301_s29 + $0x58] sm:$0xff] %vm1452_vm0, %v1718_v26  ;;  %v1735_v35 = vmax.f32 %v1703_v19, 0.0  ;;  %v1736_v28 = vmax.f32 %v1704_v58, 0.0 }
 0x274   : > { %1751 = vst.msk [vmem:[%s3301_s29 + $0x60] sm:$0xff] %vm1452_vm0, %v1719_v52  ;;  %v1737_v23 = vmax.f32 %v1705_v45, 0.0  ;;  %v1738_v55 = vmax.f32 %v1706_v11, 0.0 }
 0x275   : > { %1752 = vst.msk [vmem:[%s3301_s29 + $0x68] sm:$0xff] %vm1452_vm0, %v1720_v21 }
 0x276   : > { %1753 = vst.msk [vmem:[%s3301_s29 + $0x70] sm:$0xff] %vm1452_vm0, %v1721_v20 }
 0x277   : > { %1754 = vst.msk [vmem:[%s3301_s29 + $0x78] sm:$0xff] %vm1452_vm0, %v1722_v31 }
 0x278   : > { %1755 = vst.msk [vmem:[%s3301_s29 + $0x80] sm:$0xff] %vm1452_vm0, %v1723_v27 }
 0x279   : > { %1756 = vst.msk [vmem:[%s3301_s29 + $0x88] sm:$0xff] %vm1452_vm0, %v1724_v3 }
 0x27a   : > { %1757 = vst.msk [vmem:[%s3301_s29 + $0x90] sm:$0xff] %vm1452_vm0, %v1725_v43 }
 0x27b   : > { %1758 = vst.msk [vmem:[%s3301_s29 + $0x98] sm:$0xff] %vm1452_vm0, %v1726_v34 }
 0x27c   : > { %1759 = vst.msk [vmem:[%s3301_s29 + $0xa0] sm:$0xff] %vm1452_vm0, %v1727_v53 }
 0x27d   : > { %1760 = vst.msk [vmem:[%s3301_s29 + $0xa8] sm:$0xff] %vm1452_vm0, %v1728_v49 }
 0x27e   : > { %1761 = vst.msk [vmem:[%s3301_s29 + $0xb0] sm:$0xff] %vm1452_vm0, %v1729_v7 }
 0x27f   : > { %1762 = vst.msk [vmem:[%s3301_s29 + $0xb8] sm:$0xff] %vm1452_vm0, %v1730_v59 }
 0x280   : > { %1763 = vst.msk [vmem:[%s3301_s29 + $0xc0] sm:$0xff] %vm1452_vm0, %v1731_v50 }
 0x281   : > { %1764 = vst.msk [vmem:[%s3301_s29 + $0xc8] sm:$0xff] %vm1452_vm0, %v1732_v0 }
 0x282   : > { %1765 = vst.msk [vmem:[%s3301_s29 + $0xd0] sm:$0xff] %vm1452_vm0, %v1733_v63 }
 0x283   : > { %1766 = vst.msk [vmem:[%s3301_s29 + $0xd8] sm:$0xff] %vm1452_vm0, %v1734_v13 }
 0x284   : > { %1767 = vst.msk [vmem:[%s3301_s29 + $0xe0] sm:$0xff] %vm1452_vm0, %v1735_v35 }
 0x285   : > { %1768 = vst.msk [vmem:[%s3301_s29 + $0xe8] sm:$0xff] %vm1452_vm0, %v1736_v28 }
 0x286   : > { %1769 = vst.msk [vmem:[%s3301_s29 + $0xf0] sm:$0xff] %vm1452_vm0, %v1737_v23 }
 0x287   : > { %1770 = vst.msk [vmem:[%s3301_s29 + $0xf8] sm:$0xff] %vm1452_vm0, %v1738_v55 }
 0x288 PF: > { %s13_s12 = sadd.s32 1, %s2482_s12  }
 0x289   : > { %p10_p4 = scmp.ge.s32.totalorder %s13_s12, 4  }
 0x28b   :  { %12 = sbr.rel (!%p10_p4) target bundleno = 1 (0x1), region = 62 }

// kernel: generator_forward.35
= control target key start
LH: loop header
LB: loop body
LE: loop exit
PB: predicated region body
PF: predicated region fallthrough
CT: control target
= control target key end

     0   :  { %s5261_s12 = smov 0   ;;  %s6403_s0 = inlined_call_operand.vmem [shape: bf16[2,256,1664], index: 0, kind: input, shape index: {}]   ;;  %s6404_s1 = inlined_call_operand.vmem [shape: bf16[1664,3], index: 1, kind: input, shape index: {}]   ;;  %s6405_s2 = inlined_call_operand.vmem [shape: f32[1,3], index: 2, kind: input, shape index: {}]   ;;  %s6406_s3 = inlined_call_operand.vmem [shape: f32[2,256,3], index: 3, kind: output, shape index: {}]  }
   0x1 LB: > { %s3564_s13 = sadd.s32 4294967295, %s5239_s12   ;;  %p3568_p0 = scmp.ge.s32.totalorder %s5239_s12, 1  ;;  %s5239_s12 = sphi %s5261_s12, %s13_s12  }
   0x2   : > { %p137_p1 = scmp.lt.s32.totalorder %s5239_s12, 3 }
   0x4   : > { %p138_p2 = pnand %p3568_p0, %p137_p1 }
   0x5   : > { %p161_p3 = scmp.lt.s32.totalorder (!%p138_p2), %s3564_s13, 1 }
   0x6   : > { %141 = sbr.rel (%p138_p2) target bundleno = 1013 (0x3f5), region = 32 }
   0xb   : > { %v5038_v0 = vld [vmem:[%s6404_s1 + $0x38] sm:$0xff]  ;;  %v5037_v1 = vld [vmem:[%s6404_s1 + $0x30] sm:$0xff]  ;;  %v5036_v2 = vld [vmem:[%s6404_s1 + $0x28] sm:$0xff]  ;;  %s6408_s13 = smov (!%p161_p3, %s3564_s13), 1  ;;  %vm3476_vm0 = vcmask 23552  }
   0xc   : > { %5135 = vmatpush.bf16.msra.mxu1 %v5038_v0  ;;  %5136 = vmatpush.bf16.msra.mxu2 %v5038_v0  ;;  %v5035_v3 = vld [vmem:[%s6404_s1 + $0x20] sm:$0xff]  ;;  %v5034_v4 = vld [vmem:[%s6404_s1 + $0x18] sm:$0xff]  ;;  %v5033_v5 = vld [vmem:[%s6404_s1 + $0x10] sm:$0xff]  ;;  %s5159_s26 = smul.u32 1664, %s6408_s13  ;;  %s4822_s9 = sshll.u32 %s6408_s13, 8 }
   0xd   : > { %5137 = vmatpush.bf16.msra.mxu3 %v5038_v0  ;;  %2287 = vmatpush.bf16.msra.mxu0 %v5038_v0  ;;  %v5032_v6 = vld [vmem:[%s6404_s1 + $0x8] sm:$0xff]  ;;  %v5031_v7 = vld [vmem:[%s6404_s1] sm:$0xff]  ;;  %v5054_v16 = vld [vmem:[%s6404_s1 + $0xb8] sm:$0xff]  ;;  %s6256_s14 = scalar_lea.vmem %s6406_s3, %s4822_s9 }
   0xe   : > { %s5296_s4 = scalar_lea.vmem %s6403_s0, %s5159_s26  ;;  %v5062_v17 = vld [vmem:[%s6404_s1 + $0xf8] sm:$0xff]  ;;  %v5053_v24 = vld [vmem:[%s6404_s1 + $0xb0] sm:$0xff]  ;;  %v5052_v28 = vld [vmem:[%s6404_s1 + $0xa8] sm:$0xff] }
   0xf   : > { %v3782_v8 = vld [vmem:[%s5296_s4 + $0x1a0] sm:$0xf]  ;;  %v4881_v9 = vld [vmem:[%s5296_s4 + $0x1d0] sm:$0xf0]  ;;  %v5046_v22 = vld [vmem:[%s6404_s1 + $0x78] sm:$0xff] }
  0x10   : > { %5138 = vmatpush.bf16.msra.mxu1 %v5037_v1  ;;  %5139 = vmatpush.bf16.msra.mxu2 %v5037_v1  ;;  %v3990_v10 = vld [vmem:[%s5296_s4 + $0x340] sm:$0xf]  ;;  %v4933_v11 = vld [vmem:[%s5296_s4 + $0x370] sm:$0xf0]  ;;  %v3783_v18 = vor.u32 %v4881_v9, %v3782_v8  ;;  %v5070_v23 = vld [vmem:[%s6404_s1 + $0x138] sm:$0xff] }
  0x11   : > { %5140 = vmatpush.bf16.msra.mxu3 %v5037_v1  ;;  %2288 = vmatpush.bf16.msra.mxu0 %v5037_v1  ;;  %v4198_v12 = vld [vmem:[%s5296_s4 + $0x4e0] sm:$0xf]  ;;  %v4985_v13 = vld [vmem:[%s5296_s4 + $0x510] sm:$0xf0]  ;;  %v3991_v19 = vor.u32 %v4933_v11, %v3990_v10  ;;  %v5060_v29 = vld [vmem:[%s6404_s1 + $0xe8] sm:$0xff] }
  0x12   : > { %v3574_v14 = vld [vmem:[%s5296_s4] sm:$0xf]  ;;  %v4829_v15 = vld [vmem:[%s5296_s4 + $0x30] sm:$0xf0]  ;;  %v4199_v20 = vor.u32 %v4985_v13, %v4198_v12  ;;  %v5044_v30 = vld [vmem:[%s6404_s1 + $0x68] sm:$0xff] }
  0x13   : > { %v3575_v21 = vor.u32 %v4829_v15, %v3574_v14  ;;  %v5061_v25 = vld [vmem:[%s6404_s1 + $0xf0] sm:$0xff]  ;;  %v5068_v31 = vld [vmem:[%s6404_s1 + $0x128] sm:$0xff]  ;;  %v5051_v33 = vld [vmem:[%s6404_s1 + $0xa0] sm:$0xff] }
  0x14   : > { %5141 = vmatpush.bf16.msra.mxu1 %v5036_v2  ;;  %5142 = vmatpush.bf16.msra.mxu2 %v5036_v2  ;;  %v5045_v26 = vld [vmem:[%s6404_s1 + $0x70] sm:$0xff]  ;;  %v3834_v32 = vld [vmem:[%s5296_s4 + $0x208] sm:$0xf]  ;;  %v5059_v34 = vld [vmem:[%s6404_s1 + $0xe0] sm:$0xff] }
  0x15   : > { %5143 = vmatpush.bf16.msra.mxu3 %v5036_v2  ;;  %2289 = vmatpush.bf16.msra.mxu0 %v5036_v2  ;;  %v5069_v27 = vld [vmem:[%s6404_s1 + $0x130] sm:$0xff]  ;;  %v4894_v35 = vld [vmem:[%s5296_s4 + $0x238] sm:$0xf0]  ;;  %v4042_v36 = vld [vmem:[%s5296_s4 + $0x3a8] sm:$0xf] }
  0x16   : > { %v4946_v37 = vld [vmem:[%s5296_s4 + $0x3d8] sm:$0xf0]  ;;  %v4250_v38 = vld [vmem:[%s5296_s4 + $0x548] sm:$0xf]  ;;  %v5043_v42 = vld [vmem:[%s6404_s1 + $0x60] sm:$0xff]  ;;  %v3835_v46 = vor.u32 %v4894_v35, %v3834_v32 }
  0x17   : > { %v4998_v39 = vld [vmem:[%s5296_s4 + $0x578] sm:$0xf0]  ;;  %v3626_v40 = vld [vmem:[%s5296_s4 + $0x68] sm:$0xf]  ;;  %v5067_v43 = vld [vmem:[%s6404_s1 + $0x120] sm:$0xff]  ;;  %v4043_v47 = vor.u32 %v4946_v37, %v4042_v36 }
  0x18   : > { %5144 = vmatpush.bf16.msra.mxu1 %v5035_v3  ;;  %5145 = vmatpush.bf16.msra.mxu2 %v5035_v3  ;;  %v4842_v41 = vld [vmem:[%s5296_s4 + $0x98] sm:$0xf0]  ;;  %v4251_v48 = vor.u32 %v4998_v39, %v4250_v38  ;;  %v5049_v52 = vld [vmem:[%s6404_s1 + $0x90] sm:$0xff]  ;;  %v5048_v56 = vld [vmem:[%s6404_s1 + $0x88] sm:$0xff] }
  0x19   : > { %5146 = vmatpush.bf16.msra.mxu3 %v5035_v3  ;;  %2290 = vmatpush.bf16.msra.mxu0 %v5035_v3  ;;  %v5050_v44 = vld [vmem:[%s6404_s1 + $0x98] sm:$0xff]  ;;  %v3627_v49 = vor.u32 %v4842_v41, %v3626_v40  ;;  %v5057_v53 = vld [vmem:[%s6404_s1 + $0xd0] sm:$0xff]  ;;  %v5056_v57 = vld [vmem:[%s6404_s1 + $0xc8] sm:$0xff] }
  0x1a   : > { %v5058_v45 = vld [vmem:[%s6404_s1 + $0xd8] sm:$0xff]  ;;  %v5041_v54 = vld [vmem:[%s6404_s1 + $0x50] sm:$0xff]  ;;  %v5040_v58 = vld [vmem:[%s6404_s1 + $0x48] sm:$0xff] }
  0x1b   : > { %v5042_v50 = vld [vmem:[%s6404_s1 + $0x58] sm:$0xff]  ;;  %v5065_v55 = vld [vmem:[%s6404_s1 + $0x110] sm:$0xff]  ;;  %v5064_v59 = vld [vmem:[%s6404_s1 + $0x108] sm:$0xff] }
  0x1c   : > { %5147 = vmatpush.bf16.msra.mxu1 %v5034_v4  ;;  %5148 = vmatpush.bf16.msra.mxu2 %v5034_v4  ;;  %v5066_v51 = vld [vmem:[%s6404_s1 + $0x118] sm:$0xff]  ;;  %v3886_v60 = vld [vmem:[%s5296_s4 + $0x270] sm:$0xf]  ;;  %v5047_v61 = vld [vmem:[%s6404_s1 + $0x80] sm:$0xff] }
  0x1d   : > { %5149 = vmatpush.bf16.msra.mxu3 %v5034_v4  ;;  %2291 = vmatpush.bf16.msra.mxu0 %v5034_v4  ;;  %v5055_v62 = vld [vmem:[%s6404_s1 + $0xc0] sm:$0xff]  ;;  %v4094_v0 = vld [vmem:[%s5296_s4 + $0x410] sm:$0xf]  ;;  %v5086_v12 = vld [vmem:[%s6404_s1 + $0x1b8] sm:$0xff] }
  0x1e   : > { %v4907_v63 = vld [vmem:[%s5296_s4 + $0x2a0] sm:$0xf0]  ;;  %v4302_v2 = vld [vmem:[%s5296_s4 + $0x5b0] sm:$0xf]  ;;  %v5094_v13 = vld [vmem:[%s6404_s1 + $0x1f8] sm:$0xff] }
  0x1f   : > { %v4959_v1 = vld [vmem:[%s5296_s4 + $0x440] sm:$0xf0]  ;;  %v3678_v4 = vld [vmem:[%s5296_s4 + $0xd0] sm:$0xf]  ;;  %v3887_v8 = vor.u32 %v4907_v63, %v3886_v60  ;;  %v5078_v14 = vld [vmem:[%s6404_s1 + $0x178] sm:$0xff] }
  0x20   : > { %5150 = vmatpush.bf16.msra.mxu1 %v5033_v5  ;;  %5151 = vmatpush.bf16.msra.mxu2 %v5033_v5  ;;  %v5011_v3 = vld [vmem:[%s5296_s4 + $0x5e0] sm:$0xf0]  ;;  %v4095_v9 = vor.u32 %v4959_v1, %v4094_v0  ;;  %v5102_v15 = vld [vmem:[%s6404_s1 + $0x238] sm:$0xff]  ;;  %v4824_v32 = vld [vmem:[%s5296_s4 + $0xc] sm:$0xf] }
  0x21   : > { %5152 = vmatpush.bf16.msra.mxu3 %v5033_v5  ;;  %2292 = vmatpush.bf16.msra.mxu0 %v5033_v5  ;;  %v4855_v5 = vld [vmem:[%s5296_s4 + $0x100] sm:$0xf0]  ;;  %v4303_v10 = vor.u32 %v5011_v3, %v4302_v2  ;;  %v5085_v40 = vld [vmem:[%s6404_s1 + $0x1b0] sm:$0xff]  ;;  %v4850_v60 = vld [vmem:[%s5296_s4 + $0xdc] sm:$0xf] }
  0x22   : > { %v3679_v11 = vor.u32 %v4855_v5, %v3678_v4  ;;  %v4831_v35 = vld [vmem:[%s5296_s4 + $0x40] sm:$0xf0]  ;;  %v5093_v41 = vld [vmem:[%s6404_s1 + $0x1f0] sm:$0xff]  ;;  %v5084_v4 = vld [vmem:[%s6404_s1 + $0x1a8] sm:$0xff] }
  0x23   : > { %v4857_v63 = vld [vmem:[%s5296_s4 + $0x110] sm:$0xf0]  ;;  %v5092_v5 = vld [vmem:[%s6404_s1 + $0x1e8] sm:$0xff] }
  0x24   : > { %5153 = vmatpush.bf16.msra.mxu1 %v5032_v6  ;;  %5154 = vmatpush.bf16.msra.mxu2 %v5032_v6 }
  0x25   : > { %5155 = vmatpush.bf16.msra.mxu3 %v5032_v6  ;;  %2293 = vmatpush.bf16.msra.mxu0 %v5032_v6  ;;  %v5039_v6 = vld [vmem:[%s6404_s1 + $0x40] sm:$0xff] }
  0x28   : > { %5156 = vmatpush.bf16.msra.mxu1 %v5031_v7  ;;  %5157 = vmatpush.bf16.msra.mxu2 %v5031_v7 }
  0x29   : > { %5158 = vmatpush.bf16.msra.mxu3 %v5031_v7  ;;  %2294 = vmatpush.bf16.msra.mxu0 %v5031_v7  ;;  %v5063_v7 = vld [vmem:[%s6404_s1 + $0x100] sm:$0xff] }
  0x2b   : > { %2315 = vmatmul.bf16.vlgmr.msra.gmra.mxu1 %v3783_v18  ;;  %2335 = vmatmul.bf16.vlgmr.msra.gmra.mxu2 %v3991_v19  ;;  %v4146_v18 = vld [vmem:[%s5296_s4 + $0x478] sm:$0xf]  ;;  %v4972_v19 = vld [vmem:[%s5296_s4 + $0x4a8] sm:$0xf0] }
  0x2c   : > { %2465 = vmatpush.bf16.msrb.mxu2 %v5054_v16  ;;  %2355 = vmatmul.bf16.vlgmr.msra.gmra.mxu3 %v4199_v20  ;;  %v3938_v16 = vld [vmem:[%s5296_s4 + $0x2d8] sm:$0xf] }
  0x2d   : > { %2554 = vmatpush.bf16.msrb.mxu3 %v5062_v17  ;;  %2295 = vmatmul.bf16.vlgmr.msra.gmra.mxu0 %v3575_v21  ;;  %v4920_v17 = vld [vmem:[%s5296_s4 + $0x308] sm:$0xf0]  ;;  %v4354_v20 = vld [vmem:[%s5296_s4 + $0x618] sm:$0xf] }
  0x2e   : > { %2376 = vmatpush.bf16.msrb.mxu1 %v5046_v22  ;;  %2643 = vmatpush.bf16.msrb.mxu0 %v5070_v23  ;;  %v5024_v21 = vld [vmem:[%s5296_s4 + $0x648] sm:$0xf0]  ;;  %v3730_v22 = vld [vmem:[%s5296_s4 + $0x138] sm:$0xf] }
  0x2f   : > { %v4868_v23 = vld [vmem:[%s5296_s4 + $0x168] sm:$0xf0] }
  0x30   : > { %2466 = vmatpush.bf16.msrb.mxu2 %v5053_v24  ;;  %v3939_v24 = vor.u32 %v4920_v17, %v3938_v16 }
  0x31   : > { %2555 = vmatpush.bf16.msrb.mxu3 %v5061_v25  ;;  %v4147_v25 = vor.u32 %v4972_v19, %v4146_v18 }
  0x32   : > { %2377 = vmatpush.bf16.msrb.mxu1 %v5045_v26  ;;  %2644 = vmatpush.bf16.msrb.mxu0 %v5069_v27  ;;  %v4355_v26 = vor.u32 %v5024_v21, %v4354_v20  ;;  %v3731_v27 = vor.u32 %v4868_v23, %v3730_v22  ;;  %v5500_v20 = vld [vmem:[%s6405_s2] ss:$0 sm:$0xff]  ;;  %v4875_v21 = vld [vmem:[%s5296_s4 + $0x1a4] sm:$0xf]  ;;  %v3784_v22 = vld [vmem:[%s5296_s4 + $0x1d4] sm:$0xf0] }
  0x33   : > { %v3790_v23 = vld [vmem:[%s5296_s4 + $0x1a8] sm:$0xf] }
  0x34   : > { %2467 = vmatpush.bf16.msrb.mxu2 %v5052_v28  ;;  %v4823_v28 = vld [vmem:[%s5296_s4 + $0x4] sm:$0xf] }
  0x35   : > { %2556 = vmatpush.bf16.msrb.mxu3 %v5060_v29  ;;  %v3576_v29 = vld [vmem:[%s5296_s4 + $0x34] sm:$0xf0] }
  0x36   : > { %2378 = vmatpush.bf16.msrb.mxu1 %v5044_v30  ;;  %2645 = vmatpush.bf16.msrb.mxu0 %v5068_v31  ;;  %v3582_v30 = vld [vmem:[%s5296_s4 + $0x8] sm:$0xf]  ;;  %v4830_v31 = vld [vmem:[%s5296_s4 + $0x38] sm:$0xf0]  ;;  %v3579_v36 = vor.u32 %v4823_v28, %v3576_v29  ;;  %v4883_v28 = vld [vmem:[%s5296_s4 + $0x1e0] sm:$0xf0]  ;;  %v3787_v29 = vor.u32 %v4875_v21, %v3784_v22 }
  0x37   : > { %v3583_v37 = vor.u32 %v4830_v31, %v3582_v30 }
  0x38   : > { %2468 = vmatpush.bf16.msrb.mxu2 %v5051_v33  ;;  %v3584_v33 = vld [vmem:[%s5296_s4 + $0x3c] sm:$0xf0] }
  0x39   : > { %2557 = vmatpush.bf16.msrb.mxu3 %v5059_v34  ;;  %v3590_v34 = vld [vmem:[%s5296_s4 + $0x10] sm:$0xf]  ;;  %v3587_v38 = vor.u32 %v4824_v32, %v3584_v33 }
  0x3a   : > { %2379 = vmatpush.bf16.msrb.mxu1 %v5043_v42  ;;  %2646 = vmatpush.bf16.msrb.mxu0 %v5067_v43  ;;  %v3591_v39 = vor.u32 %v4831_v35, %v3590_v34  ;;  %v5077_v42 = vld [vmem:[%s6404_s1 + $0x170] sm:$0xff] }
  0x3b   : > { %2320 = vmatmul.bf16.gmra.mxu1 %v3835_v46  ;;  %2340 = vmatmul.bf16.gmra.mxu2 %v4043_v47  ;;  %v5101_v43 = vld [vmem:[%s6404_s1 + $0x230] sm:$0xff]  ;;  %v4843_v47 = vld [vmem:[%s5296_s4 + $0xa0] sm:$0xf0] }
  0x3c   : > { %2469 = vmatpush.bf16.msrb.mxu2 %v5050_v44  ;;  %2360 = vmatmul.bf16.gmra.mxu3 %v4251_v48  ;;  %v4836_v44 = vld [vmem:[%s5296_s4 + $0x6c] sm:$0xf]  ;;  %v3634_v46 = vld [vmem:[%s5296_s4 + $0x70] sm:$0xf]  ;;  %v4837_v48 = vld [vmem:[%s5296_s4 + $0x74] sm:$0xf] }
  0x3d   : > { %2558 = vmatpush.bf16.msrb.mxu3 %v5058_v45  ;;  %2300 = vmatmul.bf16.gmra.mxu0 %v3627_v49  ;;  %v3628_v45 = vld [vmem:[%s5296_s4 + $0x9c] sm:$0xf0]  ;;  %v3636_v49 = vld [vmem:[%s5296_s4 + $0xa4] sm:$0xf0] }
  0x3e   : > { %2380 = vmatpush.bf16.msrb.mxu1 %v5042_v50  ;;  %2647 = vmatpush.bf16.msrb.mxu0 %v5066_v51  ;;  %v3642_v50 = vld [vmem:[%s5296_s4 + $0x78] sm:$0xf]  ;;  %v4844_v51 = vld [vmem:[%s5296_s4 + $0xa8] sm:$0xf0] }
  0x40   : > { %2470 = vmatpush.bf16.msrb.mxu2 %v5049_v52  ;;  %v3631_v52 = vor.u32 %v4836_v44, %v3628_v45 }
  0x41   : > { %2559 = vmatpush.bf16.msrb.mxu3 %v5057_v53  ;;  %v3635_v53 = vor.u32 %v4843_v47, %v3634_v46  ;;  %v5099_v46 = vld [vmem:[%s6404_s1 + $0x220] sm:$0xff]  ;;  %v4888_v47 = vld [vmem:[%s5296_s4 + $0x20c] sm:$0xf] }
  0x42   : > { %2381 = vmatpush.bf16.msrb.mxu1 %v5041_v54  ;;  %2648 = vmatpush.bf16.msrb.mxu0 %v5065_v55  ;;  %v3639_v54 = vor.u32 %v4837_v48, %v3636_v49  ;;  %v3643_v55 = vor.u32 %v4844_v51, %v3642_v50  ;;  %v3836_v48 = vld [vmem:[%s5296_s4 + $0x23c] sm:$0xf0]  ;;  %v3842_v49 = vld [vmem:[%s5296_s4 + $0x210] sm:$0xf]  ;;  %v4895_v50 = vld [vmem:[%s5296_s4 + $0x240] sm:$0xf0] }
  0x43   : > { %v4889_v51 = vld [vmem:[%s5296_s4 + $0x214] sm:$0xf] }
  0x44   : > { %2471 = vmatpush.bf16.msrb.mxu2 %v5048_v56  ;;  %v4849_v56 = vld [vmem:[%s5296_s4 + $0xd4] sm:$0xf] }
  0x45   : > { %2560 = vmatpush.bf16.msrb.mxu3 %v5056_v57  ;;  %v3680_v57 = vld [vmem:[%s5296_s4 + $0x104] sm:$0xf0] }
  0x46   : > { %2382 = vmatpush.bf16.msrb.mxu1 %v5040_v58  ;;  %2649 = vmatpush.bf16.msrb.mxu0 %v5064_v59  ;;  %v3686_v58 = vld [vmem:[%s5296_s4 + $0xd8] sm:$0xf]  ;;  %v4856_v59 = vld [vmem:[%s5296_s4 + $0x108] sm:$0xf0]  ;;  %v3683_v0 = vor.u32 %v4849_v56, %v3680_v57 }
  0x47   : > { %v3687_v1 = vor.u32 %v4856_v59, %v3686_v58  ;;  %v3839_v58 = vor.u32 %v4888_v47, %v3836_v48  ;;  %v3843_v59 = vor.u32 %v4895_v50, %v3842_v49  ;;  %v3940_v47 = vld [vmem:[%s5296_s4 + $0x30c] sm:$0xf0]  ;;  %v3946_v48 = vld [vmem:[%s5296_s4 + $0x2e0] sm:$0xf]  ;;  %v4921_v49 = vld [vmem:[%s5296_s4 + $0x310] sm:$0xf0] }
  0x48   : > { %2472 = vmatpush.bf16.msrb.mxu2 %v5047_v61  ;;  %v3688_v61 = vld [vmem:[%s5296_s4 + $0x10c] sm:$0xf0]  ;;  %v4915_v50 = vld [vmem:[%s5296_s4 + $0x2e4] sm:$0xf] }
  0x49   : > { %2561 = vmatpush.bf16.msrb.mxu3 %v5055_v62  ;;  %v3694_v62 = vld [vmem:[%s5296_s4 + $0xe0] sm:$0xf]  ;;  %v3691_v2 = vor.u32 %v4850_v60, %v3688_v61 }
  0x4a   : > { %2383 = vmatpush.bf16.msrb.mxu1 %v5039_v6  ;;  %2650 = vmatpush.bf16.msrb.mxu0 %v5063_v7  ;;  %v3695_v3 = vor.u32 %v4857_v63, %v3694_v62  ;;  %v5076_v6 = vld [vmem:[%s6404_s1 + $0x168] sm:$0xff] }
  0x4b   : > { %2325 = vmatmul.bf16.gmra.mxu1 %v3887_v8  ;;  %2345 = vmatmul.bf16.gmra.mxu2 %v4095_v9  ;;  %v5100_v7 = vld [vmem:[%s6404_s1 + $0x228] sm:$0xff]  ;;  %v4862_v8 = vld [vmem:[%s5296_s4 + $0x13c] sm:$0xf]  ;;  %v3732_v9 = vld [vmem:[%s5296_s4 + $0x16c] sm:$0xf0] }
  0x4c   : > { %2365 = vmatmul.bf16.gmra.mxu3 %v4303_v10  ;;  %2821 = vmatpush.bf16.msra.mxu2 %v5086_v12  ;;  %v3738_v10 = vld [vmem:[%s5296_s4 + $0x140] sm:$0xf]  ;;  %v4863_v12 = vld [vmem:[%s5296_s4 + $0x144] sm:$0xf]  ;;  %v3735_v16 = vor.u32 %v4862_v8, %v3732_v9  ;;  %v4901_v9 = vld [vmem:[%s5296_s4 + $0x274] sm:$0xf] }
  0x4d   : > { %2305 = vmatmul.bf16.gmra.mxu0 %v3679_v11  ;;  %2910 = vmatpush.bf16.msra.mxu3 %v5094_v13  ;;  %v4869_v11 = vld [vmem:[%s5296_s4 + $0x170] sm:$0xf0]  ;;  %v3740_v13 = vld [vmem:[%s5296_s4 + $0x174] sm:$0xf0] }
  0x4e   : > { %2732 = vmatpush.bf16.msra.mxu1 %v5078_v14  ;;  %2999 = vmatpush.bf16.msra.mxu0 %v5102_v15  ;;  %v3746_v14 = vld [vmem:[%s5296_s4 + $0x148] sm:$0xf]  ;;  %v4870_v15 = vld [vmem:[%s5296_s4 + $0x178] sm:$0xf0]  ;;  %v3739_v17 = vor.u32 %v4869_v11, %v3738_v10  ;;  %v3743_v18 = vor.u32 %v4863_v12, %v3740_v13  ;;  %v3894_v11 = vld [vmem:[%s5296_s4 + $0x278] sm:$0xf] }
  0x4f   : > { %v3747_v19 = vor.u32 %v4870_v15, %v3746_v14  ;;  %v3888_v10 = vld [vmem:[%s5296_s4 + $0x2a4] sm:$0xf0]  ;;  %v4908_v12 = vld [vmem:[%s5296_s4 + $0x2a8] sm:$0xf0]  ;;  %v4902_v13 = vld [vmem:[%s5296_s4 + $0x27c] sm:$0xf] }
  0x50   : > { %2822 = vmatpush.bf16.msra.mxu2 %v5085_v40  ;;  %v3896_v14 = vld [vmem:[%s5296_s4 + $0x2ac] sm:$0xf0]  ;;  %v3902_v15 = vld [vmem:[%s5296_s4 + $0x280] sm:$0xf]  ;;  %v3891_v21 = vor.u32 %v4901_v9, %v3888_v10  ;;  %v3895_v22 = vor.u32 %v4908_v12, %v3894_v11 }
  0x51   : > { %2911 = vmatpush.bf16.msra.mxu3 %v5093_v41 }
  0x52   : > { %2733 = vmatpush.bf16.msra.mxu1 %v5077_v42  ;;  %3000 = vmatpush.bf16.msra.mxu0 %v5101_v43  ;;  %v5075_v43 = vld [vmem:[%s6404_s1 + $0x160] sm:$0xff] }
  0x54   : > { %2823 = vmatpush.bf16.msra.mxu2 %v5084_v4 }
  0x55   : > { %2912 = vmatpush.bf16.msra.mxu3 %v5092_v5 }
  0x56   : > { %2734 = vmatpush.bf16.msra.mxu1 %v5076_v6  ;;  %3001 = vmatpush.bf16.msra.mxu0 %v5100_v7 }
  0x5a   : > { %2735 = vmatpush.bf16.msra.mxu1 %v5075_v43  ;;  %3002 = vmatpush.bf16.msra.mxu0 %v5099_v46  ;;  %v5098_v43 = vld [vmem:[%s6404_s1 + $0x218] sm:$0xff] }
  0x5b   : > { %2330 = vmatmul.bf16.gmra.mxu1 %v3939_v24  ;;  %2350 = vmatmul.bf16.gmra.mxu2 %v4147_v25  ;;  %v4882_v24 = vld [vmem:[%s5296_s4 + $0x1d8] sm:$0xf0]  ;;  %v4876_v25 = vld [vmem:[%s5296_s4 + $0x1ac] sm:$0xf] }
  0x5c   : > { %2370 = vmatmul.bf16.gmra.mxu3 %v4355_v26  ;;  %v3792_v26 = vld [vmem:[%s5296_s4 + $0x1dc] sm:$0xf0]  ;;  %v3791_v30 = vor.u32 %v4882_v24, %v3790_v23  ;;  %v4914_v46 = vld [vmem:[%s5296_s4 + $0x2dc] sm:$0xf] }
  0x5d   : > { %2310 = vmatmul.bf16.gmra.mxu0 %v3731_v27  ;;  %v3798_v27 = vld [vmem:[%s5296_s4 + $0x1b0] sm:$0xf]  ;;  %v3795_v32 = vor.u32 %v4876_v25, %v3792_v26  ;;  %v3899_v25 = vor.u32 %v4902_v13, %v3896_v14 }
  0x5e   : > { %v3799_v33 = vor.u32 %v4883_v28, %v3798_v27  ;;  %3003 = vmatpush.bf16.msra.mxu0 %v5098_v43 }
  0x6b   : > { %2384 = vmatmul.bf16.vlgmr.msrb.gmra.mxu1 %v3579_v36  ;;  %2473 = vmatmul.bf16.vlgmr.msrb.gmra.mxu2 %v3583_v37  ;;  %v5083_v36 = vld [vmem:[%s6404_s1 + $0x1a0] sm:$0xff] }
  0x6c   : > { %2562 = vmatmul.bf16.vlgmr.msrb.gmra.mxu3 %v3587_v38  ;;  %v5091_v37 = vld [vmem:[%s6404_s1 + $0x1e0] sm:$0xff]  ;;  %2824 = vmatpush.bf16.msra.mxu2 %v5083_v36 }
  0x6d   : > { %2651 = vmatmul.bf16.vlgmr.msrb.gmra.mxu0 %v3591_v39  ;;  %2913 = vmatpush.bf16.msra.mxu3 %v5091_v37 }
  0x7b   : > { %2389 = vmatmul.bf16.gmra.mxu1 %v3631_v52  ;;  %2478 = vmatmul.bf16.gmra.mxu2 %v3635_v53  ;;  %v3844_v52 = vld [vmem:[%s5296_s4 + $0x244] sm:$0xf0]  ;;  %v3850_v53 = vld [vmem:[%s5296_s4 + $0x218] sm:$0xf] }
  0x7c   : > { %2567 = vmatmul.bf16.gmra.mxu3 %v3639_v54  ;;  %v4896_v54 = vld [vmem:[%s5296_s4 + $0x248] sm:$0xf0]  ;;  %v3847_v62 = vor.u32 %v4889_v51, %v3844_v52  ;;  %v3948_v51 = vld [vmem:[%s5296_s4 + $0x314] sm:$0xf0]  ;;  %v3954_v52 = vld [vmem:[%s5296_s4 + $0x2e8] sm:$0xf] }
  0x7d   : > { %2656 = vmatmul.bf16.gmra.mxu0 %v3643_v55  ;;  %v3851_v63 = vor.u32 %v4896_v54, %v3850_v53  ;;  %v4922_v53 = vld [vmem:[%s5296_s4 + $0x318] sm:$0xf0] }
  0x8b   : > { %2394 = vmatmul.bf16.gmra.mxu1 %v3683_v0  ;;  %2483 = vmatmul.bf16.gmra.mxu2 %v3687_v1 }
  0x8c   : > { %2572 = vmatmul.bf16.gmra.mxu3 %v3691_v2 }
  0x8d   : > { %2661 = vmatmul.bf16.gmra.mxu0 %v3695_v3 }
  0x9b   : > { %2399 = vmatmul.bf16.gmra.mxu1 %v3735_v16  ;;  %2488 = vmatmul.bf16.gmra.mxu2 %v3739_v17  ;;  %v4909_v16 = vld [vmem:[%s5296_s4 + $0x2b0] sm:$0xf0] }
  0x9c   : > { %2577 = vmatmul.bf16.gmra.mxu3 %v3743_v18  ;;  %v3903_v26 = vor.u32 %v4909_v16, %v3902_v15  ;;  %v4927_v16 = vld [vmem:[%s5296_s4 + $0x344] sm:$0xf] }
  0x9d   : > { %2666 = vmatmul.bf16.gmra.mxu0 %v3747_v19 }
  0xa8   : > { %v2316_v31 = vpop.f32.mrf.mxu1 }
  0xa9   : > { %v5511_v34 = vadd.f32 %v5500_v20, %v2316_v31 }
  0xaa   : > { %v5513_v35 = vpop.f32.mrf.mxu0 }
  0xab   : > { %2404 = vmatmul.bf16.gmra.mxu1 %v3787_v29  ;;  %2493 = vmatmul.bf16.gmra.mxu2 %v3791_v30  ;;  %v5082_v29 = vld [vmem:[%s6404_s1 + $0x198] sm:$0xff] }
  0xac   : > { %2582 = vmatmul.bf16.gmra.mxu3 %v3795_v32  ;;  %v5090_v30 = vld [vmem:[%s6404_s1 + $0x1d8] sm:$0xff]  ;;  %2825 = vmatpush.bf16.msra.mxu2 %v5082_v29 }
  0xad   : > { %2671 = vmatmul.bf16.gmra.mxu0 %v3799_v33  ;;  %2914 = vmatpush.bf16.msra.mxu3 %v5090_v30  ;;  %v2297_v30 = vadd.f32 %v5500_v20, %v5513_v35  ;;  %v5081_v35 = vld [vmem:[%s6404_s1 + $0x190] sm:$0xff] }
  0xae   : > { %v2336_v38 = vpop.f32.mrf.mxu2 }
  0xaf   : > { %v5522_v39 = vadd.f32 %v5500_v20, %v2336_v38  ;;  %v2356_v40 = vpop.f32.mrf.mxu3 }
  0xb0   : > { %v5525_v41 = vadd.f32 %v5500_v20, %v2356_v40  ;;  %v2318_v42 = vpop.f32.mrf.mxu1  ;;  %2826 = vmatpush.bf16.msra.mxu2 %v5081_v35 }
  0xb1   : > { %v5531_v44 = vadd.f32 %v5500_v20, %v2318_v42  ;;  %v5074_v42 = vld [vmem:[%s6404_s1 + $0x158] sm:$0xff] }
  0xb2   : > { %v5533_v45 = vpop.f32.mrf.mxu0  ;;  %2736 = vmatpush.bf16.msra.mxu1 %v5074_v42 }
  0xb6   : > { %v2338_v55 = vpop.f32.mrf.mxu2 }
  0xb7   : > { %v5547_v56 = vadd.f32 %v5500_v20, %v2338_v55  ;;  %v2358_v57 = vpop.f32.mrf.mxu3 }
  0xb8   : > { %v5550_v60 = vadd.f32 %v5500_v20, %v2358_v57  ;;  %v2321_v61 = vpop.f32.mrf.mxu1 }
  0xb9   : > { %v5553_v0 = vadd.f32 %v5500_v20, %v2321_v61 }
  0xba   : > { %v5555_v1 = vpop.f32.mrf.mxu0 }
  0xbb   : > { %2409 = vmatmul.bf16.gmra.mxu1 %v3839_v58  ;;  %2498 = vmatmul.bf16.gmra.mxu2 %v3843_v59  ;;  %v3943_v58 = vor.u32 %v4914_v46, %v3940_v47  ;;  %v3947_v59 = vor.u32 %v4921_v49, %v3946_v48 }
  0xbc   : > { %2587 = vmatmul.bf16.gmra.mxu3 %v3847_v62 }
  0xbd   : > { %2676 = vmatmul.bf16.gmra.mxu0 %v3851_v63  ;;  %v3951_v63 = vor.u32 %v4915_v50, %v3948_v51  ;;  %v5089_v51 = vld [vmem:[%s6404_s1 + $0x1d0] sm:$0xff] }
  0xbe   : > { %v2341_v2 = vpop.f32.mrf.mxu2  ;;  %2915 = vmatpush.bf16.msra.mxu3 %v5089_v51 }
  0xbf   : > { %v5558_v3 = vadd.f32 %v5500_v20, %v2341_v2  ;;  %v2361_v4 = vpop.f32.mrf.mxu3  ;;  %v3955_v2 = vor.u32 %v4922_v53, %v3954_v52  ;;  %v2299_v53 = vadd.f32 %v5500_v20, %v5533_v45  ;;  %v4044_v45 = vld [vmem:[%s5296_s4 + $0x3dc] sm:$0xf0] }
  0xc0   : > { %v5561_v5 = vadd.f32 %v5500_v20, %v2361_v4  ;;  %v2323_v6 = vpop.f32.mrf.mxu1 }
  0xc1   : > { %v5564_v7 = vadd.f32 %v5500_v20, %v2323_v6 }
  0xc2   : > { %v5566_v8 = vpop.f32.mrf.mxu0 }
  0xc3   : > { %v2304_v51 = vadd.f32 %v5500_v20, %v5566_v8 }
  0xc6   : > { %v2343_v17 = vpop.f32.mrf.mxu2 }
  0xc7   : > { %v5577_v18 = vadd.f32 %v5500_v20, %v2343_v17  ;;  %v2363_v19 = vpop.f32.mrf.mxu3  ;;  %v3992_v17 = vld [vmem:[%s5296_s4 + $0x374] sm:$0xf0] }
  0xc8   : > { %v5580_v23 = vadd.f32 %v5500_v20, %v2363_v19  ;;  %v2326_v24 = vpop.f32.mrf.mxu1  ;;  %v3998_v19 = vld [vmem:[%s5296_s4 + $0x348] sm:$0xf] }
  0xc9   : > { %v5583_v27 = vadd.f32 %v5500_v20, %v2326_v24  ;;  %v4000_v24 = vld [vmem:[%s5296_s4 + $0x37c] sm:$0xf0] }
  0xca   : > { %v5585_v28 = vpop.f32.mrf.mxu0 }
  0xcb   : > { %2414 = vmatmul.bf16.gmra.mxu1 %v3891_v21  ;;  %2503 = vmatmul.bf16.gmra.mxu2 %v3895_v22  ;;  %v4934_v21 = vld [vmem:[%s5296_s4 + $0x378] sm:$0xf0]  ;;  %v4928_v22 = vld [vmem:[%s5296_s4 + $0x34c] sm:$0xf]  ;;  %v2307_v8 = vadd.f32 %v5500_v20, %v5585_v28 }
  0xcc   : > { %2592 = vmatmul.bf16.gmra.mxu3 %v3899_v25  ;;  %v4006_v25 = vld [vmem:[%s5296_s4 + $0x350] sm:$0xf]  ;;  %v3999_v42 = vor.u32 %v4934_v21, %v3998_v19  ;;  %v4003_v47 = vor.u32 %v4928_v22, %v4000_v24  ;;  %v4941_v19 = vld [vmem:[%s5296_s4 + $0x3b4] sm:$0xf]  ;;  %v4052_v21 = vld [vmem:[%s5296_s4 + $0x3e4] sm:$0xf0] }
  0xcd   : > { %2681 = vmatmul.bf16.gmra.mxu0 %v3903_v26  ;;  %v4935_v26 = vld [vmem:[%s5296_s4 + $0x380] sm:$0xf0]  ;;  %v4058_v22 = vld [vmem:[%s5296_s4 + $0x3b8] sm:$0xf]  ;;  %v4948_v24 = vld [vmem:[%s5296_s4 + $0x3e8] sm:$0xf0] }
  0xce   : > { %v2346_v31 = vpop.f32.mrf.mxu2  ;;  %v4007_v48 = vor.u32 %v4935_v26, %v4006_v25  ;;  %v2302_v26 = vadd.f32 %v5500_v20, %v5555_v1  ;;  %v5080_v28 = vld [vmem:[%s6404_s1 + $0x188] sm:$0xff] }
  0xcf   : > { %v5594_v32 = vadd.f32 %v5500_v20, %v2346_v31  ;;  %v2366_v33 = vpop.f32.mrf.mxu3  ;;  %2827 = vmatpush.bf16.msra.mxu2 %v5080_v28 }
  0xd0   : > { %v5597_v36 = vadd.f32 %v5500_v20, %v2366_v33  ;;  %v2328_v37 = vpop.f32.mrf.mxu1 }
  0xd1   : > { %v5600_v38 = vadd.f32 %v5500_v20, %v2328_v37  ;;  %v3995_v37 = vor.u32 %v4927_v16, %v3992_v17  ;;  %v4050_v16 = vld [vmem:[%s5296_s4 + $0x3b0] sm:$0xf]  ;;  %v4947_v17 = vld [vmem:[%s5296_s4 + $0x3e0] sm:$0xf0] }
  0xd2   : > { %v5602_v40 = vpop.f32.mrf.mxu0 }
  0xd6   : > { %v2348_v54 = vpop.f32.mrf.mxu2 }
  0xd7   : > { %v5619_v55 = vadd.f32 %v5500_v20, %v2348_v54  ;;  %v2368_v57 = vpop.f32.mrf.mxu3 }
  0xd8   : > { %v5622_v61 = vadd.f32 %v5500_v20, %v2368_v57  ;;  %v2331_v62 = vpop.f32.mrf.mxu1 }
  0xd9   : > { %v5625_v4 = vadd.f32 %v5500_v20, %v2331_v62 }
  0xda   : > { %v5627_v6 = vpop.f32.mrf.mxu0 }
  0xdb   : > { %2419 = vmatmul.bf16.gmra.mxu1 %v3943_v58  ;;  %2508 = vmatmul.bf16.gmra.mxu2 %v3947_v59 }
  0xdc   : > { %2597 = vmatmul.bf16.gmra.mxu3 %v3951_v63 }
  0xdd   : > { %2686 = vmatmul.bf16.gmra.mxu0 %v3955_v2  ;;  %v5073_v2 = vld [vmem:[%s6404_s1 + $0x150] sm:$0xff] }
  0xde   : > { %v2351_v9 = vpop.f32.mrf.mxu2  ;;  %2737 = vmatpush.bf16.msra.mxu1 %v5073_v2  ;;  %v4096_v2 = vld [vmem:[%s5296_s4 + $0x444] sm:$0xf0] }
  0xdf   : > { %v5630_v10 = vadd.f32 %v5500_v20, %v2351_v9  ;;  %v2371_v11 = vpop.f32.mrf.mxu3  ;;  %v5097_v9 = vld [vmem:[%s6404_s1 + $0x210] sm:$0xff] }
  0xe0   : > { %v5633_v12 = vadd.f32 %v5500_v20, %v2371_v11  ;;  %v2333_v13 = vpop.f32.mrf.mxu1  ;;  %v4940_v11 = vld [vmem:[%s5296_s4 + $0x3ac] sm:$0xf]  ;;  %3004 = vmatpush.bf16.msra.mxu0 %v5097_v9  ;;  %v4102_v9 = vld [vmem:[%s5296_s4 + $0x418] sm:$0xf] }
  0xe1   : > { %v5636_v14 = vadd.f32 %v5500_v20, %v2333_v13 }
  0xe2   : > { %v5638_v15 = vpop.f32.mrf.mxu0 }
  0xe6   : > { %v2353_v29 = vpop.f32.mrf.mxu2 }
  0xe7   : > { %v5651_v31 = vadd.f32 %v5500_v20, %v2353_v29  ;;  %v2373_v33 = vpop.f32.mrf.mxu3 }
  0xe8   : > { %v5654_v43 = vadd.f32 %v5500_v20, %v2373_v33  ;;  %v2385_v46 = vpop.f32.mrf.mxu1  ;;  %v4047_v33 = vor.u32 %v4940_v11, %v4044_v45  ;;  %v4960_v11 = vld [vmem:[%s5296_s4 + $0x448] sm:$0xf0]  ;;  %v4954_v45 = vld [vmem:[%s5296_s4 + $0x41c] sm:$0xf] }
  0xe9   : > { %v2386_v49 = vadd.f32 %v2385_v46, %v2297_v30  ;;  %v4055_v46 = vor.u32 %v4941_v19, %v4052_v21  ;;  %v4961_v19 = vld [vmem:[%s5296_s4 + $0x450] sm:$0xf0] }
  0xea   : > { %v2652_v50 = vpop.f32.mrf.mxu0 }
  0xeb   : > { %2424 = vmatmul.bf16.gmra.mxu1 %v3995_v37  ;;  %2513 = vmatmul.bf16.gmra.mxu2 %v3999_v42  ;;  %v4051_v37 = vor.u32 %v4947_v17, %v4050_v16  ;;  %v4104_v16 = vld [vmem:[%s5296_s4 + $0x44c] sm:$0xf0]  ;;  %v4110_v17 = vld [vmem:[%s5296_s4 + $0x420] sm:$0xf] }
  0xec   : > { %2602 = vmatmul.bf16.gmra.mxu3 %v4003_v47  ;;  %v4059_v47 = vor.u32 %v4948_v24, %v4058_v22 }
  0xed   : > { %2691 = vmatmul.bf16.gmra.mxu0 %v4007_v48 }
  0xee   : > { %v2474_v52 = vpop.f32.mrf.mxu2 }
  0xef   : > { %v2475_v54 = vadd.f32 %v2474_v52, %v2386_v49  ;;  %v2563_v57 = vpop.f32.mrf.mxu3 }
  0xf0   : > { %v2387_v58 = vpop.f32.mrf.mxu1 }
  0xf1   : > { %v2564_v59 = vadd.f32 %v2563_v57, %v2475_v54  ;;  %v2388_v62 = vadd.f32 %v2387_v58, %v2299_v53 }
  0xf2   : > { %v2654_v63 = vpop.f32.mrf.mxu0 }
  0xf3   : > { %v5672_v13 = vadd.f32 %v2652_v50, %v2564_v59 }
  0xf6   : > { %v2476_v25 = vpop.f32.mrf.mxu2 }
  0xf7   : > { %v2477_v29 = vadd.f32 %v2476_v25, %v2388_v62  ;;  %v2565_v30 = vpop.f32.mrf.mxu3  ;;  %v4953_v62 = vld [vmem:[%s5296_s4 + $0x414] sm:$0xf] }
  0xf8   : > { %v2390_v42 = vpop.f32.mrf.mxu1  ;;  %v4099_v25 = vor.u32 %v4953_v62, %v4096_v2  ;;  %v4966_v62 = vld [vmem:[%s5296_s4 + $0x47c] sm:$0xf] }
  0xf9   : > { %v2566_v48 = vadd.f32 %v2565_v30, %v2477_v29  ;;  %v2391_v49 = vadd.f32 %v2390_v42, %v2302_v26  ;;  %v4103_v26 = vor.u32 %v4960_v11, %v4102_v9  ;;  %v4107_v30 = vor.u32 %v4954_v45, %v4104_v16  ;;  %v4154_v9 = vld [vmem:[%s5296_s4 + $0x480] sm:$0xf]  ;;  %v4973_v11 = vld [vmem:[%s5296_s4 + $0x4b0] sm:$0xf0]  ;;  %v4967_v45 = vld [vmem:[%s5296_s4 + $0x484] sm:$0xf] }
  0xfa   : > { %v2657_v50 = vpop.f32.mrf.mxu0  ;;  %v4156_v16 = vld [vmem:[%s5296_s4 + $0x4b4] sm:$0xf0] }
  0xfb   : > { %2429 = vmatmul.bf16.gmra.mxu1 %v4047_v33  ;;  %2518 = vmatmul.bf16.gmra.mxu2 %v4051_v37  ;;  %v5682_v35 = vadd.f32 %v2654_v63, %v2566_v48  ;;  %v4111_v33 = vor.u32 %v4961_v19, %v4110_v17  ;;  %v5088_v48 = vld [vmem:[%s6404_s1 + $0x1c8] sm:$0xff]  ;;  %v4974_v19 = vld [vmem:[%s5296_s4 + $0x4b8] sm:$0xf0] }
  0xfc   : > { %2607 = vmatmul.bf16.gmra.mxu3 %v4055_v46  ;;  %v4162_v17 = vld [vmem:[%s5296_s4 + $0x488] sm:$0xf] }
  0xfd   : > { %2696 = vmatmul.bf16.gmra.mxu0 %v4059_v47  ;;  %2916 = vmatpush.bf16.msra.mxu3 %v5088_v48  ;;  %v2314_v48 = vadd.f32 %v5500_v20, %v5638_v15 }
  0xfe   : > { %v2479_v1 = vpop.f32.mrf.mxu2 }
  0xff   : > { %v2480_v52 = vadd.f32 %v2479_v1, %v2391_v49  ;;  %v2568_v53 = vpop.f32.mrf.mxu3 }
 0x100   : > { %v2392_v54 = vpop.f32.mrf.mxu1 }
 0x101   : > { %v2569_v57 = vadd.f32 %v2568_v53, %v2480_v52  ;;  %v2393_v58 = vadd.f32 %v2392_v54, %v2304_v51 }
 0x102   : > { %v2659_v59 = vpop.f32.mrf.mxu0 }
 0x103   : > { %v5688_v63 = vadd.f32 %v2657_v50, %v2569_v57  ;;  %v2309_v50 = vadd.f32 %v5500_v20, %v5602_v40  ;;  %v4148_v40 = vld [vmem:[%s5296_s4 + $0x4ac] sm:$0xf0] }
 0x106   : > { %v2481_v21 = vpop.f32.mrf.mxu2 }
 0x107   : > { %v2482_v22 = vadd.f32 %v2481_v21, %v2393_v58  ;;  %v2570_v24 = vpop.f32.mrf.mxu3  ;;  %v5072_v58 = vld [vmem:[%s6404_s1 + $0x148] sm:$0xff] }
 0x108   : > { %v2395_v29 = vpop.f32.mrf.mxu1  ;;  %2738 = vmatpush.bf16.msra.mxu1 %v5072_v58  ;;  %v4200_v58 = vld [vmem:[%s5296_s4 + $0x514] sm:$0xf0] }
 0x109   : > { %v2571_v37 = vadd.f32 %v2570_v24, %v2482_v22  ;;  %v2396_v42 = vadd.f32 %v2395_v29, %v2307_v8  ;;  %v2312_v8 = vadd.f32 %v5500_v20, %v5627_v6 }
 0x10a   : > { %v2662_v46 = vpop.f32.mrf.mxu0 }
 0x10b   : > { %2434 = vmatmul.bf16.gmra.mxu1 %v4099_v25  ;;  %2523 = vmatmul.bf16.gmra.mxu2 %v4103_v26  ;;  %v5698_v47 = vadd.f32 %v2659_v59, %v2571_v37  ;;  %v5096_v59 = vld [vmem:[%s6404_s1 + $0x208] sm:$0xff]  ;;  %v4151_v25 = vor.u32 %v4966_v62, %v4148_v40  ;;  %v4155_v26 = vor.u32 %v4973_v11, %v4154_v9  ;;  %v4986_v62 = vld [vmem:[%s5296_s4 + $0x518] sm:$0xf0]  ;;  %v4208_v9 = vld [vmem:[%s5296_s4 + $0x51c] sm:$0xf0] }
 0x10c   : > { %2612 = vmatmul.bf16.gmra.mxu3 %v4107_v30  ;;  %3005 = vmatpush.bf16.msra.mxu0 %v5096_v59  ;;  %v4159_v30 = vor.u32 %v4967_v45, %v4156_v16  ;;  %v4206_v59 = vld [vmem:[%s5296_s4 + $0x4e8] sm:$0xf]  ;;  %v4980_v40 = vld [vmem:[%s5296_s4 + $0x4ec] sm:$0xf]  ;;  %v4214_v11 = vld [vmem:[%s5296_s4 + $0x4f0] sm:$0xf] }
 0x10d   : > { %2701 = vmatmul.bf16.gmra.mxu0 %v4111_v33  ;;  %v4163_v33 = vor.u32 %v4974_v19, %v4162_v17  ;;  %v4987_v45 = vld [vmem:[%s5296_s4 + $0x520] sm:$0xf0]  ;;  %v4207_v15 = vor.u32 %v4986_v62, %v4206_v59  ;;  %v4993_v59 = vld [vmem:[%s5296_s4 + $0x554] sm:$0xf]  ;;  %v4260_v62 = vld [vmem:[%s5296_s4 + $0x584] sm:$0xf0] }
 0x10e   : > { %v2484_v49 = vpop.f32.mrf.mxu2 }
 0x10f   : > { %v2485_v1 = vadd.f32 %v2484_v49, %v2396_v42  ;;  %v2573_v51 = vpop.f32.mrf.mxu3 }
 0x110   : > { %v2397_v52 = vpop.f32.mrf.mxu1 }
 0x111   : > { %v2574_v53 = vadd.f32 %v2573_v51, %v2485_v1  ;;  %v2398_v54 = vadd.f32 %v2397_v52, %v2309_v50 }
 0x112   : > { %v2664_v57 = vpop.f32.mrf.mxu0 }
 0x113   : > { %v5716_v2 = vadd.f32 %v2662_v46, %v2574_v53 }
 0x116   : > { %v2486_v21 = vpop.f32.mrf.mxu2 }
 0x117   : > { %v2487_v22 = vadd.f32 %v2486_v21, %v2398_v54  ;;  %v2575_v24 = vpop.f32.mrf.mxu3  ;;  %v4979_v54 = vld [vmem:[%s5296_s4 + $0x4e4] sm:$0xf] }
 0x118   : > { %v2400_v29 = vpop.f32.mrf.mxu1  ;;  %v4203_v20 = vor.u32 %v4979_v54, %v4200_v58  ;;  %v4258_v54 = vld [vmem:[%s5296_s4 + $0x550] sm:$0xf]  ;;  %v4999_v58 = vld [vmem:[%s5296_s4 + $0x580] sm:$0xf0] }
 0x119   : > { %v2576_v37 = vadd.f32 %v2575_v24, %v2487_v22  ;;  %v2401_v42 = vadd.f32 %v2400_v29, %v2312_v8  ;;  %v4211_v8 = vor.u32 %v4980_v40, %v4208_v9  ;;  %v4215_v22 = vor.u32 %v4987_v45, %v4214_v11  ;;  %v5000_v40 = vld [vmem:[%s5296_s4 + $0x588] sm:$0xf0] }
 0x11a   : > { %v2667_v46 = vpop.f32.mrf.mxu0 }
 0x11b   : > { %2439 = vmatmul.bf16.gmra.mxu1 %v4151_v25  ;;  %2528 = vmatmul.bf16.gmra.mxu2 %v4155_v26  ;;  %v5726_v28 = vadd.f32 %v2664_v57, %v2576_v37 }
 0x11c   : > { %2617 = vmatmul.bf16.gmra.mxu3 %v4159_v30  ;;  %v5079_v30 = vld [vmem:[%s6404_s1 + $0x180] sm:$0xff] }
 0x11d   : > { %2706 = vmatmul.bf16.gmra.mxu0 %v4163_v33  ;;  %v5087_v33 = vld [vmem:[%s6404_s1 + $0x1c0] sm:$0xff]  ;;  %2828 = vmatpush.bf16.msra.mxu2 %v5079_v30 }
 0x11e   : > { %v2489_v6 = vpop.f32.mrf.mxu2  ;;  %2917 = vmatpush.bf16.msra.mxu3 %v5087_v33 }
 0x11f   : > { %v2490_v49 = vadd.f32 %v2489_v6, %v2401_v42  ;;  %v2578_v50 = vpop.f32.mrf.mxu3 }
 0x120   : > { %v2402_v1 = vpop.f32.mrf.mxu1 }
 0x121   : > { %v2579_v51 = vadd.f32 %v2578_v50, %v2490_v49  ;;  %v2403_v52 = vadd.f32 %v2402_v1, %v2314_v48  ;;  %v5071_v50 = vld [vmem:[%s6404_s1 + $0x140] sm:$0xff] }
 0x122   : > { %v2669_v53 = vpop.f32.mrf.mxu0  ;;  %v5095_v1 = vld [vmem:[%s6404_s1 + $0x200] sm:$0xff]  ;;  %2739 = vmatpush.bf16.msra.mxu1 %v5071_v50  ;;  %v5006_v50 = vld [vmem:[%s5296_s4 + $0x5bc] sm:$0xf] }
 0x123   : > { %v5732_v57 = vadd.f32 %v2667_v46, %v2579_v51  ;;  %v4992_v51 = vld [vmem:[%s5296_s4 + $0x54c] sm:$0xf]  ;;  %3006 = vmatpush.bf16.msra.mxu0 %v5095_v1  ;;  %v4312_v1 = vld [vmem:[%s5296_s4 + $0x5ec] sm:$0xf0] }
 0x126   : > { %v2491_v16 = vpop.f32.mrf.mxu2 }
 0x127   : > { %v2492_v17 = vadd.f32 %v2491_v16, %v2403_v52  ;;  %v2580_v19 = vpop.f32.mrf.mxu3  ;;  %v4252_v52 = vld [vmem:[%s5296_s4 + $0x57c] sm:$0xf0] }
 0x128   : > { %v2405_v21 = vpop.f32.mrf.mxu1  ;;  %v4255_v16 = vor.u32 %v4992_v51, %v4252_v52  ;;  %v4318_v51 = vld [vmem:[%s5296_s4 + $0x5c0] sm:$0xf]  ;;  %v5013_v52 = vld [vmem:[%s5296_s4 + $0x5f0] sm:$0xf0] }
 0x129   : > { %v2581_v24 = vadd.f32 %v2580_v19, %v2492_v17  ;;  %v2406_v25 = vadd.f32 %v2405_v21, %v5511_v34  ;;  %v4259_v17 = vor.u32 %v4999_v58, %v4258_v54 }
 0x12a   : > { %v2672_v26 = vpop.f32.mrf.mxu0 }
 0x12b   : > { %2444 = vmatmul.bf16.gmra.mxu1 %v4203_v20  ;;  %2533 = vmatmul.bf16.gmra.mxu2 %v4207_v15  ;;  %v5741_v29 = vadd.f32 %v2669_v53, %v2581_v24  ;;  %v4263_v20 = vor.u32 %v4993_v59, %v4260_v62 }
 0x12c   : > { %2622 = vmatmul.bf16.gmra.mxu3 %v4211_v8 }
 0x12d   : > { %2711 = vmatmul.bf16.gmra.mxu0 %v4215_v22 }
 0x12e   : > { %v2494_v37 = vpop.f32.mrf.mxu2 }
 0x12f   : > { %v2495_v34 = vadd.f32 %v2494_v37, %v2406_v25  ;;  %v2583_v42 = vpop.f32.mrf.mxu3 }
 0x130   : > { %v2407_v46 = vpop.f32.mrf.mxu1 }
 0x131   : > { %v2584_v6 = vadd.f32 %v2583_v42, %v2495_v34  ;;  %v2408_v48 = vadd.f32 %v2407_v46, %v5531_v44  ;;  %v4266_v44 = vld [vmem:[%s5296_s4 + $0x558] sm:$0xf]  ;;  %v5005_v42 = vld [vmem:[%s5296_s4 + $0x5b4] sm:$0xf]  ;;  %v4304_v46 = vld [vmem:[%s5296_s4 + $0x5e4] sm:$0xf0] }
 0x132   : > { %v2674_v49 = vpop.f32.mrf.mxu0  ;;  %v4267_v15 = vor.u32 %v5000_v40, %v4266_v44  ;;  %v4307_v62 = vor.u32 %v5005_v42, %v4304_v46  ;;  %v4362_v42 = vld [vmem:[%s5296_s4 + $0x620] sm:$0xf]  ;;  %v5025_v46 = vld [vmem:[%s5296_s4 + $0x650] sm:$0xf0] }
 0x133   : > { %v5758_v53 = vadd.f32 %v2672_v26, %v2584_v6 }
 0x136   : > { %v2496_v9 = vpop.f32.mrf.mxu2 }
 0x137   : > { %v2497_v11 = vadd.f32 %v2496_v9, %v2408_v48  ;;  %v2585_v45 = vpop.f32.mrf.mxu3  ;;  %v4310_v48 = vld [vmem:[%s5296_s4 + $0x5b8] sm:$0xf]  ;;  %v4315_v9 = vor.u32 %v5006_v50, %v4312_v1  ;;  %v5026_v50 = vld [vmem:[%s5296_s4 + $0x658] sm:$0xf0] }
 0x138   : > { %v2410_v19 = vpop.f32.mrf.mxu1 }
 0x139   : > { %v2586_v21 = vadd.f32 %v2585_v45, %v2497_v11  ;;  %v2411_v8 = vadd.f32 %v2410_v19, %v5553_v0  ;;  %v4319_v11 = vor.u32 %v5013_v52, %v4318_v51  ;;  %v5118_v19 = vld [vmem:[%s6404_s1 + $0x2b8] sm:$0xff] }
 0x13a   : > { %v2677_v22 = vpop.f32.mrf.mxu0  ;;  %3177 = vmatpush.bf16.msrb.mxu2 %v5118_v19 }
 0x13b   : > { %2449 = vmatmul.bf16.gmra.mxu1 %v4255_v16  ;;  %2538 = vmatmul.bf16.gmra.mxu2 %v4259_v17  ;;  %v5767_v24 = vadd.f32 %v2674_v49, %v2586_v21  ;;  %v5012_v49 = vld [vmem:[%s5296_s4 + $0x5e8] sm:$0xf0] }
 0x13c   : > { %2627 = vmatmul.bf16.gmra.mxu3 %v4263_v20  ;;  %v4311_v44 = vor.u32 %v5012_v49, %v4310_v48  ;;  %v5126_v20 = vld [vmem:[%s6404_s1 + $0x2f8] sm:$0xff]  ;;  %v5019_v48 = vld [vmem:[%s5296_s4 + $0x624] sm:$0xf] }
 0x13d   : > { %2716 = vmatmul.bf16.gmra.mxu0 %v4267_v15  ;;  %3266 = vmatpush.bf16.msrb.mxu3 %v5126_v20  ;;  %v4364_v49 = vld [vmem:[%s5296_s4 + $0x654] sm:$0xf0] }
 0x13e   : > { %v2499_v25 = vpop.f32.mrf.mxu2 }
 0x13f   : > { %v2500_v26 = vadd.f32 %v2499_v25, %v2411_v8  ;;  %v2588_v30 = vpop.f32.mrf.mxu3 }
 0x140   : > { %v2412_v33 = vpop.f32.mrf.mxu1 }
 0x141   : > { %v2589_v37 = vadd.f32 %v2588_v30, %v2500_v26  ;;  %v2413_v0 = vadd.f32 %v2412_v33, %v5564_v7  ;;  %v5110_v30 = vld [vmem:[%s6404_s1 + $0x278] sm:$0xff] }
 0x142   : > { %v2679_v34 = vpop.f32.mrf.mxu0  ;;  %v5134_v33 = vld [vmem:[%s6404_s1 + $0x338] sm:$0xff]  ;;  %3088 = vmatpush.bf16.msrb.mxu1 %v5110_v30 }
 0x143   : > { %v5772_v6 = vadd.f32 %v2677_v22, %v2589_v37  ;;  %v5018_v37 = vld [vmem:[%s5296_s4 + $0x61c] sm:$0xf]  ;;  %3355 = vmatpush.bf16.msrb.mxu0 %v5134_v33  ;;  %v3600_v33 = vld [vmem:[%s5296_s4 + $0x4c] sm:$0xf0] }
 0x144   : > { %v4826_v30 = vld [vmem:[%s5296_s4 + $0x1c] sm:$0xf] }
 0x146   : > { %v2501_v54 = vpop.f32.mrf.mxu2 }
 0x147   : > { %v2502_v58 = vadd.f32 %v2501_v54, %v2413_v0  ;;  %v2590_v59 = vpop.f32.mrf.mxu3  ;;  %v4356_v0 = vld [vmem:[%s5296_s4 + $0x64c] sm:$0xf0] }
 0x148   : > { %v2415_v40 = vpop.f32.mrf.mxu1  ;;  %v4359_v54 = vor.u32 %v5018_v37, %v4356_v0  ;;  %v3606_v37 = vld [vmem:[%s5296_s4 + $0x20] sm:$0xf]  ;;  %v4833_v0 = vld [vmem:[%s5296_s4 + $0x50] sm:$0xf0] }
 0x149   : > { %v2591_v7 = vadd.f32 %v2590_v59, %v2502_v58  ;;  %v2416_v45 = vadd.f32 %v2415_v40, %v5583_v27  ;;  %v4363_v58 = vor.u32 %v5025_v46, %v4362_v42 }
 0x14a   : > { %v2682_v16 = vpop.f32.mrf.mxu0 }
 0x14b   : > { %2454 = vmatmul.bf16.gmra.mxu1 %v4307_v62  ;;  %2543 = vmatmul.bf16.gmra.mxu2 %v4311_v44  ;;  %v5781_v17 = vadd.f32 %v2679_v34, %v2591_v7  ;;  %v4367_v62 = vor.u32 %v5019_v48, %v4364_v49 }
 0x14c   : > { %2632 = vmatmul.bf16.gmra.mxu3 %v4315_v9 }
 0x14d   : > { %2721 = vmatmul.bf16.gmra.mxu0 %v4319_v11 }
 0x14e   : > { %v2504_v15 = vpop.f32.mrf.mxu2 }
 0x14f   : > { %v2505_v27 = vadd.f32 %v2504_v15, %v2416_v45  ;;  %v2593_v21 = vpop.f32.mrf.mxu3 }
 0x150   : > { %v2417_v8 = vpop.f32.mrf.mxu1 }
 0x151   : > { %v2594_v22 = vadd.f32 %v2593_v21, %v2505_v27  ;;  %v2418_v25 = vadd.f32 %v2417_v8, %v5600_v38  ;;  %v4370_v38 = vld [vmem:[%s5296_s4 + $0x628] sm:$0xf]  ;;  %v4825_v21 = vld [vmem:[%s5296_s4 + $0x14] sm:$0xf] }
 0x152   : > { %v2684_v26 = vpop.f32.mrf.mxu0  ;;  %v4371_v44 = vor.u32 %v5026_v50, %v4370_v38  ;;  %v3592_v8 = vld [vmem:[%s5296_s4 + $0x44] sm:$0xf0] }
 0x153   : > { %v5798_v34 = vadd.f32 %v2682_v16, %v2594_v22  ;;  %v3595_v49 = vor.u32 %v4825_v21, %v3592_v8  ;;  %v3650_v21 = vld [vmem:[%s5296_s4 + $0x80] sm:$0xf]  ;;  %v4845_v8 = vld [vmem:[%s5296_s4 + $0xb0] sm:$0xf0] }
 0x156   : > { %v2506_v1 = vpop.f32.mrf.mxu2 }
 0x157   : > { %v2507_v51 = vadd.f32 %v2506_v1, %v2418_v25  ;;  %v2595_v52 = vpop.f32.mrf.mxu3  ;;  %v3598_v25 = vld [vmem:[%s5296_s4 + $0x18] sm:$0xf]  ;;  %v3603_v1 = vor.u32 %v4826_v30, %v3600_v33  ;;  %v4846_v30 = vld [vmem:[%s5296_s4 + $0xb8] sm:$0xf0] }
 0x158   : > { %v2420_v59 = vpop.f32.mrf.mxu1 }
 0x159   : > { %v2596_v40 = vadd.f32 %v2595_v52, %v2507_v51  ;;  %v2421_v9 = vadd.f32 %v2420_v59, %v5625_v4  ;;  %v3607_v51 = vor.u32 %v4833_v0, %v3606_v37  ;;  %v5117_v59 = vld [vmem:[%s6404_s1 + $0x2b0] sm:$0xff] }
 0x15a   : > { %v2687_v11 = vpop.f32.mrf.mxu0  ;;  %3178 = vmatpush.bf16.msrb.mxu2 %v5117_v59 }
 0x15b   : > { %2459 = vmatmul.bf16.gmra.mxu1 %v4359_v54  ;;  %2548 = vmatmul.bf16.gmra.mxu2 %v4363_v58  ;;  %v5807_v7 = vadd.f32 %v2684_v26, %v2596_v40  ;;  %v4832_v26 = vld [vmem:[%s5296_s4 + $0x48] sm:$0xf0] }
 0x15c   : > { %2637 = vmatmul.bf16.gmra.mxu3 %v4367_v62  ;;  %v3599_v38 = vor.u32 %v4832_v26, %v3598_v25  ;;  %v5125_v62 = vld [vmem:[%s6404_s1 + $0x2f0] sm:$0xff]  ;;  %v4839_v25 = vld [vmem:[%s5296_s4 + $0x84] sm:$0xf]  ;;  %v3652_v26 = vld [vmem:[%s5296_s4 + $0xb4] sm:$0xf0] }
 0x15d   : > { %2726 = vmatmul.bf16.gmra.mxu0 %v4371_v44  ;;  %3267 = vmatpush.bf16.msrb.mxu3 %v5125_v62 }
 0x15e   : > { %v2509_v45 = vpop.f32.mrf.mxu2 }
 0x15f   : > { %v2510_v16 = vadd.f32 %v2509_v45, %v2421_v9  ;;  %v2598_v19 = vpop.f32.mrf.mxu3 }
 0x160   : > { %v2422_v20 = vpop.f32.mrf.mxu1 }
 0x161   : > { %v2599_v15 = vadd.f32 %v2598_v19, %v2510_v16  ;;  %v2423_v4 = vadd.f32 %v2422_v20, %v5636_v14  ;;  %v5109_v19 = vld [vmem:[%s6404_s1 + $0x270] sm:$0xff] }
 0x162   : > { %v2689_v27 = vpop.f32.mrf.mxu0  ;;  %v5133_v20 = vld [vmem:[%s6404_s1 + $0x330] sm:$0xff]  ;;  %3089 = vmatpush.bf16.msrb.mxu1 %v5109_v19  ;;  %v4852_v19 = vld [vmem:[%s5296_s4 + $0xec] sm:$0xf] }
 0x163   : > { %v5812_v22 = vadd.f32 %v2687_v11, %v2599_v15  ;;  %v4838_v15 = vld [vmem:[%s5296_s4 + $0x7c] sm:$0xf]  ;;  %3356 = vmatpush.bf16.msrb.mxu0 %v5133_v20  ;;  %v3704_v20 = vld [vmem:[%s5296_s4 + $0x11c] sm:$0xf0] }
 0x166   : > { %v2511_v42 = vpop.f32.mrf.mxu2 }
 0x167   : > { %v2512_v46 = vadd.f32 %v2511_v42, %v2423_v4  ;;  %v2600_v48 = vpop.f32.mrf.mxu3  ;;  %v3644_v4 = vld [vmem:[%s5296_s4 + $0xac] sm:$0xf0] }
 0x168   : > { %v2425_v50 = vpop.f32.mrf.mxu1  ;;  %v3647_v42 = vor.u32 %v4838_v15, %v3644_v4  ;;  %v3710_v15 = vld [vmem:[%s5296_s4 + $0xf0] sm:$0xf]  ;;  %v4859_v4 = vld [vmem:[%s5296_s4 + $0x120] sm:$0xf0] }
 0x169   : > { %v2601_v14 = vadd.f32 %v2600_v48, %v2512_v46  ;;  %v2426_v52 = vadd.f32 %v2425_v50, %v5522_v39  ;;  %v3651_v46 = vor.u32 %v4845_v8, %v3650_v21 }
 0x16a   : > { %v2692_v54 = vpop.f32.mrf.mxu0 }
 0x16b   : > { %2740 = vmatmul.bf16.vlgmr.msra.gmra.mxu1 %v3595_v49  ;;  %2829 = vmatmul.bf16.vlgmr.msra.gmra.mxu2 %v3599_v38  ;;  %v5821_v58 = vadd.f32 %v2689_v27, %v2601_v14  ;;  %v3655_v49 = vor.u32 %v4839_v25, %v3652_v26 }
 0x16c   : > { %2918 = vmatmul.bf16.vlgmr.msra.gmra.mxu3 %v3603_v1 }
 0x16d   : > { %3007 = vmatmul.bf16.vlgmr.msra.gmra.mxu0 %v3607_v51 }
 0x16e   : > { %v2514_v44 = vpop.f32.mrf.mxu2 }
 0x16f   : > { %v2515_v39 = vadd.f32 %v2514_v44, %v2426_v52  ;;  %v2603_v40 = vpop.f32.mrf.mxu3 }
 0x170   : > { %v2427_v9 = vpop.f32.mrf.mxu1 }
 0x171   : > { %v2604_v11 = vadd.f32 %v2603_v40, %v2515_v39  ;;  %v2428_v45 = vadd.f32 %v2427_v9, %v5547_v56  ;;  %v3658_v56 = vld [vmem:[%s5296_s4 + $0x88] sm:$0xf]  ;;  %v4851_v40 = vld [vmem:[%s5296_s4 + $0xe4] sm:$0xf]  ;;  %v3696_v9 = vld [vmem:[%s5296_s4 + $0x114] sm:$0xf0] }
 0x172   : > { %v2694_v16 = vpop.f32.mrf.mxu0  ;;  %v3659_v38 = vor.u32 %v4846_v30, %v3658_v56  ;;  %v3699_v26 = vor.u32 %v4851_v40, %v3696_v9  ;;  %v3754_v40 = vld [vmem:[%s5296_s4 + $0x150] sm:$0xf]  ;;  %v4871_v9 = vld [vmem:[%s5296_s4 + $0x180] sm:$0xf0] }
 0x173   : > { %v5838_v27 = vadd.f32 %v2692_v54, %v2604_v11 }
 0x176   : > { %v2516_v33 = vpop.f32.mrf.mxu2 }
 0x177   : > { %v2517_v37 = vadd.f32 %v2516_v33, %v2428_v45  ;;  %v2605_v0 = vpop.f32.mrf.mxu3  ;;  %v3702_v45 = vld [vmem:[%s5296_s4 + $0xe8] sm:$0xf]  ;;  %v3707_v33 = vor.u32 %v4852_v19, %v3704_v20  ;;  %v4872_v19 = vld [vmem:[%s5296_s4 + $0x188] sm:$0xf0] }
 0x178   : > { %v2430_v48 = vpop.f32.mrf.mxu1 }
 0x179   : > { %v2606_v50 = vadd.f32 %v2605_v0, %v2517_v37  ;;  %v2431_v1 = vadd.f32 %v2430_v48, %v5558_v3  ;;  %v3711_v37 = vor.u32 %v4859_v4, %v3710_v15  ;;  %v5116_v48 = vld [vmem:[%s6404_s1 + $0x2a8] sm:$0xff] }
 0x17a   : > { %v2697_v51 = vpop.f32.mrf.mxu0  ;;  %3179 = vmatpush.bf16.msrb.mxu2 %v5116_v48 }
 0x17b   : > { %2745 = vmatmul.bf16.gmra.mxu1 %v3647_v42  ;;  %2834 = vmatmul.bf16.gmra.mxu2 %v3651_v46  ;;  %v5847_v14 = vadd.f32 %v2694_v16, %v2606_v50  ;;  %v4858_v16 = vld [vmem:[%s5296_s4 + $0x118] sm:$0xf0] }
 0x17c   : > { %2923 = vmatmul.bf16.gmra.mxu3 %v3655_v49  ;;  %v3703_v56 = vor.u32 %v4858_v16, %v3702_v45  ;;  %v5124_v49 = vld [vmem:[%s6404_s1 + $0x2e8] sm:$0xff]  ;;  %v4865_v45 = vld [vmem:[%s5296_s4 + $0x154] sm:$0xf] }
 0x17d   : > { %3012 = vmatmul.bf16.gmra.mxu0 %v3659_v38  ;;  %3268 = vmatpush.bf16.msrb.mxu3 %v5124_v49  ;;  %v3756_v16 = vld [vmem:[%s5296_s4 + $0x184] sm:$0xf0] }
 0x17e   : > { %v2519_v52 = vpop.f32.mrf.mxu2 }
 0x17f   : > { %v2520_v54 = vadd.f32 %v2519_v52, %v2431_v1  ;;  %v2608_v59 = vpop.f32.mrf.mxu3 }
 0x180   : > { %v2432_v62 = vpop.f32.mrf.mxu1 }
 0x181   : > { %v2609_v44 = vadd.f32 %v2608_v59, %v2520_v54  ;;  %v2433_v3 = vadd.f32 %v2432_v62, %v5577_v18  ;;  %v5108_v59 = vld [vmem:[%s6404_s1 + $0x268] sm:$0xff] }
 0x182   : > { %v2699_v39 = vpop.f32.mrf.mxu0  ;;  %v5132_v62 = vld [vmem:[%s6404_s1 + $0x328] sm:$0xff]  ;;  %3090 = vmatpush.bf16.msrb.mxu1 %v5108_v59  ;;  %v4878_v59 = vld [vmem:[%s5296_s4 + $0x1bc] sm:$0xf] }
 0x183   : > { %v5852_v11 = vadd.f32 %v2697_v51, %v2609_v44  ;;  %v4864_v44 = vld [vmem:[%s5296_s4 + $0x14c] sm:$0xf]  ;;  %3357 = vmatpush.bf16.msrb.mxu0 %v5132_v62  ;;  %v3808_v62 = vld [vmem:[%s5296_s4 + $0x1ec] sm:$0xf0] }
 0x186   : > { %v2521_v21 = vpop.f32.mrf.mxu2 }
 0x187   : > { %v2522_v8 = vadd.f32 %v2521_v21, %v2433_v3  ;;  %v2610_v25 = vpop.f32.mrf.mxu3  ;;  %v3748_v3 = vld [vmem:[%s5296_s4 + $0x17c] sm:$0xf0] }
 0x188   : > { %v2435_v30 = vpop.f32.mrf.mxu1  ;;  %v3751_v21 = vor.u32 %v4864_v44, %v3748_v3  ;;  %v3814_v44 = vld [vmem:[%s5296_s4 + $0x1c0] sm:$0xf]  ;;  %v4885_v3 = vld [vmem:[%s5296_s4 + $0x1f0] sm:$0xf0] }
 0x189   : > { %v2611_v18 = vadd.f32 %v2610_v25, %v2522_v8  ;;  %v2436_v0 = vadd.f32 %v2435_v30, %v5594_v32  ;;  %v3755_v8 = vor.u32 %v4871_v9, %v3754_v40 }
 0x18a   : > { %v2702_v42 = vpop.f32.mrf.mxu0 }
 0x18b   : > { %2750 = vmatmul.bf16.gmra.mxu1 %v3699_v26  ;;  %2839 = vmatmul.bf16.gmra.mxu2 %v3703_v56  ;;  %v5861_v46 = vadd.f32 %v2699_v39, %v2611_v18  ;;  %v3759_v26 = vor.u32 %v4865_v45, %v3756_v16 }
 0x18c   : > { %2928 = vmatmul.bf16.gmra.mxu3 %v3707_v33 }
 0x18d   : > { %3017 = vmatmul.bf16.gmra.mxu0 %v3711_v37 }
 0x18e   : > { %v2524_v38 = vpop.f32.mrf.mxu2 }
 0x18f   : > { %v2525_v32 = vadd.f32 %v2524_v38, %v2436_v0  ;;  %v2613_v50 = vpop.f32.mrf.mxu3 }
 0x190   : > { %v2437_v1 = vpop.f32.mrf.mxu1 }
 0x191   : > { %v2614_v51 = vadd.f32 %v2613_v50, %v2525_v32  ;;  %v2438_v52 = vadd.f32 %v2437_v1, %v5619_v55  ;;  %v3762_v55 = vld [vmem:[%s5296_s4 + $0x158] sm:$0xf]  ;;  %v4877_v50 = vld [vmem:[%s5296_s4 + $0x1b4] sm:$0xf]  ;;  %v3800_v1 = vld [vmem:[%s5296_s4 + $0x1e4] sm:$0xf0] }
 0x192   : > { %v2704_v54 = vpop.f32.mrf.mxu0  ;;  %v3763_v56 = vor.u32 %v4872_v19, %v3762_v55  ;;  %v3803_v16 = vor.u32 %v4877_v50, %v3800_v1  ;;  %v3858_v50 = vld [vmem:[%s5296_s4 + $0x220] sm:$0xf]  ;;  %v4897_v1 = vld [vmem:[%s5296_s4 + $0x250] sm:$0xf0] }
 0x193   : > { %v5878_v39 = vadd.f32 %v2702_v42, %v2614_v51 }
 0x196   : > { %v2526_v20 = vpop.f32.mrf.mxu2 }
 0x197   : > { %v2527_v15 = vadd.f32 %v2526_v20, %v2438_v52  ;;  %v2615_v4 = vpop.f32.mrf.mxu3  ;;  %v3806_v52 = vld [vmem:[%s5296_s4 + $0x1b8] sm:$0xf]  ;;  %v3811_v20 = vor.u32 %v4878_v59, %v3808_v62  ;;  %v4898_v59 = vld [vmem:[%s5296_s4 + $0x258] sm:$0xf0] }
 0x198   : > { %v2440_v25 = vpop.f32.mrf.mxu1 }
 0x199   : > { %v2616_v30 = vadd.f32 %v2615_v4, %v2527_v15  ;;  %v2441_v33 = vadd.f32 %v2440_v25, %v5630_v10  ;;  %v3815_v15 = vor.u32 %v4885_v3, %v3814_v44  ;;  %v5115_v25 = vld [vmem:[%s6404_s1 + $0x2a0] sm:$0xff] }
 0x19a   : > { %v2707_v37 = vpop.f32.mrf.mxu0  ;;  %3180 = vmatpush.bf16.msrb.mxu2 %v5115_v25 }
 0x19b   : > { %2755 = vmatmul.bf16.gmra.mxu1 %v3751_v21  ;;  %2844 = vmatmul.bf16.gmra.mxu2 %v3755_v8  ;;  %v5887_v18 = vadd.f32 %v2704_v54, %v2616_v30  ;;  %v4884_v54 = vld [vmem:[%s5296_s4 + $0x1e8] sm:$0xf0] }
 0x19c   : > { %2933 = vmatmul.bf16.gmra.mxu3 %v3759_v26  ;;  %v3807_v55 = vor.u32 %v4884_v54, %v3806_v52  ;;  %v5123_v26 = vld [vmem:[%s6404_s1 + $0x2e0] sm:$0xff]  ;;  %v3860_v54 = vld [vmem:[%s5296_s4 + $0x254] sm:$0xf0] }
 0x19d   : > { %3022 = vmatmul.bf16.gmra.mxu0 %v3763_v56  ;;  %3269 = vmatpush.bf16.msrb.mxu3 %v5123_v26  ;;  %v4891_v52 = vld [vmem:[%s5296_s4 + $0x224] sm:$0xf] }
 0x19e   : > { %v2529_v0 = vpop.f32.mrf.mxu2 }
 0x19f   : > { %v2530_v42 = vadd.f32 %v2529_v0, %v2441_v33  ;;  %v2618_v48 = vpop.f32.mrf.mxu3 }
 0x1a0   : > { %v2442_v49 = vpop.f32.mrf.mxu1 }
 0x1a1   : > { %v2619_v38 = vadd.f32 %v2618_v48, %v2530_v42  ;;  %v2443_v10 = vadd.f32 %v2442_v49, %v5651_v31  ;;  %v5107_v48 = vld [vmem:[%s6404_s1 + $0x260] sm:$0xff] }
 0x1a2   : > { %v2709_v32 = vpop.f32.mrf.mxu0  ;;  %v5131_v49 = vld [vmem:[%s6404_s1 + $0x320] sm:$0xff]  ;;  %3091 = vmatpush.bf16.msrb.mxu1 %v5107_v48  ;;  %v4904_v48 = vld [vmem:[%s5296_s4 + $0x28c] sm:$0xf] }
 0x1a3   : > { %v5892_v51 = vadd.f32 %v2707_v37, %v2619_v38  ;;  %v4890_v38 = vld [vmem:[%s5296_s4 + $0x21c] sm:$0xf]  ;;  %3358 = vmatpush.bf16.msrb.mxu0 %v5131_v49  ;;  %v3912_v49 = vld [vmem:[%s5296_s4 + $0x2bc] sm:$0xf0] }
 0x1a6   : > { %v2531_v40 = vpop.f32.mrf.mxu2 }
 0x1a7   : > { %v2532_v9 = vadd.f32 %v2531_v40, %v2443_v10  ;;  %v2620_v45 = vpop.f32.mrf.mxu3  ;;  %v3852_v10 = vld [vmem:[%s5296_s4 + $0x24c] sm:$0xf0] }
 0x1a8   : > { %v2445_v19 = vpop.f32.mrf.mxu1  ;;  %v3855_v40 = vor.u32 %v4890_v38, %v3852_v10  ;;  %v3918_v38 = vld [vmem:[%s5296_s4 + $0x290] sm:$0xf]  ;;  %v4911_v10 = vld [vmem:[%s5296_s4 + $0x2c0] sm:$0xf0] }
 0x1a9   : > { %v2621_v31 = vadd.f32 %v2620_v45, %v2532_v9  ;;  %v2446_v4 = vadd.f32 %v2445_v19, %v5525_v41  ;;  %v3859_v9 = vor.u32 %v4897_v1, %v3858_v50 }
 0x1aa   : > { %v2712_v21 = vpop.f32.mrf.mxu0 }
 0x1ab   : > { %2760 = vmatmul.bf16.gmra.mxu1 %v3803_v16  ;;  %2849 = vmatmul.bf16.gmra.mxu2 %v3807_v55  ;;  %v5901_v8 = vadd.f32 %v2709_v32, %v2621_v31  ;;  %v3863_v16 = vor.u32 %v4891_v52, %v3860_v54 }
 0x1ac   : > { %2938 = vmatmul.bf16.gmra.mxu3 %v3811_v20 }
 0x1ad   : > { %3027 = vmatmul.bf16.gmra.mxu0 %v3815_v15 }
 0x1ae   : > { %v2534_v56 = vpop.f32.mrf.mxu2 }
 0x1af   : > { %v2535_v41 = vadd.f32 %v2534_v56, %v2446_v4  ;;  %v2623_v30 = vpop.f32.mrf.mxu3 }
 0x1b0   : > { %v2447_v33 = vpop.f32.mrf.mxu1 }
 0x1b1   : > { %v2624_v37 = vadd.f32 %v2623_v30, %v2535_v41  ;;  %v2448_v0 = vadd.f32 %v2447_v33, %v5550_v60  ;;  %v3866_v60 = vld [vmem:[%s5296_s4 + $0x228] sm:$0xf]  ;;  %v4903_v30 = vld [vmem:[%s5296_s4 + $0x284] sm:$0xf]  ;;  %v3904_v33 = vld [vmem:[%s5296_s4 + $0x2b4] sm:$0xf0] }
 0x1b2   : > { %v2714_v42 = vpop.f32.mrf.mxu0  ;;  %v3867_v55 = vor.u32 %v4898_v59, %v3866_v60  ;;  %v3907_v54 = vor.u32 %v4903_v30, %v3904_v33  ;;  %v3962_v30 = vld [vmem:[%s5296_s4 + $0x2f0] sm:$0xf]  ;;  %v4923_v33 = vld [vmem:[%s5296_s4 + $0x320] sm:$0xf0] }
 0x1b3   : > { %v5918_v32 = vadd.f32 %v2712_v21, %v2624_v37 }
 0x1b6   : > { %v2536_v62 = vpop.f32.mrf.mxu2 }
 0x1b7   : > { %v2537_v44 = vadd.f32 %v2536_v62, %v2448_v0  ;;  %v2625_v3 = vpop.f32.mrf.mxu3  ;;  %v3910_v0 = vld [vmem:[%s5296_s4 + $0x288] sm:$0xf]  ;;  %v3915_v62 = vor.u32 %v4904_v48, %v3912_v49  ;;  %v4924_v48 = vld [vmem:[%s5296_s4 + $0x328] sm:$0xf0] }
 0x1b8   : > { %v2450_v45 = vpop.f32.mrf.mxu1 }
 0x1b9   : > { %v2626_v19 = vadd.f32 %v2625_v3, %v2537_v44  ;;  %v2451_v20 = vadd.f32 %v2450_v45, %v5561_v5  ;;  %v3919_v44 = vor.u32 %v4911_v10, %v3918_v38  ;;  %v5114_v45 = vld [vmem:[%s6404_s1 + $0x298] sm:$0xff] }
 0x1ba   : > { %v2717_v15 = vpop.f32.mrf.mxu0  ;;  %3181 = vmatpush.bf16.msrb.mxu2 %v5114_v45 }
 0x1bb   : > { %2765 = vmatmul.bf16.gmra.mxu1 %v3855_v40  ;;  %2854 = vmatmul.bf16.gmra.mxu2 %v3859_v9  ;;  %v5927_v31 = vadd.f32 %v2714_v42, %v2626_v19  ;;  %v4910_v42 = vld [vmem:[%s5296_s4 + $0x2b8] sm:$0xf0] }
 0x1bc   : > { %2943 = vmatmul.bf16.gmra.mxu3 %v3863_v16  ;;  %v3911_v60 = vor.u32 %v4910_v42, %v3910_v0  ;;  %v5122_v16 = vld [vmem:[%s6404_s1 + $0x2d8] sm:$0xff]  ;;  %v4917_v0 = vld [vmem:[%s5296_s4 + $0x2f4] sm:$0xf]  ;;  %v3964_v42 = vld [vmem:[%s5296_s4 + $0x324] sm:$0xf0] }
 0x1bd   : > { %3032 = vmatmul.bf16.gmra.mxu0 %v3867_v55  ;;  %3270 = vmatpush.bf16.msrb.mxu3 %v5122_v16 }
 0x1be   : > { %v2539_v4 = vpop.f32.mrf.mxu2 }
 0x1bf   : > { %v2540_v21 = vadd.f32 %v2539_v4, %v2451_v20  ;;  %v2628_v25 = vpop.f32.mrf.mxu3 }
 0x1c0   : > { %v2452_v26 = vpop.f32.mrf.mxu1 }
 0x1c1   : > { %v2629_v56 = vadd.f32 %v2628_v25, %v2540_v21  ;;  %v2453_v5 = vadd.f32 %v2452_v26, %v5580_v23  ;;  %v5106_v25 = vld [vmem:[%s6404_s1 + $0x258] sm:$0xff] }
 0x1c2   : > { %v2719_v41 = vpop.f32.mrf.mxu0  ;;  %v5130_v26 = vld [vmem:[%s6404_s1 + $0x318] sm:$0xff]  ;;  %3092 = vmatpush.bf16.msrb.mxu1 %v5106_v25 }
 0x1c3   : > { %v5932_v37 = vadd.f32 %v2717_v15, %v2629_v56  ;;  %v4916_v56 = vld [vmem:[%s5296_s4 + $0x2ec] sm:$0xf]  ;;  %3359 = vmatpush.bf16.msrb.mxu0 %v5130_v26  ;;  %v4930_v25 = vld [vmem:[%s5296_s4 + $0x35c] sm:$0xf]  ;;  %v4016_v26 = vld [vmem:[%s5296_s4 + $0x38c] sm:$0xf0] }
 0x1c6   : > { %v2541_v50 = vpop.f32.mrf.mxu2 }
 0x1c7   : > { %v2542_v1 = vadd.f32 %v2541_v50, %v2453_v5  ;;  %v2630_v52 = vpop.f32.mrf.mxu3  ;;  %v3956_v5 = vld [vmem:[%s5296_s4 + $0x31c] sm:$0xf0] }
 0x1c8   : > { %v2455_v59 = vpop.f32.mrf.mxu1  ;;  %v3959_v50 = vor.u32 %v4916_v56, %v3956_v5  ;;  %v4022_v56 = vld [vmem:[%s5296_s4 + $0x360] sm:$0xf]  ;;  %v4937_v5 = vld [vmem:[%s5296_s4 + $0x390] sm:$0xf0] }
 0x1c9   : > { %v2631_v23 = vadd.f32 %v2630_v52, %v2542_v1  ;;  %v2456_v3 = vadd.f32 %v2455_v59, %v5597_v36  ;;  %v3963_v1 = vor.u32 %v4923_v33, %v3962_v30 }
 0x1ca   : > { %v2722_v40 = vpop.f32.mrf.mxu0 }
 0x1cb   : > { %2770 = vmatmul.bf16.gmra.mxu1 %v3907_v54  ;;  %2859 = vmatmul.bf16.gmra.mxu2 %v3911_v60  ;;  %v5941_v9 = vadd.f32 %v2719_v41, %v2631_v23  ;;  %v3967_v54 = vor.u32 %v4917_v0, %v3964_v42 }
 0x1cc   : > { %2948 = vmatmul.bf16.gmra.mxu3 %v3915_v62 }
 0x1cd   : > { %3037 = vmatmul.bf16.gmra.mxu0 %v3919_v44 }
 0x1ce   : > { %v2544_v55 = vpop.f32.mrf.mxu2 }
 0x1cf   : > { %v2545_v36 = vadd.f32 %v2544_v55, %v2456_v3  ;;  %v2633_v19 = vpop.f32.mrf.mxu3 }
 0x1d0   : > { %v2457_v20 = vpop.f32.mrf.mxu1 }
 0x1d1   : > { %v2634_v15 = vadd.f32 %v2633_v19, %v2545_v36  ;;  %v2458_v4 = vadd.f32 %v2457_v20, %v5622_v61  ;;  %v3970_v61 = vld [vmem:[%s5296_s4 + $0x2f8] sm:$0xf]  ;;  %v4929_v19 = vld [vmem:[%s5296_s4 + $0x354] sm:$0xf]  ;;  %v4008_v20 = vld [vmem:[%s5296_s4 + $0x384] sm:$0xf0] }
 0x1d2   : > { %v2724_v21 = vpop.f32.mrf.mxu0  ;;  %v3971_v60 = vor.u32 %v4924_v48, %v3970_v61  ;;  %v4011_v42 = vor.u32 %v4929_v19, %v4008_v20  ;;  %v4066_v19 = vld [vmem:[%s5296_s4 + $0x3c0] sm:$0xf]  ;;  %v4949_v20 = vld [vmem:[%s5296_s4 + $0x3f0] sm:$0xf0] }
 0x1d3   : > { %v5958_v41 = vadd.f32 %v2722_v40, %v2634_v15 }
 0x1d6   : > { %v2546_v49 = vpop.f32.mrf.mxu2 }
 0x1d7   : > { %v2547_v38 = vadd.f32 %v2546_v49, %v2458_v4  ;;  %v2635_v10 = vpop.f32.mrf.mxu3  ;;  %v4014_v4 = vld [vmem:[%s5296_s4 + $0x358] sm:$0xf]  ;;  %v4019_v49 = vor.u32 %v4930_v25, %v4016_v26  ;;  %v4950_v25 = vld [vmem:[%s5296_s4 + $0x3f8] sm:$0xf0] }
 0x1d8   : > { %v2460_v52 = vpop.f32.mrf.mxu1 }
 0x1d9   : > { %v2636_v59 = vadd.f32 %v2635_v10, %v2547_v38  ;;  %v2461_v62 = vadd.f32 %v2460_v52, %v5633_v12  ;;  %v4023_v38 = vor.u32 %v4937_v5, %v4022_v56  ;;  %v5113_v52 = vld [vmem:[%s6404_s1 + $0x290] sm:$0xff] }
 0x1da   : > { %v2727_v44 = vpop.f32.mrf.mxu0  ;;  %3182 = vmatpush.bf16.msrb.mxu2 %v5113_v52 }
 0x1db   : > { %2775 = vmatmul.bf16.gmra.mxu1 %v3959_v50  ;;  %2864 = vmatmul.bf16.gmra.mxu2 %v3963_v1  ;;  %v5967_v23 = vadd.f32 %v2724_v21, %v2636_v59  ;;  %v4936_v21 = vld [vmem:[%s5296_s4 + $0x388] sm:$0xf0] }
 0x1dc   : > { %2953 = vmatmul.bf16.gmra.mxu3 %v3967_v54  ;;  %v4015_v61 = vor.u32 %v4936_v21, %v4014_v4  ;;  %v5121_v54 = vld [vmem:[%s6404_s1 + $0x2d0] sm:$0xff]  ;;  %v4943_v4 = vld [vmem:[%s5296_s4 + $0x3c4] sm:$0xf]  ;;  %v4068_v21 = vld [vmem:[%s5296_s4 + $0x3f4] sm:$0xf0] }
 0x1dd   : > { %3042 = vmatmul.bf16.gmra.mxu0 %v3971_v60  ;;  %3271 = vmatpush.bf16.msrb.mxu3 %v5121_v54 }
 0x1de   : > { %v2549_v3 = vpop.f32.mrf.mxu2 }
 0x1df   : > { %v2550_v40 = vadd.f32 %v2549_v3, %v2461_v62  ;;  %v2638_v45 = vpop.f32.mrf.mxu3 }
 0x1e0   : > { %v2462_v16 = vpop.f32.mrf.mxu1 }
 0x1e1   : > { %v2639_v55 = vadd.f32 %v2638_v45, %v2550_v40  ;;  %v2463_v12 = vadd.f32 %v2462_v16, %v5654_v43  ;;  %v5105_v45 = vld [vmem:[%s6404_s1 + $0x250] sm:$0xff] }
 0x1e2   : > { %v2729_v36 = vpop.f32.mrf.mxu0  ;;  %v5129_v16 = vld [vmem:[%s6404_s1 + $0x310] sm:$0xff]  ;;  %3093 = vmatpush.bf16.msrb.mxu1 %v5105_v45  ;;  %v4956_v45 = vld [vmem:[%s5296_s4 + $0x42c] sm:$0xf] }
 0x1e3   : > { %v5972_v15 = vadd.f32 %v2727_v44, %v2639_v55  ;;  %v4942_v55 = vld [vmem:[%s5296_s4 + $0x3bc] sm:$0xf]  ;;  %3360 = vmatpush.bf16.msrb.mxu0 %v5129_v16  ;;  %v4120_v16 = vld [vmem:[%s5296_s4 + $0x45c] sm:$0xf0] }
 0x1e6   : > { %v2551_v30 = vpop.f32.mrf.mxu2 }
 0x1e7   : > { %v2552_v33 = vadd.f32 %v2551_v30, %v2463_v12  ;;  %v2640_v0 = vpop.f32.mrf.mxu3  ;;  %v4060_v12 = vld [vmem:[%s5296_s4 + $0x3ec] sm:$0xf0] }
 0x1e8   : > { %v2741_v48 = vpop.f32.mrf.mxu1  ;;  %v4063_v30 = vor.u32 %v4942_v55, %v4060_v12  ;;  %v4126_v55 = vld [vmem:[%s5296_s4 + $0x430] sm:$0xf]  ;;  %v4963_v12 = vld [vmem:[%s5296_s4 + $0x460] sm:$0xf0] }
 0x1e9   : > { %v2641_v43 = vadd.f32 %v2640_v0, %v2552_v33  ;;  %v2742_v10 = vadd.f32 %v2741_v48, %v5672_v13  ;;  %v4067_v33 = vor.u32 %v4949_v20, %v4066_v19 }
 0x1ea   : > { %v3008_v50 = vpop.f32.mrf.mxu0 }
 0x1eb   : > { %2780 = vmatmul.bf16.gmra.mxu1 %v4011_v42  ;;  %2869 = vmatmul.bf16.gmra.mxu2 %v4015_v61  ;;  %v5981_v1 = vadd.f32 %v2729_v36, %v2641_v43  ;;  %v4071_v42 = vor.u32 %v4943_v4, %v4068_v21 }
 0x1ec   : > { %2958 = vmatmul.bf16.gmra.mxu3 %v4019_v49 }
 0x1ed   : > { %3047 = vmatmul.bf16.gmra.mxu0 %v4023_v38 }
 0x1ee   : > { %v2830_v60 = vpop.f32.mrf.mxu2 }
 0x1ef   : > { %v2831_v13 = vadd.f32 %v2830_v60, %v2742_v10  ;;  %v2919_v59 = vpop.f32.mrf.mxu3 }
 0x1f0   : > { %v2743_v62 = vpop.f32.mrf.mxu1 }
 0x1f1   : > { %v2920_v44 = vadd.f32 %v2919_v59, %v2831_v13  ;;  %v2744_v3 = vadd.f32 %v2743_v62, %v5682_v35  ;;  %v4074_v35 = vld [vmem:[%s5296_s4 + $0x3c8] sm:$0xf]  ;;  %v4955_v59 = vld [vmem:[%s5296_s4 + $0x424] sm:$0xf]  ;;  %v4112_v62 = vld [vmem:[%s5296_s4 + $0x454] sm:$0xf0] }
 0x1f2   : > { %v3010_v40 = vpop.f32.mrf.mxu0  ;;  %v4075_v61 = vor.u32 %v4950_v25, %v4074_v35  ;;  %v4115_v21 = vor.u32 %v4955_v59, %v4112_v62  ;;  %v4170_v59 = vld [vmem:[%s5296_s4 + $0x490] sm:$0xf]  ;;  %v4975_v62 = vld [vmem:[%s5296_s4 + $0x4c0] sm:$0xf0] }
 0x1f3   : > { %v5998_v36 = vadd.f32 %v3008_v50, %v2920_v44 }
 0x1f6   : > { %v2832_v26 = vpop.f32.mrf.mxu2 }
 0x1f7   : > { %v2833_v56 = vadd.f32 %v2832_v26, %v2744_v3  ;;  %v2921_v5 = vpop.f32.mrf.mxu3  ;;  %v4118_v3 = vld [vmem:[%s5296_s4 + $0x428] sm:$0xf]  ;;  %v4123_v26 = vor.u32 %v4956_v45, %v4120_v16  ;;  %v4976_v45 = vld [vmem:[%s5296_s4 + $0x4c8] sm:$0xf0] }
 0x1f8   : > { %v2746_v0 = vpop.f32.mrf.mxu1 }
 0x1f9   : > { %v2922_v48 = vadd.f32 %v2921_v5, %v2833_v56  ;;  %v2747_v49 = vadd.f32 %v2746_v0, %v5688_v63  ;;  %v4127_v56 = vor.u32 %v4963_v12, %v4126_v55  ;;  %v5112_v0 = vld [vmem:[%s6404_s1 + $0x288] sm:$0xff] }
 0x1fa   : > { %v3013_v38 = vpop.f32.mrf.mxu0  ;;  %3183 = vmatpush.bf16.msrb.mxu2 %v5112_v0 }
 0x1fb   : > { %2785 = vmatmul.bf16.gmra.mxu1 %v4063_v30  ;;  %2874 = vmatmul.bf16.gmra.mxu2 %v4067_v33  ;;  %v6007_v43 = vadd.f32 %v3010_v40, %v2922_v48  ;;  %v4962_v40 = vld [vmem:[%s5296_s4 + $0x458] sm:$0xf0] }
 0x1fc   : > { %2963 = vmatmul.bf16.gmra.mxu3 %v4071_v42  ;;  %v4119_v35 = vor.u32 %v4962_v40, %v4118_v3  ;;  %v5120_v42 = vld [vmem:[%s6404_s1 + $0x2c8] sm:$0xff]  ;;  %v4969_v3 = vld [vmem:[%s5296_s4 + $0x494] sm:$0xf] }
 0x1fd   : > { %3052 = vmatmul.bf16.gmra.mxu0 %v4075_v61  ;;  %3272 = vmatpush.bf16.msrb.mxu3 %v5120_v42  ;;  %v4172_v40 = vld [vmem:[%s5296_s4 + $0x4c4] sm:$0xf0] }
 0x1fe   : > { %v2835_v10 = vpop.f32.mrf.mxu2 }
 0x1ff   : > { %v2836_v50 = vadd.f32 %v2835_v10, %v2747_v49  ;;  %v2924_v52 = vpop.f32.mrf.mxu3 }
 0x200   : > { %v2748_v54 = vpop.f32.mrf.mxu1 }
 0x201   : > { %v2925_v60 = vadd.f32 %v2924_v52, %v2836_v50  ;;  %v2749_v63 = vadd.f32 %v2748_v54, %v5698_v47  ;;  %v5104_v52 = vld [vmem:[%s6404_s1 + $0x248] sm:$0xff] }
 0x202   : > { %v3015_v13 = vpop.f32.mrf.mxu0  ;;  %v5128_v54 = vld [vmem:[%s6404_s1 + $0x308] sm:$0xff]  ;;  %3094 = vmatpush.bf16.msrb.mxu1 %v5104_v52  ;;  %v4982_v52 = vld [vmem:[%s5296_s4 + $0x4fc] sm:$0xf] }
 0x203   : > { %v6012_v44 = vadd.f32 %v3013_v38, %v2925_v60  ;;  %v4968_v60 = vld [vmem:[%s5296_s4 + $0x48c] sm:$0xf]  ;;  %3361 = vmatpush.bf16.msrb.mxu0 %v5128_v54  ;;  %v4224_v54 = vld [vmem:[%s5296_s4 + $0x52c] sm:$0xf0] }
 0x206   : > { %v2837_v19 = vpop.f32.mrf.mxu2 }
 0x207   : > { %v2838_v20 = vadd.f32 %v2837_v19, %v2749_v63  ;;  %v2926_v4 = vpop.f32.mrf.mxu3  ;;  %v4164_v63 = vld [vmem:[%s5296_s4 + $0x4bc] sm:$0xf0] }
 0x208   : > { %v2751_v25 = vpop.f32.mrf.mxu1  ;;  %v4167_v19 = vor.u32 %v4968_v60, %v4164_v63  ;;  %v4230_v60 = vld [vmem:[%s5296_s4 + $0x500] sm:$0xf]  ;;  %v4989_v63 = vld [vmem:[%s5296_s4 + $0x530] sm:$0xf0] }
 0x209   : > { %v2927_v47 = vadd.f32 %v2926_v4, %v2838_v20  ;;  %v2752_v5 = vadd.f32 %v2751_v25, %v5716_v2  ;;  %v4171_v20 = vor.u32 %v4975_v62, %v4170_v59 }
 0x20a   : > { %v3018_v30 = vpop.f32.mrf.mxu0 }
 0x20b   : > { %2790 = vmatmul.bf16.gmra.mxu1 %v4115_v21  ;;  %2879 = vmatmul.bf16.gmra.mxu2 %v4119_v35  ;;  %v6021_v33 = vadd.f32 %v3015_v13, %v2927_v47  ;;  %v4175_v21 = vor.u32 %v4969_v3, %v4172_v40 }
 0x20c   : > { %2968 = vmatmul.bf16.gmra.mxu3 %v4123_v26 }
 0x20d   : > { %3057 = vmatmul.bf16.gmra.mxu0 %v4127_v56 }
 0x20e   : > { %v2840_v61 = vpop.f32.mrf.mxu2 }
 0x20f   : > { %v2841_v2 = vadd.f32 %v2840_v61, %v2752_v5  ;;  %v2929_v48 = vpop.f32.mrf.mxu3 }
 0x210   : > { %v2753_v49 = vpop.f32.mrf.mxu1 }
 0x211   : > { %v2930_v38 = vadd.f32 %v2929_v48, %v2841_v2  ;;  %v2754_v10 = vadd.f32 %v2753_v49, %v5726_v28  ;;  %v4178_v28 = vld [vmem:[%s5296_s4 + $0x498] sm:$0xf]  ;;  %v4981_v48 = vld [vmem:[%s5296_s4 + $0x4f4] sm:$0xf]  ;;  %v4216_v49 = vld [vmem:[%s5296_s4 + $0x524] sm:$0xf0] }
 0x212   : > { %v3020_v50 = vpop.f32.mrf.mxu0  ;;  %v4179_v35 = vor.u32 %v4976_v45, %v4178_v28  ;;  %v4219_v40 = vor.u32 %v4981_v48, %v4216_v49  ;;  %v4274_v48 = vld [vmem:[%s5296_s4 + $0x560] sm:$0xf]  ;;  %v5001_v49 = vld [vmem:[%s5296_s4 + $0x590] sm:$0xf0] }
 0x213   : > { %v6038_v13 = vadd.f32 %v3018_v30, %v2930_v38 }
 0x216   : > { %v2842_v16 = vpop.f32.mrf.mxu2 }
 0x217   : > { %v2843_v55 = vadd.f32 %v2842_v16, %v2754_v10  ;;  %v2931_v12 = vpop.f32.mrf.mxu3  ;;  %v4222_v10 = vld [vmem:[%s5296_s4 + $0x4f8] sm:$0xf]  ;;  %v4227_v16 = vor.u32 %v4982_v52, %v4224_v54  ;;  %v5002_v52 = vld [vmem:[%s5296_s4 + $0x598] sm:$0xf0] }
 0x218   : > { %v2756_v4 = vpop.f32.mrf.mxu1 }
 0x219   : > { %v2932_v25 = vadd.f32 %v2931_v12, %v2843_v55  ;;  %v2757_v26 = vadd.f32 %v2756_v4, %v5732_v57  ;;  %v4231_v55 = vor.u32 %v4989_v63, %v4230_v60  ;;  %v5111_v4 = vld [vmem:[%s6404_s1 + $0x280] sm:$0xff] }
 0x21a   : > { %v3023_v56 = vpop.f32.mrf.mxu0  ;;  %3184 = vmatpush.bf16.msrb.mxu2 %v5111_v4 }
 0x21b   : > { %2795 = vmatmul.bf16.gmra.mxu1 %v4167_v19  ;;  %2884 = vmatmul.bf16.gmra.mxu2 %v4171_v20  ;;  %v6047_v47 = vadd.f32 %v3020_v50, %v2932_v25  ;;  %v4988_v50 = vld [vmem:[%s5296_s4 + $0x528] sm:$0xf0] }
 0x21c   : > { %2973 = vmatmul.bf16.gmra.mxu3 %v4175_v21  ;;  %v4223_v28 = vor.u32 %v4988_v50, %v4222_v10  ;;  %v5119_v21 = vld [vmem:[%s6404_s1 + $0x2c0] sm:$0xff]  ;;  %v4276_v50 = vld [vmem:[%s5296_s4 + $0x594] sm:$0xf0] }
 0x21d   : > { %3062 = vmatmul.bf16.gmra.mxu0 %v4179_v35  ;;  %3273 = vmatpush.bf16.msrb.mxu3 %v5119_v21  ;;  %v4995_v10 = vld [vmem:[%s5296_s4 + $0x564] sm:$0xf] }
 0x21e   : > { %v2845_v5 = vpop.f32.mrf.mxu2 }
 0x21f   : > { %v2846_v30 = vadd.f32 %v2845_v5, %v2757_v26  ;;  %v2934_v0 = vpop.f32.mrf.mxu3 }
 0x220   : > { %v2758_v42 = vpop.f32.mrf.mxu1 }
 0x221   : > { %v2935_v61 = vadd.f32 %v2934_v0, %v2846_v30  ;;  %v2759_v57 = vadd.f32 %v2758_v42, %v5741_v29  ;;  %v5103_v0 = vld [vmem:[%s6404_s1 + $0x240] sm:$0xff] }
 0x222   : > { %v3025_v2 = vpop.f32.mrf.mxu0  ;;  %v5127_v42 = vld [vmem:[%s6404_s1 + $0x300] sm:$0xff]  ;;  %3095 = vmatpush.bf16.msrb.mxu1 %v5103_v0  ;;  %v5008_v0 = vld [vmem:[%s5296_s4 + $0x5cc] sm:$0xf] }
 0x223   : > { %v6052_v38 = vadd.f32 %v3023_v56, %v2935_v61  ;;  %v4994_v61 = vld [vmem:[%s5296_s4 + $0x55c] sm:$0xf]  ;;  %3362 = vmatpush.bf16.msrb.mxu0 %v5127_v42  ;;  %v4328_v42 = vld [vmem:[%s5296_s4 + $0x5fc] sm:$0xf0] }
 0x226   : > { %v2847_v59 = vpop.f32.mrf.mxu2 }
 0x227   : > { %v2848_v62 = vadd.f32 %v2847_v59, %v2759_v57  ;;  %v2936_v3 = vpop.f32.mrf.mxu3  ;;  %v4268_v57 = vld [vmem:[%s5296_s4 + $0x58c] sm:$0xf0] }
 0x228   : > { %v2761_v45 = vpop.f32.mrf.mxu1  ;;  %v4271_v59 = vor.u32 %v4994_v61, %v4268_v57  ;;  %v4334_v61 = vld [vmem:[%s5296_s4 + $0x5d0] sm:$0xf]  ;;  %v5015_v57 = vld [vmem:[%s5296_s4 + $0x600] sm:$0xf0] }
 0x229   : > { %v2937_v29 = vadd.f32 %v2936_v3, %v2848_v62  ;;  %v2762_v12 = vadd.f32 %v2761_v45, %v5758_v53  ;;  %v4275_v62 = vor.u32 %v5001_v49, %v4274_v48 }
 0x22a   : > { %v3028_v19 = vpop.f32.mrf.mxu0 }
 0x22b   : > { %2800 = vmatmul.bf16.gmra.mxu1 %v4219_v40  ;;  %2889 = vmatmul.bf16.gmra.mxu2 %v4223_v28  ;;  %v6061_v20 = vadd.f32 %v3025_v2, %v2937_v29  ;;  %v4279_v40 = vor.u32 %v4995_v10, %v4276_v50 }
 0x22c   : > { %2978 = vmatmul.bf16.gmra.mxu3 %v4227_v16 }
 0x22d   : > { %3067 = vmatmul.bf16.gmra.mxu0 %v4231_v55 }
 0x22e   : > { %v2850_v35 = vpop.f32.mrf.mxu2 }
 0x22f   : > { %v2851_v53 = vadd.f32 %v2850_v35, %v2762_v12  ;;  %v2939_v25 = vpop.f32.mrf.mxu3 }
 0x230   : > { %v2763_v26 = vpop.f32.mrf.mxu1 }
 0x231   : > { %v2940_v56 = vadd.f32 %v2939_v25, %v2851_v53  ;;  %v2764_v5 = vadd.f32 %v2763_v26, %v5767_v24  ;;  %v4282_v24 = vld [vmem:[%s5296_s4 + $0x568] sm:$0xf]  ;;  %v5007_v25 = vld [vmem:[%s5296_s4 + $0x5c4] sm:$0xf]  ;;  %v4320_v26 = vld [vmem:[%s5296_s4 + $0x5f4] sm:$0xf0] }
 0x232   : > { %v3030_v30 = vpop.f32.mrf.mxu0  ;;  %v4283_v28 = vor.u32 %v5002_v52, %v4282_v24  ;;  %v4323_v50 = vor.u32 %v5007_v25, %v4320_v26  ;;  %v4386_v25 = vld [vmem:[%s5296_s4 + $0x638] sm:$0xf]  ;;  %v5028_v26 = vld [vmem:[%s5296_s4 + $0x668] sm:$0xf0] }
 0x233   : > { %v6078_v2 = vadd.f32 %v3028_v19, %v2940_v56 }
 0x236   : > { %v2852_v54 = vpop.f32.mrf.mxu2 }
 0x237   : > { %v2853_v60 = vadd.f32 %v2852_v54, %v2764_v5  ;;  %v2941_v63 = vpop.f32.mrf.mxu3  ;;  %v4326_v5 = vld [vmem:[%s5296_s4 + $0x5c8] sm:$0xf]  ;;  %v4331_v54 = vor.u32 %v5008_v0, %v4328_v42 }
 0x238   : > { %v2766_v3 = vpop.f32.mrf.mxu1 }
 0x239   : > { %v2942_v45 = vadd.f32 %v2941_v63, %v2853_v60  ;;  %v2767_v16 = vadd.f32 %v2766_v3, %v5772_v6  ;;  %v4335_v60 = vor.u32 %v5015_v57, %v4334_v61 }
 0x23a   : > { %v3033_v55 = vpop.f32.mrf.mxu0 }
 0x23b   : > { %2805 = vmatmul.bf16.gmra.mxu1 %v4271_v59  ;;  %2894 = vmatmul.bf16.gmra.mxu2 %v4275_v62  ;;  %v6087_v29 = vadd.f32 %v3030_v30, %v2942_v45  ;;  %v5014_v30 = vld [vmem:[%s5296_s4 + $0x5f8] sm:$0xf0] }
 0x23c   : > { %2983 = vmatmul.bf16.gmra.mxu3 %v4279_v40  ;;  %v4327_v24 = vor.u32 %v5014_v30, %v4326_v5 }
 0x23d   : > { %3072 = vmatmul.bf16.gmra.mxu0 %v4283_v28 }
 0x23e   : > { %v2855_v12 = vpop.f32.mrf.mxu2 }
 0x23f   : > { %v2856_v19 = vadd.f32 %v2855_v12, %v2767_v16  ;;  %v2944_v4 = vpop.f32.mrf.mxu3  ;;  %v5020_v12 = vld [vmem:[%s5296_s4 + $0x62c] sm:$0xf] }
 0x240   : > { %v2768_v21 = vpop.f32.mrf.mxu1 }
 0x241   : > { %v2945_v35 = vadd.f32 %v2944_v4, %v2856_v19  ;;  %v2769_v6 = vadd.f32 %v2768_v21, %v5781_v17  ;;  %v4372_v19 = vld [vmem:[%s5296_s4 + $0x65c] sm:$0xf0]  ;;  %v4378_v21 = vld [vmem:[%s5296_s4 + $0x630] sm:$0xf] }
 0x242   : > { %v3035_v53 = vpop.f32.mrf.mxu0  ;;  %v4375_v42 = vor.u32 %v5020_v12, %v4372_v19  ;;  %v3622_v12 = vld [vmem:[%s5296_s4 + $0x30] sm:$0xf]  ;;  %v4835_v19 = vld [vmem:[%s5296_s4 + $0x60] sm:$0xf0] }
 0x243   : > { %v6092_v56 = vadd.f32 %v3033_v55, %v2945_v35  ;;  %v5027_v35 = vld [vmem:[%s5296_s4 + $0x660] sm:$0xf0] }
 0x244   : > { %v4379_v61 = vor.u32 %v5027_v35, %v4378_v21 }
 0x246   : > { %v2857_v48 = vpop.f32.mrf.mxu2 }
 0x247   : > { %v2858_v49 = vadd.f32 %v2857_v48, %v2769_v6  ;;  %v2946_v10 = vpop.f32.mrf.mxu3  ;;  %v5021_v6 = vld [vmem:[%s5296_s4 + $0x634] sm:$0xf] }
 0x248   : > { %v2771_v52 = vpop.f32.mrf.mxu1 }
 0x249   : > { %v2947_v17 = vadd.f32 %v2946_v10, %v2858_v49  ;;  %v2772_v63 = vadd.f32 %v2771_v52, %v5798_v34  ;;  %v4387_v49 = vor.u32 %v5028_v26, %v4386_v25 }
 0x24a   : > { %v3038_v59 = vpop.f32.mrf.mxu0 }
 0x24b   : > { %2810 = vmatmul.bf16.gmra.mxu1 %v4323_v50  ;;  %2899 = vmatmul.bf16.gmra.mxu2 %v4327_v24  ;;  %v6101_v62 = vadd.f32 %v3035_v53, %v2947_v17  ;;  %v4380_v53 = vld [vmem:[%s5296_s4 + $0x664] sm:$0xf0] }
 0x24c   : > { %2988 = vmatmul.bf16.gmra.mxu3 %v4331_v54  ;;  %v4383_v48 = vor.u32 %v5021_v6, %v4380_v53 }
 0x24d   : > { %3077 = vmatmul.bf16.gmra.mxu0 %v4335_v60 }
 0x24e   : > { %v2860_v3 = vpop.f32.mrf.mxu2 }
 0x24f   : > { %v2861_v40 = vadd.f32 %v2860_v3, %v2772_v63  ;;  %v2949_v28 = vpop.f32.mrf.mxu3  ;;  %v4827_v3 = vld [vmem:[%s5296_s4 + $0x24] sm:$0xf] }
 0x250   : > { %v2773_v45 = vpop.f32.mrf.mxu1 }
 0x251   : > { %v2950_v16 = vadd.f32 %v2949_v28, %v2861_v40  ;;  %v2774_v34 = vadd.f32 %v2773_v45, %v5807_v7  ;;  %v3608_v40 = vld [vmem:[%s5296_s4 + $0x54] sm:$0xf0]  ;;  %v3614_v45 = vld [vmem:[%s5296_s4 + $0x28] sm:$0xf] }
 0x252   : > { %v3040_v55 = vpop.f32.mrf.mxu0  ;;  %v3611_v53 = vor.u32 %v4827_v3, %v3608_v40  ;;  %v3674_v3 = vld [vmem:[%s5296_s4 + $0x98] sm:$0xf]  ;;  %v4848_v40 = vld [vmem:[%s5296_s4 + $0xc8] sm:$0xf0] }
 0x253   : > { %v6106_v4 = vadd.f32 %v3038_v59, %v2950_v16  ;;  %v4834_v16 = vld [vmem:[%s5296_s4 + $0x58] sm:$0xf0] }
 0x254   : > { %v3615_v25 = vor.u32 %v4834_v16, %v3614_v45 }
 0x256   : > { %v2862_v5 = vpop.f32.mrf.mxu2 }
 0x257   : > { %v2863_v30 = vadd.f32 %v2862_v5, %v2774_v34  ;;  %v2951_v0 = vpop.f32.mrf.mxu3  ;;  %v4828_v34 = vld [vmem:[%s5296_s4 + $0x2c] sm:$0xf] }
 0x258   : > { %v2776_v57 = vpop.f32.mrf.mxu1 }
 0x259   : > { %v2952_v7 = vadd.f32 %v2951_v0, %v2863_v30  ;;  %v2777_v10 = vadd.f32 %v2776_v57, %v5812_v22  ;;  %v3623_v30 = vor.u32 %v4835_v19, %v3622_v12 }
 0x25a   : > { %v3043_v50 = vpop.f32.mrf.mxu0 }
 0x25b   : > { %2815 = vmatmul.bf16.gmra.mxu1 %v4375_v42  ;;  %2904 = vmatmul.bf16.gmra.mxu2 %v4379_v61  ;;  %v6115_v24 = vadd.f32 %v3040_v55, %v2952_v7  ;;  %v3616_v55 = vld [vmem:[%s5296_s4 + $0x5c] sm:$0xf0] }
 0x25c   : > { %2993 = vmatmul.bf16.gmra.mxu3 %v4383_v48  ;;  %v3619_v5 = vor.u32 %v4828_v34, %v3616_v55 }
 0x25d   : > { %3082 = vmatmul.bf16.gmra.mxu0 %v4387_v49 }
 0x25e   : > { %v2865_v52 = vpop.f32.mrf.mxu2 }
 0x25f   : > { %v2866_v54 = vadd.f32 %v2865_v52, %v2777_v10  ;;  %v2954_v60 = vpop.f32.mrf.mxu3  ;;  %v4840_v52 = vld [vmem:[%s5296_s4 + $0x8c] sm:$0xf] }
 0x260   : > { %v2778_v17 = vpop.f32.mrf.mxu1 }
 0x261   : > { %v2955_v63 = vadd.f32 %v2954_v60, %v2866_v54  ;;  %v2779_v22 = vadd.f32 %v2778_v17, %v5821_v58  ;;  %v3660_v54 = vld [vmem:[%s5296_s4 + $0xbc] sm:$0xf0]  ;;  %v3666_v17 = vld [vmem:[%s5296_s4 + $0x90] sm:$0xf] }
 0x262   : > { %v3045_v59 = vpop.f32.mrf.mxu0  ;;  %v3663_v55 = vor.u32 %v4840_v52, %v3660_v54  ;;  %v3726_v52 = vld [vmem:[%s5296_s4 + $0x100] sm:$0xf]  ;;  %v4861_v54 = vld [vmem:[%s5296_s4 + $0x130] sm:$0xf0] }
 0x263   : > { %v6120_v28 = vadd.f32 %v3043_v50, %v2955_v63  ;;  %v4847_v63 = vld [vmem:[%s5296_s4 + $0xc0] sm:$0xf0] }
 0x264   : > { %v3667_v12 = vor.u32 %v4847_v63, %v3666_v17 }
 0x266   : > { %v2867_v21 = vpop.f32.mrf.mxu2 }
 0x267   : > { %v2868_v35 = vadd.f32 %v2867_v21, %v2779_v22  ;;  %v2956_v6 = vpop.f32.mrf.mxu3  ;;  %v4841_v22 = vld [vmem:[%s5296_s4 + $0x94] sm:$0xf] }
 0x268   : > { %v2781_v26 = vpop.f32.mrf.mxu1 }
 0x269   : > { %v2957_v58 = vadd.f32 %v2956_v6, %v2868_v35  ;;  %v2782_v0 = vadd.f32 %v2781_v26, %v5838_v27  ;;  %v3675_v35 = vor.u32 %v4848_v40, %v3674_v3 }
 0x26a   : > { %v3048_v42 = vpop.f32.mrf.mxu0 }
 0x26b   : > { %3096 = vmatmul.bf16.vlgmr.msrb.gmra.mxu1 %v3611_v53  ;;  %3185 = vmatmul.bf16.vlgmr.msrb.gmra.mxu2 %v3615_v25  ;;  %v6129_v61 = vadd.f32 %v3045_v59, %v2957_v58  ;;  %v3668_v59 = vld [vmem:[%s5296_s4 + $0xc4] sm:$0xf0] }
 0x26c   : > { %3274 = vmatmul.bf16.vlgmr.msrb.gmra.mxu3 %v3619_v5  ;;  %v3671_v21 = vor.u32 %v4841_v22, %v3668_v59 }
 0x26d   : > { %3363 = vmatmul.bf16.vlgmr.msrb.gmra.mxu0 %v3623_v30 }
 0x26e   : > { %v2870_v57 = vpop.f32.mrf.mxu2 }
 0x26f   : > { %v2871_v48 = vadd.f32 %v2870_v57, %v2782_v0  ;;  %v2959_v49 = vpop.f32.mrf.mxu3  ;;  %v4853_v57 = vld [vmem:[%s5296_s4 + $0xf4] sm:$0xf] }
 0x270   : > { %v2783_v7 = vpop.f32.mrf.mxu1 }
 0x271   : > { %v2960_v10 = vadd.f32 %v2959_v49, %v2871_v48  ;;  %v2784_v27 = vadd.f32 %v2783_v7, %v5847_v14  ;;  %v3712_v48 = vld [vmem:[%s5296_s4 + $0x124] sm:$0xf0]  ;;  %v3718_v7 = vld [vmem:[%s5296_s4 + $0xf8] sm:$0xf] }
 0x272   : > { %v3050_v50 = vpop.f32.mrf.mxu0  ;;  %v3715_v59 = vor.u32 %v4853_v57, %v3712_v48  ;;  %v3778_v57 = vld [vmem:[%s5296_s4 + $0x168] sm:$0xf]  ;;  %v4874_v48 = vld [vmem:[%s5296_s4 + $0x198] sm:$0xf0] }
 0x273   : > { %v6134_v60 = vadd.f32 %v3048_v42, %v2960_v10  ;;  %v4860_v10 = vld [vmem:[%s5296_s4 + $0x128] sm:$0xf0] }
 0x274   : > { %v3719_v3 = vor.u32 %v4860_v10, %v3718_v7 }
 0x276   : > { %v2872_v45 = vpop.f32.mrf.mxu2 }
 0x277   : > { %v2873_v16 = vadd.f32 %v2872_v45, %v2784_v27  ;;  %v2961_v34 = vpop.f32.mrf.mxu3  ;;  %v4854_v27 = vld [vmem:[%s5296_s4 + $0xfc] sm:$0xf] }
 0x278   : > { %v2786_v19 = vpop.f32.mrf.mxu1 }
 0x279   : > { %v2962_v14 = vadd.f32 %v2961_v34, %v2873_v16  ;;  %v2787_v6 = vadd.f32 %v2786_v19, %v5852_v11  ;;  %v3727_v16 = vor.u32 %v4861_v54, %v3726_v52 }
 0x27a   : > { %v3053_v53 = vpop.f32.mrf.mxu0 }
 0x27b   : > { %3101 = vmatmul.bf16.gmra.mxu1 %v3663_v55  ;;  %3190 = vmatmul.bf16.gmra.mxu2 %v3667_v12  ;;  %v6143_v25 = vadd.f32 %v3050_v50, %v2962_v14  ;;  %v3720_v50 = vld [vmem:[%s5296_s4 + $0x12c] sm:$0xf0] }
 0x27c   : > { %3279 = vmatmul.bf16.gmra.mxu3 %v3671_v21  ;;  %v3723_v45 = vor.u32 %v4854_v27, %v3720_v50 }
 0x27d   : > { %3368 = vmatmul.bf16.gmra.mxu0 %v3675_v35 }
 0x27e   : > { %v2875_v26 = vpop.f32.mrf.mxu2 }
 0x27f   : > { %v2876_v5 = vadd.f32 %v2875_v26, %v2787_v6  ;;  %v2964_v30 = vpop.f32.mrf.mxu3  ;;  %v4866_v26 = vld [vmem:[%s5296_s4 + $0x15c] sm:$0xf] }
 0x280   : > { %v2788_v58 = vpop.f32.mrf.mxu1 }
 0x281   : > { %v2965_v0 = vadd.f32 %v2964_v30, %v2876_v5  ;;  %v2789_v11 = vadd.f32 %v2788_v58, %v5861_v46  ;;  %v3764_v5 = vld [vmem:[%s5296_s4 + $0x18c] sm:$0xf0]  ;;  %v3770_v58 = vld [vmem:[%s5296_s4 + $0x160] sm:$0xf] }
 0x282   : > { %v3055_v42 = vpop.f32.mrf.mxu0  ;;  %v3767_v50 = vor.u32 %v4866_v26, %v3764_v5  ;;  %v3830_v26 = vld [vmem:[%s5296_s4 + $0x1d0] sm:$0xf]  ;;  %v4887_v5 = vld [vmem:[%s5296_s4 + $0x200] sm:$0xf0] }
 0x283   : > { %v6148_v49 = vadd.f32 %v3053_v53, %v2965_v0  ;;  %v4873_v0 = vld [vmem:[%s5296_s4 + $0x190] sm:$0xf0] }
 0x284   : > { %v3771_v52 = vor.u32 %v4873_v0, %v3770_v58 }
 0x286   : > { %v2877_v17 = vpop.f32.mrf.mxu2 }
 0x287   : > { %v2878_v63 = vadd.f32 %v2877_v17, %v2789_v11  ;;  %v2966_v22 = vpop.f32.mrf.mxu3  ;;  %v4867_v11 = vld [vmem:[%s5296_s4 + $0x164] sm:$0xf] }
 0x288   : > { %v2791_v40 = vpop.f32.mrf.mxu1 }
 0x289   : > { %v2967_v46 = vadd.f32 %v2966_v22, %v2878_v63  ;;  %v2792_v34 = vadd.f32 %v2791_v40, %v5878_v39  ;;  %v3779_v63 = vor.u32 %v4874_v48, %v3778_v57 }
 0x28a   : > { %v3058_v55 = vpop.f32.mrf.mxu0 }
 0x28b   : > { %3106 = vmatmul.bf16.gmra.mxu1 %v3715_v59  ;;  %3195 = vmatmul.bf16.gmra.mxu2 %v3719_v3  ;;  %v6157_v12 = vadd.f32 %v3055_v42, %v2967_v46  ;;  %v3772_v42 = vld [vmem:[%s5296_s4 + $0x194] sm:$0xf0] }
 0x28c   : > { %3284 = vmatmul.bf16.gmra.mxu3 %v3723_v45  ;;  %v3775_v17 = vor.u32 %v4867_v11, %v3772_v42 }
 0x28d   : > { %3373 = vmatmul.bf16.gmra.mxu0 %v3727_v16 }
 0x28e   : > { %v2880_v19 = vpop.f32.mrf.mxu2 }
 0x28f   : > { %v2881_v21 = vadd.f32 %v2880_v19, %v2792_v34  ;;  %v2969_v35 = vpop.f32.mrf.mxu3  ;;  %v4879_v19 = vld [vmem:[%s5296_s4 + $0x1c4] sm:$0xf] }
 0x290   : > { %v2793_v14 = vpop.f32.mrf.mxu1 }
 0x291   : > { %v2970_v6 = vadd.f32 %v2969_v35, %v2881_v21  ;;  %v2794_v39 = vadd.f32 %v2793_v14, %v5887_v18  ;;  %v3816_v21 = vld [vmem:[%s5296_s4 + $0x1f4] sm:$0xf0]  ;;  %v3822_v14 = vld [vmem:[%s5296_s4 + $0x1c8] sm:$0xf] }
 0x292   : > { %v3060_v53 = vpop.f32.mrf.mxu0  ;;  %v3819_v42 = vor.u32 %v4879_v19, %v3816_v21  ;;  %v3882_v19 = vld [vmem:[%s5296_s4 + $0x238] sm:$0xf]  ;;  %v4900_v21 = vld [vmem:[%s5296_s4 + $0x268] sm:$0xf0] }
 0x293   : > { %v6162_v30 = vadd.f32 %v3058_v55, %v2970_v6  ;;  %v4886_v6 = vld [vmem:[%s5296_s4 + $0x1f8] sm:$0xf0] }
 0x294   : > { %v3823_v57 = vor.u32 %v4886_v6, %v3822_v14 }
 0x296   : > { %v2882_v7 = vpop.f32.mrf.mxu2 }
 0x297   : > { %v2883_v10 = vadd.f32 %v2882_v7, %v2794_v39  ;;  %v2971_v27 = vpop.f32.mrf.mxu3  ;;  %v4880_v39 = vld [vmem:[%s5296_s4 + $0x1cc] sm:$0xf] }
 0x298   : > { %v2796_v54 = vpop.f32.mrf.mxu1 }
 0x299   : > { %v2972_v18 = vadd.f32 %v2971_v27, %v2883_v10  ;;  %v2797_v22 = vadd.f32 %v2796_v54, %v5892_v51  ;;  %v3831_v10 = vor.u32 %v4887_v5, %v3830_v26 }
 0x29a   : > { %v3063_v59 = vpop.f32.mrf.mxu0 }
 0x29b   : > { %3111 = vmatmul.bf16.gmra.mxu1 %v3767_v50  ;;  %3200 = vmatmul.bf16.gmra.mxu2 %v3771_v52  ;;  %v6171_v3 = vadd.f32 %v3060_v53, %v2972_v18  ;;  %v3824_v53 = vld [vmem:[%s5296_s4 + $0x1fc] sm:$0xf0] }
 0x29c   : > { %3289 = vmatmul.bf16.gmra.mxu3 %v3775_v17  ;;  %v3827_v7 = vor.u32 %v4880_v39, %v3824_v53 }
 0x29d   : > { %3378 = vmatmul.bf16.gmra.mxu0 %v3779_v63 }
 0x29e   : > { %v2885_v40 = vpop.f32.mrf.mxu2 }
 0x29f   : > { %v2886_v45 = vadd.f32 %v2885_v40, %v2797_v22  ;;  %v2974_v16 = vpop.f32.mrf.mxu3  ;;  %v4892_v40 = vld [vmem:[%s5296_s4 + $0x22c] sm:$0xf] }
 0x2a0   : > { %v2798_v46 = vpop.f32.mrf.mxu1 }
 0x2a1   : > { %v2975_v34 = vadd.f32 %v2974_v16, %v2886_v45  ;;  %v2799_v51 = vadd.f32 %v2798_v46, %v5901_v8  ;;  %v3868_v45 = vld [vmem:[%s5296_s4 + $0x25c] sm:$0xf0]  ;;  %v3874_v46 = vld [vmem:[%s5296_s4 + $0x230] sm:$0xf] }
 0x2a2   : > { %v3065_v55 = vpop.f32.mrf.mxu0  ;;  %v3871_v53 = vor.u32 %v4892_v40, %v3868_v45  ;;  %v3934_v40 = vld [vmem:[%s5296_s4 + $0x2a0] sm:$0xf]  ;;  %v4913_v45 = vld [vmem:[%s5296_s4 + $0x2d0] sm:$0xf0] }
 0x2a3   : > { %v6176_v35 = vadd.f32 %v3063_v59, %v2975_v34  ;;  %v4899_v34 = vld [vmem:[%s5296_s4 + $0x260] sm:$0xf0] }
 0x2a4   : > { %v3875_v26 = vor.u32 %v4899_v34, %v3874_v46 }
 0x2a6   : > { %v2887_v58 = vpop.f32.mrf.mxu2 }
 0x2a7   : > { %v2888_v0 = vadd.f32 %v2887_v58, %v2799_v51  ;;  %v2976_v11 = vpop.f32.mrf.mxu3  ;;  %v4893_v51 = vld [vmem:[%s5296_s4 + $0x234] sm:$0xf] }
 0x2a8   : > { %v2801_v48 = vpop.f32.mrf.mxu1 }
 0x2a9   : > { %v2977_v8 = vadd.f32 %v2976_v11, %v2888_v0  ;;  %v2802_v27 = vadd.f32 %v2801_v48, %v5918_v32  ;;  %v3883_v0 = vor.u32 %v4900_v21, %v3882_v19 }
 0x2aa   : > { %v3068_v50 = vpop.f32.mrf.mxu0 }
 0x2ab   : > { %3116 = vmatmul.bf16.gmra.mxu1 %v3819_v42  ;;  %3205 = vmatmul.bf16.gmra.mxu2 %v3823_v57  ;;  %v6185_v52 = vadd.f32 %v3065_v55, %v2977_v8  ;;  %v3876_v55 = vld [vmem:[%s5296_s4 + $0x264] sm:$0xf0] }
 0x2ac   : > { %3294 = vmatmul.bf16.gmra.mxu3 %v3827_v7  ;;  %v3879_v58 = vor.u32 %v4893_v51, %v3876_v55 }
 0x2ad   : > { %3383 = vmatmul.bf16.gmra.mxu0 %v3831_v10 }
 0x2ae   : > { %v2890_v54 = vpop.f32.mrf.mxu2 }
 0x2af   : > { %v2891_v17 = vadd.f32 %v2890_v54, %v2802_v27  ;;  %v2979_v63 = vpop.f32.mrf.mxu3  ;;  %v4905_v54 = vld [vmem:[%s5296_s4 + $0x294] sm:$0xf] }
 0x2b0   : > { %v2803_v18 = vpop.f32.mrf.mxu1 }
 0x2b1   : > { %v2980_v22 = vadd.f32 %v2979_v63, %v2891_v17  ;;  %v2804_v32 = vadd.f32 %v2803_v18, %v5927_v31  ;;  %v3920_v17 = vld [vmem:[%s5296_s4 + $0x2c4] sm:$0xf0]  ;;  %v3926_v18 = vld [vmem:[%s5296_s4 + $0x298] sm:$0xf] }
 0x2b2   : > { %v3070_v59 = vpop.f32.mrf.mxu0  ;;  %v3923_v55 = vor.u32 %v4905_v54, %v3920_v17  ;;  %v3986_v54 = vld [vmem:[%s5296_s4 + $0x308] sm:$0xf]  ;;  %v4926_v17 = vld [vmem:[%s5296_s4 + $0x338] sm:$0xf0] }
 0x2b3   : > { %v6190_v16 = vadd.f32 %v3068_v50, %v2980_v22  ;;  %v4912_v22 = vld [vmem:[%s5296_s4 + $0x2c8] sm:$0xf0] }
 0x2b4   : > { %v3927_v19 = vor.u32 %v4912_v22, %v3926_v18 }
 0x2b6   : > { %v2892_v14 = vpop.f32.mrf.mxu2 }
 0x2b7   : > { %v2893_v6 = vadd.f32 %v2892_v14, %v2804_v32  ;;  %v2981_v39 = vpop.f32.mrf.mxu3  ;;  %v4906_v32 = vld [vmem:[%s5296_s4 + $0x29c] sm:$0xf] }
 0x2b8   : > { %v2806_v5 = vpop.f32.mrf.mxu1 }
 0x2b9   : > { %v2982_v31 = vadd.f32 %v2981_v39, %v2893_v6  ;;  %v2807_v11 = vadd.f32 %v2806_v5, %v5932_v37  ;;  %v3935_v6 = vor.u32 %v4913_v45, %v3934_v40 }
 0x2ba   : > { %v3073_v42 = vpop.f32.mrf.mxu0 }
 0x2bb   : > { %3121 = vmatmul.bf16.gmra.mxu1 %v3871_v53  ;;  %3210 = vmatmul.bf16.gmra.mxu2 %v3875_v26  ;;  %v6199_v57 = vadd.f32 %v3070_v59, %v2982_v31  ;;  %v3928_v59 = vld [vmem:[%s5296_s4 + $0x2cc] sm:$0xf0] }
 0x2bc   : > { %3299 = vmatmul.bf16.gmra.mxu3 %v3879_v58  ;;  %v3931_v14 = vor.u32 %v4906_v32, %v3928_v59 }
 0x2bd   : > { %3388 = vmatmul.bf16.gmra.mxu0 %v3883_v0 }
 0x2be   : > { %v2895_v48 = vpop.f32.mrf.mxu2 }
 0x2bf   : > { %v2896_v7 = vadd.f32 %v2895_v48, %v2807_v11  ;;  %v2984_v10 = vpop.f32.mrf.mxu3  ;;  %v4918_v48 = vld [vmem:[%s5296_s4 + $0x2fc] sm:$0xf] }
 0x2c0   : > { %v2808_v8 = vpop.f32.mrf.mxu1 }
 0x2c1   : > { %v2985_v27 = vadd.f32 %v2984_v10, %v2896_v7  ;;  %v2809_v37 = vadd.f32 %v2808_v8, %v5941_v9  ;;  %v3972_v7 = vld [vmem:[%s5296_s4 + $0x32c] sm:$0xf0]  ;;  %v3978_v8 = vld [vmem:[%s5296_s4 + $0x300] sm:$0xf] }
 0x2c2   : > { %v3075_v50 = vpop.f32.mrf.mxu0  ;;  %v3975_v59 = vor.u32 %v4918_v48, %v3972_v7  ;;  %v4038_v48 = vld [vmem:[%s5296_s4 + $0x370] sm:$0xf]  ;;  %v4939_v7 = vld [vmem:[%s5296_s4 + $0x3a0] sm:$0xf0] }
 0x2c3   : > { %v6204_v63 = vadd.f32 %v3073_v42, %v2985_v27  ;;  %v4925_v27 = vld [vmem:[%s5296_s4 + $0x330] sm:$0xf0] }
 0x2c4   : > { %v3979_v40 = vor.u32 %v4925_v27, %v3978_v8 }
 0x2c6   : > { %v2897_v46 = vpop.f32.mrf.mxu2 }
 0x2c7   : > { %v2898_v34 = vadd.f32 %v2897_v46, %v2809_v37  ;;  %v2986_v51 = vpop.f32.mrf.mxu3  ;;  %v4919_v37 = vld [vmem:[%s5296_s4 + $0x304] sm:$0xf] }
 0x2c8   : > { %v2811_v21 = vpop.f32.mrf.mxu1 }
 0x2c9   : > { %v2987_v9 = vadd.f32 %v2986_v51, %v2898_v34  ;;  %v2812_v39 = vadd.f32 %v2811_v21, %v5958_v41  ;;  %v3987_v34 = vor.u32 %v4926_v17, %v3986_v54 }
 0x2ca   : > { %v3078_v53 = vpop.f32.mrf.mxu0 }
 0x2cb   : > { %3126 = vmatmul.bf16.gmra.mxu1 %v3923_v55  ;;  %3215 = vmatmul.bf16.gmra.mxu2 %v3927_v19  ;;  %v6213_v26 = vadd.f32 %v3075_v50, %v2987_v9  ;;  %v3980_v50 = vld [vmem:[%s5296_s4 + $0x334] sm:$0xf0] }
 0x2cc   : > { %3304 = vmatmul.bf16.gmra.mxu3 %v3931_v14  ;;  %v3983_v46 = vor.u32 %v4919_v37, %v3980_v50 }
 0x2cd   : > { %3393 = vmatmul.bf16.gmra.mxu0 %v3935_v6 }
 0x2ce   : > { %v2900_v5 = vpop.f32.mrf.mxu2 }
 0x2cf   : > { %v2901_v58 = vadd.f32 %v2900_v5, %v2812_v39  ;;  %v2989_v0 = vpop.f32.mrf.mxu3  ;;  %v4931_v5 = vld [vmem:[%s5296_s4 + $0x364] sm:$0xf] }
 0x2d0   : > { %v2813_v31 = vpop.f32.mrf.mxu1 }
 0x2d1   : > { %v2990_v11 = vadd.f32 %v2989_v0, %v2901_v58  ;;  %v2814_v41 = vadd.f32 %v2813_v31, %v5967_v23  ;;  %v4024_v58 = vld [vmem:[%s5296_s4 + $0x394] sm:$0xf0]  ;;  %v4030_v31 = vld [vmem:[%s5296_s4 + $0x368] sm:$0xf] }
 0x2d2   : > { %v3080_v42 = vpop.f32.mrf.mxu0  ;;  %v4027_v50 = vor.u32 %v4931_v5, %v4024_v58  ;;  %v4084_v5 = vld [vmem:[%s5296_s4 + $0x404] sm:$0xf0]  ;;  %v4952_v58 = vld [vmem:[%s5296_s4 + $0x408] sm:$0xf0] }
 0x2d3   : > { %v6218_v10 = vadd.f32 %v3078_v53, %v2990_v11  ;;  %v4938_v11 = vld [vmem:[%s5296_s4 + $0x398] sm:$0xf0] }
 0x2d4   : > { %v4031_v54 = vor.u32 %v4938_v11, %v4030_v31 }
 0x2d6   : > { %v2902_v18 = vpop.f32.mrf.mxu2 }
 0x2d7   : > { %v2903_v22 = vadd.f32 %v2902_v18, %v2814_v41  ;;  %v2991_v32 = vpop.f32.mrf.mxu3  ;;  %v4932_v41 = vld [vmem:[%s5296_s4 + $0x36c] sm:$0xf] }
 0x2d8   : > { %v2816_v45 = vpop.f32.mrf.mxu1 }
 0x2d9   : > { %v2992_v23 = vadd.f32 %v2991_v32, %v2903_v22  ;;  %v2817_v51 = vadd.f32 %v2816_v45, %v5972_v15  ;;  %v4039_v22 = vor.u32 %v4939_v7, %v4038_v48 }
 0x2da   : > { %v3083_v55 = vpop.f32.mrf.mxu0 }
 0x2db   : > { %3131 = vmatmul.bf16.gmra.mxu1 %v3975_v59  ;;  %3220 = vmatmul.bf16.gmra.mxu2 %v3979_v40  ;;  %v6227_v19 = vadd.f32 %v3080_v42, %v2992_v23  ;;  %v4032_v42 = vld [vmem:[%s5296_s4 + $0x39c] sm:$0xf0] }
 0x2dc   : > { %3309 = vmatmul.bf16.gmra.mxu3 %v3983_v46  ;;  %v4035_v18 = vor.u32 %v4932_v41, %v4032_v42 }
 0x2dd   : > { %3398 = vmatmul.bf16.gmra.mxu0 %v3987_v34 }
 0x2de   : > { %v2905_v21 = vpop.f32.mrf.mxu2 }
 0x2df   : > { %v2906_v14 = vadd.f32 %v2905_v21, %v2817_v51  ;;  %v2994_v6 = vpop.f32.mrf.mxu3 }
 0x2e0   : > { %v2818_v9 = vpop.f32.mrf.mxu1 }
 0x2e1   : > { %v2995_v39 = vadd.f32 %v2994_v6, %v2906_v14  ;;  %v2819_v15 = vadd.f32 %v2818_v9, %v5981_v1  ;;  %v4944_v14 = vld [vmem:[%s5296_s4 + $0x3cc] sm:$0xf]  ;;  %v4076_v6 = vld [vmem:[%s5296_s4 + $0x3fc] sm:$0xf0]  ;;  %v4082_v9 = vld [vmem:[%s5296_s4 + $0x3d0] sm:$0xf] }
 0x2e2   : > { %v3085_v53 = vpop.f32.mrf.mxu0  ;;  %v4079_v42 = vor.u32 %v4944_v14, %v4076_v6  ;;  %v4958_v14 = vld [vmem:[%s5296_s4 + $0x43c] sm:$0xf]  ;;  %v4136_v6 = vld [vmem:[%s5296_s4 + $0x46c] sm:$0xf0] }
 0x2e3   : > { %v6232_v0 = vadd.f32 %v3083_v55, %v2995_v39  ;;  %v4951_v39 = vld [vmem:[%s5296_s4 + $0x400] sm:$0xf0] }
 0x2e4   : > { %v4083_v48 = vor.u32 %v4951_v39, %v4082_v9  ;;  %v4142_v9 = vld [vmem:[%s5296_s4 + $0x440] sm:$0xf]  ;;  %v4965_v39 = vld [vmem:[%s5296_s4 + $0x470] sm:$0xf0] }
 0x2e6   : > { %v2907_v8 = vpop.f32.mrf.mxu2 }
 0x2e7   : > { %v2908_v27 = vadd.f32 %v2907_v8, %v2819_v15  ;;  %v2996_v37 = vpop.f32.mrf.mxu3  ;;  %v4945_v15 = vld [vmem:[%s5296_s4 + $0x3d4] sm:$0xf] }
 0x2e8   : > { %v3097_v17 = vpop.f32.mrf.mxu1  ;;  %v4087_v8 = vor.u32 %v4945_v15, %v4084_v5 }
 0x2e9   : > { %v2997_v1 = vadd.f32 %v2996_v37, %v2908_v27  ;;  %v3098_v40 = vadd.f32 %v3097_v17, %v5998_v36  ;;  %v4090_v36 = vld [vmem:[%s5296_s4 + $0x3d8] sm:$0xf] }
 0x2ea   : > { %v3364_v32 = vpop.f32.mrf.mxu0  ;;  %v4091_v27 = vor.u32 %v4952_v58, %v4090_v36 }
 0x2eb   : > { %3136 = vmatmul.bf16.gmra.mxu1 %v4027_v50  ;;  %3225 = vmatmul.bf16.gmra.mxu2 %v4031_v54  ;;  %v6240_v59 = vadd.f32 %v3085_v53, %v2997_v1 }
 0x2ec   : > { %3314 = vmatmul.bf16.gmra.mxu3 %v4035_v18 }
 0x2ed   : > { %3403 = vmatmul.bf16.gmra.mxu0 %v4039_v22 }
 0x2ee   : > { %v3186_v45 = vpop.f32.mrf.mxu2 }
 0x2ef   : > { %v3187_v46 = vadd.f32 %v3186_v45, %v3098_v40  ;;  %v3275_v34 = vpop.f32.mrf.mxu3 }
 0x2f0   : > { %v3099_v23 = vpop.f32.mrf.mxu1 }
 0x2f1   : > { %v3276_v51 = vadd.f32 %v3275_v34, %v3187_v46  ;;  %v3100_v53 = vadd.f32 %v3099_v23, %v6007_v43  ;;  %v4957_v23 = vld [vmem:[%s5296_s4 + $0x434] sm:$0xf] }
 0x2f2   : > { %v3366_v55 = vpop.f32.mrf.mxu0 }
 0x2f3   : > { %v3365_v21 = vadd.f32 %v3364_v32, %v3276_v51  ;;  %v4128_v51 = vld [vmem:[%s5296_s4 + $0x464] sm:$0xf0] }
 0x2f4   : > { %v4131_v36 = vor.u32 %v4957_v23, %v4128_v51  ;;  %v4194_v23 = vld [vmem:[%s5296_s4 + $0x4a8] sm:$0xf]  ;;  %v4978_v51 = vld [vmem:[%s5296_s4 + $0x4d8] sm:$0xf0] }
 0x2f5   : > { %5169 = vtanh.f32 %v3365_v21  ;;  %v4964_v21 = vld [vmem:[%s5296_s4 + $0x468] sm:$0xf0] }
 0x2f6   : > { %v3188_v31 = vpop.f32.mrf.mxu2 }
 0x2f7   : > { %v3189_v11 = vadd.f32 %v3188_v31, %v3100_v53  ;;  %v3277_v41 = vpop.f32.mrf.mxu3 }
 0x2f8   : > { %v3102_v7 = vpop.f32.mrf.mxu1 }
 0x2f9   : > { %v3278_v43 = vadd.f32 %v3277_v41, %v3189_v11  ;;  %v3103_v17 = vadd.f32 %v3102_v7, %v6012_v44  ;;  %v4139_v11 = vor.u32 %v4958_v14, %v4136_v6  ;;  %v4143_v41 = vor.u32 %v4965_v39, %v4142_v9 }
 0x2fa   : > { %v3369_v37 = vpop.f32.mrf.mxu0 }
 0x2fb   : > { %v5170_v50 = vpop.eup %5169  ;;  %v3367_v54 = vadd.f32 %v3366_v55, %v3278_v43  ;;  %3141 = vmatmul.bf16.gmra.mxu1 %v4079_v42  ;;  %3230 = vmatmul.bf16.gmra.mxu2 %v4083_v48  ;;  %v4134_v55 = vld [vmem:[%s5296_s4 + $0x438] sm:$0xf] }
 0x2fc   : > { %3477 = vst.msk [vmem:[%s6256_s14] sm:$0xff] %vm3476_vm0, %v5170_v50  ;;  %3319 = vmatmul.bf16.gmra.mxu3 %v4087_v8  ;;  %v4135_v58 = vor.u32 %v4964_v21, %v4134_v55 }
 0x2fd   : > { %3408 = vmatmul.bf16.gmra.mxu0 %v4091_v27  ;;  %5171 = vtanh.f32 %v3367_v54 }
 0x2fe   : > { %v3191_v18 = vpop.f32.mrf.mxu2 }
 0x2ff   : > { %v3192_v22 = vadd.f32 %v3191_v18, %v3103_v17  ;;  %v3280_v1 = vpop.f32.mrf.mxu3 }
 0x300   : > { %v3104_v32 = vpop.f32.mrf.mxu1 }
 0x301   : > { %v3281_v40 = vadd.f32 %v3280_v1, %v3192_v22  ;;  %v3105_v44 = vadd.f32 %v3104_v32, %v6021_v33  ;;  %v4970_v1 = vld [vmem:[%s5296_s4 + $0x49c] sm:$0xf]  ;;  %v4180_v32 = vld [vmem:[%s5296_s4 + $0x4cc] sm:$0xf0] }
 0x302   : > { %v3371_v45 = vpop.f32.mrf.mxu0 }
 0x303   : > { %v5172_v46 = vpop.eup %5171  ;;  %v3370_v34 = vadd.f32 %v3369_v37, %v3281_v40  ;;  %v4186_v40 = vld [vmem:[%s5296_s4 + $0x4a0] sm:$0xf] }
 0x304   : > { %3478 = vst.msk [vmem:[%s6256_s14 + $0x8] sm:$0xff] %vm3476_vm0, %v5172_v46  ;;  %v4971_v46 = vld [vmem:[%s5296_s4 + $0x4a4] sm:$0xf] }
 0x305   : > { %5173 = vtanh.f32 %v3370_v34  ;;  %v4188_v34 = vld [vmem:[%s5296_s4 + $0x4d4] sm:$0xf0] }
 0x306   : > { %v3193_v15 = vpop.f32.mrf.mxu2  ;;  %v4191_v39 = vor.u32 %v4971_v46, %v4188_v34 }
 0x307   : > { %v3194_v53 = vadd.f32 %v3193_v15, %v3105_v44  ;;  %v3282_v5 = vpop.f32.mrf.mxu3  ;;  %v4183_v44 = vor.u32 %v4970_v1, %v4180_v32  ;;  %v4195_v15 = vor.u32 %v4978_v51, %v4194_v23 }
 0x308   : > { %v3107_v31 = vpop.f32.mrf.mxu1 }
 0x309   : > { %v3283_v42 = vadd.f32 %v3282_v5, %v3194_v53  ;;  %v3108_v33 = vadd.f32 %v3107_v31, %v6038_v13 }
 0x30a   : > { %v3374_v48 = vpop.f32.mrf.mxu0 }
 0x30b   : > { %v5174_v7 = vpop.eup %5173  ;;  %v3372_v8 = vadd.f32 %v3371_v45, %v3283_v42  ;;  %3146 = vmatmul.bf16.gmra.mxu1 %v4131_v36  ;;  %3235 = vmatmul.bf16.gmra.mxu2 %v4135_v58  ;;  %v4977_v45 = vld [vmem:[%s5296_s4 + $0x4d0] sm:$0xf0] }
 0x30c   : > { %3479 = vst.msk [vmem:[%s6256_s14 + $0x10] sm:$0xff] %vm3476_vm0, %v5174_v7  ;;  %3324 = vmatmul.bf16.gmra.mxu3 %v4139_v11  ;;  %v4187_v6 = vor.u32 %v4977_v45, %v4186_v40 }
 0x30d   : > { %3413 = vmatmul.bf16.gmra.mxu0 %v4143_v41  ;;  %5175 = vtanh.f32 %v3372_v8 }
 0x30e   : > { %v3196_v27 = vpop.f32.mrf.mxu2 }
 0x30f   : > { %v3197_v43 = vadd.f32 %v3196_v27, %v3108_v33  ;;  %v3285_v37 = vpop.f32.mrf.mxu3  ;;  %v4983_v27 = vld [vmem:[%s5296_s4 + $0x504] sm:$0xf] }
 0x310   : > { %v3109_v50 = vpop.f32.mrf.mxu1 }
 0x311   : > { %v3286_v54 = vadd.f32 %v3285_v37, %v3197_v43  ;;  %v3110_v13 = vadd.f32 %v3109_v50, %v6047_v47  ;;  %v4232_v43 = vld [vmem:[%s5296_s4 + $0x534] sm:$0xf0]  ;;  %v4238_v37 = vld [vmem:[%s5296_s4 + $0x508] sm:$0xf]  ;;  %v4990_v50 = vld [vmem:[%s5296_s4 + $0x538] sm:$0xf0] }
 0x312   : > { %v3376_v17 = vpop.f32.mrf.mxu0  ;;  %v4235_v45 = vor.u32 %v4983_v27, %v4232_v43  ;;  %v4239_v46 = vor.u32 %v4990_v50, %v4238_v37 }
 0x313   : > { %v5176_v18 = vpop.eup %5175  ;;  %v3375_v22 = vadd.f32 %v3374_v48, %v3286_v54  ;;  %v4984_v54 = vld [vmem:[%s5296_s4 + $0x50c] sm:$0xf] }
 0x314   : > { %3480 = vst.msk [vmem:[%s6256_s14 + $0x18] sm:$0xff] %vm3476_vm0, %v5176_v18  ;;  %v4246_v18 = vld [vmem:[%s5296_s4 + $0x510] sm:$0xf] }
 0x315   : > { %5177 = vtanh.f32 %v3375_v22  ;;  %v4991_v22 = vld [vmem:[%s5296_s4 + $0x540] sm:$0xf0] }
 0x316   : > { %v3198_v55 = vpop.f32.mrf.mxu2  ;;  %v4247_v23 = vor.u32 %v4991_v22, %v4246_v18 }
 0x317   : > { %v3199_v21 = vadd.f32 %v3198_v55, %v3110_v13  ;;  %v3287_v14 = vpop.f32.mrf.mxu3 }
 0x318   : > { %v3112_v9 = vpop.f32.mrf.mxu1 }
 0x319   : > { %v3288_v53 = vadd.f32 %v3287_v14, %v3199_v21  ;;  %v3113_v47 = vadd.f32 %v3112_v9, %v6052_v38 }
 0x31a   : > { %v3379_v5 = vpop.f32.mrf.mxu0 }
 0x31b   : > { %v5178_v36 = vpop.eup %5177  ;;  %v3377_v58 = vadd.f32 %v3376_v17, %v3288_v53  ;;  %3151 = vmatmul.bf16.gmra.mxu1 %v4183_v44  ;;  %3240 = vmatmul.bf16.gmra.mxu2 %v4187_v6  ;;  %v4240_v17 = vld [vmem:[%s5296_s4 + $0x53c] sm:$0xf0] }
 0x31c   : > { %3481 = vst.msk [vmem:[%s6256_s14 + $0x20] sm:$0xff] %vm3476_vm0, %v5178_v36  ;;  %3329 = vmatmul.bf16.gmra.mxu3 %v4191_v39  ;;  %v4243_v34 = vor.u32 %v4984_v54, %v4240_v17 }
 0x31d   : > { %3418 = vmatmul.bf16.gmra.mxu0 %v4195_v15  ;;  %5179 = vtanh.f32 %v3377_v58  ;;  %v4996_v58 = vld [vmem:[%s5296_s4 + $0x56c] sm:$0xf] }
 0x31e   : > { %v3201_v31 = vpop.f32.mrf.mxu2 }
 0x31f   : > { %v3202_v11 = vadd.f32 %v3201_v31, %v3113_v47  ;;  %v3290_v41 = vpop.f32.mrf.mxu3  ;;  %v4284_v47 = vld [vmem:[%s5296_s4 + $0x59c] sm:$0xf0]  ;;  %v4290_v31 = vld [vmem:[%s5296_s4 + $0x570] sm:$0xf] }
 0x320   : > { %v3114_v42 = vpop.f32.mrf.mxu1  ;;  %v4287_v43 = vor.u32 %v4996_v58, %v4284_v47 }
 0x321   : > { %v3291_v48 = vadd.f32 %v3290_v41, %v3202_v11  ;;  %v3115_v38 = vadd.f32 %v3114_v42, %v6061_v20  ;;  %v5003_v11 = vld [vmem:[%s5296_s4 + $0x5a0] sm:$0xf0]  ;;  %v4997_v41 = vld [vmem:[%s5296_s4 + $0x574] sm:$0xf]  ;;  %v4292_v42 = vld [vmem:[%s5296_s4 + $0x5a4] sm:$0xf0] }
 0x322   : > { %v3381_v7 = vpop.f32.mrf.mxu0  ;;  %v4291_v37 = vor.u32 %v5003_v11, %v4290_v31  ;;  %v4295_v54 = vor.u32 %v4997_v41, %v4292_v42 }
 0x323   : > { %v5180_v8 = vpop.eup %5179  ;;  %v3380_v33 = vadd.f32 %v3379_v5, %v3291_v48  ;;  %v4298_v48 = vld [vmem:[%s5296_s4 + $0x578] sm:$0xf] }
 0x324   : > { %3482 = vst.msk [vmem:[%s6256_s14 + $0x28] sm:$0xff] %vm3476_vm0, %v5180_v8 }
 0x325   : > { %5181 = vtanh.f32 %v3380_v33 }
 0x326   : > { %v3203_v1 = vpop.f32.mrf.mxu2 }
 0x327   : > { %v3204_v32 = vadd.f32 %v3203_v1, %v3115_v38  ;;  %v3292_v40 = vpop.f32.mrf.mxu3 }
 0x328   : > { %v3117_v13 = vpop.f32.mrf.mxu1 }
 0x329   : > { %v3293_v51 = vadd.f32 %v3292_v40, %v3204_v32  ;;  %v3118_v20 = vadd.f32 %v3117_v13, %v6078_v2 }
 0x32a   : > { %v3384_v55 = vpop.f32.mrf.mxu0 }
 0x32b   : > { %v5182_v21 = vpop.eup %5181  ;;  %v3382_v14 = vadd.f32 %v3381_v7, %v3293_v51  ;;  %3156 = vmatmul.bf16.gmra.mxu1 %v4235_v45  ;;  %3245 = vmatmul.bf16.gmra.mxu2 %v4239_v46  ;;  %v5004_v7 = vld [vmem:[%s5296_s4 + $0x5a8] sm:$0xf0] }
 0x32c   : > { %3483 = vst.msk [vmem:[%s6256_s14 + $0x30] sm:$0xff] %vm3476_vm0, %v5182_v21  ;;  %3334 = vmatmul.bf16.gmra.mxu3 %v4243_v34  ;;  %v4299_v38 = vor.u32 %v5004_v7, %v4298_v48  ;;  %v4336_v21 = vld [vmem:[%s5296_s4 + $0x604] sm:$0xf0] }
 0x32d   : > { %3423 = vmatmul.bf16.gmra.mxu0 %v4247_v23  ;;  %5183 = vtanh.f32 %v3382_v14  ;;  %v4342_v14 = vld [vmem:[%s5296_s4 + $0x5d8] sm:$0xf] }
 0x32e   : > { %v3206_v44 = vpop.f32.mrf.mxu2 }
 0x32f   : > { %v3207_v6 = vadd.f32 %v3206_v44, %v3118_v20  ;;  %v3295_v9 = vpop.f32.mrf.mxu3  ;;  %v5016_v20 = vld [vmem:[%s5296_s4 + $0x608] sm:$0xf0]  ;;  %v5010_v44 = vld [vmem:[%s5296_s4 + $0x5dc] sm:$0xf] }
 0x330   : > { %v3119_v39 = vpop.f32.mrf.mxu1  ;;  %v4343_v58 = vor.u32 %v5016_v20, %v4342_v14 }
 0x331   : > { %v3296_v15 = vadd.f32 %v3295_v9, %v3207_v6  ;;  %v3120_v2 = vadd.f32 %v3119_v39, %v6087_v29  ;;  %v4344_v6 = vld [vmem:[%s5296_s4 + $0x60c] sm:$0xf0]  ;;  %v4350_v9 = vld [vmem:[%s5296_s4 + $0x5e0] sm:$0xf]  ;;  %v5017_v39 = vld [vmem:[%s5296_s4 + $0x610] sm:$0xf0] }
 0x332   : > { %v3386_v53 = vpop.f32.mrf.mxu0  ;;  %v4347_v31 = vor.u32 %v5010_v44, %v4344_v6  ;;  %v4351_v11 = vor.u32 %v5017_v39, %v4350_v9 }
 0x333   : > { %v5184_v5 = vpop.eup %5183  ;;  %v3385_v36 = vadd.f32 %v3384_v55, %v3296_v15  ;;  %v5009_v55 = vld [vmem:[%s5296_s4 + $0x5d4] sm:$0xf] }
 0x334   : > { %3484 = vst.msk [vmem:[%s6256_s14 + $0x38] sm:$0xff] %vm3476_vm0, %v5184_v5 }
 0x335   : > { %5185 = vtanh.f32 %v3385_v36  ;;  %v4339_v36 = vor.u32 %v5009_v55, %v4336_v21 }
 0x336   : > { %v3208_v8 = vpop.f32.mrf.mxu2 }
 0x337   : > { %v3209_v33 = vadd.f32 %v3208_v8, %v3120_v2  ;;  %v3297_v27 = vpop.f32.mrf.mxu3 }
 0x338   : > { %v3122_v50 = vpop.f32.mrf.mxu1 }
 0x339   : > { %v3298_v17 = vadd.f32 %v3297_v27, %v3209_v33  ;;  %v3123_v29 = vadd.f32 %v3122_v50, %v6092_v56 }
 0x33a   : > { %v3389_v18 = vpop.f32.mrf.mxu0 }
 0x33b   : > { %v5186_v22 = vpop.eup %5185  ;;  %v3387_v1 = vadd.f32 %v3386_v53, %v3298_v17  ;;  %3161 = vmatmul.bf16.gmra.mxu1 %v4287_v43  ;;  %3250 = vmatmul.bf16.gmra.mxu2 %v4291_v37  ;;  %v4388_v17 = vld [vmem:[%s5296_s4 + $0x66c] sm:$0xf0] }
 0x33c   : > { %3485 = vst.msk [vmem:[%s6256_s14 + $0x40] sm:$0xff] %vm3476_vm0, %v5186_v22  ;;  %3339 = vmatmul.bf16.gmra.mxu3 %v4295_v54  ;;  %v5029_v22 = vld [vmem:[%s5296_s4 + $0x670] sm:$0xf0] }
 0x33d   : > { %3428 = vmatmul.bf16.gmra.mxu0 %v4299_v38  ;;  %5187 = vtanh.f32 %v3387_v1  ;;  %v5022_v38 = vld [vmem:[%s5296_s4 + $0x63c] sm:$0xf]  ;;  %v5023_v1 = vld [vmem:[%s5296_s4 + $0x644] sm:$0xf] }
 0x33e   : > { %v3211_v32 = vpop.f32.mrf.mxu2 }
 0x33f   : > { %v3212_v40 = vadd.f32 %v3211_v32, %v3123_v29  ;;  %v3300_v45 = vpop.f32.mrf.mxu3  ;;  %v4396_v29 = vld [vmem:[%s5296_s4 + $0x674] sm:$0xf0]  ;;  %v4402_v32 = vld [vmem:[%s5296_s4 + $0x648] sm:$0xf] }
 0x340   : > { %v3124_v46 = vpop.f32.mrf.mxu1  ;;  %v4399_v55 = vor.u32 %v5023_v1, %v4396_v29 }
 0x341   : > { %v3301_v13 = vadd.f32 %v3300_v45, %v3212_v40  ;;  %v3125_v56 = vadd.f32 %v3124_v46, %v6101_v62  ;;  %v5030_v40 = vld [vmem:[%s5296_s4 + $0x678] sm:$0xf0] }
 0x342   : > { %v3391_v34 = vpop.f32.mrf.mxu0  ;;  %v4403_v21 = vor.u32 %v5030_v40, %v4402_v32 }
 0x343   : > { %v5188_v23 = vpop.eup %5187  ;;  %v3390_v51 = vadd.f32 %v3389_v18, %v3301_v13  ;;  %v4394_v18 = vld [vmem:[%s5296_s4 + $0x640] sm:$0xf] }
 0x344   : > { %3486 = vst.msk [vmem:[%s6256_s14 + $0x48] sm:$0xff] %vm3476_vm0, %v5188_v23  ;;  %v4395_v23 = vor.u32 %v5029_v22, %v4394_v18 }
 0x345   : > { %5189 = vtanh.f32 %v3390_v51 }
 0x346   : > { %v3213_v15 = vpop.f32.mrf.mxu2 }
 0x347   : > { %v3214_v53 = vadd.f32 %v3213_v15, %v3125_v56  ;;  %v3302_v5 = vpop.f32.mrf.mxu3 }
 0x348   : > { %v3127_v47 = vpop.f32.mrf.mxu1 }
 0x349   : > { %v3303_v41 = vadd.f32 %v3302_v5, %v3214_v53  ;;  %v3128_v62 = vadd.f32 %v3127_v47, %v6106_v4 }
 0x34a   : > { %v3394_v2 = vpop.f32.mrf.mxu0 }
 0x34b   : > { %v5190_v42 = vpop.eup %5189  ;;  %v3392_v48 = vadd.f32 %v3391_v34, %v3303_v41  ;;  %3166 = vmatmul.bf16.gmra.mxu1 %v4339_v36  ;;  %3255 = vmatmul.bf16.gmra.mxu2 %v4343_v58  ;;  %v4391_v34 = vor.u32 %v5022_v38, %v4388_v17 }
 0x34c   : > { %3487 = vst.msk [vmem:[%s6256_s14 + $0x50] sm:$0xff] %vm3476_vm0, %v5190_v42  ;;  %3344 = vmatmul.bf16.gmra.mxu3 %v4347_v31 }
 0x34d   : > { %3433 = vmatmul.bf16.gmra.mxu0 %v4351_v11  ;;  %5191 = vtanh.f32 %v3392_v48 }
 0x34e   : > { %v3216_v7 = vpop.f32.mrf.mxu2 }
 0x34f   : > { %v3217_v8 = vadd.f32 %v3216_v7, %v3128_v62  ;;  %v3305_v33 = vpop.f32.mrf.mxu3 }
 0x350   : > { %v3129_v27 = vpop.f32.mrf.mxu1 }
 0x351   : > { %v3306_v43 = vadd.f32 %v3305_v33, %v3217_v8  ;;  %v3130_v4 = vadd.f32 %v3129_v27, %v6115_v24 }
 0x352   : > { %v3396_v37 = vpop.f32.mrf.mxu0 }
 0x353   : > { %v5192_v50 = vpop.eup %5191  ;;  %v3395_v54 = vadd.f32 %v3394_v2, %v3306_v43 }
 0x354   : > { %3488 = vst.msk [vmem:[%s6256_s14 + $0x58] sm:$0xff] %vm3476_vm0, %v5192_v50 }
 0x355   : > { %5193 = vtanh.f32 %v3395_v54 }
 0x356   : > { %v3218_v45 = vpop.f32.mrf.mxu2 }
 0x357   : > { %v3219_v46 = vadd.f32 %v3218_v45, %v3130_v4  ;;  %v3307_v13 = vpop.f32.mrf.mxu3 }
 0x358   : > { %v3132_v51 = vpop.f32.mrf.mxu1 }
 0x359   : > { %v3308_v14 = vadd.f32 %v3307_v13, %v3219_v46  ;;  %v3133_v24 = vadd.f32 %v3132_v51, %v6120_v28 }
 0x35a   : > { %v3399_v20 = vpop.f32.mrf.mxu0 }
 0x35b   : > { %v5194_v44 = vpop.eup %5193  ;;  %v3397_v56 = vadd.f32 %v3396_v37, %v3308_v14  ;;  %3171 = vmatmul.bf16.gmra.mxu1 %v4391_v34  ;;  %3260 = vmatmul.bf16.gmra.mxu2 %v4395_v23 }
 0x35c   : > { %3489 = vst.msk [vmem:[%s6256_s14 + $0x60] sm:$0xff] %vm3476_vm0, %v5194_v44  ;;  %3349 = vmatmul.bf16.gmra.mxu3 %v4399_v55 }
 0x35d   : > { %3438 = vmatmul.bf16.gmra.mxu0 %v4403_v21  ;;  %5195 = vtanh.f32 %v3397_v56 }
 0x35e   : > { %v3221_v6 = vpop.f32.mrf.mxu2 }
 0x35f   : > { %v3222_v9 = vadd.f32 %v3221_v6, %v3133_v24  ;;  %v3310_v39 = vpop.f32.mrf.mxu3 }
 0x360   : > { %v3134_v15 = vpop.f32.mrf.mxu1 }
 0x361   : > { %v3311_v53 = vadd.f32 %v3310_v39, %v3222_v9  ;;  %v3135_v47 = vadd.f32 %v3134_v15, %v6129_v61 }
 0x362   : > { %v3401_v5 = vpop.f32.mrf.mxu0 }
 0x363   : > { %v5196_v36 = vpop.eup %5195  ;;  %v3400_v58 = vadd.f32 %v3399_v20, %v3311_v53 }
 0x364   : > { %3490 = vst.msk [vmem:[%s6256_s14 + $0x68] sm:$0xff] %vm3476_vm0, %v5196_v36 }
 0x365   : > { %5197 = vtanh.f32 %v3400_v58 }
 0x366   : > { %v3223_v31 = vpop.f32.mrf.mxu2 }
 0x367   : > { %v3224_v11 = vadd.f32 %v3223_v31, %v3135_v47  ;;  %v3312_v41 = vpop.f32.mrf.mxu3 }
 0x368   : > { %v3137_v2 = vpop.f32.mrf.mxu1 }
 0x369   : > { %v3313_v28 = vadd.f32 %v3312_v41, %v3224_v11  ;;  %v3138_v7 = vadd.f32 %v3137_v2, %v6134_v60 }
 0x36a   : > { %v3404_v42 = vpop.f32.mrf.mxu0 }
 0x36b   : > { %v5198_v48 = vpop.eup %5197  ;;  %v3402_v62 = vadd.f32 %v3401_v5, %v3313_v28 }
 0x36c   : > { %3491 = vst.msk [vmem:[%s6256_s14 + $0x70] sm:$0xff] %vm3476_vm0, %v5198_v48 }
 0x36d   : > { %5199 = vtanh.f32 %v3402_v62 }
 0x36e   : > { %v3226_v8 = vpop.f32.mrf.mxu2 }
 0x36f   : > { %v3227_v33 = vadd.f32 %v3226_v8, %v3138_v7  ;;  %v3315_v27 = vpop.f32.mrf.mxu3 }
 0x370   : > { %v3139_v43 = vpop.f32.mrf.mxu1 }
 0x371   : > { %v3316_v61 = vadd.f32 %v3315_v27, %v3227_v33  ;;  %v3140_v38 = vadd.f32 %v3139_v43, %v6143_v25 }
 0x372   : > { %v3406_v37 = vpop.f32.mrf.mxu0 }
 0x373   : > { %v5200_v50 = vpop.eup %5199  ;;  %v3405_v54 = vadd.f32 %v3404_v42, %v3316_v61 }
 0x374   : > { %3492 = vst.msk [vmem:[%s6256_s14 + $0x78] sm:$0xff] %vm3476_vm0, %v5200_v50 }
 0x375   : > { %5201 = vtanh.f32 %v3405_v54 }
 0x376   : > { %v3228_v17 = vpop.f32.mrf.mxu2 }
 0x377   : > { %v3229_v18 = vadd.f32 %v3228_v17, %v3140_v38  ;;  %v3317_v22 = vpop.f32.mrf.mxu3 }
 0x378   : > { %v3142_v1 = vpop.f32.mrf.mxu1 }
 0x379   : > { %v3318_v60 = vadd.f32 %v3317_v22, %v3229_v18  ;;  %v3143_v40 = vadd.f32 %v3142_v1, %v6148_v49 }
 0x37a   : > { %v3409_v4 = vpop.f32.mrf.mxu0 }
 0x37b   : > { %v5202_v29 = vpop.eup %5201  ;;  %v3407_v32 = vadd.f32 %v3406_v37, %v3318_v60 }
 0x37c   : > { %3493 = vst.msk [vmem:[%s6256_s14 + $0x80] sm:$0xff] %vm3476_vm0, %v5202_v29 }
 0x37d   : > { %5203 = vtanh.f32 %v3407_v32 }
 0x37e   : > { %v3231_v45 = vpop.f32.mrf.mxu2 }
 0x37f   : > { %v3232_v46 = vadd.f32 %v3231_v45, %v3143_v40  ;;  %v3320_v13 = vpop.f32.mrf.mxu3 }
 0x380   : > { %v3144_v34 = vpop.f32.mrf.mxu1 }
 0x381   : > { %v3321_v25 = vadd.f32 %v3320_v13, %v3232_v46  ;;  %v3145_v21 = vadd.f32 %v3144_v34, %v6157_v12 }
 0x382   : > { %v3411_v23 = vpop.f32.mrf.mxu0 }
 0x383   : > { %v5204_v51 = vpop.eup %5203  ;;  %v3410_v55 = vadd.f32 %v3409_v4, %v3321_v25 }
 0x384   : > { %3494 = vst.msk [vmem:[%s6256_s14 + $0x88] sm:$0xff] %vm3476_vm0, %v5204_v51 }
 0x385   : > { %5205 = vtanh.f32 %v3410_v55 }
 0x386   : > { %v3233_v14 = vpop.f32.mrf.mxu2 }
 0x387   : > { %v3234_v20 = vadd.f32 %v3233_v14, %v3145_v21  ;;  %v3322_v44 = vpop.f32.mrf.mxu3 }
 0x388   : > { %v3147_v56 = vpop.f32.mrf.mxu1 }
 0x389   : > { %v3323_v49 = vadd.f32 %v3322_v44, %v3234_v20  ;;  %v3148_v39 = vadd.f32 %v3147_v56, %v6162_v30 }
 0x38a   : > { %v3414_v24 = vpop.f32.mrf.mxu0 }
 0x38b   : > { %v5206_v6 = vpop.eup %5205  ;;  %v3412_v9 = vadd.f32 %v3411_v23, %v3323_v49 }
 0x38c   : > { %3495 = vst.msk [vmem:[%s6256_s14 + $0x90] sm:$0xff] %vm3476_vm0, %v5206_v6 }
 0x38d   : > { %5207 = vtanh.f32 %v3412_v9 }
 0x38e   : > { %v3236_v15 = vpop.f32.mrf.mxu2 }
 0x38f   : > { %v3237_v53 = vadd.f32 %v3236_v15, %v3148_v39  ;;  %v3325_v5 = vpop.f32.mrf.mxu3 }
 0x390   : > { %v3149_v36 = vpop.f32.mrf.mxu1 }
 0x391   : > { %v3326_v12 = vadd.f32 %v3325_v5, %v3237_v53  ;;  %v3150_v11 = vadd.f32 %v3149_v36, %v6171_v3 }
 0x392   : > { %v3416_v58 = vpop.f32.mrf.mxu0 }
 0x393   : > { %v5208_v47 = vpop.eup %5207  ;;  %v3415_v31 = vadd.f32 %v3414_v24, %v3326_v12 }
 0x394   : > { %3496 = vst.msk [vmem:[%s6256_s14 + $0x98] sm:$0xff] %vm3476_vm0, %v5208_v47 }
 0x395   : > { %5209 = vtanh.f32 %v3415_v31 }
 0x396   : > { %v3238_v41 = vpop.f32.mrf.mxu2 }
 0x397   : > { %v3239_v2 = vadd.f32 %v3238_v41, %v3150_v11  ;;  %v3327_v28 = vpop.f32.mrf.mxu3 }
 0x398   : > { %v3152_v42 = vpop.f32.mrf.mxu1 }
 0x399   : > { %v3328_v30 = vadd.f32 %v3327_v28, %v3239_v2  ;;  %v3153_v8 = vadd.f32 %v3152_v42, %v6176_v35 }
 0x39a   : > { %v3419_v48 = vpop.f32.mrf.mxu0 }
 0x39b   : > { %v5210_v62 = vpop.eup %5209  ;;  %v3417_v7 = vadd.f32 %v3416_v58, %v3328_v30 }
 0x39c   : > { %3497 = vst.msk [vmem:[%s6256_s14 + $0xa0] sm:$0xff] %vm3476_vm0, %v5210_v62 }
 0x39d   : > { %5211 = vtanh.f32 %v3417_v7 }
 0x39e   : > { %v3241_v33 = vpop.f32.mrf.mxu2 }
 0x39f   : > { %v3242_v27 = vadd.f32 %v3241_v33, %v3153_v8  ;;  %v3330_v43 = vpop.f32.mrf.mxu3 }
 0x3a0   : > { %v3154_v61 = vpop.f32.mrf.mxu1 }
 0x3a1   : > { %v3331_v3 = vadd.f32 %v3330_v43, %v3242_v27  ;;  %v3155_v38 = vadd.f32 %v3154_v61, %v6185_v52 }
 0x3a2   : > { %v3421_v37 = vpop.f32.mrf.mxu0 }
 0x3a3   : > { %v5212_v50 = vpop.eup %5211  ;;  %v3420_v54 = vadd.f32 %v3419_v48, %v3331_v3 }
 0x3a4   : > { %3498 = vst.msk [vmem:[%s6256_s14 + $0xa8] sm:$0xff] %vm3476_vm0, %v5212_v50 }
 0x3a5   : > { %5213 = vtanh.f32 %v3420_v54 }
 0x3a6   : > { %v3243_v17 = vpop.f32.mrf.mxu2 }
 0x3a7   : > { %v3244_v18 = vadd.f32 %v3243_v17, %v3155_v38  ;;  %v3332_v22 = vpop.f32.mrf.mxu3 }
 0x3a8   : > { %v3157_v1 = vpop.f32.mrf.mxu1 }
 0x3a9   : > { %v3333_v35 = vadd.f32 %v3332_v22, %v3244_v18  ;;  %v3158_v32 = vadd.f32 %v3157_v1, %v6190_v16 }
 0x3aa   : > { %v3424_v60 = vpop.f32.mrf.mxu0 }
 0x3ab   : > { %v5214_v4 = vpop.eup %5213  ;;  %v3422_v29 = vadd.f32 %v3421_v37, %v3333_v35 }
 0x3ac   : > { %3499 = vst.msk [vmem:[%s6256_s14 + $0xb0] sm:$0xff] %vm3476_vm0, %v5214_v4 }
 0x3ad   : > { %5215 = vtanh.f32 %v3422_v29 }
 0x3ae   : > { %v3246_v40 = vpop.f32.mrf.mxu2 }
 0x3af   : > { %v3247_v45 = vadd.f32 %v3246_v40, %v3158_v32  ;;  %v3335_v46 = vpop.f32.mrf.mxu3 }
 0x3b0   : > { %v3159_v13 = vpop.f32.mrf.mxu1 }
 0x3b1   : > { %v3336_v52 = vadd.f32 %v3335_v46, %v3247_v45  ;;  %v3160_v51 = vadd.f32 %v3159_v13, %v6199_v57 }
 0x3b2   : > { %v3426_v34 = vpop.f32.mrf.mxu0 }
 0x3b3   : > { %v5216_v25 = vpop.eup %5215  ;;  %v3425_v23 = vadd.f32 %v3424_v60, %v3336_v52 }
 0x3b4   : > { %3500 = vst.msk [vmem:[%s6256_s14 + $0xb8] sm:$0xff] %vm3476_vm0, %v5216_v25 }
 0x3b5   : > { %5217 = vtanh.f32 %v3425_v23 }
 0x3b6   : > { %v3248_v55 = vpop.f32.mrf.mxu2 }
 0x3b7   : > { %v3249_v21 = vadd.f32 %v3248_v55, %v3160_v51  ;;  %v3337_v14 = vpop.f32.mrf.mxu3 }
 0x3b8   : > { %v3162_v20 = vpop.f32.mrf.mxu1 }
 0x3b9   : > { %v3338_v16 = vadd.f32 %v3337_v14, %v3249_v21  ;;  %v3163_v24 = vadd.f32 %v3162_v20, %v6204_v63 }
 0x3ba   : > { %v3429_v44 = vpop.f32.mrf.mxu0 }
 0x3bb   : > { %v5218_v56 = vpop.eup %5217  ;;  %v3427_v49 = vadd.f32 %v3426_v34, %v3338_v16 }
 0x3bc   : > { %3501 = vst.msk [vmem:[%s6256_s14 + $0xc0] sm:$0xff] %vm3476_vm0, %v5218_v56 }
 0x3bd   : > { %5219 = vtanh.f32 %v3427_v49 }
 0x3be   : > { %v3251_v6 = vpop.f32.mrf.mxu2 }
 0x3bf   : > { %v3252_v9 = vadd.f32 %v3251_v6, %v3163_v24  ;;  %v3340_v39 = vpop.f32.mrf.mxu3 }
 0x3c0   : > { %v3164_v15 = vpop.f32.mrf.mxu1 }
 0x3c1   : > { %v3341_v57 = vadd.f32 %v3340_v39, %v3252_v9  ;;  %v3165_v12 = vadd.f32 %v3164_v15, %v6213_v26 }
 0x3c2   : > { %v3431_v53 = vpop.f32.mrf.mxu0 }
 0x3c3   : > { %v5220_v5 = vpop.eup %5219  ;;  %v3430_v36 = vadd.f32 %v3429_v44, %v3341_v57 }
 0x3c4   : > { %3502 = vst.msk [vmem:[%s6256_s14 + $0xc8] sm:$0xff] %vm3476_vm0, %v5220_v5 }
 0x3c5   : > { %5221 = vtanh.f32 %v3430_v36 }
 0x3c6   : > { %v3253_v58 = vpop.f32.mrf.mxu2 }
 0x3c7   : > { %v3254_v47 = vadd.f32 %v3253_v58, %v3165_v12  ;;  %v3342_v31 = vpop.f32.mrf.mxu3 }
 0x3c8   : > { %v3167_v11 = vpop.f32.mrf.mxu1 }
 0x3c9   : > { %v3343_v63 = vadd.f32 %v3342_v31, %v3254_v47  ;;  %v3168_v42 = vadd.f32 %v3167_v11, %v6218_v10 }
 0x3ca   : > { %v3434_v28 = vpop.f32.mrf.mxu0 }
 0x3cb   : > { %v5222_v41 = vpop.eup %5221  ;;  %v3432_v2 = vadd.f32 %v3431_v53, %v3343_v63 }
 0x3cc   : > { %3503 = vst.msk [vmem:[%s6256_s14 + $0xd0] sm:$0xff] %vm3476_vm0, %v5222_v41 }
 0x3cd   : > { %5223 = vtanh.f32 %v3432_v2 }
 0x3ce   : > { %v3256_v30 = vpop.f32.mrf.mxu2 }
 0x3cf   : > { %v3257_v48 = vadd.f32 %v3256_v30, %v3168_v42  ;;  %v3345_v62 = vpop.f32.mrf.mxu3 }
 0x3d0   : > { %v3169_v7 = vpop.f32.mrf.mxu1 }
 0x3d1   : > { %v3346_v26 = vadd.f32 %v3345_v62, %v3257_v48  ;;  %v3170_v27 = vadd.f32 %v3169_v7, %v6227_v19 }
 0x3d2   : > { %v3436_v43 = vpop.f32.mrf.mxu0 }
 0x3d3   : > { %v5224_v8 = vpop.eup %5223  ;;  %v3435_v33 = vadd.f32 %v3434_v28, %v3346_v26 }
 0x3d4   : > { %3504 = vst.msk [vmem:[%s6256_s14 + $0xd8] sm:$0xff] %vm3476_vm0, %v5224_v8 }
 0x3d5   : > { %5225 = vtanh.f32 %v3435_v33 }
 0x3d6   : > { %v3258_v61 = vpop.f32.mrf.mxu2 }
 0x3d7   : > { %v3259_v3 = vadd.f32 %v3258_v61, %v3170_v27  ;;  %v3347_v37 = vpop.f32.mrf.mxu3 }
 0x3d8   : > { %v3172_v50 = vpop.f32.mrf.mxu1 }
 0x3d9   : > { %v3348_v10 = vadd.f32 %v3347_v37, %v3259_v3  ;;  %v3173_v17 = vadd.f32 %v3172_v50, %v6232_v0 }
 0x3da   : > { %v3439_v35 = vpop.f32.mrf.mxu0 }
 0x3db   : > { %v5226_v54 = vpop.eup %5225  ;;  %v3437_v38 = vadd.f32 %v3436_v43, %v3348_v10 }
 0x3dc   : > { %3505 = vst.msk [vmem:[%s6256_s14 + $0xe0] sm:$0xff] %vm3476_vm0, %v5226_v54 }
 0x3dd   : > { %5227 = vtanh.f32 %v3437_v38 }
 0x3de   : > { %v3261_v18 = vpop.f32.mrf.mxu2 }
 0x3df   : > { %v3262_v22 = vadd.f32 %v3261_v18, %v3173_v17  ;;  %v3350_v1 = vpop.f32.mrf.mxu3 }
 0x3e0   : > { %v3174_v60 = vpop.f32.mrf.mxu1 }
 0x3e1   : > { %v3351_v19 = vadd.f32 %v3350_v1, %v3262_v22  ;;  %v3175_v32 = vadd.f32 %v3174_v60, %v6240_v59 }
 0x3e2   : > { %v3441_v0 = vpop.f32.mrf.mxu0 }
 0x3e3   : > { %v5228_v4 = vpop.eup %5227  ;;  %v3440_v29 = vadd.f32 %v3439_v35, %v3351_v19 }
 0x3e4   : > { %3506 = vst.msk [vmem:[%s6256_s14 + $0xe8] sm:$0xff] %vm3476_vm0, %v5228_v4 }
 0x3e5   : > { %5229 = vtanh.f32 %v3440_v29 }
 0x3e6   : > { %v3263_v40 = vpop.f32.mrf.mxu2 }
 0x3e7   : > { %v3264_v45 = vadd.f32 %v3263_v40, %v3175_v32  ;;  %v3352_v46 = vpop.f32.mrf.mxu3 }
 0x3e9   : > { %v3353_v13 = vadd.f32 %v3352_v46, %v3264_v45 }
 0x3eb   : > { %v5230_v52 = vpop.eup %5229  ;;  %v3442_v34 = vadd.f32 %v3441_v0, %v3353_v13 }
 0x3ec   : > { %3507 = vst.msk [vmem:[%s6256_s14 + $0xf0] sm:$0xff] %vm3476_vm0, %v5230_v52 }
 0x3ed   : > { %5231 = vtanh.f32 %v3442_v34 }
 0x3f3   : > { %v5232_v25 = vpop.eup %5231 }
 0x3f4   : > { %3508 = vst.msk [vmem:[%s6256_s14 + $0xf8] sm:$0xff] %vm3476_vm0, %v5232_v25 }
 0x3f5 PF: > { %s13_s12 = sadd.s32 1, %s5239_s12  }
 0x3f6   : > { %p10_p4 = scmp.ge.s32.totalorder %s13_s12, 4  }
 0x3f8   :  { %12 = sbr.rel (!%p10_p4) target bundleno = 1 (0x1), region = 62 }

</bundles_post_ra>
